<compile_context>
chip_gen: v7x
topology: tpu7x:2x2x1
jax: 0.10.0
libtpu: 0.0.40
codegen_flags: <defaults>
</compile_context>

<pallas_src>
import jax
import jax.numpy as jnp
from jax.experimental import pallas as pl
from jax.experimental.pallas import tpu as pltpu

EPS = 1e-5


# --------------------------------------------------------------------------- fused kernel

def _fused_se_block_kernel(x_ref, w1_ref, s1_ref, w2_ref, s2_ref,
                           fc1w_ref, fc1b_ref, fc2w_ref, fc2b_ref,
                           out_ref, xpad_ref, hpad_ref):
    """Whole StSEBasicBlock for one batch element, entirely in VMEM.

    x_ref   : (1, H, W, Cin) f32    input image (also the residual)
    w1_ref  : (9, Cin, C)   bf16    conv1 taps, BN1 scale folded in
    s1_ref  : (1, C)        f32     BN1 shift
    w2_ref  : (9, C, C)     bf16    conv2 taps, BN2 scale folded in
    s2_ref  : (1, C)        f32     BN2 shift
    fc1w/fc1b/fc2w/fc2b     f32     SE MLP parameters
    out_ref : (1, H, W, C)  f32
    xpad_ref: (PADF, Cin)   f32     flat zero-padded input scratch
    hpad_ref: (PADF, C)     f32     flat zero-padded conv1-output scratch
    """
    H, W, C = out_ref.shape[1], out_ref.shape[2], out_ref.shape[3]
    Wp = W + 2
    M = H * Wp                      # flattened output rows incl. 2 garbage columns per row

    # zero the padded scratches (halo cells must read as 0); interiors are overwritten below
    xpad_ref[...] = jnp.zeros_like(xpad_ref)
    hpad_ref[...] = jnp.zeros_like(hpad_ref)

    # scatter the unpadded input rows into the interior of the flat padded scratch
    for y in range(H):              # static, fully unrolled
        xpad_ref[pl.ds((y + 1) * Wp + 1, W), :] = x_ref[0, y]

    # validity mask of the flattened (H, W+2) view: columns W, W+1 of each row are garbage
    col = jax.lax.broadcasted_iota(jnp.int32, (M, 1), 0) % Wp
    valid = col < W                 # (M, 1)

    def conv3x3(pad_ref, w_ref):
        """9 big-M implicit-GEMM taps (bf16 MXU operands, f32 accumulation)."""
        acc = jnp.zeros((M, w_ref.shape[2]), jnp.float32)
        for dy in range(3):
            for dx in range(3):
                a = pad_ref[pl.ds(dy * Wp + dx, M), :].astype(jnp.bfloat16)
                acc += jnp.dot(a, w_ref[3 * dy + dx],
                               preferred_element_type=jnp.float32)
        return acc

    # ---- conv1 + bn1 + relu
    h1 = jnp.maximum(conv3x3(xpad_ref, w1_ref) + s1_ref[...], 0.0)
    h1 = jnp.where(valid, h1, 0.0)  # garbage columns map onto halo cells -> force to zero

    # hand off to conv2's padded scratch: flat(out)[p] == flat(padded)[p + (W+3)]
    hpad_ref[pl.ds(Wp + 1, M), :] = h1

    # ---- conv2 + bn2 (pre-ReLU "original_out") with fused global average pooling
    h2 = conv3x3(hpad_ref, w2_ref) + s2_ref[...]
    pooled = jnp.sum(jnp.where(valid, h2, 0.0), axis=0, keepdims=True) * (1.0 / (H * W))

    # ---- SE gate: sigmoid(relu(pooled @ fc1 + b1) @ fc2 + b2)   (tiny -> VPU path)
    hid = jnp.sum(pooled[:, :, None] * fc1w_ref[...][None, :, :], axis=1) + fc1b_ref[...]
    hid = jnp.maximum(hid, 0.0)
    gl = jnp.sum(hid[:, :, None] * fc2w_ref[...][None, :, :], axis=1) + fc2b_ref[...]
    gate = jax.nn.sigmoid(gl)       # (1, C)

    # ---- epilogue: out = relu(h2 * gate + residual), per output row (drops garbage cols)
    gated = h2 * gate
    for y in range(H):              # static, fully unrolled
        row = gated[y * Wp:y * Wp + W, :] + x_ref[0, y]
        out_ref[0, y] = jnp.maximum(row, 0.0).astype(out_ref.dtype)


# --------------------------------------------------------------------------- wrapper

def st_se_basic_block(params, x_nchw):
    """Forward pass of StSEBasicBlock.  x_nchw: (B, C, H, W) f32, returns (B, C, H, W) f32."""
    x = jnp.transpose(x_nchw, (0, 2, 3, 1)).astype(jnp.float32)   # NCHW -> NHWC
    B, H, W, Cin = x.shape
    C = params["conv2_w"].shape[2]
    R = params["fc1_w"].shape[1]
    PADF = (H + 2) * (W + 2) + 8    # flat padded rows + slack so tap slices never go OOB

    out = pl.pallas_call(
        _fused_se_block_kernel,
        out_shape=jax.ShapeDtypeStruct((B, H, W, C), jnp.float32),
        grid_spec=pltpu.PrefetchScalarGridSpec(
            num_scalar_prefetch=0,
            grid=(B,),
            in_specs=[
                pl.BlockSpec((1, H, W, Cin), lambda b: (b, 0, 0, 0)),   # x (residual too)
                pl.BlockSpec((9, Cin, C), lambda b: (0, 0, 0)),         # conv1 taps
                pl.BlockSpec((1, C), lambda b: (0, 0)),                 # bn1 shift
                pl.BlockSpec((9, C, C), lambda b: (0, 0, 0)),           # conv2 taps
                pl.BlockSpec((1, C), lambda b: (0, 0)),                 # bn2 shift
                pl.BlockSpec((C, R), lambda b: (0, 0)),                 # fc1 weight
                pl.BlockSpec((1, R), lambda b: (0, 0)),                 # fc1 bias
                pl.BlockSpec((R, C), lambda b: (0, 0)),                 # fc2 weight
                pl.BlockSpec((1, C), lambda b: (0, 0)),                 # fc2 bias
            ],
            out_specs=pl.BlockSpec((1, H, W, C), lambda b: (b, 0, 0, 0)),
            scratch_shapes=[
                pltpu.VMEM((PADF, Cin), jnp.float32),    # flat padded input
                pltpu.VMEM((PADF, C), jnp.float32),      # flat padded conv1 output
            ],
        ),
        compiler_params=pltpu.CompilerParams(
            dimension_semantics=("parallel",)),
    )(x, params["conv1_w"], params["conv1_shift"],
      params["conv2_w"], params["conv2_shift"],
      params["fc1_w"], params["fc1_b"], params["fc2_w"], params["fc2_b"])

    return jnp.transpose(out, (0, 3, 1, 2))                        # back to NCHW


# --------------------------------------------------------------------------- parameters

def init_params(key, inplanes, planes):
    r = max(1, int(round(planes / 16.0)))
    ks = jax.random.split(key, 8)

    def conv_bn(kw, kbn, cin, cout):
        w = 0.05 * jax.random.normal(kw, (3, 3, cin, cout), jnp.float32)
        k1, k2, k3, k4 = jax.random.split(kbn, 4)
        gamma = 1.0 + 0.1 * jax.random.normal(k1, (cout,), jnp.float32)
        beta = 0.1 * jax.random.normal(k2, (cout,), jnp.float32)
        mean = 0.1 * jax.random.normal(k3, (cout,), jnp.float32)
        var = jax.random.uniform(k4, (cout,), jnp.float32, 0.5, 1.5)
        scale = gamma / jnp.sqrt(var + EPS)                       # BN (eval) scale
        w_folded = (w * scale[None, None, None, :]).reshape(9, cin, cout)
        shift = (beta - scale * mean).reshape(1, cout)            # conv bias=False
        return w_folded.astype(jnp.bfloat16), shift               # bf16 MXU operands, once

    conv1_w, conv1_shift = conv_bn(ks[0], ks[1], inplanes, planes)
    conv2_w, conv2_shift = conv_bn(ks[2], ks[3], planes, planes)
    return {
        "conv1_w": conv1_w, "conv1_shift": conv1_shift,
        "conv2_w": conv2_w, "conv2_shift": conv2_shift,
        "fc1_w": 0.05 * jax.random.normal(ks[4], (planes, r), jnp.float32),
        "fc1_b": 0.05 * jax.random.normal(ks[5], (1, r), jnp.float32),
        "fc2_w": 0.05 * jax.random.normal(ks[6], (r, planes), jnp.float32),
        "fc2_b": 0.05 * jax.random.normal(ks[7], (1, planes), jnp.float32),
    }


# --------------------------------------------------------------------------- pure-JAX reference

def st_se_basic_block_reference(params, x_nchw):
    """Reference forward (XLA convs) with the same bf16 operand rounding as the kernel."""
    x = jnp.transpose(x_nchw, (0, 2, 3, 1)).astype(jnp.float32)

    def conv(inp, w9_bf16, shift):
        cin, cout = w9_bf16.shape[1], w9_bf16.shape[2]
        w = w9_bf16.astype(jnp.float32).reshape(3, 3, cin, cout)
        y = jax.lax.conv_general_dilated(
            inp, w, window_strides=(1, 1), padding="SAME",
            dimension_numbers=("NHWC", "HWIO", "NHWC"))
        return y + shift.reshape(1, 1, 1, -1)

    xb = x.astype(jnp.bfloat16).astype(jnp.float32)
    h1 = jnp.maximum(conv(xb, params["conv1_w"], params["conv1_shift"]), 0.0)
    h1 = h1.astype(jnp.bfloat16).astype(jnp.float32)
    h2 = conv(h1, params["conv2_w"], params["conv2_shift"])
    pooled = jnp.mean(h2, axis=(1, 2))                              # (B, C)
    hid = jnp.maximum(pooled @ params["fc1_w"] + params["fc1_b"], 0.0)
    gate = jax.nn.sigmoid(hid @ params["fc2_w"] + params["fc2_b"])  # (B, C)
    out = jnp.maximum(h2 * gate[:, None, None, :] + x, 0.0)
    return jnp.transpose(out, (0, 3, 1, 2))


# --------------------------------------------------------------------------- main

if __name__ == "__main__":
    key = jax.random.PRNGKey(0)
    kx, kp = jax.random.split(key)

    B, C, H, W = 2, 64, 16, 16          # inplanes == planes (required by the residual add)
    x = jax.random.normal(kx, (B, C, H, W), dtype=jnp.float32)      # NCHW like PyTorch
    params = init_params(kp, inplanes=C, planes=C)

    fwd = jax.jit(st_se_basic_block)
    out = jax.block_until_ready(fwd(params, x))

    ref = jax.block_until_ready(jax.jit(st_se_basic_block_reference)(params, x))

    assert out.shape == (B, C, H, W)
    assert bool(jnp.all(jnp.isfinite(out)))
    assert bool(jnp.all(out >= 0.0))    # final ReLU
    max_err = float(jnp.max(jnp.abs(out - ref)))
    assert max_err < 3e-2, f"max abs error vs reference: {max_err}"
    print("KERNEL_OK")
</pallas_src>

<mosaic_0001>
module attributes {stable_mosaic.version = 11 : i64} {
  func.func @_fused_se_block_kernel(%arg0: i32, %arg1: memref<1x16x16x64xf32, #tpu.memory_space<vmem>>, %arg2: memref<9x64x64xbf16, #tpu.memory_space<vmem>>, %arg3: memref<1x64xf32, #tpu.memory_space<vmem>>, %arg4: memref<9x64x64xbf16, #tpu.memory_space<vmem>>, %arg5: memref<1x64xf32, #tpu.memory_space<vmem>>, %arg6: memref<64x4xf32, #tpu.memory_space<vmem>>, %arg7: memref<1x4xf32, #tpu.memory_space<vmem>>, %arg8: memref<4x64xf32, #tpu.memory_space<vmem>>, %arg9: memref<1x64xf32, #tpu.memory_space<vmem>>, %arg10: memref<1x16x16x64xf32, #tpu.memory_space<vmem>>, %arg11: memref<332x64xf32, #tpu.memory_space<vmem>>, %arg12: memref<332x64xf32, #tpu.memory_space<vmem>>) attributes {dimension_semantics = [#tpu.dimension_semantics<parallel>], iteration_bounds = array<i64: 2>, scalar_prefetch = 0 : i64, scratch_operands = 2 : i64, tpu.core_type = #tpu.core_type<tc>, window_params = [{transform_indices = @transform_0, window_bounds = array<i64: 1, 16, 16, 64>}, {pipeline_mode = #tpu.pipeline_mode<synchronous>, transform_indices = @transform_1, window_bounds = array<i64: 9, 64, 64>}, {pipeline_mode = #tpu.pipeline_mode<synchronous>, transform_indices = @transform_2, window_bounds = array<i64: 1, 64>}, {pipeline_mode = #tpu.pipeline_mode<synchronous>, transform_indices = @transform_3, window_bounds = array<i64: 9, 64, 64>}, {pipeline_mode = #tpu.pipeline_mode<synchronous>, transform_indices = @transform_4, window_bounds = array<i64: 1, 64>}, {pipeline_mode = #tpu.pipeline_mode<synchronous>, transform_indices = @transform_5, window_bounds = array<i64: 64, 4>}, {pipeline_mode = #tpu.pipeline_mode<synchronous>, transform_indices = @transform_6, window_bounds = array<i64: 1, 4>}, {pipeline_mode = #tpu.pipeline_mode<synchronous>, transform_indices = @transform_7, window_bounds = array<i64: 4, 64>}, {pipeline_mode = #tpu.pipeline_mode<synchronous>, transform_indices = @transform_8, window_bounds = array<i64: 1, 64>}, {transform_indices = @transform_9, window_bounds = array<i64: 1, 16, 16, 64>}]} {
    %cst = arith.constant 0.000000e+00 : f32
    %0 = vector.broadcast %cst : f32 to vector<332x64xf32>
    %c0 = arith.constant 0 : index
    %c0_0 = arith.constant 0 : index
    %1 = vector.load %arg11[%c0, %c0_0] : memref<332x64xf32, #tpu.memory_space<vmem>>, vector<332x64xf32>
    tpu.vector_store %arg11[%c0, %c0_0], %0 {strides = array<i32>} : memref<332x64xf32, #tpu.memory_space<vmem>>, vector<332x64xf32>,
    %cst_1 = arith.constant 0.000000e+00 : f32
    %2 = vector.broadcast %cst_1 : f32 to vector<332x64xf32>
    %c0_2 = arith.constant 0 : index
    %c0_3 = arith.constant 0 : index
    %3 = vector.load %arg12[%c0_2, %c0_3] : memref<332x64xf32, #tpu.memory_space<vmem>>, vector<332x64xf32>
    tpu.vector_store %arg12[%c0_2, %c0_3], %2 {strides = array<i32>} : memref<332x64xf32, #tpu.memory_space<vmem>>, vector<332x64xf32>,
    %c0_4 = arith.constant 0 : index
    %c0_5 = arith.constant 0 : index
    %c0_6 = arith.constant 0 : index
    %c0_7 = arith.constant 0 : index
    %4 = vector.load %arg1[%c0_4, %c0_5, %c0_6, %c0_7] : memref<1x16x16x64xf32, #tpu.memory_space<vmem>>, vector<1x1x16x64xf32>
    %5 = vector.shape_cast %4 : vector<1x1x16x64xf32> to vector<16x64xf32>
    %c19 = arith.constant 19 : index
    %c0_8 = arith.constant 0 : index
    %6 = vector.load %arg11[%c19, %c0_8] : memref<332x64xf32, #tpu.memory_space<vmem>>, vector<16x64xf32>
    tpu.vector_store %arg11[%c19, %c0_8], %5 {strides = array<i32>} : memref<332x64xf32, #tpu.memory_space<vmem>>, vector<16x64xf32>,
    %c0_9 = arith.constant 0 : index
    %c1 = arith.constant 1 : index
    %c0_10 = arith.constant 0 : index
    %c0_11 = arith.constant 0 : index
    %7 = vector.load %arg1[%c0_9, %c1, %c0_10, %c0_11] : memref<1x16x16x64xf32, #tpu.memory_space<vmem>>, vector<1x1x16x64xf32>
    %8 = vector.shape_cast %7 : vector<1x1x16x64xf32> to vector<16x64xf32>
    %c37 = arith.constant 37 : index
    %c0_12 = arith.constant 0 : index
    %9 = vector.load %arg11[%c37, %c0_12] : memref<332x64xf32, #tpu.memory_space<vmem>>, vector<16x64xf32>
    tpu.vector_store %arg11[%c37, %c0_12], %8 {strides = array<i32>} : memref<332x64xf32, #tpu.memory_space<vmem>>, vector<16x64xf32>,
    %c0_13 = arith.constant 0 : index
    %c2 = arith.constant 2 : index
    %c0_14 = arith.constant 0 : index
    %c0_15 = arith.constant 0 : index
    %10 = vector.load %arg1[%c0_13, %c2, %c0_14, %c0_15] : memref<1x16x16x64xf32, #tpu.memory_space<vmem>>, vector<1x1x16x64xf32>
    %11 = vector.shape_cast %10 : vector<1x1x16x64xf32> to vector<16x64xf32>
    %c55 = arith.constant 55 : index
    %c0_16 = arith.constant 0 : index
    %12 = vector.load %arg11[%c55, %c0_16] : memref<332x64xf32, #tpu.memory_space<vmem>>, vector<16x64xf32>
    tpu.vector_store %arg11[%c55, %c0_16], %11 {strides = array<i32>} : memref<332x64xf32, #tpu.memory_space<vmem>>, vector<16x64xf32>,
    %c0_17 = arith.constant 0 : index
    %c3 = arith.constant 3 : index
    %c0_18 = arith.constant 0 : index
    %c0_19 = arith.constant 0 : index
    %13 = vector.load %arg1[%c0_17, %c3, %c0_18, %c0_19] : memref<1x16x16x64xf32, #tpu.memory_space<vmem>>, vector<1x1x16x64xf32>
    %14 = vector.shape_cast %13 : vector<1x1x16x64xf32> to vector<16x64xf32>
    %c73 = arith.constant 73 : index
    %c0_20 = arith.constant 0 : index
    %15 = vector.load %arg11[%c73, %c0_20] : memref<332x64xf32, #tpu.memory_space<vmem>>, vector<16x64xf32>
    tpu.vector_store %arg11[%c73, %c0_20], %14 {strides = array<i32>} : memref<332x64xf32, #tpu.memory_space<vmem>>, vector<16x64xf32>,
    %c0_21 = arith.constant 0 : index
    %c4 = arith.constant 4 : index
    %c0_22 = arith.constant 0 : index
    %c0_23 = arith.constant 0 : index
    %16 = vector.load %arg1[%c0_21, %c4, %c0_22, %c0_23] : memref<1x16x16x64xf32, #tpu.memory_space<vmem>>, vector<1x1x16x64xf32>
    %17 = vector.shape_cast %16 : vector<1x1x16x64xf32> to vector<16x64xf32>
    %c91 = arith.constant 91 : index
    %c0_24 = arith.constant 0 : index
    %18 = vector.load %arg11[%c91, %c0_24] : memref<332x64xf32, #tpu.memory_space<vmem>>, vector<16x64xf32>
    tpu.vector_store %arg11[%c91, %c0_24], %17 {strides = array<i32>} : memref<332x64xf32, #tpu.memory_space<vmem>>, vector<16x64xf32>,
    %c0_25 = arith.constant 0 : index
    %c5 = arith.constant 5 : index
    %c0_26 = arith.constant 0 : index
    %c0_27 = arith.constant 0 : index
    %19 = vector.load %arg1[%c0_25, %c5, %c0_26, %c0_27] : memref<1x16x16x64xf32, #tpu.memory_space<vmem>>, vector<1x1x16x64xf32>
    %20 = vector.shape_cast %19 : vector<1x1x16x64xf32> to vector<16x64xf32>
    %c109 = arith.constant 109 : index
    %c0_28 = arith.constant 0 : index
    %21 = vector.load %arg11[%c109, %c0_28] : memref<332x64xf32, #tpu.memory_space<vmem>>, vector<16x64xf32>
    tpu.vector_store %arg11[%c109, %c0_28], %20 {strides = array<i32>} : memref<332x64xf32, #tpu.memory_space<vmem>>, vector<16x64xf32>,
    %c0_29 = arith.constant 0 : index
    %c6 = arith.constant 6 : index
    %c0_30 = arith.constant 0 : index
    %c0_31 = arith.constant 0 : index
    %22 = vector.load %arg1[%c0_29, %c6, %c0_30, %c0_31] : memref<1x16x16x64xf32, #tpu.memory_space<vmem>>, vector<1x1x16x64xf32>
    %23 = vector.shape_cast %22 : vector<1x1x16x64xf32> to vector<16x64xf32>
    %c127 = arith.constant 127 : index
    %c0_32 = arith.constant 0 : index
    %24 = vector.load %arg11[%c127, %c0_32] : memref<332x64xf32, #tpu.memory_space<vmem>>, vector<16x64xf32>
    tpu.vector_store %arg11[%c127, %c0_32], %23 {strides = array<i32>} : memref<332x64xf32, #tpu.memory_space<vmem>>, vector<16x64xf32>,
    %c0_33 = arith.constant 0 : index
    %c7 = arith.constant 7 : index
    %c0_34 = arith.constant 0 : index
    %c0_35 = arith.constant 0 : index
    %25 = vector.load %arg1[%c0_33, %c7, %c0_34, %c0_35] : memref<1x16x16x64xf32, #tpu.memory_space<vmem>>, vector<1x1x16x64xf32>
    %26 = vector.shape_cast %25 : vector<1x1x16x64xf32> to vector<16x64xf32>
    %c145 = arith.constant 145 : index
    %c0_36 = arith.constant 0 : index
    %27 = vector.load %arg11[%c145, %c0_36] : memref<332x64xf32, #tpu.memory_space<vmem>>, vector<16x64xf32>
    tpu.vector_store %arg11[%c145, %c0_36], %26 {strides = array<i32>} : memref<332x64xf32, #tpu.memory_space<vmem>>, vector<16x64xf32>,
    %c0_37 = arith.constant 0 : index
    %c8 = arith.constant 8 : index
    %c0_38 = arith.constant 0 : index
    %c0_39 = arith.constant 0 : index
    %28 = vector.load %arg1[%c0_37, %c8, %c0_38, %c0_39] : memref<1x16x16x64xf32, #tpu.memory_space<vmem>>, vector<1x1x16x64xf32>
    %29 = vector.shape_cast %28 : vector<1x1x16x64xf32> to vector<16x64xf32>
    %c163 = arith.constant 163 : index
    %c0_40 = arith.constant 0 : index
    %30 = vector.load %arg11[%c163, %c0_40] : memref<332x64xf32, #tpu.memory_space<vmem>>, vector<16x64xf32>
    tpu.vector_store %arg11[%c163, %c0_40], %29 {strides = array<i32>} : memref<332x64xf32, #tpu.memory_space<vmem>>, vector<16x64xf32>,
    %c0_41 = arith.constant 0 : index
    %c9 = arith.constant 9 : index
    %c0_42 = arith.constant 0 : index
    %c0_43 = arith.constant 0 : index
    %31 = vector.load %arg1[%c0_41, %c9, %c0_42, %c0_43] : memref<1x16x16x64xf32, #tpu.memory_space<vmem>>, vector<1x1x16x64xf32>
    %32 = vector.shape_cast %31 : vector<1x1x16x64xf32> to vector<16x64xf32>
    %c181 = arith.constant 181 : index
    %c0_44 = arith.constant 0 : index
    %33 = vector.load %arg11[%c181, %c0_44] : memref<332x64xf32, #tpu.memory_space<vmem>>, vector<16x64xf32>
    tpu.vector_store %arg11[%c181, %c0_44], %32 {strides = array<i32>} : memref<332x64xf32, #tpu.memory_space<vmem>>, vector<16x64xf32>,
    %c0_45 = arith.constant 0 : index
    %c10 = arith.constant 10 : index
    %c0_46 = arith.constant 0 : index
    %c0_47 = arith.constant 0 : index
    %34 = vector.load %arg1[%c0_45, %c10, %c0_46, %c0_47] : memref<1x16x16x64xf32, #tpu.memory_space<vmem>>, vector<1x1x16x64xf32>
    %35 = vector.shape_cast %34 : vector<1x1x16x64xf32> to vector<16x64xf32>
    %c199 = arith.constant 199 : index
    %c0_48 = arith.constant 0 : index
    %36 = vector.load %arg11[%c199, %c0_48] : memref<332x64xf32, #tpu.memory_space<vmem>>, vector<16x64xf32>
    tpu.vector_store %arg11[%c199, %c0_48], %35 {strides = array<i32>} : memref<332x64xf32, #tpu.memory_space<vmem>>, vector<16x64xf32>,
    %c0_49 = arith.constant 0 : index
    %c11 = arith.constant 11 : index
    %c0_50 = arith.constant 0 : index
    %c0_51 = arith.constant 0 : index
    %37 = vector.load %arg1[%c0_49, %c11, %c0_50, %c0_51] : memref<1x16x16x64xf32, #tpu.memory_space<vmem>>, vector<1x1x16x64xf32>
    %38 = vector.shape_cast %37 : vector<1x1x16x64xf32> to vector<16x64xf32>
    %c217 = arith.constant 217 : index
    %c0_52 = arith.constant 0 : index
    %39 = vector.load %arg11[%c217, %c0_52] : memref<332x64xf32, #tpu.memory_space<vmem>>, vector<16x64xf32>
    tpu.vector_store %arg11[%c217, %c0_52], %38 {strides = array<i32>} : memref<332x64xf32, #tpu.memory_space<vmem>>, vector<16x64xf32>,
    %c0_53 = arith.constant 0 : index
    %c12 = arith.constant 12 : index
    %c0_54 = arith.constant 0 : index
    %c0_55 = arith.constant 0 : index
    %40 = vector.load %arg1[%c0_53, %c12, %c0_54, %c0_55] : memref<1x16x16x64xf32, #tpu.memory_space<vmem>>, vector<1x1x16x64xf32>
    %41 = vector.shape_cast %40 : vector<1x1x16x64xf32> to vector<16x64xf32>
    %c235 = arith.constant 235 : index
    %c0_56 = arith.constant 0 : index
    %42 = vector.load %arg11[%c235, %c0_56] : memref<332x64xf32, #tpu.memory_space<vmem>>, vector<16x64xf32>
    tpu.vector_store %arg11[%c235, %c0_56], %41 {strides = array<i32>} : memref<332x64xf32, #tpu.memory_space<vmem>>, vector<16x64xf32>,
    %c0_57 = arith.constant 0 : index
    %c13 = arith.constant 13 : index
    %c0_58 = arith.constant 0 : index
    %c0_59 = arith.constant 0 : index
    %43 = vector.load %arg1[%c0_57, %c13, %c0_58, %c0_59] : memref<1x16x16x64xf32, #tpu.memory_space<vmem>>, vector<1x1x16x64xf32>
    %44 = vector.shape_cast %43 : vector<1x1x16x64xf32> to vector<16x64xf32>
    %c253 = arith.constant 253 : index
    %c0_60 = arith.constant 0 : index
    %45 = vector.load %arg11[%c253, %c0_60] : memref<332x64xf32, #tpu.memory_space<vmem>>, vector<16x64xf32>
    tpu.vector_store %arg11[%c253, %c0_60], %44 {strides = array<i32>} : memref<332x64xf32, #tpu.memory_space<vmem>>, vector<16x64xf32>,
    %c0_61 = arith.constant 0 : index
    %c14 = arith.constant 14 : index
    %c0_62 = arith.constant 0 : index
    %c0_63 = arith.constant 0 : index
    %46 = vector.load %arg1[%c0_61, %c14, %c0_62, %c0_63] : memref<1x16x16x64xf32, #tpu.memory_space<vmem>>, vector<1x1x16x64xf32>
    %47 = vector.shape_cast %46 : vector<1x1x16x64xf32> to vector<16x64xf32>
    %c271 = arith.constant 271 : index
    %c0_64 = arith.constant 0 : index
    %48 = vector.load %arg11[%c271, %c0_64] : memref<332x64xf32, #tpu.memory_space<vmem>>, vector<16x64xf32>
    tpu.vector_store %arg11[%c271, %c0_64], %47 {strides = array<i32>} : memref<332x64xf32, #tpu.memory_space<vmem>>, vector<16x64xf32>,
    %c0_65 = arith.constant 0 : index
    %c15 = arith.constant 15 : index
    %c0_66 = arith.constant 0 : index
    %c0_67 = arith.constant 0 : index
    %49 = vector.load %arg1[%c0_65, %c15, %c0_66, %c0_67] : memref<1x16x16x64xf32, #tpu.memory_space<vmem>>, vector<1x1x16x64xf32>
    %50 = vector.shape_cast %49 : vector<1x1x16x64xf32> to vector<16x64xf32>
    %c289 = arith.constant 289 : index
    %c0_68 = arith.constant 0 : index
    %51 = vector.load %arg11[%c289, %c0_68] : memref<332x64xf32, #tpu.memory_space<vmem>>, vector<16x64xf32>
    tpu.vector_store %arg11[%c289, %c0_68], %50 {strides = array<i32>} : memref<332x64xf32, #tpu.memory_space<vmem>>, vector<16x64xf32>,
    %52 = tpu.iota {dimensions = array<i32: 0>} : vector<288x1xi32>
    %c18_i32 = arith.constant 18 : i32
    %c0_i32 = arith.constant 0 : i32
    %53 = arith.cmpi eq, %c18_i32, %c0_i32 : i32
    %c1_i32 = arith.constant 1 : i32
    %54 = arith.select %53, %c1_i32, %c18_i32 : i32
    %55 = vector.broadcast %54 : i32 to vector<288x1xi32>
    %56 = arith.remsi %52, %55 : vector<288x1xi32>
    %c0_i32_69 = arith.constant 0 : i32
    %57 = vector.broadcast %c0_i32_69 : i32 to vector<288x1xi32>
    %58 = arith.cmpi ne, %56, %57 : vector<288x1xi32>
    %c0_i32_70 = arith.constant 0 : i32
    %59 = vector.broadcast %c0_i32_70 : i32 to vector<288x1xi32>
    %60 = arith.cmpi slt, %56, %59 : vector<288x1xi32>
    %c0_i32_71 = arith.constant 0 : i32
    %61 = arith.cmpi slt, %54, %c0_i32_71 : i32
    %62 = vector.broadcast %61 : i1 to vector<288x1xi1>
    %63 = vector.broadcast %62 : vector<288x1xi1> to vector<288x1xi1>
    %64 = arith.xori %60, %63 : vector<288x1xi1>
    %65 = arith.andi %64, %58 : vector<288x1xi1>
    %66 = vector.broadcast %54 : i32 to vector<288x1xi32>
    %67 = arith.addi %56, %66 : vector<288x1xi32>
    %68 = arith.select %65, %67, %56 : vector<288x1xi1>, vector<288x1xi32>
    %c16_i32 = arith.constant 16 : i32
    %69 = vector.broadcast %c16_i32 : i32 to vector<288x1xi32>
    %70 = arith.cmpi slt, %68, %69 : vector<288x1xi32>
    %cst_72 = arith.constant 0.000000e+00 : f32
    %71 = vector.broadcast %cst_72 : f32 to vector<288x64xf32>
    %c0_73 = arith.constant 0 : index
    %c0_74 = arith.constant 0 : index
    %72 = vector.load %arg11[%c0_73, %c0_74] : memref<332x64xf32, #tpu.memory_space<vmem>>, vector<288x64xf32>
    %73 = arith.truncf %72 : vector<288x64xf32> to vector<288x64xbf16>
    %c0_75 = arith.constant 0 : index
    %c0_76 = arith.constant 0 : index
    %c0_77 = arith.constant 0 : index
    %74 = vector.load %arg2[%c0_75, %c0_76, %c0_77] : memref<9x64x64xbf16, #tpu.memory_space<vmem>>, vector<1x64x64xbf16>
    %75 = vector.shape_cast %74 : vector<1x64x64xbf16> to vector<64x64xbf16>
    %cst_78 = arith.constant dense<0.000000e+00> : vector<288x64xf32>
    %76 = tpu.matmul %73, %75, %cst_78 {dimension_numbers = #tpu.dot_dimension_numbers<[1], [0], [0], [1], [0, 0, 1, 1], [], []>} : vector<288x64xbf16>, vector<64x64xbf16>, vector<288x64xf32> -> vector<288x64xf32>
    %77 = arith.addf %71, %76 : vector<288x64xf32>
    %c1_79 = arith.constant 1 : index
    %c0_80 = arith.constant 0 : index
    %78 = vector.load %arg11[%c1_79, %c0_80] : memref<332x64xf32, #tpu.memory_space<vmem>>, vector<288x64xf32>
    %79 = arith.truncf %78 : vector<288x64xf32> to vector<288x64xbf16>
    %c1_81 = arith.constant 1 : index
    %c0_82 = arith.constant 0 : index
    %c0_83 = arith.constant 0 : index
    %80 = vector.load %arg2[%c1_81, %c0_82, %c0_83] : memref<9x64x64xbf16, #tpu.memory_space<vmem>>, vector<1x64x64xbf16>
    %81 = vector.shape_cast %80 : vector<1x64x64xbf16> to vector<64x64xbf16>
    %cst_84 = arith.constant dense<0.000000e+00> : vector<288x64xf32>
    %82 = tpu.matmul %79, %81, %cst_84 {dimension_numbers = #tpu.dot_dimension_numbers<[1], [0], [0], [1], [0, 0, 1, 1], [], []>} : vector<288x64xbf16>, vector<64x64xbf16>, vector<288x64xf32> -> vector<288x64xf32>
    %83 = arith.addf %77, %82 : vector<288x64xf32>
    %c2_85 = arith.constant 2 : index
    %c0_86 = arith.constant 0 : index
    %84 = vector.load %arg11[%c2_85, %c0_86] : memref<332x64xf32, #tpu.memory_space<vmem>>, vector<288x64xf32>
    %85 = arith.truncf %84 : vector<288x64xf32> to vector<288x64xbf16>
    %c2_87 = arith.constant 2 : index
    %c0_88 = arith.constant 0 : index
    %c0_89 = arith.constant 0 : index
    %86 = vector.load %arg2[%c2_87, %c0_88, %c0_89] : memref<9x64x64xbf16, #tpu.memory_space<vmem>>, vector<1x64x64xbf16>
    %87 = vector.shape_cast %86 : vector<1x64x64xbf16> to vector<64x64xbf16>
    %cst_90 = arith.constant dense<0.000000e+00> : vector<288x64xf32>
    %88 = tpu.matmul %85, %87, %cst_90 {dimension_numbers = #tpu.dot_dimension_numbers<[1], [0], [0], [1], [0, 0, 1, 1], [], []>} : vector<288x64xbf16>, vector<64x64xbf16>, vector<288x64xf32> -> vector<288x64xf32>
    %89 = arith.addf %83, %88 : vector<288x64xf32>
    %c18 = arith.constant 18 : index
    %c0_91 = arith.constant 0 : index
    %90 = vector.load %arg11[%c18, %c0_91] : memref<332x64xf32, #tpu.memory_space<vmem>>, vector<288x64xf32>
    %91 = arith.truncf %90 : vector<288x64xf32> to vector<288x64xbf16>
    %c3_92 = arith.constant 3 : index
    %c0_93 = arith.constant 0 : index
    %c0_94 = arith.constant 0 : index
    %92 = vector.load %arg2[%c3_92, %c0_93, %c0_94] : memref<9x64x64xbf16, #tpu.memory_space<vmem>>, vector<1x64x64xbf16>
    %93 = vector.shape_cast %92 : vector<1x64x64xbf16> to vector<64x64xbf16>
    %cst_95 = arith.constant dense<0.000000e+00> : vector<288x64xf32>
    %94 = tpu.matmul %91, %93, %cst_95 {dimension_numbers = #tpu.dot_dimension_numbers<[1], [0], [0], [1], [0, 0, 1, 1], [], []>} : vector<288x64xbf16>, vector<64x64xbf16>, vector<288x64xf32> -> vector<288x64xf32>
    %95 = arith.addf %89, %94 : vector<288x64xf32>
    %c19_96 = arith.constant 19 : index
    %c0_97 = arith.constant 0 : index
    %96 = vector.load %arg11[%c19_96, %c0_97] : memref<332x64xf32, #tpu.memory_space<vmem>>, vector<288x64xf32>
    %97 = arith.truncf %96 : vector<288x64xf32> to vector<288x64xbf16>
    %c4_98 = arith.constant 4 : index
    %c0_99 = arith.constant 0 : index
    %c0_100 = arith.constant 0 : index
    %98 = vector.load %arg2[%c4_98, %c0_99, %c0_100] : memref<9x64x64xbf16, #tpu.memory_space<vmem>>, vector<1x64x64xbf16>
    %99 = vector.shape_cast %98 : vector<1x64x64xbf16> to vector<64x64xbf16>
    %cst_101 = arith.constant dense<0.000000e+00> : vector<288x64xf32>
    %100 = tpu.matmul %97, %99, %cst_101 {dimension_numbers = #tpu.dot_dimension_numbers<[1], [0], [0], [1], [0, 0, 1, 1], [], []>} : vector<288x64xbf16>, vector<64x64xbf16>, vector<288x64xf32> -> vector<288x64xf32>
    %101 = arith.addf %95, %100 : vector<288x64xf32>
    %c20 = arith.constant 20 : index
    %c0_102 = arith.constant 0 : index
    %102 = vector.load %arg11[%c20, %c0_102] : memref<332x64xf32, #tpu.memory_space<vmem>>, vector<288x64xf32>
    %103 = arith.truncf %102 : vector<288x64xf32> to vector<288x64xbf16>
    %c5_103 = arith.constant 5 : index
    %c0_104 = arith.constant 0 : index
    %c0_105 = arith.constant 0 : index
    %104 = vector.load %arg2[%c5_103, %c0_104, %c0_105] : memref<9x64x64xbf16, #tpu.memory_space<vmem>>, vector<1x64x64xbf16>
    %105 = vector.shape_cast %104 : vector<1x64x64xbf16> to vector<64x64xbf16>
    %cst_106 = arith.constant dense<0.000000e+00> : vector<288x64xf32>
    %106 = tpu.matmul %103, %105, %cst_106 {dimension_numbers = #tpu.dot_dimension_numbers<[1], [0], [0], [1], [0, 0, 1, 1], [], []>} : vector<288x64xbf16>, vector<64x64xbf16>, vector<288x64xf32> -> vector<288x64xf32>
    %107 = arith.addf %101, %106 : vector<288x64xf32>
    %c36 = arith.constant 36 : index
    %c0_107 = arith.constant 0 : index
    %108 = vector.load %arg11[%c36, %c0_107] : memref<332x64xf32, #tpu.memory_space<vmem>>, vector<288x64xf32>
    %109 = arith.truncf %108 : vector<288x64xf32> to vector<288x64xbf16>
    %c6_108 = arith.constant 6 : index
    %c0_109 = arith.constant 0 : index
    %c0_110 = arith.constant 0 : index
    %110 = vector.load %arg2[%c6_108, %c0_109, %c0_110] : memref<9x64x64xbf16, #tpu.memory_space<vmem>>, vector<1x64x64xbf16>
    %111 = vector.shape_cast %110 : vector<1x64x64xbf16> to vector<64x64xbf16>
    %cst_111 = arith.constant dense<0.000000e+00> : vector<288x64xf32>
    %112 = tpu.matmul %109, %111, %cst_111 {dimension_numbers = #tpu.dot_dimension_numbers<[1], [0], [0], [1], [0, 0, 1, 1], [], []>} : vector<288x64xbf16>, vector<64x64xbf16>, vector<288x64xf32> -> vector<288x64xf32>
    %113 = arith.addf %107, %112 : vector<288x64xf32>
    %c37_112 = arith.constant 37 : index
    %c0_113 = arith.constant 0 : index
    %114 = vector.load %arg11[%c37_112, %c0_113] : memref<332x64xf32, #tpu.memory_space<vmem>>, vector<288x64xf32>
    %115 = arith.truncf %114 : vector<288x64xf32> to vector<288x64xbf16>
    %c7_114 = arith.constant 7 : index
    %c0_115 = arith.constant 0 : index
    %c0_116 = arith.constant 0 : index
    %116 = vector.load %arg2[%c7_114, %c0_115, %c0_116] : memref<9x64x64xbf16, #tpu.memory_space<vmem>>, vector<1x64x64xbf16>
    %117 = vector.shape_cast %116 : vector<1x64x64xbf16> to vector<64x64xbf16>
    %cst_117 = arith.constant dense<0.000000e+00> : vector<288x64xf32>
    %118 = tpu.matmul %115, %117, %cst_117 {dimension_numbers = #tpu.dot_dimension_numbers<[1], [0], [0], [1], [0, 0, 1, 1], [], []>} : vector<288x64xbf16>, vector<64x64xbf16>, vector<288x64xf32> -> vector<288x64xf32>
    %119 = arith.addf %113, %118 : vector<288x64xf32>
    %c38 = arith.constant 38 : index
    %c0_118 = arith.constant 0 : index
    %120 = vector.load %arg11[%c38, %c0_118] : memref<332x64xf32, #tpu.memory_space<vmem>>, vector<288x64xf32>
    %121 = arith.truncf %120 : vector<288x64xf32> to vector<288x64xbf16>
    %c8_119 = arith.constant 8 : index
    %c0_120 = arith.constant 0 : index
    %c0_121 = arith.constant 0 : index
    %122 = vector.load %arg2[%c8_119, %c0_120, %c0_121] : memref<9x64x64xbf16, #tpu.memory_space<vmem>>, vector<1x64x64xbf16>
    %123 = vector.shape_cast %122 : vector<1x64x64xbf16> to vector<64x64xbf16>
    %cst_122 = arith.constant dense<0.000000e+00> : vector<288x64xf32>
    %124 = tpu.matmul %121, %123, %cst_122 {dimension_numbers = #tpu.dot_dimension_numbers<[1], [0], [0], [1], [0, 0, 1, 1], [], []>} : vector<288x64xbf16>, vector<64x64xbf16>, vector<288x64xf32> -> vector<288x64xf32>
    %125 = arith.addf %119, %124 : vector<288x64xf32>
    %c0_123 = arith.constant 0 : index
    %c0_124 = arith.constant 0 : index
    %126 = vector.load %arg3[%c0_123, %c0_124] : memref<1x64xf32, #tpu.memory_space<vmem>>, vector<1x64xf32>
    %127 = vector.broadcast %126 : vector<1x64xf32> to vector<288x64xf32>
    %128 = arith.addf %125, %127 : vector<288x64xf32>
    %cst_125 = arith.constant 0.000000e+00 : f32
    %129 = vector.broadcast %cst_125 : f32 to vector<288x64xf32>
    %130 = arith.maximumf %128, %129 : vector<288x64xf32>
    %cst_126 = arith.constant 0.000000e+00 : f32
    %131 = vector.shape_cast %70 : vector<288x1xi1> to vector<288x1xi1>
    %132 = vector.broadcast %131 : vector<288x1xi1> to vector<288x64xi1>
    %133 = vector.broadcast %cst_126 : f32 to vector<288x64xf32>
    %134 = arith.select %132, %130, %133 : vector<288x64xi1>, vector<288x64xf32>
    %c19_127 = arith.constant 19 : index
    %c0_128 = arith.constant 0 : index
    %135 = vector.load %arg12[%c19_127, %c0_128] : memref<332x64xf32, #tpu.memory_space<vmem>>, vector<288x64xf32>
    tpu.vector_store %arg12[%c19_127, %c0_128], %134 {strides = array<i32>} : memref<332x64xf32, #tpu.memory_space<vmem>>, vector<288x64xf32>,
    %cst_129 = arith.constant 0.000000e+00 : f32
    %136 = vector.broadcast %cst_129 : f32 to vector<288x64xf32>
    %c0_130 = arith.constant 0 : index
    %c0_131 = arith.constant 0 : index
    %137 = vector.load %arg12[%c0_130, %c0_131] : memref<332x64xf32, #tpu.memory_space<vmem>>, vector<288x64xf32>
    %138 = arith.truncf %137 : vector<288x64xf32> to vector<288x64xbf16>
    %c0_132 = arith.constant 0 : index
    %c0_133 = arith.constant 0 : index
    %c0_134 = arith.constant 0 : index
    %139 = vector.load %arg4[%c0_132, %c0_133, %c0_134] : memref<9x64x64xbf16, #tpu.memory_space<vmem>>, vector<1x64x64xbf16>
    %140 = vector.shape_cast %139 : vector<1x64x64xbf16> to vector<64x64xbf16>
    %cst_135 = arith.constant dense<0.000000e+00> : vector<288x64xf32>
    %141 = tpu.matmul %138, %140, %cst_135 {dimension_numbers = #tpu.dot_dimension_numbers<[1], [0], [0], [1], [0, 0, 1, 1], [], []>} : vector<288x64xbf16>, vector<64x64xbf16>, vector<288x64xf32> -> vector<288x64xf32>
    %142 = arith.addf %136, %141 : vector<288x64xf32>
    %c1_136 = arith.constant 1 : index
    %c0_137 = arith.constant 0 : index
    %143 = vector.load %arg12[%c1_136, %c0_137] : memref<332x64xf32, #tpu.memory_space<vmem>>, vector<288x64xf32>
    %144 = arith.truncf %143 : vector<288x64xf32> to vector<288x64xbf16>
    %c1_138 = arith.constant 1 : index
    %c0_139 = arith.constant 0 : index
    %c0_140 = arith.constant 0 : index
    %145 = vector.load %arg4[%c1_138, %c0_139, %c0_140] : memref<9x64x64xbf16, #tpu.memory_space<vmem>>, vector<1x64x64xbf16>
    %146 = vector.shape_cast %145 : vector<1x64x64xbf16> to vector<64x64xbf16>
    %cst_141 = arith.constant dense<0.000000e+00> : vector<288x64xf32>
    %147 = tpu.matmul %144, %146, %cst_141 {dimension_numbers = #tpu.dot_dimension_numbers<[1], [0], [0], [1], [0, 0, 1, 1], [], []>} : vector<288x64xbf16>, vector<64x64xbf16>, vector<288x64xf32> -> vector<288x64xf32>
    %148 = arith.addf %142, %147 : vector<288x64xf32>
    %c2_142 = arith.constant 2 : index
    %c0_143 = arith.constant 0 : index
    %149 = vector.load %arg12[%c2_142, %c0_143] : memref<332x64xf32, #tpu.memory_space<vmem>>, vector<288x64xf32>
    %150 = arith.truncf %149 : vector<288x64xf32> to vector<288x64xbf16>
    %c2_144 = arith.constant 2 : index
    %c0_145 = arith.constant 0 : index
    %c0_146 = arith.constant 0 : index
    %151 = vector.load %arg4[%c2_144, %c0_145, %c0_146] : memref<9x64x64xbf16, #tpu.memory_space<vmem>>, vector<1x64x64xbf16>
    %152 = vector.shape_cast %151 : vector<1x64x64xbf16> to vector<64x64xbf16>
    %cst_147 = arith.constant dense<0.000000e+00> : vector<288x64xf32>
    %153 = tpu.matmul %150, %152, %cst_147 {dimension_numbers = #tpu.dot_dimension_numbers<[1], [0], [0], [1], [0, 0, 1, 1], [], []>} : vector<288x64xbf16>, vector<64x64xbf16>, vector<288x64xf32> -> vector<288x64xf32>
    %154 = arith.addf %148, %153 : vector<288x64xf32>
    %c18_148 = arith.constant 18 : index
    %c0_149 = arith.constant 0 : index
    %155 = vector.load %arg12[%c18_148, %c0_149] : memref<332x64xf32, #tpu.memory_space<vmem>>, vector<288x64xf32>
    %156 = arith.truncf %155 : vector<288x64xf32> to vector<288x64xbf16>
    %c3_150 = arith.constant 3 : index
    %c0_151 = arith.constant 0 : index
    %c0_152 = arith.constant 0 : index
    %157 = vector.load %arg4[%c3_150, %c0_151, %c0_152] : memref<9x64x64xbf16, #tpu.memory_space<vmem>>, vector<1x64x64xbf16>
    %158 = vector.shape_cast %157 : vector<1x64x64xbf16> to vector<64x64xbf16>
    %cst_153 = arith.constant dense<0.000000e+00> : vector<288x64xf32>
    %159 = tpu.matmul %156, %158, %cst_153 {dimension_numbers = #tpu.dot_dimension_numbers<[1], [0], [0], [1], [0, 0, 1, 1], [], []>} : vector<288x64xbf16>, vector<64x64xbf16>, vector<288x64xf32> -> vector<288x64xf32>
    %160 = arith.addf %154, %159 : vector<288x64xf32>
    %c19_154 = arith.constant 19 : index
    %c0_155 = arith.constant 0 : index
    %161 = vector.load %arg12[%c19_154, %c0_155] : memref<332x64xf32, #tpu.memory_space<vmem>>, vector<288x64xf32>
    %162 = arith.truncf %161 : vector<288x64xf32> to vector<288x64xbf16>
    %c4_156 = arith.constant 4 : index
    %c0_157 = arith.constant 0 : index
    %c0_158 = arith.constant 0 : index
    %163 = vector.load %arg4[%c4_156, %c0_157, %c0_158] : memref<9x64x64xbf16, #tpu.memory_space<vmem>>, vector<1x64x64xbf16>
    %164 = vector.shape_cast %163 : vector<1x64x64xbf16> to vector<64x64xbf16>
    %cst_159 = arith.constant dense<0.000000e+00> : vector<288x64xf32>
    %165 = tpu.matmul %162, %164, %cst_159 {dimension_numbers = #tpu.dot_dimension_numbers<[1], [0], [0], [1], [0, 0, 1, 1], [], []>} : vector<288x64xbf16>, vector<64x64xbf16>, vector<288x64xf32> -> vector<288x64xf32>
    %166 = arith.addf %160, %165 : vector<288x64xf32>
    %c20_160 = arith.constant 20 : index
    %c0_161 = arith.constant 0 : index
    %167 = vector.load %arg12[%c20_160, %c0_161] : memref<332x64xf32, #tpu.memory_space<vmem>>, vector<288x64xf32>
    %168 = arith.truncf %167 : vector<288x64xf32> to vector<288x64xbf16>
    %c5_162 = arith.constant 5 : index
    %c0_163 = arith.constant 0 : index
    %c0_164 = arith.constant 0 : index
    %169 = vector.load %arg4[%c5_162, %c0_163, %c0_164] : memref<9x64x64xbf16, #tpu.memory_space<vmem>>, vector<1x64x64xbf16>
    %170 = vector.shape_cast %169 : vector<1x64x64xbf16> to vector<64x64xbf16>
    %cst_165 = arith.constant dense<0.000000e+00> : vector<288x64xf32>
    %171 = tpu.matmul %168, %170, %cst_165 {dimension_numbers = #tpu.dot_dimension_numbers<[1], [0], [0], [1], [0, 0, 1, 1], [], []>} : vector<288x64xbf16>, vector<64x64xbf16>, vector<288x64xf32> -> vector<288x64xf32>
    %172 = arith.addf %166, %171 : vector<288x64xf32>
    %c36_166 = arith.constant 36 : index
    %c0_167 = arith.constant 0 : index
    %173 = vector.load %arg12[%c36_166, %c0_167] : memref<332x64xf32, #tpu.memory_space<vmem>>, vector<288x64xf32>
    %174 = arith.truncf %173 : vector<288x64xf32> to vector<288x64xbf16>
    %c6_168 = arith.constant 6 : index
    %c0_169 = arith.constant 0 : index
    %c0_170 = arith.constant 0 : index
    %175 = vector.load %arg4[%c6_168, %c0_169, %c0_170] : memref<9x64x64xbf16, #tpu.memory_space<vmem>>, vector<1x64x64xbf16>
    %176 = vector.shape_cast %175 : vector<1x64x64xbf16> to vector<64x64xbf16>
    %cst_171 = arith.constant dense<0.000000e+00> : vector<288x64xf32>
    %177 = tpu.matmul %174, %176, %cst_171 {dimension_numbers = #tpu.dot_dimension_numbers<[1], [0], [0], [1], [0, 0, 1, 1], [], []>} : vector<288x64xbf16>, vector<64x64xbf16>, vector<288x64xf32> -> vector<288x64xf32>
    %178 = arith.addf %172, %177 : vector<288x64xf32>
    %c37_172 = arith.constant 37 : index
    %c0_173 = arith.constant 0 : index
    %179 = vector.load %arg12[%c37_172, %c0_173] : memref<332x64xf32, #tpu.memory_space<vmem>>, vector<288x64xf32>
    %180 = arith.truncf %179 : vector<288x64xf32> to vector<288x64xbf16>
    %c7_174 = arith.constant 7 : index
    %c0_175 = arith.constant 0 : index
    %c0_176 = arith.constant 0 : index
    %181 = vector.load %arg4[%c7_174, %c0_175, %c0_176] : memref<9x64x64xbf16, #tpu.memory_space<vmem>>, vector<1x64x64xbf16>
    %182 = vector.shape_cast %181 : vector<1x64x64xbf16> to vector<64x64xbf16>
    %cst_177 = arith.constant dense<0.000000e+00> : vector<288x64xf32>
    %183 = tpu.matmul %180, %182, %cst_177 {dimension_numbers = #tpu.dot_dimension_numbers<[1], [0], [0], [1], [0, 0, 1, 1], [], []>} : vector<288x64xbf16>, vector<64x64xbf16>, vector<288x64xf32> -> vector<288x64xf32>
    %184 = arith.addf %178, %183 : vector<288x64xf32>
    %c38_178 = arith.constant 38 : index
    %c0_179 = arith.constant 0 : index
    %185 = vector.load %arg12[%c38_178, %c0_179] : memref<332x64xf32, #tpu.memory_space<vmem>>, vector<288x64xf32>
    %186 = arith.truncf %185 : vector<288x64xf32> to vector<288x64xbf16>
    %c8_180 = arith.constant 8 : index
    %c0_181 = arith.constant 0 : index
    %c0_182 = arith.constant 0 : index
    %187 = vector.load %arg4[%c8_180, %c0_181, %c0_182] : memref<9x64x64xbf16, #tpu.memory_space<vmem>>, vector<1x64x64xbf16>
    %188 = vector.shape_cast %187 : vector<1x64x64xbf16> to vector<64x64xbf16>
    %cst_183 = arith.constant dense<0.000000e+00> : vector<288x64xf32>
    %189 = tpu.matmul %186, %188, %cst_183 {dimension_numbers = #tpu.dot_dimension_numbers<[1], [0], [0], [1], [0, 0, 1, 1], [], []>} : vector<288x64xbf16>, vector<64x64xbf16>, vector<288x64xf32> -> vector<288x64xf32>
    %190 = arith.addf %184, %189 : vector<288x64xf32>
    %c0_184 = arith.constant 0 : index
    %c0_185 = arith.constant 0 : index
    %191 = vector.load %arg5[%c0_184, %c0_185] : memref<1x64xf32, #tpu.memory_space<vmem>>, vector<1x64xf32>
    %192 = vector.broadcast %191 : vector<1x64xf32> to vector<288x64xf32>
    %193 = arith.addf %190, %192 : vector<288x64xf32>
    %cst_186 = arith.constant 0.000000e+00 : f32
    %194 = vector.shape_cast %70 : vector<288x1xi1> to vector<288x1xi1>
    %195 = vector.broadcast %194 : vector<288x1xi1> to vector<288x64xi1>
    %196 = vector.broadcast %cst_186 : f32 to vector<288x64xf32>
    %197 = arith.select %195, %193, %196 : vector<288x64xi1>, vector<288x64xf32>
    %cst_187 = arith.constant dense<0.000000e+00> : vector<64xf32>
    %198 = vector.multi_reduction <add>, %197, %cst_187 [0] : vector<288x64xf32> to vector<64xf32>
    %199 = vector.shape_cast %198 : vector<64xf32> to vector<1x64xf32>
    %cst_188 = arith.constant 3.906250e-03 : f32
    %200 = vector.broadcast %cst_188 : f32 to vector<1x64xf32>
    %201 = arith.mulf %199, %200 : vector<1x64xf32>
    %202 = vector.shape_cast %201 : vector<1x64xf32> to vector<1x64x1xf32>
    %c0_189 = arith.constant 0 : index
    %c0_190 = arith.constant 0 : index
    %203 = vector.load %arg6[%c0_189, %c0_190] : memref<64x4xf32, #tpu.memory_space<vmem>>, vector<64x4xf32>
    %204 = vector.shape_cast %203 : vector<64x4xf32> to vector<1x64x4xf32>
    %205 = vector.broadcast %202 : vector<1x64x1xf32> to vector<1x64x4xf32>
    %206 = arith.mulf %205, %204 : vector<1x64x4xf32>
    %cst_191 = arith.constant dense<0.000000e+00> : vector<1x4xf32>
    %207 = vector.multi_reduction <add>, %206, %cst_191 [1] : vector<1x64x4xf32> to vector<1x4xf32>
    %c0_192 = arith.constant 0 : index
    %c0_193 = arith.constant 0 : index
    %208 = vector.load %arg7[%c0_192, %c0_193] : memref<1x4xf32, #tpu.memory_space<vmem>>, vector<1x4xf32>
    %209 = arith.addf %207, %208 : vector<1x4xf32>
    %cst_194 = arith.constant 0.000000e+00 : f32
    %210 = vector.broadcast %cst_194 : f32 to vector<1x4xf32>
    %211 = arith.maximumf %209, %210 : vector<1x4xf32>
    %212 = vector.shape_cast %211 : vector<1x4xf32> to vector<1x4x1xf32>
    %c0_195 = arith.constant 0 : index
    %c0_196 = arith.constant 0 : index
    %213 = vector.load %arg8[%c0_195, %c0_196] : memref<4x64xf32, #tpu.memory_space<vmem>>, vector<4x64xf32>
    %214 = vector.shape_cast %213 : vector<4x64xf32> to vector<1x4x64xf32>
    %215 = vector.broadcast %212 : vector<1x4x1xf32> to vector<1x4x64xf32>
    %216 = arith.mulf %215, %214 : vector<1x4x64xf32>
    %cst_197 = arith.constant dense<0.000000e+00> : vector<1x64xf32>
    %217 = vector.multi_reduction <add>, %216, %cst_197 [1] : vector<1x4x64xf32> to vector<1x64xf32>
    %c0_198 = arith.constant 0 : index
    %c0_199 = arith.constant 0 : index
    %218 = vector.load %arg9[%c0_198, %c0_199] : memref<1x64xf32, #tpu.memory_space<vmem>>, vector<1x64xf32>
    %219 = arith.addf %217, %218 : vector<1x64xf32>
    %220 = arith.negf %219 : vector<1x64xf32>
    %221 = math.exp %220 : vector<1x64xf32>
    %cst_200 = arith.constant 1.000000e+00 : f32
    %222 = vector.broadcast %cst_200 : f32 to vector<1x64xf32>
    %223 = arith.addf %222, %221 : vector<1x64xf32>
    %224 = arith.divf %222, %223 : vector<1x64xf32>
    %225 = vector.broadcast %224 : vector<1x64xf32> to vector<288x64xf32>
    %226 = arith.mulf %193, %225 : vector<288x64xf32>
    %227 = vector.extract_strided_slice %226 {offsets = [0, 0], sizes = [16, 64], strides = [1, 1]} : vector<288x64xf32> to vector<16x64xf32>
    %c0_201 = arith.constant 0 : index
    %c0_202 = arith.constant 0 : index
    %c0_203 = arith.constant 0 : index
    %c0_204 = arith.constant 0 : index
    %228 = vector.load %arg1[%c0_201, %c0_202, %c0_203, %c0_204] : memref<1x16x16x64xf32, #tpu.memory_space<vmem>>, vector<1x1x16x64xf32>
    %229 = vector.shape_cast %228 : vector<1x1x16x64xf32> to vector<16x64xf32>
    %230 = arith.addf %227, %229 : vector<16x64xf32>
    %cst_205 = arith.constant 0.000000e+00 : f32
    %231 = vector.broadcast %cst_205 : f32 to vector<16x64xf32>
    %232 = arith.maximumf %230, %231 : vector<16x64xf32>
    %c0_206 = arith.constant 0 : index
    %c0_207 = arith.constant 0 : index
    %c0_208 = arith.constant 0 : index
    %c0_209 = arith.constant 0 : index
    %233 = vector.load %arg10[%c0_206, %c0_207, %c0_208, %c0_209] : memref<1x16x16x64xf32, #tpu.memory_space<vmem>>, vector<1x1x16x64xf32>
    %234 = vector.shape_cast %233 : vector<1x1x16x64xf32> to vector<16x64xf32>
    %235 = vector.shape_cast %232 : vector<16x64xf32> to vector<1x1x16x64xf32>
    tpu.vector_store %arg10[%c0_206, %c0_207, %c0_208, %c0_209], %235 {strides = array<i32>} : memref<1x16x16x64xf32, #tpu.memory_space<vmem>>, vector<1x1x16x64xf32>,
    %236 = vector.extract_strided_slice %226 {offsets = [18, 0], sizes = [16, 64], strides = [1, 1]} : vector<288x64xf32> to vector<16x64xf32>
    %c0_210 = arith.constant 0 : index
    %c1_211 = arith.constant 1 : index
    %c0_212 = arith.constant 0 : index
    %c0_213 = arith.constant 0 : index
    %237 = vector.load %arg1[%c0_210, %c1_211, %c0_212, %c0_213] : memref<1x16x16x64xf32, #tpu.memory_space<vmem>>, vector<1x1x16x64xf32>
    %238 = vector.shape_cast %237 : vector<1x1x16x64xf32> to vector<16x64xf32>
    %239 = arith.addf %236, %238 : vector<16x64xf32>
    %cst_214 = arith.constant 0.000000e+00 : f32
    %240 = vector.broadcast %cst_214 : f32 to vector<16x64xf32>
    %241 = arith.maximumf %239, %240 : vector<16x64xf32>
    %c0_215 = arith.constant 0 : index
    %c1_216 = arith.constant 1 : index
    %c0_217 = arith.constant 0 : index
    %c0_218 = arith.constant 0 : index
    %242 = vector.load %arg10[%c0_215, %c1_216, %c0_217, %c0_218] : memref<1x16x16x64xf32, #tpu.memory_space<vmem>>, vector<1x1x16x64xf32>
    %243 = vector.shape_cast %242 : vector<1x1x16x64xf32> to vector<16x64xf32>
    %244 = vector.shape_cast %241 : vector<16x64xf32> to vector<1x1x16x64xf32>
    tpu.vector_store %arg10[%c0_215, %c1_216, %c0_217, %c0_218], %244 {strides = array<i32>} : memref<1x16x16x64xf32, #tpu.memory_space<vmem>>, vector<1x1x16x64xf32>,
    %245 = vector.extract_strided_slice %226 {offsets = [36, 0], sizes = [16, 64], strides = [1, 1]} : vector<288x64xf32> to vector<16x64xf32>
    %c0_219 = arith.constant 0 : index
    %c2_220 = arith.constant 2 : index
    %c0_221 = arith.constant 0 : index
    %c0_222 = arith.constant 0 : index
    %246 = vector.load %arg1[%c0_219, %c2_220, %c0_221, %c0_222] : memref<1x16x16x64xf32, #tpu.memory_space<vmem>>, vector<1x1x16x64xf32>
    %247 = vector.shape_cast %246 : vector<1x1x16x64xf32> to vector<16x64xf32>
    %248 = arith.addf %245, %247 : vector<16x64xf32>
    %cst_223 = arith.constant 0.000000e+00 : f32
    %249 = vector.broadcast %cst_223 : f32 to vector<16x64xf32>
    %250 = arith.maximumf %248, %249 : vector<16x64xf32>
    %c0_224 = arith.constant 0 : index
    %c2_225 = arith.constant 2 : index
    %c0_226 = arith.constant 0 : index
    %c0_227 = arith.constant 0 : index
    %251 = vector.load %arg10[%c0_224, %c2_225, %c0_226, %c0_227] : memref<1x16x16x64xf32, #tpu.memory_space<vmem>>, vector<1x1x16x64xf32>
    %252 = vector.shape_cast %251 : vector<1x1x16x64xf32> to vector<16x64xf32>
    %253 = vector.shape_cast %250 : vector<16x64xf32> to vector<1x1x16x64xf32>
    tpu.vector_store %arg10[%c0_224, %c2_225, %c0_226, %c0_227], %253 {strides = array<i32>} : memref<1x16x16x64xf32, #tpu.memory_space<vmem>>, vector<1x1x16x64xf32>,
    %254 = vector.extract_strided_slice %226 {offsets = [54, 0], sizes = [16, 64], strides = [1, 1]} : vector<288x64xf32> to vector<16x64xf32>
    %c0_228 = arith.constant 0 : index
    %c3_229 = arith.constant 3 : index
    %c0_230 = arith.constant 0 : index
    %c0_231 = arith.constant 0 : index
    %255 = vector.load %arg1[%c0_228, %c3_229, %c0_230, %c0_231] : memref<1x16x16x64xf32, #tpu.memory_space<vmem>>, vector<1x1x16x64xf32>
    %256 = vector.shape_cast %255 : vector<1x1x16x64xf32> to vector<16x64xf32>
    %257 = arith.addf %254, %256 : vector<16x64xf32>
    %cst_232 = arith.constant 0.000000e+00 : f32
    %258 = vector.broadcast %cst_232 : f32 to vector<16x64xf32>
    %259 = arith.maximumf %257, %258 : vector<16x64xf32>
    %c0_233 = arith.constant 0 : index
    %c3_234 = arith.constant 3 : index
    %c0_235 = arith.constant 0 : index
    %c0_236 = arith.constant 0 : index
    %260 = vector.load %arg10[%c0_233, %c3_234, %c0_235, %c0_236] : memref<1x16x16x64xf32, #tpu.memory_space<vmem>>, vector<1x1x16x64xf32>
    %261 = vector.shape_cast %260 : vector<1x1x16x64xf32> to vector<16x64xf32>
    %262 = vector.shape_cast %259 : vector<16x64xf32> to vector<1x1x16x64xf32>
    tpu.vector_store %arg10[%c0_233, %c3_234, %c0_235, %c0_236], %262 {strides = array<i32>} : memref<1x16x16x64xf32, #tpu.memory_space<vmem>>, vector<1x1x16x64xf32>,
    %263 = vector.extract_strided_slice %226 {offsets = [72, 0], sizes = [16, 64], strides = [1, 1]} : vector<288x64xf32> to vector<16x64xf32>
    %c0_237 = arith.constant 0 : index
    %c4_238 = arith.constant 4 : index
    %c0_239 = arith.constant 0 : index
    %c0_240 = arith.constant 0 : index
    %264 = vector.load %arg1[%c0_237, %c4_238, %c0_239, %c0_240] : memref<1x16x16x64xf32, #tpu.memory_space<vmem>>, vector<1x1x16x64xf32>
    %265 = vector.shape_cast %264 : vector<1x1x16x64xf32> to vector<16x64xf32>
    %266 = arith.addf %263, %265 : vector<16x64xf32>
    %cst_241 = arith.constant 0.000000e+00 : f32
    %267 = vector.broadcast %cst_241 : f32 to vector<16x64xf32>
    %268 = arith.maximumf %266, %267 : vector<16x64xf32>
    %c0_242 = arith.constant 0 : index
    %c4_243 = arith.constant 4 : index
    %c0_244 = arith.constant 0 : index
    %c0_245 = arith.constant 0 : index
    %269 = vector.load %arg10[%c0_242, %c4_243, %c0_244, %c0_245] : memref<1x16x16x64xf32, #tpu.memory_space<vmem>>, vector<1x1x16x64xf32>
    %270 = vector.shape_cast %269 : vector<1x1x16x64xf32> to vector<16x64xf32>
    %271 = vector.shape_cast %268 : vector<16x64xf32> to vector<1x1x16x64xf32>
    tpu.vector_store %arg10[%c0_242, %c4_243, %c0_244, %c0_245], %271 {strides = array<i32>} : memref<1x16x16x64xf32, #tpu.memory_space<vmem>>, vector<1x1x16x64xf32>,
    %272 = vector.extract_strided_slice %226 {offsets = [90, 0], sizes = [16, 64], strides = [1, 1]} : vector<288x64xf32> to vector<16x64xf32>
    %c0_246 = arith.constant 0 : index
    %c5_247 = arith.constant 5 : index
    %c0_248 = arith.constant 0 : index
    %c0_249 = arith.constant 0 : index
    %273 = vector.load %arg1[%c0_246, %c5_247, %c0_248, %c0_249] : memref<1x16x16x64xf32, #tpu.memory_space<vmem>>, vector<1x1x16x64xf32>
    %274 = vector.shape_cast %273 : vector<1x1x16x64xf32> to vector<16x64xf32>
    %275 = arith.addf %272, %274 : vector<16x64xf32>
    %cst_250 = arith.constant 0.000000e+00 : f32
    %276 = vector.broadcast %cst_250 : f32 to vector<16x64xf32>
    %277 = arith.maximumf %275, %276 : vector<16x64xf32>
    %c0_251 = arith.constant 0 : index
    %c5_252 = arith.constant 5 : index
    %c0_253 = arith.constant 0 : index
    %c0_254 = arith.constant 0 : index
    %278 = vector.load %arg10[%c0_251, %c5_252, %c0_253, %c0_254] : memref<1x16x16x64xf32, #tpu.memory_space<vmem>>, vector<1x1x16x64xf32>
    %279 = vector.shape_cast %278 : vector<1x1x16x64xf32> to vector<16x64xf32>
    %280 = vector.shape_cast %277 : vector<16x64xf32> to vector<1x1x16x64xf32>
    tpu.vector_store %arg10[%c0_251, %c5_252, %c0_253, %c0_254], %280 {strides = array<i32>} : memref<1x16x16x64xf32, #tpu.memory_space<vmem>>, vector<1x1x16x64xf32>,
    %281 = vector.extract_strided_slice %226 {offsets = [108, 0], sizes = [16, 64], strides = [1, 1]} : vector<288x64xf32> to vector<16x64xf32>
    %c0_255 = arith.constant 0 : index
    %c6_256 = arith.constant 6 : index
    %c0_257 = arith.constant 0 : index
    %c0_258 = arith.constant 0 : index
    %282 = vector.load %arg1[%c0_255, %c6_256, %c0_257, %c0_258] : memref<1x16x16x64xf32, #tpu.memory_space<vmem>>, vector<1x1x16x64xf32>
    %283 = vector.shape_cast %282 : vector<1x1x16x64xf32> to vector<16x64xf32>
    %284 = arith.addf %281, %283 : vector<16x64xf32>
    %cst_259 = arith.constant 0.000000e+00 : f32
    %285 = vector.broadcast %cst_259 : f32 to vector<16x64xf32>
    %286 = arith.maximumf %284, %285 : vector<16x64xf32>
    %c0_260 = arith.constant 0 : index
    %c6_261 = arith.constant 6 : index
    %c0_262 = arith.constant 0 : index
    %c0_263 = arith.constant 0 : index
    %287 = vector.load %arg10[%c0_260, %c6_261, %c0_262, %c0_263] : memref<1x16x16x64xf32, #tpu.memory_space<vmem>>, vector<1x1x16x64xf32>
    %288 = vector.shape_cast %287 : vector<1x1x16x64xf32> to vector<16x64xf32>
    %289 = vector.shape_cast %286 : vector<16x64xf32> to vector<1x1x16x64xf32>
    tpu.vector_store %arg10[%c0_260, %c6_261, %c0_262, %c0_263], %289 {strides = array<i32>} : memref<1x16x16x64xf32, #tpu.memory_space<vmem>>, vector<1x1x16x64xf32>,
    %290 = vector.extract_strided_slice %226 {offsets = [126, 0], sizes = [16, 64], strides = [1, 1]} : vector<288x64xf32> to vector<16x64xf32>
    %c0_264 = arith.constant 0 : index
    %c7_265 = arith.constant 7 : index
    %c0_266 = arith.constant 0 : index
    %c0_267 = arith.constant 0 : index
    %291 = vector.load %arg1[%c0_264, %c7_265, %c0_266, %c0_267] : memref<1x16x16x64xf32, #tpu.memory_space<vmem>>, vector<1x1x16x64xf32>
    %292 = vector.shape_cast %291 : vector<1x1x16x64xf32> to vector<16x64xf32>
    %293 = arith.addf %290, %292 : vector<16x64xf32>
    %cst_268 = arith.constant 0.000000e+00 : f32
    %294 = vector.broadcast %cst_268 : f32 to vector<16x64xf32>
    %295 = arith.maximumf %293, %294 : vector<16x64xf32>
    %c0_269 = arith.constant 0 : index
    %c7_270 = arith.constant 7 : index
    %c0_271 = arith.constant 0 : index
    %c0_272 = arith.constant 0 : index
    %296 = vector.load %arg10[%c0_269, %c7_270, %c0_271, %c0_272] : memref<1x16x16x64xf32, #tpu.memory_space<vmem>>, vector<1x1x16x64xf32>
    %297 = vector.shape_cast %296 : vector<1x1x16x64xf32> to vector<16x64xf32>
    %298 = vector.shape_cast %295 : vector<16x64xf32> to vector<1x1x16x64xf32>
    tpu.vector_store %arg10[%c0_269, %c7_270, %c0_271, %c0_272], %298 {strides = array<i32>} : memref<1x16x16x64xf32, #tpu.memory_space<vmem>>, vector<1x1x16x64xf32>,
    %299 = vector.extract_strided_slice %226 {offsets = [144, 0], sizes = [16, 64], strides = [1, 1]} : vector<288x64xf32> to vector<16x64xf32>
    %c0_273 = arith.constant 0 : index
    %c8_274 = arith.constant 8 : index
    %c0_275 = arith.constant 0 : index
    %c0_276 = arith.constant 0 : index
    %300 = vector.load %arg1[%c0_273, %c8_274, %c0_275, %c0_276] : memref<1x16x16x64xf32, #tpu.memory_space<vmem>>, vector<1x1x16x64xf32>
    %301 = vector.shape_cast %300 : vector<1x1x16x64xf32> to vector<16x64xf32>
    %302 = arith.addf %299, %301 : vector<16x64xf32>
    %cst_277 = arith.constant 0.000000e+00 : f32
    %303 = vector.broadcast %cst_277 : f32 to vector<16x64xf32>
    %304 = arith.maximumf %302, %303 : vector<16x64xf32>
    %c0_278 = arith.constant 0 : index
    %c8_279 = arith.constant 8 : index
    %c0_280 = arith.constant 0 : index
    %c0_281 = arith.constant 0 : index
    %305 = vector.load %arg10[%c0_278, %c8_279, %c0_280, %c0_281] : memref<1x16x16x64xf32, #tpu.memory_space<vmem>>, vector<1x1x16x64xf32>
    %306 = vector.shape_cast %305 : vector<1x1x16x64xf32> to vector<16x64xf32>
    %307 = vector.shape_cast %304 : vector<16x64xf32> to vector<1x1x16x64xf32>
    tpu.vector_store %arg10[%c0_278, %c8_279, %c0_280, %c0_281], %307 {strides = array<i32>} : memref<1x16x16x64xf32, #tpu.memory_space<vmem>>, vector<1x1x16x64xf32>,
    %308 = vector.extract_strided_slice %226 {offsets = [162, 0], sizes = [16, 64], strides = [1, 1]} : vector<288x64xf32> to vector<16x64xf32>
    %c0_282 = arith.constant 0 : index
    %c9_283 = arith.constant 9 : index
    %c0_284 = arith.constant 0 : index
    %c0_285 = arith.constant 0 : index
    %309 = vector.load %arg1[%c0_282, %c9_283, %c0_284, %c0_285] : memref<1x16x16x64xf32, #tpu.memory_space<vmem>>, vector<1x1x16x64xf32>
    %310 = vector.shape_cast %309 : vector<1x1x16x64xf32> to vector<16x64xf32>
    %311 = arith.addf %308, %310 : vector<16x64xf32>
    %cst_286 = arith.constant 0.000000e+00 : f32
    %312 = vector.broadcast %cst_286 : f32 to vector<16x64xf32>
    %313 = arith.maximumf %311, %312 : vector<16x64xf32>
    %c0_287 = arith.constant 0 : index
    %c9_288 = arith.constant 9 : index
    %c0_289 = arith.constant 0 : index
    %c0_290 = arith.constant 0 : index
    %314 = vector.load %arg10[%c0_287, %c9_288, %c0_289, %c0_290] : memref<1x16x16x64xf32, #tpu.memory_space<vmem>>, vector<1x1x16x64xf32>
    %315 = vector.shape_cast %314 : vector<1x1x16x64xf32> to vector<16x64xf32>
    %316 = vector.shape_cast %313 : vector<16x64xf32> to vector<1x1x16x64xf32>
    tpu.vector_store %arg10[%c0_287, %c9_288, %c0_289, %c0_290], %316 {strides = array<i32>} : memref<1x16x16x64xf32, #tpu.memory_space<vmem>>, vector<1x1x16x64xf32>,
    %317 = vector.extract_strided_slice %226 {offsets = [180, 0], sizes = [16, 64], strides = [1, 1]} : vector<288x64xf32> to vector<16x64xf32>
    %c0_291 = arith.constant 0 : index
    %c10_292 = arith.constant 10 : index
    %c0_293 = arith.constant 0 : index
    %c0_294 = arith.constant 0 : index
    %318 = vector.load %arg1[%c0_291, %c10_292, %c0_293, %c0_294] : memref<1x16x16x64xf32, #tpu.memory_space<vmem>>, vector<1x1x16x64xf32>
    %319 = vector.shape_cast %318 : vector<1x1x16x64xf32> to vector<16x64xf32>
    %320 = arith.addf %317, %319 : vector<16x64xf32>
    %cst_295 = arith.constant 0.000000e+00 : f32
    %321 = vector.broadcast %cst_295 : f32 to vector<16x64xf32>
    %322 = arith.maximumf %320, %321 : vector<16x64xf32>
    %c0_296 = arith.constant 0 : index
    %c10_297 = arith.constant 10 : index
    %c0_298 = arith.constant 0 : index
    %c0_299 = arith.constant 0 : index
    %323 = vector.load %arg10[%c0_296, %c10_297, %c0_298, %c0_299] : memref<1x16x16x64xf32, #tpu.memory_space<vmem>>, vector<1x1x16x64xf32>
    %324 = vector.shape_cast %323 : vector<1x1x16x64xf32> to vector<16x64xf32>
    %325 = vector.shape_cast %322 : vector<16x64xf32> to vector<1x1x16x64xf32>
    tpu.vector_store %arg10[%c0_296, %c10_297, %c0_298, %c0_299], %325 {strides = array<i32>} : memref<1x16x16x64xf32, #tpu.memory_space<vmem>>, vector<1x1x16x64xf32>,
    %326 = vector.extract_strided_slice %226 {offsets = [198, 0], sizes = [16, 64], strides = [1, 1]} : vector<288x64xf32> to vector<16x64xf32>
    %c0_300 = arith.constant 0 : index
    %c11_301 = arith.constant 11 : index
    %c0_302 = arith.constant 0 : index
    %c0_303 = arith.constant 0 : index
    %327 = vector.load %arg1[%c0_300, %c11_301, %c0_302, %c0_303] : memref<1x16x16x64xf32, #tpu.memory_space<vmem>>, vector<1x1x16x64xf32>
    %328 = vector.shape_cast %327 : vector<1x1x16x64xf32> to vector<16x64xf32>
    %329 = arith.addf %326, %328 : vector<16x64xf32>
    %cst_304 = arith.constant 0.000000e+00 : f32
    %330 = vector.broadcast %cst_304 : f32 to vector<16x64xf32>
    %331 = arith.maximumf %329, %330 : vector<16x64xf32>
    %c0_305 = arith.constant 0 : index
    %c11_306 = arith.constant 11 : index
    %c0_307 = arith.constant 0 : index
    %c0_308 = arith.constant 0 : index
    %332 = vector.load %arg10[%c0_305, %c11_306, %c0_307, %c0_308] : memref<1x16x16x64xf32, #tpu.memory_space<vmem>>, vector<1x1x16x64xf32>
    %333 = vector.shape_cast %332 : vector<1x1x16x64xf32> to vector<16x64xf32>
    %334 = vector.shape_cast %331 : vector<16x64xf32> to vector<1x1x16x64xf32>
    tpu.vector_store %arg10[%c0_305, %c11_306, %c0_307, %c0_308], %334 {strides = array<i32>} : memref<1x16x16x64xf32, #tpu.memory_space<vmem>>, vector<1x1x16x64xf32>,
    %335 = vector.extract_strided_slice %226 {offsets = [216, 0], sizes = [16, 64], strides = [1, 1]} : vector<288x64xf32> to vector<16x64xf32>
    %c0_309 = arith.constant 0 : index
    %c12_310 = arith.constant 12 : index
    %c0_311 = arith.constant 0 : index
    %c0_312 = arith.constant 0 : index
    %336 = vector.load %arg1[%c0_309, %c12_310, %c0_311, %c0_312] : memref<1x16x16x64xf32, #tpu.memory_space<vmem>>, vector<1x1x16x64xf32>
    %337 = vector.shape_cast %336 : vector<1x1x16x64xf32> to vector<16x64xf32>
    %338 = arith.addf %335, %337 : vector<16x64xf32>
    %cst_313 = arith.constant 0.000000e+00 : f32
    %339 = vector.broadcast %cst_313 : f32 to vector<16x64xf32>
    %340 = arith.maximumf %338, %339 : vector<16x64xf32>
    %c0_314 = arith.constant 0 : index
    %c12_315 = arith.constant 12 : index
    %c0_316 = arith.constant 0 : index
    %c0_317 = arith.constant 0 : index
    %341 = vector.load %arg10[%c0_314, %c12_315, %c0_316, %c0_317] : memref<1x16x16x64xf32, #tpu.memory_space<vmem>>, vector<1x1x16x64xf32>
    %342 = vector.shape_cast %341 : vector<1x1x16x64xf32> to vector<16x64xf32>
    %343 = vector.shape_cast %340 : vector<16x64xf32> to vector<1x1x16x64xf32>
    tpu.vector_store %arg10[%c0_314, %c12_315, %c0_316, %c0_317], %343 {strides = array<i32>} : memref<1x16x16x64xf32, #tpu.memory_space<vmem>>, vector<1x1x16x64xf32>,
    %344 = vector.extract_strided_slice %226 {offsets = [234, 0], sizes = [16, 64], strides = [1, 1]} : vector<288x64xf32> to vector<16x64xf32>
    %c0_318 = arith.constant 0 : index
    %c13_319 = arith.constant 13 : index
    %c0_320 = arith.constant 0 : index
    %c0_321 = arith.constant 0 : index
    %345 = vector.load %arg1[%c0_318, %c13_319, %c0_320, %c0_321] : memref<1x16x16x64xf32, #tpu.memory_space<vmem>>, vector<1x1x16x64xf32>
    %346 = vector.shape_cast %345 : vector<1x1x16x64xf32> to vector<16x64xf32>
    %347 = arith.addf %344, %346 : vector<16x64xf32>
    %cst_322 = arith.constant 0.000000e+00 : f32
    %348 = vector.broadcast %cst_322 : f32 to vector<16x64xf32>
    %349 = arith.maximumf %347, %348 : vector<16x64xf32>
    %c0_323 = arith.constant 0 : index
    %c13_324 = arith.constant 13 : index
    %c0_325 = arith.constant 0 : index
    %c0_326 = arith.constant 0 : index
    %350 = vector.load %arg10[%c0_323, %c13_324, %c0_325, %c0_326] : memref<1x16x16x64xf32, #tpu.memory_space<vmem>>, vector<1x1x16x64xf32>
    %351 = vector.shape_cast %350 : vector<1x1x16x64xf32> to vector<16x64xf32>
    %352 = vector.shape_cast %349 : vector<16x64xf32> to vector<1x1x16x64xf32>
    tpu.vector_store %arg10[%c0_323, %c13_324, %c0_325, %c0_326], %352 {strides = array<i32>} : memref<1x16x16x64xf32, #tpu.memory_space<vmem>>, vector<1x1x16x64xf32>,
    %353 = vector.extract_strided_slice %226 {offsets = [252, 0], sizes = [16, 64], strides = [1, 1]} : vector<288x64xf32> to vector<16x64xf32>
    %c0_327 = arith.constant 0 : index
    %c14_328 = arith.constant 14 : index
    %c0_329 = arith.constant 0 : index
    %c0_330 = arith.constant 0 : index
    %354 = vector.load %arg1[%c0_327, %c14_328, %c0_329, %c0_330] : memref<1x16x16x64xf32, #tpu.memory_space<vmem>>, vector<1x1x16x64xf32>
    %355 = vector.shape_cast %354 : vector<1x1x16x64xf32> to vector<16x64xf32>
    %356 = arith.addf %353, %355 : vector<16x64xf32>
    %cst_331 = arith.constant 0.000000e+00 : f32
    %357 = vector.broadcast %cst_331 : f32 to vector<16x64xf32>
    %358 = arith.maximumf %356, %357 : vector<16x64xf32>
    %c0_332 = arith.constant 0 : index
    %c14_333 = arith.constant 14 : index
    %c0_334 = arith.constant 0 : index
    %c0_335 = arith.constant 0 : index
    %359 = vector.load %arg10[%c0_332, %c14_333, %c0_334, %c0_335] : memref<1x16x16x64xf32, #tpu.memory_space<vmem>>, vector<1x1x16x64xf32>
    %360 = vector.shape_cast %359 : vector<1x1x16x64xf32> to vector<16x64xf32>
    %361 = vector.shape_cast %358 : vector<16x64xf32> to vector<1x1x16x64xf32>
    tpu.vector_store %arg10[%c0_332, %c14_333, %c0_334, %c0_335], %361 {strides = array<i32>} : memref<1x16x16x64xf32, #tpu.memory_space<vmem>>, vector<1x1x16x64xf32>,
    %362 = vector.extract_strided_slice %226 {offsets = [270, 0], sizes = [16, 64], strides = [1, 1]} : vector<288x64xf32> to vector<16x64xf32>
    %c0_336 = arith.constant 0 : index
    %c15_337 = arith.constant 15 : index
    %c0_338 = arith.constant 0 : index
    %c0_339 = arith.constant 0 : index
    %363 = vector.load %arg1[%c0_336, %c15_337, %c0_338, %c0_339] : memref<1x16x16x64xf32, #tpu.memory_space<vmem>>, vector<1x1x16x64xf32>
    %364 = vector.shape_cast %363 : vector<1x1x16x64xf32> to vector<16x64xf32>
    %365 = arith.addf %362, %364 : vector<16x64xf32>
    %cst_340 = arith.constant 0.000000e+00 : f32
    %366 = vector.broadcast %cst_340 : f32 to vector<16x64xf32>
    %367 = arith.maximumf %365, %366 : vector<16x64xf32>
    %c0_341 = arith.constant 0 : index
    %c15_342 = arith.constant 15 : index
    %c0_343 = arith.constant 0 : index
    %c0_344 = arith.constant 0 : index
    %368 = vector.load %arg10[%c0_341, %c15_342, %c0_343, %c0_344] : memref<1x16x16x64xf32, #tpu.memory_space<vmem>>, vector<1x1x16x64xf32>
    %369 = vector.shape_cast %368 : vector<1x1x16x64xf32> to vector<16x64xf32>
    %370 = vector.shape_cast %367 : vector<16x64xf32> to vector<1x1x16x64xf32>
    tpu.vector_store %arg10[%c0_341, %c15_342, %c0_343, %c0_344], %370 {strides = array<i32>} : memref<1x16x16x64xf32, #tpu.memory_space<vmem>>, vector<1x1x16x64xf32>,
    return
  }
  func.func @transform_0(%arg0: i32) -> (i32, i32, i32, i32) {
    %c0_i32 = arith.constant 0 : i32
    %c0_i32_0 = arith.constant 0 : i32
    %c0_i32_1 = arith.constant 0 : i32
    %c0_i32_2 = arith.constant 0 : i32
    return %arg0, %c0_i32, %c0_i32_0, %c0_i32_1 : i32, i32, i32, i32
  }
  func.func @transform_1(%arg0: i32) -> (i32, i32, i32) {
    %c0_i32 = arith.constant 0 : i32
    %c0_i32_0 = arith.constant 0 : i32
    %c0_i32_1 = arith.constant 0 : i32
    %c0_i32_2 = arith.constant 0 : i32
    return %c0_i32, %c0_i32_0, %c0_i32_1 : i32, i32, i32
  }
  func.func @transform_2(%arg0: i32) -> (i32, i32) {
    %c0_i32 = arith.constant 0 : i32
    %c0_i32_0 = arith.constant 0 : i32
    %c0_i32_1 = arith.constant 0 : i32
    return %c0_i32, %c0_i32_0 : i32, i32
  }
  func.func @transform_3(%arg0: i32) -> (i32, i32, i32) {
    %c0_i32 = arith.constant 0 : i32
    %c0_i32_0 = arith.constant 0 : i32
    %c0_i32_1 = arith.constant 0 : i32
    %c0_i32_2 = arith.constant 0 : i32
    return %c0_i32, %c0_i32_0, %c0_i32_1 : i32, i32, i32
  }
  func.func @transform_4(%arg0: i32) -> (i32, i32) {
    %c0_i32 = arith.constant 0 : i32
    %c0_i32_0 = arith.constant 0 : i32
    %c0_i32_1 = arith.constant 0 : i32
    return %c0_i32, %c0_i32_0 : i32, i32
  }
  func.func @transform_5(%arg0: i32) -> (i32, i32) {
    %c0_i32 = arith.constant 0 : i32
    %c0_i32_0 = arith.constant 0 : i32
    %c0_i32_1 = arith.constant 0 : i32
    return %c0_i32, %c0_i32_0 : i32, i32
  }
  func.func @transform_6(%arg0: i32) -> (i32, i32) {
    %c0_i32 = arith.constant 0 : i32
    %c0_i32_0 = arith.constant 0 : i32
    %c0_i32_1 = arith.constant 0 : i32
    return %c0_i32, %c0_i32_0 : i32, i32
  }
  func.func @transform_7(%arg0: i32) -> (i32, i32) {
    %c0_i32 = arith.constant 0 : i32
    %c0_i32_0 = arith.constant 0 : i32
    %c0_i32_1 = arith.constant 0 : i32
    return %c0_i32, %c0_i32_0 : i32, i32
  }
  func.func @transform_8(%arg0: i32) -> (i32, i32) {
    %c0_i32 = arith.constant 0 : i32
    %c0_i32_0 = arith.constant 0 : i32
    %c0_i32_1 = arith.constant 0 : i32
    return %c0_i32, %c0_i32_0 : i32, i32
  }
  func.func @transform_9(%arg0: i32) -> (i32, i32, i32, i32) {
    %c0_i32 = arith.constant 0 : i32
    %c0_i32_0 = arith.constant 0 : i32
    %c0_i32_1 = arith.constant 0 : i32
    %c0_i32_2 = arith.constant 0 : i32
    return %arg0, %c0_i32, %c0_i32_0, %c0_i32_1 : i32, i32, i32, i32
  }
}

</mosaic_0001>

<bundles_post_ra>
// kernel: st_se_basic_block.1
= control target key start
LH: loop header
LB: loop body
LE: loop exit
PB: predicated region body
PF: predicated region fallthrough
CT: control target
= control target key end

     0   :  { %14 = vsyncpa [#allocation5], 0  ;;  %s14078_s0 = inlined_call_operand.hbm [shape: f32[2,16,16,64], index: 0, kind: input, shape index: {}]   ;;  %s14079_s1 = inlined_call_operand.hbm [shape: bf16[9,64,64], index: 1, kind: input, shape index: {}]   ;;  %s14080_s2 = inlined_call_operand.vmem [shape: f32[1,64], index: 2, kind: input, shape index: {}]   ;;  %s14081_s3 = inlined_call_operand.hbm [shape: bf16[9,64,64], index: 3, kind: input, shape index: {}]   ;;  %s14082_s4 = inlined_call_operand.vmem [shape: f32[1,64], index: 4, kind: input, shape index: {}]   ;;  %s14083_s5 = inlined_call_operand.vmem [shape: f32[64,4], index: 5, kind: input, shape index: {}]   ;;  %s14084_s6 = inlined_call_operand.vmem [shape: f32[1,4], index: 6, kind: input, shape index: {}]   ;;  %s14085_s7 = inlined_call_operand.vmem [shape: f32[4,64], index: 7, kind: input, shape index: {}]   ;;  %s14086_s8 = inlined_call_operand.vmem [shape: f32[1,64], index: 8, kind: input, shape index: {}]   ;;  %s14087_s9 = inlined_call_operand.hbm [shape: f32[2,16,16,64], index: 9, kind: output, shape index: {}]  }
   0x1   :  { %16 = vsyncpa [#allocation5 + $0x1], 0 }
   0x2   :  { %17 = vsyncpa [#allocation8], 0 }
   0x3   :  { %18 = vsyncpa [#allocation6], 0 }
   0x4   :  { %20 = vsyncpa [#allocation6 + $0x1], 0  ;;  %s11052_s30 = smov 0   ;;  %s11054_s10 = smov 0  }
   0x5   :  { %s11056_s11 = smov 0   ;;  %s11058_s12 = smov 0  }
   0x6 LB: > { %s11073_s13 = sadd.s32 4294967295, %s10989_s12   ;;  %s8326_s14 = sadd.s32 4294967294, %s10989_s12   ;;  %s10989_s12 = sphi %s11058_s12, %s14831_s12   ;;  %s10985_s11 = sphi %s11056_s11, %s14830_s11   ;;  %s10981_s10 = sphi %s11054_s10, %s14829_s10   ;;  %s10977_s30 = sphi %s11052_s30, %s14828_s30  }
   0x7   : > { %p46_p0 = scmp.ne.s32.totalorder %s10981_s10, %s10977_s30  ;;  %p14088_p1 = scmp.eq.s32.totalorder %s11073_s13, 0 }
   0x8   : > { %p244_p3 = scmp.eq.s32.totalorder %s8326_s14, 1  ;;  %p8327_p5 = scmp.ge.s32.totalorder %s10989_s12, 1 }
   0x9   : > { %p11082_p4 = por %p14088_p1, %p46_p0  ;;  %p251_p7 = scmp.lt.s32.totalorder %s10989_s12, 3 }
   0xa   : > { %p11087_p6 = por %p244_p3, %p46_p0  ;;  %s10991_s18 = smov [#allocation7]  }
   0xb   : > { %s14180_s15 = scalar_select %p11082_p4, 1, 0 }
   0xc   : > { %s14181_s16 = scalar_select %p11087_p6, 1, 0 }
   0xd   : > { %p11092_p8 = pnand %p8327_p5, %p251_p7  ;;  %s263_s19 = sshll.u32 %s10991_s18, 4  ;;  %s11096_s19 = int_to_ptr.vmem [resolvable:$true] %s263_s19 }
   0xe   : > { %14182 = sst [smem:[#allocation14_spill]] %s14181_s16  ;;  %s10992_s21 = smov [#allocation9]  }
   0xf   : > { %p10695_p9 = pneg %p11092_p8  ;;  %s279_s22 = sshll.u32 %s10992_s21, 4  ;;  %s11107_s22 = int_to_ptr.vmem [resolvable:$true] %s279_s22 }
  0x10   : > { %s10833_s25 = scalar_lea.hbm %s14079_s1, 4608 }
  0x11   : > { %p11103_p11 = pnand %p10695_p9, %p14088_p1  ;;  %p10834_p12 = scmp.ne.s32.totalorder %s14079_s1, %s10833_s25 }
  0x12   : > { %p10840_p5 = scmp.lt.u32.totalorder %s10833_s25, %s14079_s1 }
  0x13   : > { %p10835_p13 = pneg %p11103_p11 }
  0x15   : > { %p10836_p0 = pnand %p10835_p13, %p10834_p12 }
  0x17   : > { %p10837_p3 = pneg %p10836_p0 }
  0x19   : > { %p10842_p7 = pnand %p10840_p5, %p10837_p3 }
  0x1b   : > { %10845 = shalt.err (!%p10842_p7)
}
  0x1c   : > { %s10846_s14 = scalar_lea.vmem %s11096_s19, 4608  ;;  %p10854_p2 = scmp.lt.s32.totalorder %s11096_s19, %s11096_s19 }
  0x1d   : > { %p10847_p9 = scmp.ne.s32.totalorder %s11096_s19, %s10846_s14  ;;  %p10855_p12 = scmp.lt.s32.totalorder %s10846_s14, %s10846_s14 }
  0x1f   : > { %p10849_p10 = pnand %p10847_p9, %p10835_p13  ;;  %p10856_p0 = por %p10855_p12, %p10854_p2 }
  0x21   : > { %p10850_p1 = pneg %p10849_p10 }
  0x23   : > { %p10857_p6 = pnand %p10856_p0, %p10850_p1 }
  0x25   : > { %10860 = shalt.err (!%p10857_p6)
}
  0x26   : > { %s10993_s18 = smov 64   ;;  %s10994_s21 = smov 4  }
  0x27   : > { %10698 = dma.hbm_to_vmem [thread:$0]  (!%p11103_p11), %s14079_s1, 4608, %s11096_s19, [#allocation8], %s10993_s18, %s10993_s18, %s10994_s21  }
  0x28   : > { %s10861_s27 = scalar_lea.hbm %s14081_s3, 4608 }
  0x29   : > { %p10862_p2 = scmp.ne.s32.totalorder %s14081_s3, %s10861_s27  ;;  %p10868_p10 = scmp.lt.u32.totalorder %s10861_s27, %s14081_s3 }
  0x2b   : > { %p10864_p1 = pnand %p10862_p2, %p10835_p13 }
  0x2d   : > { %p10865_p6 = pneg %p10864_p1 }
  0x2f   : > { %p10870_p3 = pnand %p10868_p10, %p10865_p6 }
  0x31   : > { %10873 = shalt.err (!%p10870_p3)
}
  0x32   : > { %s10874_s19 = scalar_lea.vmem %s11107_s22, 4608  ;;  %p10882_p12 = scmp.lt.s32.totalorder %s11107_s22, %s11107_s22 }
  0x33   : > { %p10875_p5 = scmp.ne.s32.totalorder %s11107_s22, %s10874_s19  ;;  %p10883_p0 = scmp.lt.s32.totalorder %s10874_s19, %s10874_s19 }
  0x35   : > { %p10877_p7 = pnand %p10875_p5, %p10835_p13  ;;  %p10884_p2 = por %p10883_p0, %p10882_p12 }
  0x37   : > { %p10878_p9 = pneg %p10877_p7 }
  0x39   : > { %p10885_p1 = pnand %p10884_p2, %p10878_p9 }
  0x3b   : > { %10888 = shalt.err (!%p10885_p1)
}
  0x3c   : > { %10701 = dma.hbm_to_vmem [thread:$0]  (!%p11103_p11), %s14081_s3, 4608, %s11107_s22, [#allocation8], %s10993_s18, %s10993_s18, %s10994_s21  }
  0x3d   : > { %s11162_s24 = sadd.s32 1, %s10989_s12   ;;  %s33_s20 = sadd.s32 1, %s10985_s11 }
  0x3e   : > { %s30_s25 = ssub.s32 %s10989_s12, %s11162_s24  ;;  %p40_p13 = scmp.ne.s32.totalorder %s10985_s11, %s10981_s10 }
  0x3f   : > { %p31_p6 = scmp.eq.s32.totalorder %s30_s25, 0  ;;  %p41_p10 = scmp.eq.s32.totalorder %s10989_s12, 0 }
  0x40   : > { %p14185_p3 = scmp.eq.s32.totalorder %s11073_s13, 1  ;;  %p10712_p7 = scmp.lt.s32.totalorder %s10989_s12, 2 }
  0x41   : > { %s11178_s27 = scalar_select %p31_p6, %s10985_s11, %s33_s20  }
  0x42   : > { %p11172_p5 = por %p14185_p3, %p40_p13  ;;  %p42_p9 = por %p41_p10, %p40_p13 }
  0x43   : > { %s308_s28 = sand.u32 1, %s10985_s11   ;;  %s8845_s22 = sshll.u32 %s10989_s12, 12 }
  0x44   : > { %s14186_s26 = scalar_select %p11172_p5, 1, 0 }
  0x45   : > { %s8331_s29 = sshll.u32 %s308_s28, 8  ;;  %s11185_s14 = scalar_lea.hbm %s14078_s0, %s8845_s22 }
  0x46   : > { %s312_s19 = scalar_lea.vmem [#allocation4], %s8331_s29  ;;  %p11189_p11 = pnand %p10712_p7, %p42_p9 }
  0x47   : > { %s319_s16 = sshll.u32 %s312_s19, 4  ;;  %s11193_s20 = scalar_lea.sflag [#allocation5], %s308_s28  ;;  %s11187_s16 = int_to_ptr.vmem [resolvable:$true] %s319_s16 }
  0x48   : > { %s10889_s25 = scalar_lea.hbm %s11185_s14, 4096  ;;  %p10891_p0 = pneg %p11189_p11 }
  0x49   : > { %p10890_p12 = scmp.ne.s32.totalorder %s11185_s14, %s10889_s25  ;;  %s10894_s18 = scalar_lea.hbm %s14078_s0, 8192 }
  0x4a   : > { %p10895_p13 = scmp.lt.u32.totalorder %s11185_s14, %s14078_s0  ;;  %p10896_p6 = scmp.lt.u32.totalorder %s10894_s18, %s10889_s25 }
  0x4b   : > { %p10892_p2 = pnand %p10891_p0, %p10890_p12  ;;  %p10898_p3 = scmp.lt.u32.totalorder %s10889_s25, %s11185_s14 }
  0x4c   : > { %p10897_p10 = por %p10896_p6, %p10895_p13 }
  0x4d   : > { %p10893_p1 = pneg %p10892_p2 }
  0x4e   : > { %p10899_p7 = por %p10898_p3, %p10897_p10 }
  0x50   : > { %p10900_p9 = pnand %p10899_p7, %p10893_p1 }
  0x52   : > { %10903 = shalt.err (!%p10900_p9)
}
  0x53   : > { %s10904_s28 = scalar_lea.vmem %s11187_s16, 4096  ;;  %s10995_s29 = smov [#allocation4]  }
  0x54   : > { %p10905_p12 = scmp.ne.s32.totalorder %s11187_s16, %s10904_s28  ;;  %s10909_s22 = sshll.u32 %s10995_s29, 4  ;;  %s10910_s22 = int_to_ptr.vmem [resolvable:$false] %s10909_s22 }
  0x55   : > { %s10911_s21 = scalar_lea.vmem %s10910_s22, 8192  ;;  %p10912_p4 = scmp.lt.s32.totalorder %s11187_s16, %s10910_s22 }
  0x56   : > { %p10907_p2 = pnand %p10905_p12, %p10891_p0  ;;  %p10913_p13 = scmp.lt.s32.totalorder %s10911_s21, %s10904_s28 }
  0x58   : > { %p10908_p5 = pneg %p10907_p2  ;;  %p10914_p6 = por %p10913_p13, %p10912_p4 }
  0x5a   : > { %p10915_p10 = pnand %p10914_p6, %p10908_p5 }
  0x5c   : > { %10918 = shalt.err (!%p10915_p10)
}
  0x5d   : > { %s10996_s25 = smov 128   ;;  %s10997_s18 = smov 8  }
  0x5e   : > { %10705 = dma.hbm_to_vmem [thread:$0]  (!%p11189_p11), %s11185_s14, 4096, %s11187_s16, %s11193_s20, %s10996_s25, %s10996_s25, %s10997_s18  }
  0x5f   : > { %331 = sbr.rel (%p11092_p8) target bundleno = 2252 (0x8cc), region = 56 }
  0x66   : > { %s11224_s19 = sand.u32 1, %s10981_s10   ;;  %p14188_p4 = scmp.ne.s32.totalorder %s14180_s15, 0 }
  0x67   : > { %s8335_s28 = sshll.u32 %s11224_s19, 8  ;;  %s334_s29 = scalar_lea.sflag [#allocation5], %s11224_s19 }
  0x68   : > { %s11230_s22 = scalar_lea.vmem [#allocation4], %s8335_s28 }
  0x69   : > { %10964 = dma.done.wait (%p14188_p4), %s334_s29, 4096  }
  0x6a   : > { %10966 = vsyncadd (%p14188_p4), %s334_s29, 4294963200  ;;  %p14189_p5 = scmp.eq.s32.totalorder %s11073_s13, 0 }
  0x6c   : > { %10968 = dma.done.wait (%p14189_p5), [#allocation8], 9216   ;;  %p14190_p8 = pmov %p14189_p5 }
  0x6d   : > { %vm14092_vm0 = vcmask 523264   ;;  %v10998_v0 = vmov 0.0   ;;  %v10757_v1 = vld [vmem:[#allocation7 + $0x20] sm:$0xff]   ;;  %v10758_v2 = vld [vmem:[#allocation7 + $0x28] sm:$0xff]   ;;  %v10759_v3 = vld [vmem:[#allocation7 + $0x30] sm:$0xff]   ;;  %s13852_s21 = scalar_lea.vmem [#allocation10], %s8335_s28 }
  0x6e   : > { %10970 = vsyncadd (%p14190_p8), [#allocation8], 4294958080  ;;  %382 = vst.msk [vmem:[#allocation2] sm:$0xff] %vm14092_vm0, %v10998_v0  ;;  %9243 = vmatprep.subr.bf16.mxu0 %v10757_v1  ;;  %v467_v6 = vld [vmem:[%s11230_s22] sm:$0xff]  ;;  %v468_v8 = vld [vmem:[%s11230_s22 + $0x8] sm:$0xff]  ;;  %s8846_s28 = sshll.u32 %s11073_s13, 12 }
  0x6f   : > { %383 = vst.msk [vmem:[#allocation2 + $0x8] sm:$0xff] %vm14092_vm0, %v10998_v0  ;;  %384 = vst.msk [vmem:[#allocation2 + $0x10] sm:$0xff] %vm14092_vm0, %v10998_v0  ;;  %9244 = vmatpush3.bf16.msra.mxu0 %v10757_v1  ;;  %v10760_v9 = vld [vmem:[#allocation7 + $0x38] sm:$0xff]   ;;  %v8339_v10 = vld [vmem:[%s11230_s22 + $0x10] sm:$0xff]  ;;  %s14022_s18 = scalar_lea.hbm %s14087_s9, %s8846_s28  ;;  %s8221_s29 = scalar_lea.sflag [#allocation6], %s11224_s19 }
  0x70   : > { %385 = vst.msk [vmem:[#allocation2 + $0x18] sm:$0xff] %vm14092_vm0, %v10998_v0  ;;  %386 = vst.msk [vmem:[#allocation2 + $0x20] sm:$0xff] %vm14092_vm0, %v10998_v0  ;;  %9245 = vmatprep.subr.bf16.mxu0 %v10758_v2  ;;  %v8340_v11 = vld [vmem:[%s11230_s22 + $0x18] sm:$0xff]  ;;  %v8341_v12 = vld [vmem:[%s11230_s22 + $0x20] sm:$0xff]  ;;  %p14824_p0 = scmp.ne.s32.totalorder %s14186_s26, 0  ;;  %s10999_s17 = smov [#allocation10]  }
  0x71   : > { %387 = vst.msk [vmem:[#allocation2 + $0x28] sm:$0xff] %vm14092_vm0, %v10998_v0  ;;  %388 = vst.msk [vmem:[#allocation2 + $0x30] sm:$0xff] %vm14092_vm0, %v10998_v0  ;;  %v8342_v13 = vld [vmem:[%s11230_s22 + $0x28] sm:$0xff]  ;;  %v8343_v14 = vld [vmem:[%s11230_s22 + $0x30] sm:$0xff]  ;;  %s10923_s14 = sshll.u32 %s10999_s17, 4  ;;  %s10924_s14 = int_to_ptr.vmem [resolvable:$false] %s10923_s14 }
  0x72   : > { %389 = vst.msk [vmem:[#allocation2 + $0x38] sm:$0xff] %vm14092_vm0, %v10998_v0  ;;  %390 = vst.msk [vmem:[#allocation2 + $0x40] sm:$0xff] %vm14092_vm0, %v10998_v0  ;;  %v8344_v15 = vld [vmem:[%s11230_s22 + $0x38] sm:$0xff]  ;;  %v8345_v16 = vld [vmem:[%s11230_s22 + $0x40] sm:$0xff]  ;;  %s10925_s16 = scalar_lea.vmem %s10924_s14, 8192 }
  0x73   : > { %391 = vst.msk [vmem:[#allocation2 + $0x48] sm:$0xff] %vm14092_vm0, %v10998_v0  ;;  %392 = vst.msk [vmem:[#allocation2 + $0x50] sm:$0xff] %vm14092_vm0, %v10998_v0  ;;  %9246 = vmatpush3.bf16.msra.mxu0 %v10758_v2  ;;  %v8346_v17 = vld [vmem:[%s11230_s22 + $0x48] sm:$0xff]  ;;  %v10761_v18 = vld [vmem:[#allocation7] sm:$0xff]  }
  0x74   : > { %393 = vst.msk [vmem:[#allocation2 + $0x58] sm:$0xff] %vm14092_vm0, %v10998_v0  ;;  %394 = vst.msk [vmem:[#allocation2 + $0x60] sm:$0xff] %vm14092_vm0, %v10998_v0  ;;  %9247 = vmatprep.subr.bf16.mxu0 %v10759_v3  ;;  %v8347_v19 = vld [vmem:[%s11230_s22 + $0x50] sm:$0xff]  ;;  %v8348_v20 = vld [vmem:[%s11230_s22 + $0x58] sm:$0xff] }
  0x75   : > { %395 = vst.msk [vmem:[#allocation2 + $0x68] sm:$0xff] %vm14092_vm0, %v10998_v0  ;;  %396 = vst.msk [vmem:[#allocation2 + $0x70] sm:$0xff] %vm14092_vm0, %v10998_v0  ;;  %v8349_v21 = vld [vmem:[%s11230_s22 + $0x60] sm:$0xff]  ;;  %v8350_v22 = vld [vmem:[%s11230_s22 + $0x68] sm:$0xff] }
  0x76   : > { %397 = vst.msk [vmem:[#allocation2 + $0x78] sm:$0xff] %vm14092_vm0, %v10998_v0  ;;  %398 = vst.msk [vmem:[#allocation2 + $0x80] sm:$0xff] %vm14092_vm0, %v10998_v0  ;;  %v1257_v4 = vld [vmem:[#allocation2 + $0x1] sm:$0xff]  ;;  %v1258_v5 = vld [vmem:[#allocation2 + $0x9] sm:$0xff] }
  0x77   : > { %399 = vst.msk [vmem:[#allocation2 + $0x88] sm:$0xff] %vm14092_vm0, %v10998_v0  ;;  %400 = vst.msk [vmem:[#allocation2 + $0x90] sm:$0xff] %vm14092_vm0, %v10998_v0  ;;  %v1293_v7 = vpack.c.bf16 %v1258_v5, %v1257_v4  ;;  %9248 = vmatpush3.bf16.msra.mxu0 %v10759_v3  ;;  %v8351_v23 = vld [vmem:[%s11230_s22 + $0x70] sm:$0xff]  ;;  %v8352_v24 = vld [vmem:[%s11230_s22 + $0x78] sm:$0xff] }
  0x78   : > { %401 = vst.msk [vmem:[#allocation2 + $0x98] sm:$0xff] %vm14092_vm0, %v10998_v0  ;;  %402 = vst.msk [vmem:[#allocation2 + $0xa0] sm:$0xff] %vm14092_vm0, %v10998_v0  ;;  %9249 = vmatprep.subr.bf16.mxu0 %v10760_v9  ;;  %v8353_v27 = vld [vmem:[%s11230_s22 + $0x80] sm:$0xff]  ;;  %v8354_v31 = vld [vmem:[%s11230_s22 + $0x88] sm:$0xff] }
  0x79   : > { %403 = vst.msk [vmem:[#allocation2 + $0xa8] sm:$0xff] %vm14092_vm0, %v10998_v0  ;;  %404 = vst.msk [vmem:[#allocation2 + $0xb0] sm:$0xff] %vm14092_vm0, %v10998_v0  ;;  %9251 = vmatprep.mubr.msk.bf16.mxu0 %vm14092_vm0, %v1293_v7  ;;  %v10762_v33 = vld [vmem:[#allocation7 + $0x8] sm:$0xff]   ;;  %v8355_v34 = vld [vmem:[%s11230_s22 + $0x90] sm:$0xff] }
  0x7a   : > { %405 = vst.msk [vmem:[#allocation2 + $0xb8] sm:$0xff] %vm14092_vm0, %v10998_v0  ;;  %406 = vst.msk [vmem:[#allocation2 + $0xc0] sm:$0xff] %vm14092_vm0, %v10998_v0  ;;  %v8356_v35 = vld [vmem:[%s11230_s22 + $0x98] sm:$0xff]  ;;  %v10763_v36 = vld [vmem:[#allocation7 + $0x10] sm:$0xff]  }
  0x7b   : > { %407 = vst.msk [vmem:[#allocation2 + $0xc8] sm:$0xff] %vm14092_vm0, %v10998_v0  ;;  %408 = vst.msk [vmem:[#allocation2 + $0xd0] sm:$0xff] %vm14092_vm0, %v10998_v0  ;;  %9250 = vmatpush3.bf16.msra.mxu0 %v10760_v9  ;;  %v8357_v41 = vld [vmem:[%s11230_s22 + $0xa0] sm:$0xff]  ;;  %v8358_v42 = vld [vmem:[%s11230_s22 + $0xa8] sm:$0xff] }
  0x7c   : > { %409 = vst.msk [vmem:[#allocation2 + $0xd8] sm:$0xff] %vm14092_vm0, %v10998_v0  ;;  %410 = vst.msk [vmem:[#allocation2 + $0xe0] sm:$0xff] %vm14092_vm0, %v10998_v0  ;;  %9287 = vmatprep.subr.bf16.mxu0 %v10761_v18  ;;  %v8359_v43 = vld [vmem:[%s11230_s22 + $0xb0] sm:$0xff]  ;;  %v10764_v45 = vld [vmem:[#allocation7 + $0x18] sm:$0xff]  }
  0x7d   : > { %411 = vst.msk [vmem:[#allocation2 + $0xe8] sm:$0xff] %vm14092_vm0, %v10998_v0  ;;  %412 = vst.msk [vmem:[#allocation2 + $0xf0] sm:$0xff] %vm14092_vm0, %v10998_v0  ;;  %v8360_v47 = vld [vmem:[%s11230_s22 + $0xb8] sm:$0xff]  ;;  %v8361_v48 = vld [vmem:[%s11230_s22 + $0xc0] sm:$0xff] }
  0x7e   : > { %413 = vst.msk [vmem:[#allocation2 + $0xf8] sm:$0xff] %vm14092_vm0, %v10998_v0  ;;  %414 = vst.msk [vmem:[#allocation2 + $0x100] sm:$0xff] %vm14092_vm0, %v10998_v0  ;;  %v8362_v49 = vld [vmem:[%s11230_s22 + $0xc8] sm:$0xff]  ;;  %v8363_v50 = vld [vmem:[%s11230_s22 + $0xd0] sm:$0xff] }
  0x7f   : > { %415 = vst.msk [vmem:[#allocation2 + $0x108] sm:$0xff] %vm14092_vm0, %v10998_v0  ;;  %416 = vst.msk [vmem:[#allocation2 + $0x110] sm:$0xff] %vm14092_vm0, %v10998_v0  ;;  %v8364_v51 = vld [vmem:[%s11230_s22 + $0xd8] sm:$0xff]  ;;  %v8365_v52 = vld [vmem:[%s11230_s22 + $0xe0] sm:$0xff] }
  0x80   : > { %417 = vst.msk [vmem:[#allocation2 + $0x118] sm:$0xff] %vm14092_vm0, %v10998_v0  ;;  %418 = vst.msk [vmem:[#allocation2 + $0x120] sm:$0xff] %vm14092_vm0, %v10998_v0  ;;  %v8366_v53 = vld [vmem:[%s11230_s22 + $0xe8] sm:$0xff]  ;;  %v11469_v58 = vld [vmem:[#allocation7 + $0x40] sm:$0xff]  }
  0x81   : > { %419 = vst.msk [vmem:[#allocation2 + $0x128] sm:$0xff] %vm14092_vm0, %v10998_v0  ;;  %420 = vst.msk [vmem:[#allocation2 + $0x130] sm:$0xff] %vm14092_vm0, %v10998_v0 }
  0x82   : > { %421 = vst.msk [vmem:[#allocation2 + $0x138] sm:$0xff] %vm14092_vm0, %v10998_v0  ;;  %422 = vst.msk [vmem:[#allocation2 + $0x140] sm:$0xff] %vm14092_vm0, %v10998_v0 }
  0x83   : > { %425 = vst.msk [vmem:[#allocation3] sm:$0xff] %vm14092_vm0, %v10998_v0  ;;  %426 = vst.msk [vmem:[#allocation3 + $0x8] sm:$0xff] %vm14092_vm0, %v10998_v0 }
  0x84   : > { %427 = vst.msk [vmem:[#allocation3 + $0x10] sm:$0xff] %vm14092_vm0, %v10998_v0  ;;  %428 = vst.msk [vmem:[#allocation3 + $0x18] sm:$0xff] %vm14092_vm0, %v10998_v0 }
  0x85   : > { %429 = vst.msk [vmem:[#allocation3 + $0x20] sm:$0xff] %vm14092_vm0, %v10998_v0  ;;  %430 = vst.msk [vmem:[#allocation3 + $0x28] sm:$0xff] %vm14092_vm0, %v10998_v0 }
  0x86   : > { %431 = vst.msk [vmem:[#allocation3 + $0x30] sm:$0xff] %vm14092_vm0, %v10998_v0  ;;  %432 = vst.msk [vmem:[#allocation3 + $0x38] sm:$0xff] %vm14092_vm0, %v10998_v0 }
  0x87   : > { %433 = vst.msk [vmem:[#allocation3 + $0x40] sm:$0xff] %vm14092_vm0, %v10998_v0  ;;  %434 = vst.msk [vmem:[#allocation3 + $0x48] sm:$0xff] %vm14092_vm0, %v10998_v0 }
  0x88   : > { %435 = vst.msk [vmem:[#allocation3 + $0x50] sm:$0xff] %vm14092_vm0, %v10998_v0  ;;  %436 = vst.msk [vmem:[#allocation3 + $0x58] sm:$0xff] %vm14092_vm0, %v10998_v0 }
  0x89   : > { %437 = vst.msk [vmem:[#allocation3 + $0x60] sm:$0xff] %vm14092_vm0, %v10998_v0  ;;  %438 = vst.msk [vmem:[#allocation3 + $0x68] sm:$0xff] %vm14092_vm0, %v10998_v0 }
  0x8a   : > { %439 = vst.msk [vmem:[#allocation3 + $0x70] sm:$0xff] %vm14092_vm0, %v10998_v0  ;;  %440 = vst.msk [vmem:[#allocation3 + $0x78] sm:$0xff] %vm14092_vm0, %v10998_v0 }
  0x8b   : > { %441 = vst.msk [vmem:[#allocation3 + $0x80] sm:$0xff] %vm14092_vm0, %v10998_v0  ;;  %442 = vst.msk [vmem:[#allocation3 + $0x88] sm:$0xff] %vm14092_vm0, %v10998_v0 }
  0x8c   : > { %443 = vst.msk [vmem:[#allocation3 + $0x90] sm:$0xff] %vm14092_vm0, %v10998_v0  ;;  %444 = vst.msk [vmem:[#allocation3 + $0x98] sm:$0xff] %vm14092_vm0, %v10998_v0 }
  0x8d   : > { %445 = vst.msk [vmem:[#allocation3 + $0xa0] sm:$0xff] %vm14092_vm0, %v10998_v0  ;;  %446 = vst.msk [vmem:[#allocation3 + $0xa8] sm:$0xff] %vm14092_vm0, %v10998_v0 }
  0x8e   : > { %447 = vst.msk [vmem:[#allocation3 + $0xb0] sm:$0xff] %vm14092_vm0, %v10998_v0  ;;  %448 = vst.msk [vmem:[#allocation3 + $0xb8] sm:$0xff] %vm14092_vm0, %v10998_v0 }
  0x8f   : > { %449 = vst.msk [vmem:[#allocation3 + $0xc0] sm:$0xff] %vm14092_vm0, %v10998_v0  ;;  %450 = vst.msk [vmem:[#allocation3 + $0xc8] sm:$0xff] %vm14092_vm0, %v10998_v0 }
  0x90   : > { %451 = vst.msk [vmem:[#allocation3 + $0xd0] sm:$0xff] %vm14092_vm0, %v10998_v0  ;;  %452 = vst.msk [vmem:[#allocation3 + $0xd8] sm:$0xff] %vm14092_vm0, %v10998_v0 }
  0x91   : > { %453 = vst.msk [vmem:[#allocation3 + $0xe0] sm:$0xff] %vm14092_vm0, %v10998_v0  ;;  %454 = vst.msk [vmem:[#allocation3 + $0xe8] sm:$0xff] %vm14092_vm0, %v10998_v0 }
  0x92   : > { %455 = vst.msk [vmem:[#allocation3 + $0xf0] sm:$0xff] %vm14092_vm0, %v10998_v0  ;;  %456 = vst.msk [vmem:[#allocation3 + $0xf8] sm:$0xff] %vm14092_vm0, %v10998_v0 }
  0x93   : > { %457 = vst.msk [vmem:[#allocation3 + $0x100] sm:$0xff] %vm14092_vm0, %v10998_v0  ;;  %458 = vst.msk [vmem:[#allocation3 + $0x108] sm:$0xff] %vm14092_vm0, %v10998_v0 }
  0x94   : > { %459 = vst.msk [vmem:[#allocation3 + $0x110] sm:$0xff] %vm14092_vm0, %v10998_v0  ;;  %460 = vst.msk [vmem:[#allocation3 + $0x118] sm:$0xff] %vm14092_vm0, %v10998_v0 }
  0x95   : > { %461 = vst.msk [vmem:[#allocation3 + $0x120] sm:$0xff] %vm14092_vm0, %v10998_v0  ;;  %462 = vst.msk [vmem:[#allocation3 + $0x128] sm:$0xff] %vm14092_vm0, %v10998_v0 }
  0x96   : > { %463 = vst.msk [vmem:[#allocation3 + $0x130] sm:$0xff] %vm14092_vm0, %v10998_v0  ;;  %464 = vst.msk [vmem:[#allocation3 + $0x138] sm:$0xff] %vm14092_vm0, %v10998_v0 }
  0x97   : > { %465 = vst.msk [vmem:[#allocation3 + $0x140] sm:$0xff] %vm14092_vm0, %v10998_v0  ;;  %469 = vst.msk [vmem:[#allocation2 + $0x13] sm:$0xff] %vm14092_vm0, %v467_v6 }
  0x98   : > { %470 = vst.msk [vmem:[#allocation2 + $0x1b] sm:$0xff] %vm14092_vm0, %v468_v8  ;;  %474 = vst.msk [vmem:[#allocation2 + $0x25] sm:$0xff] %vm14092_vm0, %v8339_v10 }
  0x99   : > { %475 = vst.msk [vmem:[#allocation2 + $0x2d] sm:$0xff] %vm14092_vm0, %v8340_v11  ;;  %479 = vst.msk [vmem:[#allocation2 + $0x37] sm:$0xff] %vm14092_vm0, %v8341_v12 }
  0x9a   : > { %480 = vst.msk [vmem:[#allocation2 + $0x3f] sm:$0xff] %vm14092_vm0, %v8342_v13  ;;  %484 = vst.msk [vmem:[#allocation2 + $0x49] sm:$0xff] %vm14092_vm0, %v8343_v14 }
  0x9b   : > { %485 = vst.msk [vmem:[#allocation2 + $0x51] sm:$0xff] %vm14092_vm0, %v8344_v15  ;;  %489 = vst.msk [vmem:[#allocation2 + $0x5b] sm:$0xff] %vm14092_vm0, %v8345_v16 }
  0x9c   : > { %490 = vst.msk [vmem:[#allocation2 + $0x63] sm:$0xff] %vm14092_vm0, %v8346_v17  ;;  %494 = vst.msk [vmem:[#allocation2 + $0x6d] sm:$0xff] %vm14092_vm0, %v8347_v19 }
  0x9d   : > { %495 = vst.msk [vmem:[#allocation2 + $0x75] sm:$0xff] %vm14092_vm0, %v8348_v20  ;;  %499 = vst.msk [vmem:[#allocation2 + $0x7f] sm:$0xff] %vm14092_vm0, %v8349_v21 }
  0x9e   : > { %v1259_v25 = vld [vmem:[#allocation2 + $0x11] sm:$0xff]  ;;  %500 = vst.msk [vmem:[#allocation2 + $0x87] sm:$0xff] %vm14092_vm0, %v8350_v22  ;;  %504 = vst.msk [vmem:[#allocation2 + $0x91] sm:$0xff] %vm14092_vm0, %v8351_v23 }
  0x9f   : > { %505 = vst.msk [vmem:[#allocation2 + $0x99] sm:$0xff] %vm14092_vm0, %v8352_v24  ;;  %v1260_v26 = vld [vmem:[#allocation2 + $0x19] sm:$0xff]  ;;  %v1261_v29 = vld [vmem:[#allocation2 + $0x21] sm:$0xff]  ;;  %509 = vst.msk [vmem:[#allocation2 + $0xa3] sm:$0xff] %vm14092_vm0, %v8353_v27 }
  0xa0   : > { %v1294_v28 = vpack.c.bf16 %v1260_v26, %v1259_v25  ;;  %v1262_v30 = vld [vmem:[#allocation2 + $0x29] sm:$0xff]  ;;  %510 = vst.msk [vmem:[#allocation2 + $0xab] sm:$0xff] %vm14092_vm0, %v8354_v31  ;;  %514 = vst.msk [vmem:[#allocation2 + $0xb5] sm:$0xff] %vm14092_vm0, %v8355_v34  ;;  %v1263_v37 = vld [vmem:[#allocation2 + $0x31] sm:$0xff] }
  0xa1   : > { %v1295_v32 = vpack.c.bf16 %v1262_v30, %v1261_v29  ;;  %515 = vst.msk [vmem:[#allocation2 + $0xbd] sm:$0xff] %vm14092_vm0, %v8356_v35  ;;  %v1264_v38 = vld [vmem:[#allocation2 + $0x39] sm:$0xff]  ;;  %v1265_v39 = vld [vmem:[#allocation2 + $0x41] sm:$0xff]  ;;  %v1266_v40 = vld [vmem:[#allocation2 + $0x49] sm:$0xff] }
  0xa2   : > { %9252 = vmatmul.mubr.msk.bf16.vlgmr.msra.gmra.mrb[0].mxu0 %vm14092_vm0, %v1294_v28  ;;  %519 = vst.msk [vmem:[#allocation2 + $0xc7] sm:$0xff] %vm14092_vm0, %v8357_v41  ;;  %520 = vst.msk [vmem:[#allocation2 + $0xcf] sm:$0xff] %vm14092_vm0, %v8358_v42  ;;  %v1296_v44 = vpack.c.bf16 %v1264_v38, %v1263_v37  ;;  %v1297_v46 = vpack.c.bf16 %v1266_v40, %v1265_v39  ;;  %v1267_v54 = vld [vmem:[#allocation2 + $0x51] sm:$0xff]  ;;  %v1268_v55 = vld [vmem:[#allocation2 + $0x59] sm:$0xff] }
  0xa3   : > { %9288 = vmatpush3.bf16.msra.mxu0 %v10761_v18  ;;  %9255 = vmatprep.mubr.msk.bf16.mxu0 %vm14092_vm0, %v1295_v32  ;;  %524 = vst.msk [vmem:[#allocation2 + $0xd9] sm:$0xff] %vm14092_vm0, %v8359_v43  ;;  %525 = vst.msk [vmem:[#allocation2 + $0xe1] sm:$0xff] %vm14092_vm0, %v8360_v47  ;;  %v1269_v56 = vld [vmem:[#allocation2 + $0x61] sm:$0xff]  ;;  %v1270_v57 = vld [vmem:[#allocation2 + $0x69] sm:$0xff]  ;;  %v1298_v59 = vpack.c.bf16 %v1268_v55, %v1267_v54 }
  0xa4   : > { %9289 = vmatprep.subr.bf16.mxu0 %v10762_v33  ;;  %529 = vst.msk [vmem:[#allocation2 + $0xeb] sm:$0xff] %vm14092_vm0, %v8361_v48  ;;  %530 = vst.msk [vmem:[#allocation2 + $0xf3] sm:$0xff] %vm14092_vm0, %v8362_v49  ;;  %v1299_v60 = vpack.c.bf16 %v1270_v57, %v1269_v56  ;;  %v1271_v61 = vld [vmem:[#allocation2 + $0x71] sm:$0xff]  ;;  %v1272_v62 = vld [vmem:[#allocation2 + $0x79] sm:$0xff] }
  0xa5   : > { %534 = vst.msk [vmem:[#allocation2 + $0xfd] sm:$0xff] %vm14092_vm0, %v8363_v50  ;;  %535 = vst.msk [vmem:[#allocation2 + $0x105] sm:$0xff] %vm14092_vm0, %v8364_v51  ;;  %v1273_v63 = vld [vmem:[#allocation2 + $0x81] sm:$0xff]  ;;  %v1274_v0 = vld [vmem:[#allocation2 + $0x89] sm:$0xff]  ;;  %v1300_v1 = vpack.c.bf16 %v1272_v62, %v1271_v61 }
  0xa6   : > { %539 = vst.msk [vmem:[#allocation2 + $0x10f] sm:$0xff] %vm14092_vm0, %v8365_v52  ;;  %540 = vst.msk [vmem:[#allocation2 + $0x117] sm:$0xff] %vm14092_vm0, %v8366_v53  ;;  %v1301_v2 = vpack.c.bf16 %v1274_v0, %v1273_v63  ;;  %v1275_v3 = vld [vmem:[#allocation2 + $0x91] sm:$0xff]  ;;  %v1276_v4 = vld [vmem:[#allocation2 + $0x99] sm:$0xff] }
  0xa7   : > { %9290 = vmatpush3.bf16.msra.mxu0 %v10762_v33  ;;  %v1277_v5 = vld [vmem:[#allocation2 + $0xa1] sm:$0xff]  ;;  %v1278_v6 = vld [vmem:[#allocation2 + $0xa9] sm:$0xff]  ;;  %v1302_v7 = vpack.c.bf16 %v1276_v4, %v1275_v3  ;;  %v1279_v9 = vld [vmem:[#allocation2 + $0xb1] sm:$0xff] }
  0xa8   : > { %9291 = vmatprep.subr.bf16.mxu0 %v10763_v36  ;;  %v1303_v8 = vpack.c.bf16 %v1278_v6, %v1277_v5  ;;  %v1280_v10 = vld [vmem:[#allocation2 + $0xb9] sm:$0xff]  ;;  %v1196_v28 = vld [vmem:[#allocation2 + $0x8] sm:$0xff]  ;;  %v1197_v33 = vld [vmem:[#allocation2 + $0x10] sm:$0xff] }
  0xa9   : > { %v1281_v11 = vld [vmem:[#allocation2 + $0xc1] sm:$0xff]  ;;  %v1282_v12 = vld [vmem:[#allocation2 + $0xc9] sm:$0xff]  ;;  %v1304_v13 = vpack.c.bf16 %v1280_v10, %v1279_v9  ;;  %v1283_v15 = vld [vmem:[#allocation2 + $0xd1] sm:$0xff] }
  0xaa   : > { %9256 = vmatmul.mubr.msk.bf16.gmra.mrb[4].mxu0 %vm14092_vm0, %v1296_v44  ;;  %v1305_v14 = vpack.c.bf16 %v1282_v12, %v1281_v11  ;;  %v1284_v16 = vld [vmem:[#allocation2 + $0xd9] sm:$0xff]  ;;  %v1285_v17 = vld [vmem:[#allocation2 + $0xe1] sm:$0xff]  ;;  %v8367_v40 = vld [vmem:[%s11230_s22 + $0xf0] sm:$0xff] }
  0xab   : > { %9259 = vmatprep.mubr.msk.bf16.mxu0 %vm14092_vm0, %v1297_v46  ;;  %9292 = vmatpush3.bf16.msra.mxu0 %v10763_v36  ;;  %v1286_v18 = vld [vmem:[#allocation2 + $0xe9] sm:$0xff]  ;;  %v1306_v19 = vpack.c.bf16 %v1284_v16, %v1283_v15  ;;  %v1287_v21 = vld [vmem:[#allocation2 + $0xf1] sm:$0xff]  ;;  %v1195_v27 = vld [vmem:[#allocation2] sm:$0xff]  ;;  %544 = vst.msk [vmem:[#allocation2 + $0x121] sm:$0xff] %vm14092_vm0, %v8367_v40 }
  0xac   : > { %9293 = vmatprep.subr.bf16.mxu0 %v10764_v45  ;;  %v1307_v20 = vpack.c.bf16 %v1286_v18, %v1285_v17  ;;  %v1288_v22 = vld [vmem:[#allocation2 + $0xf9] sm:$0xff]  ;;  %v1289_v23 = vld [vmem:[#allocation2 + $0x101] sm:$0xff]  ;;  %v1231_v32 = vpack.c.bf16 %v1196_v28, %v1195_v27  ;;  %v1201_v41 = vld [vmem:[#allocation2 + $0x30] sm:$0xff] }
  0xad   : > { %v1290_v24 = vld [vmem:[#allocation2 + $0x109] sm:$0xff]  ;;  %v1308_v25 = vpack.c.bf16 %v1288_v22, %v1287_v21  ;;  %v1291_v29 = vld [vmem:[#allocation2 + $0x111] sm:$0xff]  ;;  %v1292_v30 = vld [vmem:[#allocation2 + $0x119] sm:$0xff] }
  0xae   : > { %v1309_v26 = vpack.c.bf16 %v1290_v24, %v1289_v23  ;;  %v1310_v31 = vpack.c.bf16 %v1292_v30, %v1291_v29  ;;  %v1198_v34 = vld [vmem:[#allocation2 + $0x18] sm:$0xff]  ;;  %v1199_v35 = vld [vmem:[#allocation2 + $0x20] sm:$0xff]  ;;  %v1200_v36 = vld [vmem:[#allocation2 + $0x28] sm:$0xff] }
  0xaf   : > { %9294 = vmatpush3.bf16.msra.mxu0 %v10764_v45  ;;  %v1232_v37 = vpack.c.bf16 %v1198_v34, %v1197_v33  ;;  %v10766_v38 = vld [vmem:[#allocation7 + $0x48] sm:$0xff]   ;;  %v1233_v39 = vpack.c.bf16 %v1200_v36, %v1199_v35  ;;  %v1202_v42 = vld [vmem:[#allocation2 + $0x38] sm:$0xff]  ;;  %v1203_v43 = vld [vmem:[#allocation2 + $0x40] sm:$0xff] }
  0xb0   : > { %9331 = vmatprep.subr.bf16.mxu0 %v11469_v58  ;;  %v1204_v44 = vld [vmem:[#allocation2 + $0x48] sm:$0xff]  ;;  %v10767_v45 = vld [vmem:[#allocation7 + $0x50] sm:$0xff]   ;;  %v1234_v46 = vpack.c.bf16 %v1202_v42, %v1201_v41  ;;  %v10768_v48 = vld [vmem:[#allocation7 + $0x58] sm:$0xff]  }
  0xb1   : > { %v1235_v47 = vpack.c.bf16 %v1204_v44, %v1203_v43  ;;  %v1205_v49 = vld [vmem:[#allocation2 + $0x50] sm:$0xff]  ;;  %v1206_v50 = vld [vmem:[#allocation2 + $0x58] sm:$0xff]  ;;  %v1207_v51 = vld [vmem:[#allocation2 + $0x60] sm:$0xff] }
  0xb2   : > { %9260 = vmatmul.mubr.msk.bf16.gmra.mrb[8].mxu0 %vm14092_vm0, %v1298_v59  ;;  %v1208_v52 = vld [vmem:[#allocation2 + $0x68] sm:$0xff]  ;;  %v11493_v53 = vld [vmem:[#allocation7 + $0x60] sm:$0xff]   ;;  %v1236_v54 = vpack.c.bf16 %v1206_v50, %v1205_v49  ;;  %v1209_v56 = vld [vmem:[#allocation2 + $0x70] sm:$0xff] }
  0xb3   : > { %9263 = vmatprep.mubr.msk.bf16.mxu0 %vm14092_vm0, %v1299_v60  ;;  %v1237_v55 = vpack.c.bf16 %v1208_v52, %v1207_v51  ;;  %v1210_v57 = vld [vmem:[#allocation2 + $0x78] sm:$0xff]  ;;  %v1212_v59 = vld [vmem:[#allocation2 + $0x88] sm:$0xff]  ;;  %v1213_v62 = vld [vmem:[#allocation2 + $0x90] sm:$0xff] }
  0xb4   : > { %v1238_v60 = vpack.c.bf16 %v1210_v57, %v1209_v56  ;;  %v1214_v63 = vld [vmem:[#allocation2 + $0x98] sm:$0xff]  ;;  %v1215_v0 = vld [vmem:[#allocation2 + $0xa0] sm:$0xff]  ;;  %v1217_v4 = vld [vmem:[#allocation2 + $0xb0] sm:$0xff] }
  0xb5   : > { %v1218_v5 = vld [vmem:[#allocation2 + $0xb8] sm:$0xff]  ;;  %v1219_v6 = vld [vmem:[#allocation2 + $0xc0] sm:$0xff]  ;;  %v1221_v10 = vld [vmem:[#allocation2 + $0xd0] sm:$0xff] }
  0xb6   : > { %v1222_v11 = vld [vmem:[#allocation2 + $0xd8] sm:$0xff]  ;;  %v1223_v12 = vld [vmem:[#allocation2 + $0xe0] sm:$0xff]  ;;  %v1225_v16 = vld [vmem:[#allocation2 + $0xf0] sm:$0xff] }
  0xb7   : > { %v1226_v17 = vld [vmem:[#allocation2 + $0xf8] sm:$0xff]  ;;  %v1227_v18 = vld [vmem:[#allocation2 + $0x100] sm:$0xff]  ;;  %v1229_v22 = vld [vmem:[#allocation2 + $0x110] sm:$0xff] }
  0xb8   : > { %v1230_v23 = vld [vmem:[#allocation2 + $0x118] sm:$0xff]  ;;  %v1830_v24 = vld [vmem:[#allocation2 + $0x2] sm:$0xff]  ;;  %v10771_v40 = vld [vmem:[#allocation7 + $0x70] sm:$0xff]  }
  0xb9   : > { %v1832_v28 = vld [vmem:[#allocation2 + $0x12] sm:$0xff]  ;;  %v1833_v29 = vld [vmem:[#allocation2 + $0x1a] sm:$0xff]  ;;  %v1834_v30 = vld [vmem:[#allocation2 + $0x22] sm:$0xff] }
  0xba   : > { %9264 = vmatmul.mubr.msk.bf16.gmra.mrb[12].mxu0 %vm14092_vm0, %v1300_v1  ;;  %v1216_v1 = vld [vmem:[#allocation2 + $0xa8] sm:$0xff]  ;;  %v8368_v34 = vld [vmem:[%s11230_s22 + $0xf8] sm:$0xff] }
  0xbb   : > { %9267 = vmatprep.mubr.msk.bf16.mxu0 %vm14092_vm0, %v1301_v2  ;;  %v1240_v2 = vpack.c.bf16 %v1214_v63, %v1213_v62  ;;  %v1241_v3 = vpack.c.bf16 %v1216_v1, %v1215_v0  ;;  %v10770_v35 = vld [vmem:[#allocation7 + $0x68] sm:$0xff]   ;;  %545 = vst.msk [vmem:[#allocation2 + $0x129] sm:$0xff] %vm14092_vm0, %v8368_v34  ;;  %v1836_v36 = vld [vmem:[#allocation2 + $0x32] sm:$0xff]  ;;  %v1845_v52 = vld [vmem:[#allocation2 + $0x7a] sm:$0xff] }
  0xbc   : > { %v10772_v43 = vld [vmem:[#allocation7 + $0x78] sm:$0xff]   ;;  %v1854_v1 = vld [vmem:[#allocation2 + $0xc2] sm:$0xff] }
  0xbd   : > { %v1840_v44 = vld [vmem:[#allocation2 + $0x52] sm:$0xff]  ;;  %v1853_v0 = vld [vmem:[#allocation2 + $0xba] sm:$0xff] }
  0xbe   : > { %v1844_v51 = vld [vmem:[#allocation2 + $0x72] sm:$0xff] }
  0xbf   : > { %v1848_v57 = vld [vmem:[#allocation2 + $0x92] sm:$0xff] }
  0xc0   : > { %v1852_v63 = vld [vmem:[#allocation2 + $0xb2] sm:$0xff] }
  0xc2   : > { %9268 = vmatmul.mubr.msk.bf16.gmra.mrb[16].mxu0 %vm14092_vm0, %v1302_v7  ;;  %v1220_v7 = vld [vmem:[#allocation2 + $0xc8] sm:$0xff] }
  0xc3   : > { %9271 = vmatprep.mubr.msk.bf16.mxu0 %vm14092_vm0, %v1303_v8  ;;  %v1242_v8 = vpack.c.bf16 %v1218_v5, %v1217_v4  ;;  %v1243_v9 = vpack.c.bf16 %v1220_v7, %v1219_v6  ;;  %v1856_v5 = vld [vmem:[#allocation2 + $0xd2] sm:$0xff]  ;;  %v1857_v6 = vld [vmem:[#allocation2 + $0xda] sm:$0xff]  ;;  %v1858_v7 = vld [vmem:[#allocation2 + $0xe2] sm:$0xff] }
  0xca   : > { %9272 = vmatmul.mubr.msk.bf16.gmra.mrb[20].mxu0 %vm14092_vm0, %v1304_v13  ;;  %v1224_v13 = vld [vmem:[#allocation2 + $0xe8] sm:$0xff] }
  0xcb   : > { %9275 = vmatprep.mubr.msk.bf16.mxu0 %vm14092_vm0, %v1305_v14  ;;  %v1244_v14 = vpack.c.bf16 %v1222_v11, %v1221_v10  ;;  %v1245_v15 = vpack.c.bf16 %v1224_v13, %v1223_v12  ;;  %v1860_v11 = vld [vmem:[#allocation2 + $0xf2] sm:$0xff]  ;;  %v1861_v12 = vld [vmem:[#allocation2 + $0xfa] sm:$0xff]  ;;  %v1862_v13 = vld [vmem:[#allocation2 + $0x102] sm:$0xff] }
  0xd2   : > { %9276 = vmatmul.mubr.msk.bf16.gmra.mrb[24].mxu0 %vm14092_vm0, %v1306_v19  ;;  %v1228_v19 = vld [vmem:[#allocation2 + $0x108] sm:$0xff] }
  0xd3   : > { %9279 = vmatprep.mubr.msk.bf16.mxu0 %vm14092_vm0, %v1307_v20  ;;  %v1246_v20 = vpack.c.bf16 %v1226_v17, %v1225_v16  ;;  %v1247_v21 = vpack.c.bf16 %v1228_v19, %v1227_v18  ;;  %v1864_v17 = vld [vmem:[#allocation2 + $0x112] sm:$0xff]  ;;  %v1865_v18 = vld [vmem:[#allocation2 + $0x11a] sm:$0xff] }
  0xd4   : > { %v1883_v19 = vpack.c.bf16 %v1865_v18, %v1864_v17  ;;  %v2572_v18 = vld [vmem:[#allocation2 + $0x123] sm:$0xff] }
  0xda   : > { %9280 = vmatmul.mubr.msk.bf16.gmra.mrb[28].mxu0 %vm14092_vm0, %v1308_v25  ;;  %v1831_v25 = vld [vmem:[#allocation2 + $0xa] sm:$0xff] }
  0xdb   : > { %9283 = vmatprep.mubr.msk.bf16.mxu0 %vm14092_vm0, %v1309_v26  ;;  %v1248_v26 = vpack.c.bf16 %v1230_v23, %v1229_v22  ;;  %v1866_v27 = vpack.c.bf16 %v1831_v25, %v1830_v24  ;;  %v10776_v22 = vld [vmem:[#allocation7 + $0x98] sm:$0xff]   ;;  %v10777_v23 = vld [vmem:[#allocation7 + $0xa0] sm:$0xff]   ;;  %v2219_v25 = vld [vmem:[#allocation2 + $0x12a] sm:$0xff] }
  0xdc   : > { %v2218_v24 = vld [vmem:[#allocation2 + $0x122] sm:$0xff] }
  0xe2   : > { %9284 = vmatmul.mubr.msk.bf16.gmra.mrb[32].mxu0 %vm14092_vm0, %v1310_v31  ;;  %v1835_v31 = vld [vmem:[#allocation2 + $0x2a] sm:$0xff] }
  0xe3   : > { %9295 = vmatprep.mubr.msk.bf16.mxu0 %vm14092_vm0, %v1231_v32  ;;  %v11510_v32 = vpack.c.bf16 %v1833_v29, %v1832_v28  ;;  %v11512_v33 = vpack.c.bf16 %v1835_v31, %v1834_v30  ;;  %v2237_v28 = vpack.c.bf16 %v2219_v25, %v2218_v24  ;;  %v2540_v30 = vld [vmem:[#allocation2 + $0x23] sm:$0xff]  ;;  %v2541_v31 = vld [vmem:[#allocation2 + $0x2b] sm:$0xff] }
  0xe4   : > { %v2575_v34 = vpack.c.bf16 %v2541_v31, %v2540_v30  ;;  %v2894_v24 = vld [vmem:[#allocation2 + $0x24] sm:$0xff]  ;;  %v2895_v25 = vld [vmem:[#allocation2 + $0x2c] sm:$0xff] }
  0xe5   : > { %v10782_v30 = vld [vmem:[#allocation7 + $0xc8] sm:$0xff]  }
  0xe6   : > { %v2898_v31 = vld [vmem:[#allocation2 + $0x44] sm:$0xff] }
  0xea   : > { %9296 = vmatmul.mubr.msk.bf16.vlgmr.msra.gmra.mrb[0].mxu0 %vm14092_vm0, %v1232_v37  ;;  %v1837_v37 = vld [vmem:[#allocation2 + $0x3a] sm:$0xff] }
  0xeb   : > { %9332 = vmatpush3.bf16.msra.mxu0 %v11469_v58  ;;  %9299 = vmatprep.mubr.msk.bf16.mxu0 %vm14092_vm0, %v1233_v39  ;;  %v1211_v58 = vld [vmem:[#allocation2 + $0x80] sm:$0xff]  ;;  %v1839_v39 = vld [vmem:[#allocation2 + $0x4a] sm:$0xff]  ;;  %v11521_v41 = vpack.c.bf16 %v1837_v37, %v1836_v36 }
  0xec   : > { %9333 = vmatprep.subr.bf16.mxu0 %v10766_v38  ;;  %v1239_v61 = vpack.c.bf16 %v1212_v59, %v1211_v58  ;;  %v1849_v58 = vld [vmem:[#allocation2 + $0x9a] sm:$0xff]  ;;  %v1850_v59 = vld [vmem:[#allocation2 + $0xa2] sm:$0xff] }
  0xed   : > { %v10778_v36 = vld [vmem:[#allocation7 + $0xa8] sm:$0xff]  }
  0xee   : > { %v2544_v37 = vld [vmem:[#allocation2 + $0x43] sm:$0xff] }
  0xef   : > { %9334 = vmatpush3.bf16.msra.mxu0 %v10766_v38  ;;  %v1838_v38 = vld [vmem:[#allocation2 + $0x42] sm:$0xff] }
  0xf0   : > { %9335 = vmatprep.subr.bf16.mxu0 %v10767_v45  ;;  %v11523_v42 = vpack.c.bf16 %v1839_v39, %v1838_v38  ;;  %v2545_v38 = vld [vmem:[#allocation2 + $0x4b] sm:$0xff]  ;;  %v2546_v39 = vld [vmem:[#allocation2 + $0x53] sm:$0xff] }
  0xf2   : > { %9300 = vmatmul.mubr.msk.bf16.gmra.mrb[4].mxu0 %vm14092_vm0, %v1234_v46  ;;  %v1842_v46 = vld [vmem:[#allocation2 + $0x62] sm:$0xff] }
  0xf3   : > { %9303 = vmatprep.mubr.msk.bf16.mxu0 %vm14092_vm0, %v1235_v47  ;;  %9336 = vmatpush3.bf16.msra.mxu0 %v10767_v45  ;;  %v1841_v45 = vld [vmem:[#allocation2 + $0x5a] sm:$0xff]  ;;  %v1843_v47 = vld [vmem:[#allocation2 + $0x6a] sm:$0xff] }
  0xf4   : > { %9337 = vmatprep.subr.bf16.mxu0 %v10768_v48  ;;  %v1871_v49 = vpack.c.bf16 %v1841_v45, %v1840_v44  ;;  %v11529_v50 = vpack.c.bf16 %v1843_v47, %v1842_v46  ;;  %v10780_v44 = vld [vmem:[#allocation7 + $0xb8] sm:$0xff]   ;;  %v2548_v45 = vld [vmem:[#allocation2 + $0x63] sm:$0xff]  ;;  %v2549_v46 = vld [vmem:[#allocation2 + $0x6b] sm:$0xff] }
  0xf5   : > { %v2550_v47 = vld [vmem:[#allocation2 + $0x73] sm:$0xff] }
  0xf7   : > { %9338 = vmatpush3.bf16.msra.mxu0 %v10768_v48  ;;  %v10773_v48 = vld [vmem:[#allocation7 + $0x80] sm:$0xff]  }
  0xf8   : > { %9375 = vmatprep.subr.bf16.mxu0 %v11493_v53 }
  0xfa   : > { %9304 = vmatmul.mubr.msk.bf16.gmra.mrb[8].mxu0 %vm14092_vm0, %v1236_v54  ;;  %v1847_v54 = vld [vmem:[#allocation2 + $0x8a] sm:$0xff] }
  0xfb   : > { %9307 = vmatprep.mubr.msk.bf16.mxu0 %vm14092_vm0, %v1237_v55  ;;  %v1873_v55 = vpack.c.bf16 %v1845_v52, %v1844_v51  ;;  %v2552_v52 = vld [vmem:[#allocation2 + $0x83] sm:$0xff] }
 0x102   : > { %9308 = vmatmul.mubr.msk.bf16.gmra.mrb[12].mxu0 %vm14092_vm0, %v1238_v60  ;;  %v1851_v60 = vld [vmem:[#allocation2 + $0xaa] sm:$0xff] }
 0x103   : > { %9311 = vmatprep.mubr.msk.bf16.mxu0 %vm14092_vm0, %v1239_v61  ;;  %v1875_v61 = vpack.c.bf16 %v1849_v58, %v1848_v57  ;;  %v1876_v62 = vpack.c.bf16 %v1851_v60, %v1850_v59  ;;  %v2556_v58 = vld [vmem:[#allocation2 + $0xa3] sm:$0xff]  ;;  %v2557_v59 = vld [vmem:[#allocation2 + $0xab] sm:$0xff]  ;;  %v2558_v60 = vld [vmem:[#allocation2 + $0xb3] sm:$0xff] }
 0x10a   : > { %9312 = vmatmul.mubr.msk.bf16.gmra.mrb[16].mxu0 %vm14092_vm0, %v1240_v2  ;;  %v1855_v2 = vld [vmem:[#allocation2 + $0xca] sm:$0xff] }
 0x10b   : > { %9315 = vmatprep.mubr.msk.bf16.mxu0 %vm14092_vm0, %v1241_v3  ;;  %v1877_v3 = vpack.c.bf16 %v1853_v0, %v1852_v63  ;;  %v1878_v4 = vpack.c.bf16 %v1855_v2, %v1854_v1  ;;  %v2560_v0 = vld [vmem:[#allocation2 + $0xc3] sm:$0xff]  ;;  %v2561_v1 = vld [vmem:[#allocation2 + $0xcb] sm:$0xff]  ;;  %v2562_v2 = vld [vmem:[#allocation2 + $0xd3] sm:$0xff] }
 0x112   : > { %9316 = vmatmul.mubr.msk.bf16.gmra.mrb[20].mxu0 %vm14092_vm0, %v1242_v8  ;;  %v1859_v8 = vld [vmem:[#allocation2 + $0xea] sm:$0xff] }
 0x113   : > { %9319 = vmatprep.mubr.msk.bf16.mxu0 %vm14092_vm0, %v1243_v9  ;;  %v1879_v9 = vpack.c.bf16 %v1857_v6, %v1856_v5  ;;  %v1880_v10 = vpack.c.bf16 %v1859_v8, %v1858_v7  ;;  %v2564_v6 = vld [vmem:[#allocation2 + $0xe3] sm:$0xff]  ;;  %v2565_v7 = vld [vmem:[#allocation2 + $0xeb] sm:$0xff]  ;;  %v2566_v8 = vld [vmem:[#allocation2 + $0xf3] sm:$0xff] }
 0x11a   : > { %9320 = vmatmul.mubr.msk.bf16.gmra.mrb[24].mxu0 %vm14092_vm0, %v1244_v14  ;;  %v1863_v14 = vld [vmem:[#allocation2 + $0x10a] sm:$0xff] }
 0x11b   : > { %9323 = vmatprep.mubr.msk.bf16.mxu0 %vm14092_vm0, %v1245_v15  ;;  %v1881_v15 = vpack.c.bf16 %v1861_v12, %v1860_v11  ;;  %v1882_v16 = vpack.c.bf16 %v1863_v14, %v1862_v13  ;;  %v2568_v12 = vld [vmem:[#allocation2 + $0x103] sm:$0xff]  ;;  %v2569_v13 = vld [vmem:[#allocation2 + $0x10b] sm:$0xff]  ;;  %v2570_v14 = vld [vmem:[#allocation2 + $0x113] sm:$0xff] }
 0x122   : > { %9324 = vmatmul.mubr.msk.bf16.gmra.mrb[28].mxu0 %vm14092_vm0, %v1246_v20  ;;  %v10774_v20 = vld [vmem:[#allocation7 + $0x88] sm:$0xff]  }
 0x123   : > { %9327 = vmatprep.mubr.msk.bf16.mxu0 %vm14092_vm0, %v1247_v21  ;;  %v10775_v21 = vld [vmem:[#allocation7 + $0x90] sm:$0xff]  }
 0x12a   : > { %9328 = vmatmul.mubr.msk.bf16.gmra.mrb[32].mxu0 %vm14092_vm0, %v1248_v26  ;;  %v2538_v26 = vld [vmem:[#allocation2 + $0x13] sm:$0xff] }
 0x12b   : > { %9339 = vmatprep.mubr.msk.bf16.mxu0 %vm14092_vm0, %v1866_v27  ;;  %v2539_v27 = vld [vmem:[#allocation2 + $0x1b] sm:$0xff] }
 0x12c   : > { %v2574_v29 = vpack.c.bf16 %v2539_v27, %v2538_v26  ;;  %v2896_v26 = vld [vmem:[#allocation2 + $0x34] sm:$0xff]  ;;  %v2897_v27 = vld [vmem:[#allocation2 + $0x3c] sm:$0xff] }
 0x132   : > { %9340 = vmatmul.mubr.msk.bf16.vlgmr.msra.gmra.mrb[0].mxu0 %vm14092_vm0, %v11510_v32 }
 0x133   : > { %9376 = vmatpush3.bf16.msra.mxu0 %v11493_v53  ;;  %9343 = vmatprep.mubr.msk.bf16.mxu0 %vm14092_vm0, %v11512_v33  ;;  %v1846_v53 = vld [vmem:[#allocation2 + $0x82] sm:$0xff] }
 0x134   : > { %9377 = vmatprep.subr.bf16.mxu0 %v10770_v35  ;;  %v1874_v56 = vpack.c.bf16 %v1847_v54, %v1846_v53  ;;  %v2553_v53 = vld [vmem:[#allocation2 + $0x8b] sm:$0xff]  ;;  %v2554_v54 = vld [vmem:[#allocation2 + $0x93] sm:$0xff] }
 0x137   : > { %9378 = vmatpush3.bf16.msra.mxu0 %v10770_v35 }
 0x138   : > { %9379 = vmatprep.subr.bf16.mxu0 %v10771_v40 }
 0x13a   : > { %9344 = vmatmul.mubr.msk.bf16.gmra.mrb[4].mxu0 %vm14092_vm0, %v11521_v41 }
 0x13b   : > { %9347 = vmatprep.mubr.msk.bf16.mxu0 %vm14092_vm0, %v11523_v42  ;;  %9380 = vmatpush3.bf16.msra.mxu0 %v10771_v40  ;;  %v2547_v40 = vld [vmem:[#allocation2 + $0x5b] sm:$0xff] }
 0x13c   : > { %9381 = vmatprep.subr.bf16.mxu0 %v10772_v43 }
 0x13f   : > { %9382 = vmatpush3.bf16.msra.mxu0 %v10772_v43  ;;  %v2578_v43 = vpack.c.bf16 %v2547_v40, %v2546_v39  ;;  %v2902_v39 = vld [vmem:[#allocation2 + $0x64] sm:$0xff]  ;;  %v2903_v40 = vld [vmem:[#allocation2 + $0x6c] sm:$0xff] }
 0x140   : > { %9419 = vmatprep.subr.bf16.mxu0 %v10773_v48 }
 0x142   : > { %9348 = vmatmul.mubr.msk.bf16.gmra.mrb[8].mxu0 %vm14092_vm0, %v1871_v49 }
 0x143   : > { %9351 = vmatprep.mubr.msk.bf16.mxu0 %vm14092_vm0, %v11529_v50 }
 0x14a   : > { %9352 = vmatmul.mubr.msk.bf16.gmra.mrb[12].mxu0 %vm14092_vm0, %v1873_v55 }
 0x14b   : > { %9355 = vmatprep.mubr.msk.bf16.mxu0 %vm14092_vm0, %v1874_v56 }
 0x152   : > { %9356 = vmatmul.mubr.msk.bf16.gmra.mrb[16].mxu0 %vm14092_vm0, %v1875_v61 }
 0x153   : > { %9359 = vmatprep.mubr.msk.bf16.mxu0 %vm14092_vm0, %v1876_v62 }
 0x15a   : > { %9360 = vmatmul.mubr.msk.bf16.gmra.mrb[20].mxu0 %vm14092_vm0, %v1877_v3 }
 0x15b   : > { %9363 = vmatprep.mubr.msk.bf16.mxu0 %vm14092_vm0, %v1878_v4 }
 0x162   : > { %9364 = vmatmul.mubr.msk.bf16.gmra.mrb[24].mxu0 %vm14092_vm0, %v1879_v9 }
 0x163   : > { %9367 = vmatprep.mubr.msk.bf16.mxu0 %vm14092_vm0, %v1880_v10 }
 0x16a   : > { %9368 = vmatmul.mubr.msk.bf16.gmra.mrb[28].mxu0 %vm14092_vm0, %v1881_v15 }
 0x16b   : > { %9371 = vmatprep.mubr.msk.bf16.mxu0 %vm14092_vm0, %v1882_v16 }
 0x172   : > { %9372 = vmatmul.mubr.msk.bf16.gmra.mrb[32].mxu0 %vm14092_vm0, %v1883_v19 }
 0x173   : > { %9383 = vmatprep.mubr.msk.bf16.mxu0 %vm14092_vm0, %v11510_v32  ;;  %v2542_v32 = vld [vmem:[#allocation2 + $0x33] sm:$0xff] }
 0x17a   : > { %9384 = vmatmul.mubr.msk.bf16.vlgmr.msra.gmra.mrb[0].mxu0 %vm14092_vm0, %v11512_v33  ;;  %v2543_v33 = vld [vmem:[#allocation2 + $0x3b] sm:$0xff] }
 0x17b   : > { %9420 = vmatpush3.bf16.msra.mxu0 %v10773_v48  ;;  %9387 = vmatprep.mubr.msk.bf16.mxu0 %vm14092_vm0, %v11521_v41  ;;  %v2576_v35 = vpack.c.bf16 %v2543_v33, %v2542_v32  ;;  %v10779_v41 = vld [vmem:[#allocation7 + $0xb0] sm:$0xff]   ;;  %v2551_v48 = vld [vmem:[#allocation2 + $0x7b] sm:$0xff] }
 0x17c   : > { %9421 = vmatprep.subr.bf16.mxu0 %v10774_v20  ;;  %v2580_v51 = vpack.c.bf16 %v2551_v48, %v2550_v47  ;;  %v2899_v32 = vld [vmem:[#allocation2 + $0x4c] sm:$0xff]  ;;  %v2900_v33 = vld [vmem:[#allocation2 + $0x54] sm:$0xff] }
 0x17d   : > { %v2907_v47 = vld [vmem:[#allocation2 + $0x8c] sm:$0xff]  ;;  %v2908_v48 = vld [vmem:[#allocation2 + $0x94] sm:$0xff] }
 0x17f   : > { %9422 = vmatpush3.bf16.msra.mxu0 %v10774_v20  ;;  %v2892_v20 = vld [vmem:[#allocation2 + $0x14] sm:$0xff] }
 0x180   : > { %9423 = vmatprep.subr.bf16.mxu0 %v10775_v21 }
 0x182   : > { %9388 = vmatmul.mubr.msk.bf16.gmra.mrb[4].mxu0 %vm14092_vm0, %v11523_v42  ;;  %v2577_v42 = vpack.c.bf16 %v2545_v38, %v2544_v37  ;;  %v10784_v38 = vld [vmem:[#allocation7 + $0xd8] sm:$0xff]  }
 0x183   : > { %9391 = vmatprep.mubr.msk.bf16.mxu0 %vm14092_vm0, %v1871_v49  ;;  %9424 = vmatpush3.bf16.msra.mxu0 %v10775_v21  ;;  %v11573_v49 = vld [vmem:[#allocation7 + $0xc0] sm:$0xff]  }
 0x184   : > { %9425 = vmatprep.subr.bf16.mxu0 %v10776_v22  ;;  %v2893_v21 = vld [vmem:[#allocation2 + $0x1c] sm:$0xff] }
 0x187   : > { %9426 = vmatpush3.bf16.msra.mxu0 %v10776_v22 }
 0x188   : > { %9463 = vmatprep.subr.bf16.mxu0 %v10777_v23 }
 0x18a   : > { %9392 = vmatmul.mubr.msk.bf16.gmra.mrb[8].mxu0 %vm14092_vm0, %v11529_v50  ;;  %v2579_v50 = vpack.c.bf16 %v2549_v46, %v2548_v45  ;;  %v2906_v46 = vld [vmem:[#allocation2 + $0x84] sm:$0xff] }
 0x18b   : > { %9395 = vmatprep.mubr.msk.bf16.mxu0 %vm14092_vm0, %v1873_v55  ;;  %v2555_v55 = vld [vmem:[#allocation2 + $0x9b] sm:$0xff] }
 0x18c   : > { %v2582_v57 = vpack.c.bf16 %v2555_v55, %v2554_v54  ;;  %v2912_v54 = vld [vmem:[#allocation2 + $0xb4] sm:$0xff]  ;;  %v2913_v55 = vld [vmem:[#allocation2 + $0xbc] sm:$0xff] }
 0x192   : > { %9396 = vmatmul.mubr.msk.bf16.gmra.mrb[12].mxu0 %vm14092_vm0, %v1874_v56  ;;  %v2581_v56 = vpack.c.bf16 %v2553_v53, %v2552_v52  ;;  %v2910_v52 = vld [vmem:[#allocation2 + $0xa4] sm:$0xff]  ;;  %v2911_v53 = vld [vmem:[#allocation2 + $0xac] sm:$0xff] }
 0x193   : > { %9399 = vmatprep.mubr.msk.bf16.mxu0 %vm14092_vm0, %v1875_v61  ;;  %v2559_v61 = vld [vmem:[#allocation2 + $0xbb] sm:$0xff] }
 0x194   : > { %v2584_v63 = vpack.c.bf16 %v2559_v61, %v2558_v60  ;;  %v2916_v60 = vld [vmem:[#allocation2 + $0xd4] sm:$0xff]  ;;  %v2917_v61 = vld [vmem:[#allocation2 + $0xdc] sm:$0xff] }
 0x19a   : > { %9400 = vmatmul.mubr.msk.bf16.gmra.mrb[16].mxu0 %vm14092_vm0, %v1876_v62  ;;  %v2583_v62 = vpack.c.bf16 %v2557_v59, %v2556_v58  ;;  %v2914_v58 = vld [vmem:[#allocation2 + $0xc4] sm:$0xff]  ;;  %v2915_v59 = vld [vmem:[#allocation2 + $0xcc] sm:$0xff] }
 0x19b   : > { %9403 = vmatprep.mubr.msk.bf16.mxu0 %vm14092_vm0, %v1877_v3  ;;  %v2563_v3 = vld [vmem:[#allocation2 + $0xdb] sm:$0xff] }
 0x19c   : > { %v2586_v5 = vpack.c.bf16 %v2563_v3, %v2562_v2  ;;  %v2920_v2 = vld [vmem:[#allocation2 + $0xf4] sm:$0xff]  ;;  %v2921_v3 = vld [vmem:[#allocation2 + $0xfc] sm:$0xff] }
 0x1a2   : > { %9404 = vmatmul.mubr.msk.bf16.gmra.mrb[20].mxu0 %vm14092_vm0, %v1878_v4  ;;  %v2585_v4 = vpack.c.bf16 %v2561_v1, %v2560_v0  ;;  %v2918_v0 = vld [vmem:[#allocation2 + $0xe4] sm:$0xff]  ;;  %v2919_v1 = vld [vmem:[#allocation2 + $0xec] sm:$0xff] }
 0x1a3   : > { %9407 = vmatprep.mubr.msk.bf16.mxu0 %vm14092_vm0, %v1879_v9  ;;  %v2567_v9 = vld [vmem:[#allocation2 + $0xfb] sm:$0xff] }
 0x1a4   : > { %v2588_v11 = vpack.c.bf16 %v2567_v9, %v2566_v8  ;;  %v2924_v8 = vld [vmem:[#allocation2 + $0x114] sm:$0xff]  ;;  %v2925_v9 = vld [vmem:[#allocation2 + $0x11c] sm:$0xff] }
 0x1aa   : > { %9408 = vmatmul.mubr.msk.bf16.gmra.mrb[24].mxu0 %vm14092_vm0, %v1880_v10  ;;  %v2587_v10 = vpack.c.bf16 %v2565_v7, %v2564_v6  ;;  %v2922_v6 = vld [vmem:[#allocation2 + $0x104] sm:$0xff]  ;;  %v2923_v7 = vld [vmem:[#allocation2 + $0x10c] sm:$0xff] }
 0x1ab   : > { %9411 = vmatprep.mubr.msk.bf16.mxu0 %vm14092_vm0, %v1881_v15  ;;  %v2571_v15 = vld [vmem:[#allocation2 + $0x11b] sm:$0xff] }
 0x1ac   : > { %v2590_v17 = vpack.c.bf16 %v2571_v15, %v2570_v14  ;;  %v10786_v15 = vld [vmem:[#allocation7 + $0xe8] sm:$0xff]  }
 0x1b2   : > { %9412 = vmatmul.mubr.msk.bf16.gmra.mrb[28].mxu0 %vm14092_vm0, %v1882_v16  ;;  %v2589_v16 = vpack.c.bf16 %v2569_v13, %v2568_v12  ;;  %v2926_v12 = vld [vmem:[#allocation2 + $0x124] sm:$0xff]  ;;  %v2927_v13 = vld [vmem:[#allocation2 + $0x12c] sm:$0xff] }
 0x1b3   : > { %9415 = vmatprep.mubr.msk.bf16.mxu0 %vm14092_vm0, %v1883_v19  ;;  %v2573_v19 = vld [vmem:[#allocation2 + $0x12b] sm:$0xff]  ;;  %v2945_v14 = vpack.c.bf16 %v2927_v13, %v2926_v12  ;;  %v3634_v12 = vld [vmem:[#allocation2 + $0x135] sm:$0xff]  ;;  %v3635_v13 = vld [vmem:[#allocation2 + $0x13d] sm:$0xff] }
 0x1b4   : > { %v2591_v22 = vpack.c.bf16 %v2573_v19, %v2572_v18  ;;  %v10789_v18 = vld [vmem:[#allocation7 + $0x100] sm:$0xff]   ;;  %v3280_v19 = vld [vmem:[#allocation2 + $0x134] sm:$0xff] }
 0x1ba   : > { %9416 = vmatmul.mubr.msk.bf16.gmra.mrb[32].mxu0 %vm14092_vm0, %v2237_v28  ;;  %v11590_v28 = vpack.c.bf16 %v2895_v25, %v2894_v24  ;;  %v3602_v25 = vld [vmem:[#allocation2 + $0x35] sm:$0xff] }
 0x1bb   : > { %9427 = vmatprep.mubr.msk.bf16.mxu0 %vm14092_vm0, %v2574_v29  ;;  %v11592_v29 = vpack.c.bf16 %v2897_v27, %v2896_v26  ;;  %v3603_v26 = vld [vmem:[#allocation2 + $0x3d] sm:$0xff]  ;;  %v3604_v27 = vld [vmem:[#allocation2 + $0x45] sm:$0xff] }
 0x1c2   : > { %9428 = vmatmul.mubr.msk.bf16.vlgmr.msra.gmra.mrb[0].mxu0 %vm14092_vm0, %v2575_v34  ;;  %v2901_v34 = vld [vmem:[#allocation2 + $0x5c] sm:$0xff] }
 0x1c3   : > { %9464 = vmatpush3.bf16.msra.mxu0 %v10777_v23  ;;  %9431 = vmatprep.mubr.msk.bf16.mxu0 %vm14092_vm0, %v2576_v35  ;;  %v2928_v23 = vpack.c.bf16 %v2893_v21, %v2892_v20  ;;  %v10783_v35 = vld [vmem:[#allocation7 + $0xd0] sm:$0xff]   ;;  %v11601_v37 = vpack.c.bf16 %v2901_v34, %v2900_v33  ;;  %v3281_v20 = vld [vmem:[#allocation2 + $0x13c] sm:$0xff]  ;;  %v3600_v21 = vld [vmem:[#allocation2 + $0x25] sm:$0xff] }
 0x1c4   : > { %9465 = vmatprep.subr.bf16.mxu0 %v10778_v36  ;;  %v3607_v33 = vld [vmem:[#allocation2 + $0x5d] sm:$0xff]  ;;  %v3608_v34 = vld [vmem:[#allocation2 + $0x65] sm:$0xff] }
 0x1c7   : > { %9466 = vmatpush3.bf16.msra.mxu0 %v10778_v36  ;;  %v11599_v36 = vpack.c.bf16 %v2899_v32, %v2898_v31  ;;  %v10790_v31 = vld [vmem:[#allocation7 + $0x108] sm:$0xff]   ;;  %v3606_v32 = vld [vmem:[#allocation2 + $0x55] sm:$0xff] }
 0x1c8   : > { %9467 = vmatprep.subr.bf16.mxu0 %v10779_v41 }
 0x1ca   : > { %9432 = vmatmul.mubr.msk.bf16.gmra.mrb[4].mxu0 %vm14092_vm0, %v2577_v42  ;;  %v2905_v42 = vld [vmem:[#allocation2 + $0x7c] sm:$0xff] }
 0x1cb   : > { %9435 = vmatprep.mubr.msk.bf16.mxu0 %vm14092_vm0, %v2578_v43  ;;  %9468 = vmatpush3.bf16.msra.mxu0 %v10779_v41  ;;  %v2904_v41 = vld [vmem:[#allocation2 + $0x74] sm:$0xff]  ;;  %v10785_v43 = vld [vmem:[#allocation7 + $0xe0] sm:$0xff]  }
 0x1cc   : > { %9469 = vmatprep.subr.bf16.mxu0 %v10780_v44  ;;  %v11607_v45 = vpack.c.bf16 %v2905_v42, %v2904_v41  ;;  %v3611_v41 = vld [vmem:[#allocation2 + $0x7d] sm:$0xff]  ;;  %v3612_v42 = vld [vmem:[#allocation2 + $0x85] sm:$0xff] }
 0x1cf   : > { %9470 = vmatpush3.bf16.msra.mxu0 %v10780_v44  ;;  %v2933_v44 = vpack.c.bf16 %v2903_v40, %v2902_v39  ;;  %v10792_v39 = vld [vmem:[#allocation7 + $0x118] sm:$0xff]  }
 0x1d0   : > { %9507 = vmatprep.subr.bf16.mxu0 %v11573_v49  ;;  %v3610_v40 = vld [vmem:[#allocation2 + $0x75] sm:$0xff] }
 0x1d2   : > { %9436 = vmatmul.mubr.msk.bf16.gmra.mrb[8].mxu0 %vm14092_vm0, %v2579_v50  ;;  %v2935_v50 = vpack.c.bf16 %v2907_v47, %v2906_v46  ;;  %v3614_v46 = vld [vmem:[#allocation2 + $0x95] sm:$0xff]  ;;  %v3615_v47 = vld [vmem:[#allocation2 + $0x9d] sm:$0xff] }
 0x1d3   : > { %9439 = vmatprep.mubr.msk.bf16.mxu0 %vm14092_vm0, %v2580_v51 }
 0x1da   : > { %9440 = vmatmul.mubr.msk.bf16.gmra.mrb[12].mxu0 %vm14092_vm0, %v2581_v56  ;;  %v2937_v56 = vpack.c.bf16 %v2911_v53, %v2910_v52  ;;  %v3618_v52 = vld [vmem:[#allocation2 + $0xb5] sm:$0xff]  ;;  %v3619_v53 = vld [vmem:[#allocation2 + $0xbd] sm:$0xff] }
 0x1db   : > { %9443 = vmatprep.mubr.msk.bf16.mxu0 %vm14092_vm0, %v2582_v57  ;;  %v2938_v57 = vpack.c.bf16 %v2913_v55, %v2912_v54  ;;  %v3620_v54 = vld [vmem:[#allocation2 + $0xc5] sm:$0xff]  ;;  %v3621_v55 = vld [vmem:[#allocation2 + $0xcd] sm:$0xff] }
 0x1e2   : > { %9444 = vmatmul.mubr.msk.bf16.gmra.mrb[16].mxu0 %vm14092_vm0, %v2583_v62  ;;  %v2939_v62 = vpack.c.bf16 %v2915_v59, %v2914_v58  ;;  %v3622_v58 = vld [vmem:[#allocation2 + $0xd5] sm:$0xff]  ;;  %v3623_v59 = vld [vmem:[#allocation2 + $0xdd] sm:$0xff] }
 0x1e3   : > { %9447 = vmatprep.mubr.msk.bf16.mxu0 %vm14092_vm0, %v2584_v63  ;;  %v2940_v63 = vpack.c.bf16 %v2917_v61, %v2916_v60  ;;  %v3624_v60 = vld [vmem:[#allocation2 + $0xe5] sm:$0xff]  ;;  %v3625_v61 = vld [vmem:[#allocation2 + $0xed] sm:$0xff] }
 0x1ea   : > { %9448 = vmatmul.mubr.msk.bf16.gmra.mrb[20].mxu0 %vm14092_vm0, %v2585_v4  ;;  %v2941_v4 = vpack.c.bf16 %v2919_v1, %v2918_v0  ;;  %v3626_v0 = vld [vmem:[#allocation2 + $0xf5] sm:$0xff]  ;;  %v3627_v1 = vld [vmem:[#allocation2 + $0xfd] sm:$0xff] }
 0x1eb   : > { %9451 = vmatprep.mubr.msk.bf16.mxu0 %vm14092_vm0, %v2586_v5  ;;  %v2942_v5 = vpack.c.bf16 %v2921_v3, %v2920_v2  ;;  %v3628_v2 = vld [vmem:[#allocation2 + $0x105] sm:$0xff]  ;;  %v3629_v3 = vld [vmem:[#allocation2 + $0x10d] sm:$0xff] }
 0x1f2   : > { %9452 = vmatmul.mubr.msk.bf16.gmra.mrb[24].mxu0 %vm14092_vm0, %v2587_v10  ;;  %v2943_v10 = vpack.c.bf16 %v2923_v7, %v2922_v6  ;;  %v3630_v6 = vld [vmem:[#allocation2 + $0x115] sm:$0xff]  ;;  %v3631_v7 = vld [vmem:[#allocation2 + $0x11d] sm:$0xff] }
 0x1f3   : > { %9455 = vmatprep.mubr.msk.bf16.mxu0 %vm14092_vm0, %v2588_v11  ;;  %v2944_v11 = vpack.c.bf16 %v2925_v9, %v2924_v8  ;;  %v3632_v8 = vld [vmem:[#allocation2 + $0x125] sm:$0xff]  ;;  %v3633_v9 = vld [vmem:[#allocation2 + $0x12d] sm:$0xff] }
 0x1fa   : > { %9456 = vmatmul.mubr.msk.bf16.gmra.mrb[28].mxu0 %vm14092_vm0, %v2589_v16  ;;  %v10787_v16 = vld [vmem:[#allocation7 + $0xf0] sm:$0xff]  }
 0x1fb   : > { %9459 = vmatprep.mubr.msk.bf16.mxu0 %vm14092_vm0, %v2590_v17  ;;  %v10788_v17 = vld [vmem:[#allocation7 + $0xf8] sm:$0xff]  }
 0x202   : > { %9460 = vmatmul.mubr.msk.bf16.gmra.mrb[32].mxu0 %vm14092_vm0, %v2591_v22  ;;  %v3601_v22 = vld [vmem:[#allocation2 + $0x2d] sm:$0xff] }
 0x203   : > { %9471 = vmatprep.mubr.msk.bf16.mxu0 %vm14092_vm0, %v2928_v23  ;;  %v3299_v23 = vpack.c.bf16 %v3281_v20, %v3280_v19  ;;  %v3636_v24 = vpack.c.bf16 %v3601_v22, %v3600_v21  ;;  %v3957_v19 = vld [vmem:[#allocation2 + $0x3e] sm:$0xff]  ;;  %v3958_v20 = vld [vmem:[#allocation2 + $0x46] sm:$0xff]  ;;  %v3959_v21 = vld [vmem:[#allocation2 + $0x4e] sm:$0xff] }
 0x20a   : > { %9472 = vmatmul.mubr.msk.bf16.vlgmr.msra.gmra.mrb[0].mxu0 %vm14092_vm0, %v11590_v28 }
 0x20b   : > { %9508 = vmatpush3.bf16.msra.mxu0 %v11573_v49  ;;  %9475 = vmatprep.mubr.msk.bf16.mxu0 %vm14092_vm0, %v11592_v29  ;;  %v2909_v49 = vld [vmem:[#allocation2 + $0x9c] sm:$0xff] }
 0x20c   : > { %9509 = vmatprep.subr.bf16.mxu0 %v10782_v30  ;;  %v2936_v51 = vpack.c.bf16 %v2909_v49, %v2908_v48  ;;  %v3616_v48 = vld [vmem:[#allocation2 + $0xa5] sm:$0xff]  ;;  %v3617_v49 = vld [vmem:[#allocation2 + $0xad] sm:$0xff] }
 0x20f   : > { %9510 = vmatpush3.bf16.msra.mxu0 %v10782_v30 }
 0x210   : > { %9511 = vmatprep.subr.bf16.mxu0 %v10783_v35 }
 0x212   : > { %9476 = vmatmul.mubr.msk.bf16.gmra.mrb[4].mxu0 %vm14092_vm0, %v11599_v36 }
 0x213   : > { %9479 = vmatprep.mubr.msk.bf16.mxu0 %vm14092_vm0, %v11601_v37  ;;  %9512 = vmatpush3.bf16.msra.mxu0 %v10783_v35  ;;  %v3609_v35 = vld [vmem:[#allocation2 + $0x6d] sm:$0xff] }
 0x214   : > { %9513 = vmatprep.subr.bf16.mxu0 %v10784_v38 }
 0x217   : > { %9514 = vmatpush3.bf16.msra.mxu0 %v10784_v38  ;;  %v3640_v38 = vpack.c.bf16 %v3609_v35, %v3608_v34 }
 0x218   : > { %9551 = vmatprep.subr.bf16.mxu0 %v10785_v43 }
 0x21a   : > { %9480 = vmatmul.mubr.msk.bf16.gmra.mrb[8].mxu0 %vm14092_vm0, %v2933_v44 }
 0x21b   : > { %9483 = vmatprep.mubr.msk.bf16.mxu0 %vm14092_vm0, %v11607_v45 }
 0x222   : > { %9484 = vmatmul.mubr.msk.bf16.gmra.mrb[12].mxu0 %vm14092_vm0, %v2935_v50 }
 0x223   : > { %9487 = vmatprep.mubr.msk.bf16.mxu0 %vm14092_vm0, %v2936_v51 }
 0x22a   : > { %9488 = vmatmul.mubr.msk.bf16.gmra.mrb[16].mxu0 %vm14092_vm0, %v2937_v56 }
 0x22b   : > { %9491 = vmatprep.mubr.msk.bf16.mxu0 %vm14092_vm0, %v2938_v57 }
 0x232   : > { %9492 = vmatmul.mubr.msk.bf16.gmra.mrb[20].mxu0 %vm14092_vm0, %v2939_v62 }
 0x233   : > { %9495 = vmatprep.mubr.msk.bf16.mxu0 %vm14092_vm0, %v2940_v63 }
 0x23a   : > { %9496 = vmatmul.mubr.msk.bf16.gmra.mrb[24].mxu0 %vm14092_vm0, %v2941_v4 }
 0x23b   : > { %9499 = vmatprep.mubr.msk.bf16.mxu0 %vm14092_vm0, %v2942_v5 }
 0x242   : > { %9500 = vmatmul.mubr.msk.bf16.gmra.mrb[28].mxu0 %vm14092_vm0, %v2943_v10 }
 0x243   : > { %9503 = vmatprep.mubr.msk.bf16.mxu0 %vm14092_vm0, %v2944_v11 }
 0x24a   : > { %9504 = vmatmul.mubr.msk.bf16.gmra.mrb[32].mxu0 %vm14092_vm0, %v2945_v14 }
 0x24b   : > { %9515 = vmatprep.mubr.msk.bf16.mxu0 %vm14092_vm0, %v11590_v28  ;;  %v3605_v28 = vld [vmem:[#allocation2 + $0x4d] sm:$0xff] }
 0x24c   : > { %v3638_v30 = vpack.c.bf16 %v3605_v28, %v3604_v27  ;;  %v3963_v27 = vld [vmem:[#allocation2 + $0x6e] sm:$0xff] }
 0x252   : > { %9516 = vmatmul.mubr.msk.bf16.vlgmr.msra.gmra.mrb[0].mxu0 %vm14092_vm0, %v11592_v29  ;;  %v3637_v29 = vpack.c.bf16 %v3603_v26, %v3602_v25  ;;  %v3961_v25 = vld [vmem:[#allocation2 + $0x5e] sm:$0xff]  ;;  %v3962_v26 = vld [vmem:[#allocation2 + $0x66] sm:$0xff] }
 0x253   : > { %9552 = vmatpush3.bf16.msra.mxu0 %v10785_v43  ;;  %9519 = vmatprep.mubr.msk.bf16.mxu0 %vm14092_vm0, %v11599_v36  ;;  %v10791_v36 = vld [vmem:[#allocation7 + $0x110] sm:$0xff]  }
 0x254   : > { %9553 = vmatprep.subr.bf16.mxu0 %v10786_v15  ;;  %v3613_v43 = vld [vmem:[#allocation2 + $0x8d] sm:$0xff] }
 0x257   : > { %9554 = vmatpush3.bf16.msra.mxu0 %v10786_v15  ;;  %v3955_v15 = vld [vmem:[#allocation2 + $0x2e] sm:$0xff] }
 0x258   : > { %9555 = vmatprep.subr.bf16.mxu0 %v10787_v16 }
 0x25a   : > { %9520 = vmatmul.mubr.msk.bf16.gmra.mrb[4].mxu0 %vm14092_vm0, %v11601_v37  ;;  %v3639_v37 = vpack.c.bf16 %v3607_v33, %v3606_v32  ;;  %v3966_v32 = vld [vmem:[#allocation2 + $0x86] sm:$0xff]  ;;  %v3967_v33 = vld [vmem:[#allocation2 + $0x8e] sm:$0xff] }
 0x25b   : > { %9523 = vmatprep.mubr.msk.bf16.mxu0 %vm14092_vm0, %v2933_v44  ;;  %9556 = vmatpush3.bf16.msra.mxu0 %v10787_v16  ;;  %v3641_v44 = vpack.c.bf16 %v3611_v41, %v3610_v40  ;;  %v3653_v16 = vpack.c.bf16 %v3635_v13, %v3634_v12  ;;  %v3996_v35 = vpack.c.bf16 %v3967_v33, %v3966_v32  ;;  %v11683_v12 = vld [vmem:[#allocation9] sm:$0xff]   ;;  %v546_v13 = vlaneseq }
 0x25c   : > { %9557 = vmatprep.subr.bf16.mxu0 %v10788_v17  ;;  %14191 = vst [vmem:[#allocation15_spill] sm:$0xff] %v11683_v12 }
 0x25f   : > { %9558 = vmatpush3.bf16.msra.mxu0 %v10788_v17 }
 0x260   : > { %9595 = vmatprep.subr.bf16.mxu0 %v10789_v18 }
 0x262   : > { %9524 = vmatmul.mubr.msk.bf16.gmra.mrb[8].mxu0 %vm14092_vm0, %v11607_v45  ;;  %v3642_v45 = vpack.c.bf16 %v3613_v43, %v3612_v42  ;;  %v3972_v42 = vld [vmem:[#allocation2 + $0xb6] sm:$0xff]  ;;  %v3973_v43 = vld [vmem:[#allocation2 + $0xbe] sm:$0xff] }
 0x263   : > { %9527 = vmatprep.mubr.msk.bf16.mxu0 %vm14092_vm0, %v2935_v50  ;;  %v3643_v50 = vpack.c.bf16 %v3615_v47, %v3614_v46  ;;  %v3999_v46 = vpack.c.bf16 %v3973_v43, %v3972_v42 }
 0x26a   : > { %9528 = vmatmul.mubr.msk.bf16.gmra.mrb[12].mxu0 %vm14092_vm0, %v2936_v51  ;;  %v3644_v51 = vpack.c.bf16 %v3617_v49, %v3616_v48  ;;  %v3976_v48 = vld [vmem:[#allocation2 + $0xd6] sm:$0xff]  ;;  %v3977_v49 = vld [vmem:[#allocation2 + $0xde] sm:$0xff] }
 0x26b   : > { %9531 = vmatprep.mubr.msk.bf16.mxu0 %vm14092_vm0, %v2937_v56  ;;  %v3645_v56 = vpack.c.bf16 %v3619_v53, %v3618_v52  ;;  %v4001_v52 = vpack.c.bf16 %v3977_v49, %v3976_v48 }
 0x272   : > { %9532 = vmatmul.mubr.msk.bf16.gmra.mrb[16].mxu0 %vm14092_vm0, %v2938_v57  ;;  %v3646_v57 = vpack.c.bf16 %v3621_v55, %v3620_v54  ;;  %v3980_v54 = vld [vmem:[#allocation2 + $0xf6] sm:$0xff]  ;;  %v3981_v55 = vld [vmem:[#allocation2 + $0xfe] sm:$0xff] }
 0x273   : > { %9535 = vmatprep.mubr.msk.bf16.mxu0 %vm14092_vm0, %v2939_v62  ;;  %v3647_v62 = vpack.c.bf16 %v3623_v59, %v3622_v58  ;;  %v4003_v58 = vpack.c.bf16 %v3981_v55, %v3980_v54 }
 0x27a   : > { %9536 = vmatmul.mubr.msk.bf16.gmra.mrb[20].mxu0 %vm14092_vm0, %v2940_v63  ;;  %v3648_v63 = vpack.c.bf16 %v3625_v61, %v3624_v60  ;;  %v3984_v60 = vld [vmem:[#allocation2 + $0x116] sm:$0xff]  ;;  %v3985_v61 = vld [vmem:[#allocation2 + $0x11e] sm:$0xff] }
 0x27b   : > { %9539 = vmatprep.mubr.msk.bf16.mxu0 %vm14092_vm0, %v2941_v4  ;;  %v3649_v4 = vpack.c.bf16 %v3627_v1, %v3626_v0  ;;  %v4005_v0 = vpack.c.bf16 %v3985_v61, %v3984_v60 }
 0x282   : > { %9540 = vmatmul.mubr.msk.bf16.gmra.mrb[24].mxu0 %vm14092_vm0, %v2942_v5  ;;  %v3650_v5 = vpack.c.bf16 %v3629_v3, %v3628_v2  ;;  %v3988_v2 = vld [vmem:[#allocation2 + $0x136] sm:$0xff]  ;;  %v3989_v3 = vld [vmem:[#allocation2 + $0x13e] sm:$0xff] }
 0x283   : > { %9543 = vmatprep.mubr.msk.bf16.mxu0 %vm14092_vm0, %v2943_v10  ;;  %v3651_v10 = vpack.c.bf16 %v3631_v7, %v3630_v6  ;;  %v10794_v6 = vld [vmem:[#allocation9 + $0x28] sm:$0xff]   ;;  %v10795_v7 = vld [vmem:[#allocation9 + $0x30] sm:$0xff]  }
 0x28a   : > { %9544 = vmatmul.mubr.msk.bf16.gmra.mrb[28].mxu0 %vm14092_vm0, %v2944_v11  ;;  %v3652_v11 = vpack.c.bf16 %v3633_v9, %v3632_v8  ;;  %v10796_v8 = vld [vmem:[#allocation9 + $0x38] sm:$0xff]  }
 0x28b   : > { %9547 = vmatprep.mubr.msk.bf16.mxu0 %vm14092_vm0, %v2945_v14  ;;  %v3954_v14 = vld [vmem:[#allocation2 + $0x26] sm:$0xff]  ;;  %v4593_v9 = vld [vmem:[#allocation3 + $0x1] sm:$0xff] }
 0x28c   : > { %v3990_v17 = vpack.c.bf16 %v3955_v15, %v3954_v14  ;;  %v11686_v14 = vshrl.u32 %v546_v13, 7 }
 0x28e   : > { %v549_v15 = vadd.s32 16, %v11686_v14  ;;  %v11712_v33 = vadd.s32 56, %v11686_v14  ;;  %v11729_v43 = vadd.s32 80, %v11686_v14  ;;  %v11753_v55 = vadd.s32 64, %v11686_v14 }
 0x28f   : > { %v11803_v13 = vadd.s32 96, %v11686_v14 }
 0x292   : > { %9548 = vmatmul.mubr.msk.bf16.gmra.mrb[32].mxu0 %vm14092_vm0, %v3299_v23  ;;  %v3992_v23 = vpack.c.bf16 %v3959_v21, %v3958_v20  ;;  %v548_v21 = vadd.s32 8, %v11686_v14 }
 0x293   : > { %9559 = vmatprep.mubr.msk.bf16.mxu0 %vm14092_vm0, %v3636_v24  ;;  %v3960_v24 = vld [vmem:[#allocation2 + $0x56] sm:$0xff] }
 0x294   : > { %v3993_v28 = vpack.c.bf16 %v3961_v25, %v3960_v24 }
 0x29a   : > { %9560 = vmatmul.mubr.msk.bf16.vlgmr.msra.gmra.mrb[0].mxu0 %vm14092_vm0, %v3637_v29  ;;  %v3994_v29 = vpack.c.bf16 %v3963_v27, %v3962_v26  ;;  %v11703_v26 = vmul.u32.u64.low 3817748708, %v548_v21  ;;  %v11704_v27 = vmul.u32.u64.high 3817748708, %v548_v21, %v11703_v26 }
 0x29b   : > { %9596 = vmatpush3.bf16.msra.mxu0 %v10789_v18  ;;  %9563 = vmatprep.mubr.msk.bf16.mxu0 %vm14092_vm0, %v3638_v30  ;;  %v3956_v18 = vld [vmem:[#allocation2 + $0x36] sm:$0xff] }
 0x29c   : > { %9597 = vmatprep.subr.bf16.mxu0 %v10790_v31  ;;  %v3991_v22 = vpack.c.bf16 %v3957_v19, %v3956_v18  ;;  %v3964_v30 = vld [vmem:[#allocation2 + $0x76] sm:$0xff]  ;;  %v550_v18 = vadd.s32 24, %v11686_v14  ;;  %v11694_v19 = vmul.u32.u64.low 3817748708, %v11686_v14  ;;  %v11695_v20 = vmul.u32.u64.high 3817748708, %v11686_v14, %v11694_v19 }
 0x29d   : > { %v12212_v19 = vadd.s32 192, %v11686_v14 }
 0x29e   : > { %v11700_v24 = vmul.u32.u64.low 3817748708, %v550_v18  ;;  %v11701_v25 = vmul.u32.u64.high 3817748708, %v550_v18, %v11700_v24  ;;  %v589_v32 = vshrl.u32 %v11695_v20, 4 }
 0x29f   : > { %9598 = vmatpush3.bf16.msra.mxu0 %v10790_v31  ;;  %v3965_v31 = vld [vmem:[#allocation2 + $0x7e] sm:$0xff] }
 0x2a0   : > { %9599 = vmatprep.subr.bf16.mxu0 %v10791_v36  ;;  %v3995_v34 = vpack.c.bf16 %v3965_v31, %v3964_v30  ;;  %v551_v31 = vadd.s32 32, %v11686_v14  ;;  %v12233_v24 = vld [vmem:[%s14080_s2] ss:$0 sm:$0xff] }
 0x2a2   : > { %9564 = vmatmul.mubr.msk.bf16.gmra.mrb[4].mxu0 %vm14092_vm0, %v3639_v37  ;;  %v3969_v37 = vld [vmem:[#allocation2 + $0x9e] sm:$0xff] }
 0x2a3   : > { %9567 = vmatprep.mubr.msk.bf16.mxu0 %vm14092_vm0, %v3640_v38  ;;  %9600 = vmatpush3.bf16.msra.mxu0 %v10791_v36  ;;  %v3968_v36 = vld [vmem:[#allocation2 + $0x96] sm:$0xff]  ;;  %v3970_v38 = vld [vmem:[#allocation2 + $0xa6] sm:$0xff] }
 0x2a4   : > { %9601 = vmatprep.subr.bf16.mxu0 %v10792_v39  ;;  %v3997_v40 = vpack.c.bf16 %v3969_v37, %v3968_v36  ;;  %v11717_v36 = vmul.u32.u64.low 3817748708, %v551_v31  ;;  %v11718_v37 = vmul.u32.u64.high 3817748708, %v551_v31, %v11717_v36 }
 0x2a7   : > { %9602 = vmatpush3.bf16.msra.mxu0 %v10792_v39  ;;  %v3971_v39 = vld [vmem:[#allocation2 + $0xae] sm:$0xff] }
 0x2a8   : > { %v3998_v41 = vpack.c.bf16 %v3971_v39, %v3970_v38  ;;  %v590_v38 = vmul.u32 18, %v589_v32  ;;  %v11721_v39 = vadd.s32 40, %v11686_v14 }
 0x2aa   : > { %9568 = vmatmul.mubr.msk.bf16.gmra.mrb[8].mxu0 %vm14092_vm0, %v3641_v44  ;;  %v3974_v44 = vld [vmem:[#allocation2 + $0xc6] sm:$0xff] }
 0x2ab   : > { %9571 = vmatprep.mubr.msk.bf16.mxu0 %vm14092_vm0, %v3642_v45  ;;  %v3975_v45 = vld [vmem:[#allocation2 + $0xce] sm:$0xff] }
 0x2ac   : > { %v4000_v47 = vpack.c.bf16 %v3975_v45, %v3974_v44 }
 0x2b2   : > { %9572 = vmatmul.mubr.msk.bf16.gmra.mrb[12].mxu0 %vm14092_vm0, %v3643_v50  ;;  %v3978_v50 = vld [vmem:[#allocation2 + $0xe6] sm:$0xff] }
 0x2b3   : > { %9575 = vmatprep.mubr.msk.bf16.mxu0 %vm14092_vm0, %v3644_v51  ;;  %v3979_v51 = vld [vmem:[#allocation2 + $0xee] sm:$0xff] }
 0x2b4   : > { %v4002_v53 = vpack.c.bf16 %v3979_v51, %v3978_v50  ;;  %v11746_v50 = vsub.s32 %v11686_v14, %v590_v38 }
 0x2b6   : > { %vm979_vm4 = vcmp.ne.s32.totalorder %v11746_v50, 0  ;;  %vm1015_vm5 = vcmp.lt.s32.totalorder %v11746_v50, 0 }
 0x2b7   : > { %vm11809_vm11 = vmand %vm1015_vm5, %vm979_vm4 }
 0x2ba   : > { %9576 = vmatmul.mubr.msk.bf16.gmra.mrb[16].mxu0 %vm14092_vm0, %v3645_v56  ;;  %v3982_v56 = vld [vmem:[#allocation2 + $0x106] sm:$0xff] }
 0x2bb   : > { %9579 = vmatprep.mubr.msk.bf16.mxu0 %vm14092_vm0, %v3646_v57  ;;  %v3983_v57 = vld [vmem:[#allocation2 + $0x10e] sm:$0xff] }
 0x2bc   : > { %v4004_v59 = vpack.c.bf16 %v3983_v57, %v3982_v56  ;;  %v633_v57 = vshrl.u32 %v11718_v37, 4 }
 0x2c2   : > { %9580 = vmatmul.mubr.msk.bf16.gmra.mrb[20].mxu0 %vm14092_vm0, %v3647_v62  ;;  %v3986_v62 = vld [vmem:[#allocation2 + $0x126] sm:$0xff] }
 0x2c3   : > { %9583 = vmatprep.mubr.msk.bf16.mxu0 %vm14092_vm0, %v3648_v63  ;;  %v3987_v63 = vld [vmem:[#allocation2 + $0x12e] sm:$0xff] }
 0x2c4   : > { %v4006_v1 = vpack.c.bf16 %v3987_v63, %v3986_v62  ;;  %v11771_v62 = vadd.s32 18, %v11746_v50 }
 0x2ca   : > { %9584 = vmatmul.mubr.msk.bf16.gmra.mrb[24].mxu0 %vm14092_vm0, %v3649_v4  ;;  %v4007_v4 = vpack.c.bf16 %v3989_v3, %v3988_v2  ;;  %v634_v3 = vmul.u32 18, %v633_v57 }
 0x2cb   : > { %9587 = vmatprep.mubr.msk.bf16.mxu0 %vm14092_vm0, %v3650_v5  ;;  %v10793_v5 = vld [vmem:[#allocation9 + $0x20] sm:$0xff]  }
 0x2cc   : > { %9639 = vmatprep.subr.bf16.mxu1 %v10793_v5  ;;  %v11831_v20 = vsub.s32 %v551_v31, %v634_v3  ;;  %v11860_v31 = vmul.u32.u64.low 3817748708, %v11803_v13  ;;  %v11861_v32 = vmul.u32.u64.high 3817748708, %v11803_v13, %v11860_v31  ;;  %v11922_v3 = vadd.s32 152, %v11686_v14 }
 0x2cd   : > { %9640 = vmatpush3.bf16.msra.mxu1 %v10793_v5  ;;  %v14210_v31 = vmov 0 }
 0x2ce   : > { %9641 = vmatprep.subr.bf16.mxu1 %v10794_v6 }
 0x2d1   : > { %9642 = vmatpush3.bf16.msra.mxu1 %v10794_v6 }
 0x2d2   : > { %9588 = vmatmul.mubr.msk.bf16.gmra.mrb[28].mxu0 %vm14092_vm0, %v3651_v10  ;;  %9643 = vmatprep.subr.bf16.mxu1 %v10795_v7  ;;  %v4594_v10 = vld [vmem:[#allocation3 + $0x9] sm:$0xff] }
 0x2d3   : > { %9591 = vmatprep.mubr.msk.bf16.mxu0 %vm14092_vm0, %v3652_v11  ;;  %v4629_v11 = vpack.c.bf16 %v4594_v10, %v4593_v9  ;;  %v11795_v10 = vadd.s32 112, %v11686_v14 }
 0x2d5   : > { %9644 = vmatpush3.bf16.msra.mxu1 %v10795_v7  ;;  %9647 = vmatprep.mubr.msk.bf16.mxu1 %vm14092_vm0, %v4629_v11  ;;  %v11790_v7 = vadd.s32 72, %v11686_v14 }
 0x2d6   : > { %9645 = vmatprep.subr.bf16.mxu1 %v10796_v8 }
 0x2d9   : > { %9646 = vmatpush3.bf16.msra.mxu1 %v10796_v8 }
 0x2da   : > { %9592 = vmatmul.mubr.msk.bf16.gmra.mrb[32].mxu0 %vm14092_vm0, %v3653_v16  ;;  %9683 = vmatprep.subr.bf16.mxu1 %v11683_v12 }
 0x2db   : > { %9603 = vmatprep.mubr.msk.bf16.mxu0 %vm14092_vm0, %v3990_v17  ;;  %v11689_v16 = vmul.u32.u64.low 3817748708, %v549_v15  ;;  %v11690_v17 = vmul.u32.u64.high 3817748708, %v549_v15, %v11689_v16 }
 0x2e2   : > { %9604 = vmatmul.mubr.msk.bf16.vlgmr.msra.gmra.mrb[0].mxu0 %vm14092_vm0, %v3991_v22  ;;  %v611_v22 = vshrl.u32 %v11690_v17, 4  ;;  %v11818_v17 = vadd.s32 120, %v11686_v14 }
 0x2e3   : > { %9607 = vmatprep.mubr.msk.bf16.mxu0 %vm14092_vm0, %v3992_v23  ;;  %v553_v23 = vadd.s32 48, %v11686_v14 }
 0x2ea   : > { %9608 = vmatmul.mubr.msk.bf16.gmra.mrb[4].mxu0 %vm14092_vm0, %v3993_v28  ;;  %v612_v28 = vmul.u32 18, %v611_v22 }
 0x2eb   : > { %9611 = vmatprep.mubr.msk.bf16.mxu0 %vm14092_vm0, %v3994_v29  ;;  %v11706_v29 = vmul.u32.u64.low 3817748708, %v553_v23  ;;  %v11707_v30 = vmul.u32.u64.high 3817748708, %v553_v23, %v11706_v29 }
 0x2ec   : > { %v14200_v29 = vmov 0 }
 0x2ed   : > { %v655_v44 = vshrl.u32 %v11707_v30, 4 }
 0x2ef   : > { %v656_v54 = vmul.u32 18, %v655_v44 }
 0x2f1   : > { %v11773_v63 = vsub.s32 %v553_v23, %v656_v54  ;;  %v11834_v22 = vmul.u32.u64.low 3817748708, %v11790_v7  ;;  %v11835_v23 = vmul.u32.u64.high 3817748708, %v11790_v7, %v11834_v22 }
 0x2f2   : > { %9612 = vmatmul.mubr.msk.bf16.gmra.mrb[8].mxu0 %vm14092_vm0, %v3995_v34  ;;  %v11714_v34 = vsub.s32 %v549_v15, %v612_v28  ;;  %v14260_v15 = vmov 0 }
 0x2f3   : > { %9615 = vmatprep.mubr.msk.bf16.mxu0 %vm14092_vm0, %v3996_v35  ;;  %v622_v35 = vshrl.u32 %v11701_v25, 4  ;;  %vm985_vm10 = vcmp.ne.s32.totalorder %v11773_v63, 0  ;;  %vm1021_vm12 = vcmp.lt.s32.totalorder %v11773_v63, 0  ;;  %v11815_v16 = vadd.s32 18, %v11773_v63 }
 0x2f4   : > { %vm981_vm1 = vcmp.ne.s32.totalorder %v11714_v34, 0  ;;  %vm1017_vm2 = vcmp.lt.s32.totalorder %v11714_v34, 0  ;;  %vm11854_vm15 = vmand %vm1021_vm12, %vm985_vm10 }
 0x2f5   : > { %v623_v45 = vmul.u32 18, %v622_v35  ;;  %vm11741_vm3 = vmand %vm1017_vm2, %vm981_vm1  ;;  %v14201_v29 = vsel %vm11854_vm15, 4294967295, %v14200_v29  ;;  %v11867_v35 = vmul.u32.u64.low 3817748708, %v11818_v17  ;;  %v11868_v36 = vmul.u32.u64.high 3817748708, %v11818_v17, %v11867_v35 }
 0x2f6   : > { %vm983_vm1 = vcmp.ne.s32.totalorder %v11831_v20, 0  ;;  %vm1019_vm2 = vcmp.lt.s32.totalorder %v11831_v20, 0 }
 0x2f7   : > { %v11755_v56 = vsub.s32 %v550_v18, %v623_v45  ;;  %v11821_v18 = vadd.s32 104, %v11686_v14  ;;  %v754_v22 = vshrl.u32 %v11868_v36, 4 }
 0x2f8   : > { %v11974_v35 = vmul.u32.u64.low 3817748708, %v11922_v3  ;;  %v11975_v36 = vmul.u32.u64.high 3817748708, %v11922_v3, %v11974_v35 }
 0x2f9   : > { %vm982_vm6 = vcmp.ne.s32.totalorder %v11755_v56, 0  ;;  %vm1018_vm7 = vcmp.lt.s32.totalorder %v11755_v56, 0  ;;  %v11782_v2 = vadd.s32 18, %v11755_v56 }
 0x2fa   : > { %9616 = vmatmul.mubr.msk.bf16.gmra.mrb[12].mxu0 %vm14092_vm0, %v3997_v40  ;;  %v600_v40 = vshrl.u32 %v11704_v27, 4  ;;  %vm11827_vm13 = vmand %vm1018_vm7, %vm982_vm6  ;;  %v11849_v27 = vmul.u32.u64.low 3817748708, %v11795_v10  ;;  %v11850_v28 = vmul.u32.u64.high 3817748708, %v11795_v10, %v11849_v27 }
 0x2fb   : > { %9619 = vmatprep.mubr.msk.bf16.mxu0 %vm14092_vm0, %v3998_v41  ;;  %v11725_v41 = vmul.u32.u64.low 3817748708, %v11712_v33  ;;  %v11726_v42 = vmul.u32.u64.high 3817748708, %v11712_v33, %v11725_v41  ;;  %v11871_v37 = vmul.u32.u64.low 3817748708, %v11821_v18  ;;  %v11872_v38 = vmul.u32.u64.high 3817748708, %v11821_v18, %v11871_v37 }
 0x2fc   : > { %v601_v51 = vmul.u32 18, %v600_v40  ;;  %v11978_v37 = vadd.s32 176, %v11686_v14  ;;  %v14235_v40 = vmov 0 }
 0x2fd   : > { %v666_v61 = vshrl.u32 %v11726_v42, 4 }
 0x2fe   : > { %v11767_v60 = vsub.s32 %v548_v21, %v601_v51 }
 0x2ff   : > { %v667_v8 = vmul.u32 18, %v666_v61  ;;  %v688_v61 = vshrl.u32 %v11835_v23, 4  ;;  %v732_v23 = vshrl.u32 %v11872_v38, 4 }
 0x300   : > { %vm980_vm8 = vcmp.ne.s32.totalorder %v11767_v60, 0  ;;  %vm1016_vm9 = vcmp.lt.s32.totalorder %v11767_v60, 0  ;;  %v11799_v11 = vadd.s32 18, %v11767_v60 }
 0x301   : > { %vm11841_vm14 = vmand %vm1016_vm9, %vm980_vm8  ;;  %v11846_v25 = vsub.s32 %v11712_v33, %v667_v8  ;;  %v11864_v33 = vadd.s32 144, %v11686_v14  ;;  %v14204_v8 = vmov 0 }
 0x302   : > { %9620 = vmatmul.mubr.msk.bf16.gmra.mrb[16].mxu0 %vm14092_vm0, %v3999_v46  ;;  %v11735_v46 = vadd.s32 18, %v11714_v34  ;;  %vm11928_vm8 = vmand %vm1019_vm2, %vm983_vm1 }
 0x303   : > { %9623 = vmatprep.mubr.msk.bf16.mxu0 %vm14092_vm0, %v4000_v47  ;;  %v11738_v47 = vmul.u32.u64.low 3817748708, %v11721_v39  ;;  %v11739_v48 = vmul.u32.u64.high 3817748708, %v11721_v39, %v11738_v47  ;;  %vm986_vm4 = vcmp.ne.s32.totalorder %v11846_v25, 0  ;;  %vm1022_vm5 = vcmp.lt.s32.totalorder %v11846_v25, 0 }
 0x304   : > { %vm11942_vm12 = vmand %vm1022_vm5, %vm986_vm4  ;;  %v12096_v47 = vadd.s32 168, %v11686_v14 }
 0x305   : > { %v14205_v8 = vsel %vm11942_vm12, 4294967295, %v14204_v8 }
 0x30a   : > { %9624 = vmatmul.mubr.msk.bf16.gmra.mrb[20].mxu0 %vm14092_vm0, %v4001_v52 }
 0x30b   : > { %9627 = vmatprep.mubr.msk.bf16.mxu0 %vm14092_vm0, %v4002_v53  ;;  %v11749_v52 = vmul.u32.u64.low 3817748708, %v11729_v43  ;;  %v11750_v53 = vmul.u32.u64.high 3817748708, %v11729_v43, %v11749_v52 }
 0x30c   : > { %v11903_v51 = vmul.u32.u64.low 3817748708, %v11864_v33  ;;  %v11904_v52 = vmul.u32.u64.high 3817748708, %v11864_v33, %v11903_v51 }
 0x30d   : > { %v699_v9 = vshrl.u32 %v11750_v53, 4  ;;  %v11909_v53 = vadd.s32 18, %v11846_v25 }
 0x30f   : > { %v700_v26 = vmul.u32 18, %v699_v9 }
 0x312   : > { %9628 = vmatmul.mubr.msk.bf16.gmra.mrb[24].mxu0 %vm14092_vm0, %v4003_v58 }
 0x313   : > { %9631 = vmatprep.mubr.msk.bf16.mxu0 %vm14092_vm0, %v4004_v59  ;;  %v11763_v59 = vadd.s32 88, %v11686_v14 }
 0x315   : > { %v11786_v5 = vmul.u32.u64.low 3817748708, %v11763_v59  ;;  %v11787_v6 = vmul.u32.u64.high 3817748708, %v11763_v59, %v11786_v5 }
 0x316   : > { %v721_v5 = vshrl.u32 %v11861_v32, 4 }
 0x317   : > { %v710_v44 = vshrl.u32 %v11787_v6, 4  ;;  %v11936_v6 = vadd.s32 136, %v11686_v14 }
 0x318   : > { %v722_v38 = vmul.u32 18, %v721_v5 }
 0x319   : > { %v711_v57 = vmul.u32 18, %v710_v44  ;;  %v11982_v44 = vmul.u32.u64.low 3817748708, %v11936_v6  ;;  %v11983_v51 = vmul.u32.u64.high 3817748708, %v11936_v6, %v11982_v44 }
 0x31a   : > { %9632 = vmatmul.mubr.msk.bf16.gmra.mrb[28].mxu0 %vm14092_vm0, %v4005_v0  ;;  %v12018_v5 = vsub.s32 %v11803_v13, %v722_v38  ;;  %v12034_v13 = vadd.s32 160, %v11686_v14 }
 0x31b   : > { %9635 = vmatprep.mubr.msk.bf16.mxu0 %vm14092_vm0, %v4006_v1  ;;  %v11776_v0 = vmul.u32.u64.low 3817748708, %v11753_v55  ;;  %v11777_v1 = vmul.u32.u64.high 3817748708, %v11753_v55, %v11776_v0  ;;  %v11963_v27 = vsub.s32 %v11763_v59, %v711_v57  ;;  %v787_v59 = vshrl.u32 %v11904_v52, 4 }
 0x31c   : > { %v12105_v45 = vadd.s32 18, %v12018_v5 }
 0x31d   : > { %v677_v30 = vshrl.u32 %v11777_v1, 4  ;;  %v743_v1 = vshrl.u32 %v11850_v28, 4  ;;  %14209 = vst [vmem:[#allocation17_spill] sm:$0xff] %v11963_v27  ;;  %v689_v28 = vmul.u32 18, %v688_v61  ;;  %v755_v61 = vmul.u32 18, %v754_v22 }
 0x31e   : > { %v788_v52 = vmul.u32 18, %v787_v59 }
 0x31f   : > { %v678_v54 = vmul.u32 18, %v677_v30  ;;  %v744_v32 = vmul.u32 18, %v743_v1 }
 0x320   : > { %v733_v1 = vmul.u32 18, %v732_v23  ;;  %v12010_v23 = vmul.u32.u64.low 3817748708, %v11978_v37  ;;  %v12011_v35 = vmul.u32.u64.high 3817748708, %v11978_v37, %v12010_v23  ;;  %v12055_v59 = vsub.s32 %v11864_v33, %v788_v52 }
 0x321   : > { %v12007_v22 = vsub.s32 %v11795_v10, %v744_v32  ;;  %v12025_v10 = vsub.s32 %v11818_v17, %v755_v61  ;;  %v798_v17 = vshrl.u32 %v11975_v36, 4  ;;  %v776_v61 = vshrl.u32 %v11983_v51, 4 }
 0x322   : > { %9636 = vmatmul.mubr.msk.bf16.gmra.mrb[32].mxu0 %vm14092_vm0, %v4007_v4  ;;  %v644_v4 = vshrl.u32 %v11739_v48, 4  ;;  %v11897_v48 = vadd.s32 18, %v11831_v20  ;;  %14218 = vst [vmem:[#allocation22_spill] sm:$0xff] %v12055_v59  ;;  %v14220_v36 = vmov 0  ;;  %v12083_v23 = vadd.s32 184, %v11686_v14 }
 0x323   : > { %v777_v41 = vmul.u32 18, %v776_v61  ;;  %v12126_v61 = vadd.s32 18, %v12025_v10 }
 0x324   : > { %v645_v21 = vmul.u32 18, %v644_v4  ;;  %v14202_v4 = vmov 0 }
 0x325   : > { %v14203_v4 = vsel %vm11928_vm8, 4294967295, %v14202_v4 }
 0x326   : > { %v11883_v42 = vsub.s32 %v11721_v39, %v645_v21  ;;  %v11900_v39 = vsub.s32 %v11729_v43, %v700_v26  ;;  %v11914_v43 = vadd.s32 128, %v11686_v14  ;;  %v11950_v21 = vsub.s32 %v11753_v55, %v678_v54 }
 0x327   : > { %v14207_v26 = vmov 0  ;;  %v799_v54 = vmul.u32 18, %v798_v17  ;;  %v12138_v17 = vadd.s32 18, %v12055_v59 }
 0x328   : > { %vm984_vm6 = vcmp.ne.s32.totalorder %v11883_v42, 0  ;;  %vm1020_vm7 = vcmp.lt.s32.totalorder %v11883_v42, 0  ;;  %v11918_v0 = vadd.s32 18, %v11883_v42  ;;  %vm989_vm9 = vcmp.ne.s32.totalorder %v11900_v39, 0  ;;  %14206 = vst [vmem:[#allocation16_spill] sm:$0xff] %v11950_v21 }
 0x329   : > { %vm1025_vm10 = vcmp.lt.s32.totalorder %v11900_v39, 0  ;;  %v11947_v9 = vadd.s32 18, %v11900_v39  ;;  %vm11958_vm1 = vmand %vm1020_vm7, %vm984_vm6  ;;  %v11966_v30 = vmul.u32.u64.low 3817748708, %v11914_v43  ;;  %v11967_v55 = vmul.u32.u64.high 3817748708, %v11914_v43, %v11966_v30  ;;  %14241 = vst [vmem:[#allocation25_spill] sm:$0xff] %v12138_v17 }
 0x32a   : > { %v14208_v26 = vsel %vm11958_vm1, 4294967295, %v14207_v26  ;;  %vm11969_vm2 = vmand %vm1025_vm10, %vm989_vm9  ;;  %vm987_vm4 = vcmp.ne.s32.totalorder %v11950_v21, 0  ;;  %v12003_v30 = vsub.s32 %v11790_v7, %v689_v28  ;;  %vm1023_vm5 = vcmp.lt.s32.totalorder %v11950_v21, 0 }
 0x32b   : > { %v14211_v31 = vsel %vm11969_vm2, 4294967295, %v14210_v31  ;;  %v12014_v44 = vadd.s32 18, %v11950_v21  ;;  %vm990_vm6 = vcmp.ne.s32.totalorder %v11963_v27, 0  ;;  %v12022_v7 = vadd.s32 18, %v11963_v27  ;;  %vm12046_vm9 = vmand %vm1023_vm5, %vm987_vm4 }
 0x32c   : > { %v12028_v28 = vsub.s32 %v11821_v18, %v733_v1  ;;  %v765_v32 = vshrl.u32 %v11967_v55, 4  ;;  %v12037_v38 = vadd.s32 18, %v12003_v30  ;;  %v14215_v18 = vmov 0 }
 0x32d   : > { %14212 = vst [vmem:[#allocation18_spill] sm:$0xff] %v12014_v44  ;;  %14213 = vst [vmem:[#allocation19_spill] sm:$0xff] %v12022_v7  ;;  %v14216_v18 = vsel %vm12046_vm9, 4294967295, %v14215_v18  ;;  %v12051_v55 = vadd.s32 18, %v12007_v22  ;;  %vm14219_vm7 = vcmp.lt.s32.totalorder %v11963_v27, 0  ;;  %vm1027_vm4 = vcmp.lt.s32.totalorder %v12018_v5, 0 }
 0x32e   : > { %14214 = vst [vmem:[#allocation20_spill] sm:$0xff] %v12028_v28  ;;  %14217 = vst [vmem:[#allocation21_spill] sm:$0xff] %v14216_v18  ;;  %vm994_vm5 = vcmp.ne.s32.totalorder %v12025_v10, 0  ;;  %vm14223_vm1 = vcmp.ne.s32.totalorder %v12003_v30, 0  ;;  %vm14224_vm12 = vcmp.lt.s32.totalorder %v12003_v30, 0  ;;  %v766_v51 = vmul.u32 18, %v765_v32 }
 0x32f   : > { %vm12062_vm0 = vmand %vm14219_vm7, %vm990_vm6  ;;  %v12079_v1 = vmul.u32.u64.low 3817748708, %v12034_v13  ;;  %v12080_v52 = vmul.u32.u64.high 3817748708, %v12034_v13, %v12079_v1  ;;  %vm14227_vm6 = vcmp.ne.s32.totalorder %v12007_v22, 0  ;;  %vm14228_vm7 = vcmp.lt.s32.totalorder %v12007_v22, 0 }
 0x330   : > { %v14221_v36 = vsel %vm12062_vm0, 4294967295, %v14220_v36  ;;  %vm12074_vm8 = vmand %vm14224_vm12, %vm14223_vm1  ;;  %vm1028_vm12 = vcmp.lt.s32.totalorder %v12028_v28, 0  ;;  %v831_v32 = vshrl.u32 %v12011_v35, 4  ;;  %vm14231_vm1 = vcmp.ne.s32.totalorder %v12018_v5, 0 }
 0x331   : > { %14222 = vst [vmem:[#allocation23_spill] sm:$0xff] %v14221_v36  ;;  %vm12089_vm10 = vmand %vm14228_vm7, %vm14227_vm6  ;;  %v14232_v1 = vmov 0  ;;  %vm997_vm6 = vcmp.ne.s32.totalorder %v12055_v59, 0  ;;  %vm1033_vm7 = vcmp.lt.s32.totalorder %v12055_v59, 0  ;;  %v12129_v58 = vadd.s32 18, %v12028_v28 }
 0x332   : > { %vm12100_vm2 = vmand %vm1027_vm4, %vm14231_vm1  ;;  %vm14234_vm4 = vcmp.lt.s32.totalorder %v12025_v10, 0  ;;  %vm14238_vm9 = vcmp.ne.s32.totalorder %v12028_v28, 0  ;;  %v14239_v35 = vmov 0  ;;  %v12141_v12 = vsub.s32 %v11914_v43, %v766_v51 }
 0x333   : > { %v14233_v1 = vsel %vm12100_vm2, 4294967295, %v14232_v1  ;;  %vm12121_vm1 = vmand %vm14234_vm4, %vm994_vm5  ;;  %14237 = vst [vmem:[#allocation24_spill] sm:$0xff] %v12129_v58  ;;  %v12144_v27 = vmul.u32.u64.low 3817748708, %v12083_v23  ;;  %v12145_v7 = vmul.u32.u64.high 3817748708, %v12083_v23, %v12144_v27  ;;  %v14242_v36 = vsel %vm11741_vm3, %v11735_v46, %v11714_v34 }
 0x334   : > { %v14236_v40 = vsel %vm12121_vm1, 4294967295, %v14235_v40  ;;  %vm12133_vm15 = vmand %vm1028_vm12, %vm14238_vm9  ;;  %vm12152_vm5 = vcmp.lt.s32.totalorder %v14242_v36, 16  ;;  %v14243_v21 = vmov 0  ;;  %v14245_v44 = vmov 0 }
 0x335   : > { %v14240_v35 = vsel %vm12133_vm15, 4294967295, %v14239_v35  ;;  %v14244_v21 = vsel %vm12152_vm5, 4294967295, %v14243_v21  ;;  %vm12156_vm9 = vmand %vm1033_vm7, %vm997_vm6  ;;  %v12161_v43 = vsub.s32 %v11922_v3, %v799_v54  ;;  %v832_v51 = vmul.u32 18, %v831_v32 }
 0x336   : > { %v14246_v44 = vsel %vm12156_vm9, 4294967295, %v14245_v44  ;;  %v12164_v18 = vmul.u32.u64.low 3817748708, %v12096_v47  ;;  %v12165_v27 = vmul.u32.u64.high 3817748708, %v12096_v47, %v12164_v18  ;;  %v14248_v34 = vsel %vm11809_vm11, %v11771_v62, %v11746_v50 }
 0x337   : > { %14247 = vst [vmem:[#allocation26_spill] sm:$0xff] %v14246_v44  ;;  %vm12172_vm3 = vcmp.lt.s32.totalorder %v14248_v34, 16  ;;  %v14249_v46 = vmov 0  ;;  %v12189_v50 = vsub.s32 %v11936_v6, %v777_v41  ;;  %v14251_v62 = vsel %vm11827_vm13, %v11782_v2, %v11755_v56 }
 0x338   : > { %v14250_v46 = vsel %vm12172_vm3, 4294967295, %v14249_v46  ;;  %vm12196_vm11 = vcmp.lt.s32.totalorder %v14251_v62, 16  ;;  %v14252_v54 = vmov 0  ;;  %v12209_v6 = vadd.s32 208, %v11686_v14 }
 0x339   : > { %v14253_v54 = vsel %vm12196_vm11, 4294967295, %v14252_v54  ;;  %v14255_v56 = vsel %vm11841_vm14, %v11799_v11, %v11767_v60  ;;  %v14256_v2 = vmov 0  ;;  %vm995_vm12 = vcmp.ne.s32.totalorder %v12141_v12, 0 }
 0x33a   : > { %14254 = vst [vmem:[#allocation27_spill] sm:$0xff] %v14253_v54  ;;  %vm12219_vm13 = vcmp.lt.s32.totalorder %v14255_v56, 16  ;;  %v809_v32 = vshrl.u32 %v12080_v52, 4  ;;  %v12236_v60 = vadd.s32 18, %v12141_v12  ;;  %v12241_v11 = vsub.s32 %v11978_v37, %v832_v51 }
 0x33b   : > { %v14257_v2 = vsel %vm12219_vm13, 4294967295, %v14256_v2  ;;  %v12244_v34 = vadd.s32 18, %v12161_v43  ;;  %v12249_v52 = vadd.s32 216, %v11686_v14  ;;  %vm14259_vm4 = vcmp.lt.s32.totalorder %v12141_v12, 0 }
 0x33c   : > { %14258 = vst [vmem:[#allocation28_spill] sm:$0xff] %v14257_v2  ;;  %v12252_v56 = vmul.u32.u64.low 3817748708, %v12209_v6  ;;  %v12253_v36 = vmul.u32.u64.high 3817748708, %v12209_v6, %v12252_v56  ;;  %v12256_v41 = vmul.u32.u64.low 3817748708, %v12212_v19  ;;  %v12257_v18 = vmul.u32.u64.high 3817748708, %v12212_v19, %v12256_v41  ;;  %vm12264_vm6 = vmand %vm14259_vm4, %vm995_vm12 }
 0x33d   : > { %v14261_v15 = vsel %vm12264_vm6, 4294967295, %v14260_v15  ;;  %v12269_v3 = vadd.s32 18, %v12189_v50  ;;  %v810_v49 = vmul.u32 18, %v809_v32  ;;  %v842_v56 = vshrl.u32 %v12145_v7, 4 }
 0x33e   : > { %vm14262_vm7 = vnez %v14201_v29  ;;  %v14264_v17 = vmov 0  ;;  %vm14267_vm12 = vcmp.ne.s32.totalorder %v12161_v43, 0  ;;  %vm14268_vm4 = vcmp.lt.s32.totalorder %v12161_v43, 0 }
 0x33f   : > { %vm12286_vm9 = vmand %vm14268_vm4, %vm14267_vm12  ;;  %v14269_v32 = vmov 0  ;;  %v820_v29 = vshrl.u32 %v12165_v27, 4  ;;  %v12304_v44 = vmul.u32.u64.low 3817748708, %v12249_v52  ;;  %v12305_v28 = vmul.u32.u64.high 3817748708, %v12249_v52, %v12304_v44 }
 0x340   : > { %v14270_v32 = vsel %vm12286_vm9, 4294967295, %v14269_v32  ;;  %vm14275_vm12 = vnez %v14205_v8  ;;  %vm14281_vm1 = vcmp.lt.s32.totalorder %v12189_v50, 0  ;;  %v12330_v8 = vadd.s32 18, %v12241_v11 }
 0x3b5   : > { %v9605_v62 = vpop.f32.mrb[0].mxu0 }
 0x3b6   : > { %v4317_v37 = vadd.f32 %v9605_v62, %v12233_v24  ;;  %v4129_v51 = vpop.f32.mrb[1].mxu0  ;;  %v14263_v62 = vsel %vm14262_vm7, %v11815_v16, %v11773_v63  ;;  %vm14271_vm7 = vnez %v14203_v4  ;;  %v14277_v4 = vmov 0 }
 0x3b7   : > { %v4315_v59 = vadd.f32 %v12233_v24, %v4129_v51  ;;  %v9606_v41 = vpop.f32.mrb[2].mxu0  ;;  %vm12278_vm14 = vcmp.lt.s32.totalorder %v14263_v62, 16  ;;  %v14272_v51 = vsel %vm14271_vm7, %v11897_v48, %v11831_v20  ;;  %v14273_v62 = vmov 0  ;;  %v14304_v20 = vld [vmem:[#allocation18_spill] sm:$0xff]  ;;  %v12670_v48 = vld [vmem:[#allocation9 + $0x40] sm:$0xff]  }
 0x3b8   : > { %v14265_v17 = vsel %vm12278_vm14, 4294967295, %v14264_v17  ;;  %v4353_v7 = vmax.f32 %v4317_v37, 0.0  ;;  %v4318_v63 = vadd.f32 %v9606_v41, %v12233_v24  ;;  %v4132_v16 = vpop.f32.mrb[3].mxu0  ;;  %vm12299_vm2 = vcmp.lt.s32.totalorder %v14272_v51, 16 }
 0x3b9   : > { %14266 = vst [vmem:[#allocation29_spill] sm:$0xff] %v14265_v17  ;;  %v14274_v62 = vsel %vm12299_vm2, 4294967295, %v14273_v62  ;;  %v4351_v58 = vmax.f32 %v4315_v59, 0.0  ;;  %v4316_v27 = vadd.f32 %v12233_v24, %v4132_v16  ;;  %v14276_v37 = vsel %vm14275_vm12, %v11909_v53, %v11846_v25 }
 0x3ba   : > { %vm12313_vm4 = vcmp.lt.s32.totalorder %v14276_v37, 16  ;;  %vm14280_vm7 = vcmp.ne.s32.totalorder %v12189_v50, 0  ;;  %v4461_v25 = vsel %vm12152_vm5, %v4353_v7, 0.0  ;;  %v4354_v53 = vmax.f32 %v4318_v63, 0.0 }
 0x3bb   : > { %v14278_v4 = vsel %vm12313_vm4, 4294967295, %v14277_v4  ;;  %vm12325_vm15 = vmand %vm14281_vm1, %vm14280_vm7  ;;  %vm14284_vm12 = vnez %v14208_v26  ;;  %v14286_v59 = vmov 0  ;;  %vm14289_vm1 = vcmp.ne.s32.totalorder %v12241_v11, 0 }
 0x3bc   : > { %14279 = vst [vmem:[#allocation30_spill] sm:$0xff] %v14278_v4  ;;  %v14285_v44 = vsel %vm14284_vm12, %v11918_v0, %v11883_v42  ;;  %vm14290_vm7 = vcmp.lt.s32.totalorder %v12241_v11, 0  ;;  %v14291_v7 = vmov 0  ;;  %v12356_v26 = vsub.s32 %v12034_v13, %v810_v49  ;;  %v10798_v4 = vld [vmem:[#allocation9 + $0x8] sm:$0xff]  }
 0x3bd   : > { %vm12339_vm6 = vcmp.lt.s32.totalorder %v14285_v44, 16  ;;  %vm12351_vm5 = vmand %vm14290_vm7, %vm14289_vm1  ;;  %vm14293_vm12 = vcmask 523264   ;;  %v4459_v42 = vsel %vm12172_vm3, %v4351_v58, 0.0  ;;  %v4352_v0 = vmax.f32 %v4316_v27, 0.0 }
 0x3be   : > { %v14287_v59 = vsel %vm12339_vm6, 4294967295, %v14286_v59  ;;  %v14292_v7 = vsel %vm12351_vm5, 4294967295, %v14291_v7  ;;  %4497 = vst.msk [vmem:[#allocation3 + $0x23] sm:$0xff] %vm14293_vm12, %v4461_v25  ;;  %v843_v63 = vmul.u32 18, %v842_v56  ;;  %v821_v16 = vmul.u32 18, %v820_v29  ;;  %vm14294_vm9 = vmmov %vm14293_vm12  ;;  %v9609_v56 = vpop.f32.mrb[4].mxu0 }
 0x3bf   : > { %14288 = vst [vmem:[#allocation31_spill] sm:$0xff] %v14287_v59  ;;  %4495 = vst.msk [vmem:[#allocation3 + $0x13] sm:$0xff] %vm14294_vm9, %v4459_v42  ;;  %v4462_v51 = vsel %vm12196_vm11, %v4354_v53, 0.0  ;;  %v12369_v13 = vadd.s32 200, %v11686_v14  ;;  %v12372_v49 = vadd.s32 240, %v11686_v14  ;;  %v4460_v58 = vsel %vm12219_vm13, %v4352_v0, 0.0 }
 0x3c0   : > { %vm14295_vm1 = vmmov %vm14294_vm9  ;;  %v875_v27 = vshrl.u32 %v12253_v36, 4  ;;  %v12383_v25 = vadd.s32 224, %v11686_v14  ;;  %v4321_v53 = vadd.f32 %v9609_v56, %v12233_v24  ;;  %v4145_v44 = vpop.f32.mrb[5].mxu0  ;;  %v853_v42 = vshrl.u32 %v12257_v18, 4 }
 0x3c1   : > { %4498 = vst.msk [vmem:[#allocation3 + $0x2b] sm:$0xff] %vm14295_vm1, %v4462_v51  ;;  %vm14296_vm9 = vmmov %vm14295_vm1  ;;  %v12390_v0 = vadd.s32 248, %v11686_v14  ;;  %v4319_v51 = vadd.f32 %v12233_v24, %v4145_v44  ;;  %v9610_v29 = vpop.f32.mrb[6].mxu0  ;;  %vm14297_vm12 = vnez %v14211_v31  ;;  %v12404_v56 = vsub.s32 %v12083_v23, %v843_v63  ;;  %v14302_v31 = vld [vmem:[#allocation21_spill] sm:$0xff] }
 0x3c2   : > { %4496 = vst.msk [vmem:[#allocation3 + $0x1b] sm:$0xff] %vm14296_vm9, %v4460_v58  ;;  %v14298_v36 = vsel %vm14297_vm12, %v11947_v9, %v11900_v39  ;;  %v14299_v58 = vmov 0  ;;  %v12407_v18 = vsub.s32 %v12096_v47, %v821_v16  ;;  %v4357_v37 = vmax.f32 %v4321_v53, 0.0  ;;  %v4148_v41 = vpop.f32.mrb[7].mxu0  ;;  %v14305_v39 = vld [vmem:[#allocation16_spill] sm:$0xff]  ;;  %v14311_v53 = vld [vmem:[#allocation17_spill] sm:$0xff] }
 0x3c3   : > { %vm12398_vm1 = vcmp.lt.s32.totalorder %v14298_v36, 16  ;;  %v4322_v44 = vadd.f32 %v9610_v29, %v12233_v24  ;;  %vm14303_vm7 = vnez %v14302_v31  ;;  %v14307_v36 = vmov 0  ;;  %v14310_v29 = vld [vmem:[#allocation19_spill] sm:$0xff] }
 0x3c4   : > { %v14300_v58 = vsel %vm12398_vm1, 4294967295, %v14299_v58  ;;  %v14306_v9 = vsel %vm14303_vm7, %v14304_v20, %v14305_v39  ;;  %v12420_v54 = vmul.u32.u64.low 3817748708, %v12369_v13  ;;  %v12421_v23 = vmul.u32.u64.high 3817748708, %v12369_v13, %v12420_v54 }
 0x3c5   : > { %14301 = vst [vmem:[#allocation32_spill] sm:$0xff] %v14300_v58  ;;  %vm12415_vm12 = vcmp.lt.s32.totalorder %v14306_v9, 16  ;;  %v4355_v63 = vmax.f32 %v4319_v51, 0.0  ;;  %v4320_v47 = vadd.f32 %v12233_v24, %v4148_v41  ;;  %v14312_v2 = vsel %vm12062_vm0, %v14310_v29, %v14311_v53 }
 0x3c6   : > { %v14308_v36 = vsel %vm12415_vm12, 4294967295, %v14307_v36  ;;  %vm12429_vm9 = vcmp.lt.s32.totalorder %v14312_v2, 16  ;;  %v14313_v31 = vmov 0  ;;  %v12434_v20 = vadd.s32 18, %v12356_v26 }
 0x3c7   : > { %v14314_v31 = vsel %vm12429_vm9, 4294967295, %v14313_v31  ;;  %v876_v39 = vmul.u32 18, %v875_v27  ;;  %v4465_v9 = vsel %vm12278_vm14, %v4357_v37, 0.0  ;;  %v4358_v54 = vmax.f32 %v4322_v44, 0.0 }
 0x3c8   : > { %14315 = vst [vmem:[#allocation21_spill] sm:$0xff] %v14314_v31  ;;  %v14316_v41 = vsel %vm12074_vm8, %v12037_v38, %v12003_v30  ;;  %v14317_v51 = vmov 0  ;;  %vm14320_vm0 = vcmp.ne.s32.totalorder %v12356_v26, 0  ;;  %vm14321_vm11 = vcmp.lt.s32.totalorder %v12356_v26, 0  ;;  %v4598_v44 = vld [vmem:[#allocation3 + $0x29] sm:$0xff] }
 0x3c9   : > { %vm12443_vm7 = vcmp.lt.s32.totalorder %v14316_v41, 16  ;;  %vm12451_vm13 = vmand %vm14321_vm11, %vm14320_vm0  ;;  %v854_v27 = vmul.u32 18, %v853_v42  ;;  %v886_v37 = vshrl.u32 %v12305_v28, 4  ;;  %vm14324_vm14 = vcmask 523264   ;;  %v4596_v16 = vld [vmem:[#allocation3 + $0x19] sm:$0xff]  ;;  %v4597_v29 = vld [vmem:[#allocation3 + $0x21] sm:$0xff] }
 0x3ca   : > { %v14318_v51 = vsel %vm12443_vm7, 4294967295, %v14317_v51  ;;  %4501 = vst.msk [vmem:[#allocation3 + $0x43] sm:$0xff] %vm14324_vm14, %v4465_v9  ;;  %v4463_v30 = vsel %vm12299_vm2, %v4355_v63, 0.0  ;;  %v4356_v38 = vmax.f32 %v4320_v47, 0.0  ;;  %vm1002_vm8 = vcmp.ne.s32.totalorder %v12404_v56, 0  ;;  %vm14325_vm5 = vmmov %vm14324_vm14  ;;  %v9613_v63 = vpop.f32.mrb[8].mxu0 }
 0x3cb   : > { %14319 = vst [vmem:[#allocation18_spill] sm:$0xff] %v14318_v51  ;;  %vm1038_vm3 = vcmp.lt.s32.totalorder %v12404_v56, 0  ;;  %4499 = vst.msk [vmem:[#allocation3 + $0x33] sm:$0xff] %vm14325_vm5, %v4463_v30  ;;  %v4466_v33 = vsel %vm12313_vm4, %v4358_v54, 0.0  ;;  %v12465_v42 = vadd.s32 18, %v12404_v56  ;;  %v4595_v47 = vld [vmem:[#allocation3 + $0x11] sm:$0xff]  ;;  %v12480_v54 = vsub.s32 %v12209_v6, %v876_v39 }
 0x3cc   : > { %vm14326_vm0 = vmmov %vm14325_vm5  ;;  %v4464_v28 = vsel %vm12339_vm6, %v4356_v38, 0.0  ;;  %v12477_v9 = vadd.s32 18, %v12407_v18  ;;  %v4325_v41 = vadd.f32 %v9613_v63, %v12233_v24  ;;  %v4161_v30 = vpop.f32.mrb[9].mxu0  ;;  %v4630_v38 = vpack.c.bf16 %v4596_v16, %v4595_v47  ;;  %v14356_v31 = vld [vmem:[#allocation26_spill] sm:$0xff] }
 0x3cd   : > { %4502 = vst.msk [vmem:[#allocation3 + $0x4b] sm:$0xff] %vm14326_vm0, %v4466_v33  ;;  %vm14327_vm5 = vmmov %vm14326_vm0  ;;  %v4631_v33 = vpack.c.bf16 %v4598_v44, %v4597_v29  ;;  %v12485_v59 = vsub.s32 %v12212_v19, %v854_v27  ;;  %v4323_v17 = vadd.f32 %v12233_v24, %v4161_v30  ;;  %v9614_v53 = vpop.f32.mrb[10].mxu0  ;;  %v14328_v6 = vsel %vm12089_vm10, %v12051_v55, %v12007_v22  ;;  %v14359_v51 = vld [vmem:[#allocation22_spill] sm:$0xff] }
 0x3ce   : > { %4500 = vst.msk [vmem:[#allocation3 + $0x3b] sm:$0xff] %vm14327_vm5, %v4464_v28  ;;  %vm12493_vm0 = vcmp.lt.s32.totalorder %v14328_v6, 16  ;;  %v14329_v39 = vmov 0  ;;  %v887_v28 = vmul.u32 18, %v886_v37  ;;  %v4361_v47 = vmax.f32 %v4325_v41, 0.0  ;;  %v4164_v27 = vpop.f32.mrb[11].mxu0  ;;  %9648 = vmatmul.mubr.msk.bf16.vlgmr.msra.gmra.mrb[0].mxu1 %vm14327_vm5, %v4630_v38  ;;  %vm14335_vm11 = vmmov %vm14327_vm5 }
 0x3cf   : > { %v14330_v39 = vsel %vm12493_vm0, 4294967295, %v14329_v39  ;;  %v12498_v63 = vmul.u32.u64.low 3817748708, %v12372_v49  ;;  %v12499_v44 = vmul.u32.u64.high 3817748708, %v12372_v49, %v12498_v63  ;;  %v4326_v19 = vadd.f32 %v9614_v53, %v12233_v24  ;;  %9651 = vmatprep.mubr.msk.bf16.mxu1 %vm14335_vm11, %v4631_v33  ;;  %v14336_v53 = vld [vmem:[#allocation15_spill] sm:$0xff]  ;;  %vm12532_vm4 = vmand %vm1038_vm3, %vm1002_vm8  ;;  %v10799_v38 = vld [vmem:[#allocation9 + $0x10] sm:$0xff]  }
 0x3d0   : > { %vm14331_vm14 = vnez %v14233_v1  ;;  %v864_v55 = vshrl.u32 %v12421_v23, 4  ;;  %v12514_v37 = vadd.s32 232, %v11686_v14  ;;  %v4359_v16 = vmax.f32 %v4323_v17, 0.0  ;;  %9684 = vmatpush3.bf16.msra.mxu1 %v14336_v53  ;;  %v14344_v17 = vld [vmem:[#allocation24_spill] sm:$0xff] }
 0x3d1   : > { %v14332_v57 = vsel %vm14331_vm14, %v12105_v45, %v12018_v5  ;;  %v4324_v29 = vadd.f32 %v12233_v24, %v4164_v27  ;;  %vm14337_vm5 = vnez %v14236_v40  ;;  %v14339_v5 = vmov 0  ;;  %9685 = vmatprep.subr.bf16.mxu1 %v10798_v4 }
 0x3d2   : > { %vm12508_vm10 = vcmp.lt.s32.totalorder %v14332_v57, 16  ;;  %v14338_v45 = vsel %vm14337_vm5, %v12126_v61, %v12025_v10  ;;  %v4469_v40 = vsel %vm12398_vm1, %v4361_v47, 0.0  ;;  %v4362_v10 = vmax.f32 %v4326_v19, 0.0  ;;  %v14345_v61 = vld [vmem:[#allocation20_spill] sm:$0xff] }
 0x3d3   : > { %vm12524_vm14 = vcmp.lt.s32.totalorder %v14338_v45, 16  ;;  %vm14343_vm5 = vnez %v14240_v35  ;;  %v14347_v41 = vmov 0  ;;  %vm14349_vm3 = vcmp.ne.s32.totalorder %v12407_v18, 0 }
 0x3d4   : > { %v14340_v5 = vsel %vm12524_vm14, 4294967295, %v14339_v5  ;;  %v14346_v23 = vsel %vm14343_vm5, %v14344_v17, %v14345_v61  ;;  %vm14350_vm8 = vcmp.lt.s32.totalorder %v12407_v18, 0  ;;  %vm14353_vm6 = vcmask 523264   ;;  %v4602_v27 = vld [vmem:[#allocation3 + $0x49] sm:$0xff]  ;;  %9686 = vmatpush3.bf16.msra.mxu1 %v10798_v4 }
 0x3d5   : > { %vm12545_vm2 = vcmp.lt.s32.totalorder %v14346_v23, 16  ;;  %vm12553_vm11 = vmand %vm14350_vm8, %vm14349_vm3  ;;  %v12558_v33 = vmul.u32.u64.low 3817748708, %v12383_v25  ;;  %v12559_v35 = vmul.u32.u64.high 3817748708, %v12383_v25, %v12558_v33  ;;  %4505 = vst.msk [vmem:[#allocation3 + $0x63] sm:$0xff] %vm14353_vm6, %v4469_v40  ;;  %v4467_v6 = vsel %vm12415_vm12, %v4359_v16, 0.0  ;;  %v4599_v40 = vld [vmem:[#allocation3 + $0x31] sm:$0xff]  ;;  %9687 = vmatprep.subr.bf16.mxu1 %v10799_v38 }
 0x3d6   : > { %v14348_v41 = vsel %vm12545_vm2, 4294967295, %v14347_v41  ;;  %v4360_v63 = vmax.f32 %v4324_v29, 0.0  ;;  %v12565_v47 = vadd.s32 18, %v12480_v54  ;;  %vm14354_vm3 = vmmov %vm14353_vm6  ;;  %v4470_v19 = vsel %vm12429_vm9, %v4362_v10, 0.0  ;;  %v9617_v29 = vpop.f32.mrb[12].mxu0  ;;  %v4600_v17 = vld [vmem:[#allocation3 + $0x39] sm:$0xff] }
 0x3d7   : > { %4503 = vst.msk [vmem:[#allocation3 + $0x53] sm:$0xff] %vm14354_vm3, %v4467_v6  ;;  %v865_v57 = vmul.u32 18, %v864_v55  ;;  %v12572_v53 = vmul.u32.u64.low 3817748708, %v12390_v0  ;;  %v12573_v45 = vmul.u32.u64.high 3817748708, %v12390_v0, %v12572_v53  ;;  %vm14355_vm6 = vmmov %vm14354_vm3  ;;  %v4601_v61 = vld [vmem:[#allocation3 + $0x41] sm:$0xff]  ;;  %v4329_v23 = vadd.f32 %v9617_v29, %v12233_v24  ;;  %v4177_v33 = vpop.f32.mrb[13].mxu0 }
 0x3d8   : > { %4506 = vst.msk [vmem:[#allocation3 + $0x6b] sm:$0xff] %vm14355_vm6, %v4470_v19  ;;  %v4468_v16 = vsel %vm12443_vm7, %v4360_v63, 0.0  ;;  %v4632_v6 = vpack.c.bf16 %v4600_v17, %v4599_v40  ;;  %v4633_v63 = vpack.c.bf16 %v4602_v27, %v4601_v61  ;;  %v12590_v4 = vsub.s32 %v12249_v52, %v887_v28  ;;  %v10800_v19 = vld [vmem:[#allocation9 + $0x18] sm:$0xff]   ;;  %v9618_v10 = vpop.f32.mrb[14].mxu0  ;;  %v14358_v55 = vld [vmem:[#allocation25_spill] sm:$0xff]  ;;  %vm14367_vm9 = vmmov %vm14354_vm3  ;;  %9688 = vmatpush3.bf16.msra.mxu1 %v10799_v38 }
 0x3d9   : > { %4504 = vst.msk [vmem:[#allocation3 + $0x5b] sm:$0xff] %vm14354_vm3, %v4468_v16  ;;  %v4327_v53 = vadd.f32 %v12233_v24, %v4177_v33  ;;  %vm14357_vm6 = vnez %v14356_v31  ;;  %v14361_v16 = vmov 0  ;;  %v12603_v29 = vadd.s32 18, %v12485_v59  ;;  %v4180_v17 = vpop.f32.mrb[15].mxu0  ;;  %9689 = vmatprep.subr.bf16.mxu1 %v10800_v19 }
 0x3da   : > { %v14360_v58 = vsel %vm14357_vm6, %v14358_v55, %v14359_v51  ;;  %v919_v52 = vshrl.u32 %v12499_v44, 4  ;;  %v12607_v28 = vadd.s32 272, %v11686_v14  ;;  %v4365_v27 = vmax.f32 %v4329_v23, 0.0  ;;  %9652 = vmatmul.mubr.msk.bf16.gmra.mrb[4].mxu1 %vm14354_vm3, %v4632_v6 }
 0x3db   : > { %vm12598_vm8 = vcmp.lt.s32.totalorder %v14360_v58, 16  ;;  %v4330_v40 = vadd.f32 %v9618_v10, %v12233_v24  ;;  %vm14363_vm6 = vnez %v14261_v15  ;;  %v14365_v31 = vmov 0  ;;  %9655 = vmatprep.mubr.msk.bf16.mxu1 %vm14367_vm9, %v4633_v63 }
 0x3dc   : > { %v14362_v16 = vsel %vm12598_vm8, 4294967295, %v14361_v16  ;;  %v14364_v58 = vsel %vm14363_vm6, %v12236_v60, %v12141_v12  ;;  %v12621_v51 = vsub.s32 %v12369_v13, %v865_v57  ;;  %v12624_v44 = vadd.s32 256, %v11686_v14  ;;  %9690 = vmatpush3.bf16.msra.mxu1 %v10800_v19 }
 0x3dd   : > { %vm12616_vm5 = vcmp.lt.s32.totalorder %v14364_v58, 16  ;;  %v4363_v61 = vmax.f32 %v4327_v53, 0.0  ;;  %v4328_v10 = vadd.f32 %v12233_v24, %v4180_v17  ;;  %vm14368_vm3 = vnez %v14270_v32  ;;  %9727 = vmatprep.subr.bf16.mxu1 %v12670_v48 }
 0x3de   : > { %v14366_v31 = vsel %vm12616_vm5, 4294967295, %v14365_v31  ;;  %v14369_v12 = vsel %vm14368_vm3, %v12244_v34, %v12161_v43  ;;  %v14370_v15 = vmov 0  ;;  %vm14372_vm7 = vcmp.ne.s32.totalorder %v12480_v54, 0  ;;  %v4603_v17 = vld [vmem:[#allocation3 + $0x51] sm:$0xff] }
 0x3df   : > { %vm12633_vm6 = vcmp.lt.s32.totalorder %v14369_v12, 16  ;;  %vm14373_vm1 = vcmp.lt.s32.totalorder %v12480_v54, 0  ;;  %v12646_v13 = vmul.u32.u64.low 3817748708, %v12514_v37  ;;  %v12647_v57 = vmul.u32.u64.high 3817748708, %v12514_v37, %v12646_v13  ;;  %v4606_v63 = vld [vmem:[#allocation3 + $0x69] sm:$0xff] }
 0x3e0   : > { %v14371_v15 = vsel %vm12633_vm6, 4294967295, %v14370_v15  ;;  %vm12641_vm12 = vmand %vm14373_vm1, %vm14372_vm7  ;;  %v4473_v43 = vsel %vm12493_vm0, %v4365_v27, 0.0  ;;  %v4366_v34 = vmax.f32 %v4330_v40, 0.0  ;;  %v14376_v32 = vsel %vm12325_vm15, %v12269_v3, %v12189_v50  ;;  %v9621_v40 = vpop.f32.mrb[16].mxu0  ;;  %v4604_v58 = vld [vmem:[#allocation3 + $0x59] sm:$0xff] }
 0x3e1   : > { %vm12656_vm9 = vcmp.lt.s32.totalorder %v14376_v32, 16  ;;  %v14377_v55 = vmov 0  ;;  %vm14379_vm1 = vcmp.ne.s32.totalorder %v12485_v59, 0  ;;  %vm14380_vm7 = vcmp.lt.s32.totalorder %v12485_v59, 0 }
 0x3e2   : > { %v14378_v55 = vsel %vm12656_vm9, 4294967295, %v14377_v55  ;;  %vm12664_vm3 = vmand %vm14380_vm7, %vm14379_vm1  ;;  %vm1006_vm0 = vcmp.ne.s32.totalorder %v12590_v4, 0  ;;  %v897_v23 = vshrl.u32 %v12559_v35, 4  ;;  %vm14383_vm15 = vcmask 523264  }
 0x3e3   : > { %4509 = vst.msk [vmem:[#allocation3 + $0x83] sm:$0xff] %vm14383_vm15, %v4473_v43  ;;  %v4471_v3 = vsel %vm12508_vm10, %v4363_v61, 0.0  ;;  %v4364_v50 = vmax.f32 %v4328_v10, 0.0  ;;  %v920_v33 = vmul.u32 18, %v919_v52  ;;  %vm14384_vm1 = vmmov %vm14383_vm15  ;;  %v4474_v6 = vsel %vm12524_vm14, %v4366_v34, 0.0  ;;  %v4605_v61 = vld [vmem:[#allocation3 + $0x61] sm:$0xff] }
 0x3e4   : > { %4507 = vst.msk [vmem:[#allocation3 + $0x73] sm:$0xff] %vm14384_vm1, %v4471_v3  ;;  %v12680_v35 = vadd.s32 18, %v12590_v4  ;;  %v12683_v53 = vadd.s32 280, %v11686_v14  ;;  %v12686_v27 = vadd.s32 264, %v11686_v14  ;;  %vm14385_vm7 = vmmov %vm14384_vm1  ;;  %v930_v13 = vshrl.u32 %v12573_v45, 4  ;;  %v4193_v34 = vpop.f32.mrb[17].mxu0 }
 0x3e5   : > { %4510 = vst.msk [vmem:[#allocation3 + $0x8b] sm:$0xff] %vm14385_vm7, %v4474_v6  ;;  %v4472_v52 = vsel %vm12545_vm2, %v4364_v50, 0.0  ;;  %vm14386_vm7 = vmmov %vm14384_vm1  ;;  %v4333_v43 = vadd.f32 %v9621_v40, %v12233_v24  ;;  %v4634_v32 = vpack.c.bf16 %v4604_v58, %v4603_v17  ;;  %v4635_v3 = vpack.c.bf16 %v4606_v63, %v4605_v61  ;;  %v9622_v12 = vpop.f32.mrb[18].mxu0 }
 0x3e6   : > { %4508 = vst.msk [vmem:[#allocation3 + $0x7b] sm:$0xff] %vm14386_vm7, %v4472_v52  ;;  %v898_v50 = vmul.u32 18, %v897_v23  ;;  %v4331_v6 = vadd.f32 %v12233_v24, %v4193_v34  ;;  %vm14387_vm15 = vnez %v14292_v7  ;;  %v12716_v19 = vsub.s32 %v12372_v49, %v920_v33  ;;  %v4196_v17 = vpop.f32.mrb[19].mxu0  ;;  %vm14394_vm9 = vmmov %vm14386_vm7 }
 0x3e7   : > { %v14388_v10 = vsel %vm14387_vm15, %v12330_v8, %v12241_v11  ;;  %v12719_v63 = vmul.u32.u64.low 3817748708, %v12607_v28  ;;  %v12720_v23 = vmul.u32.u64.high 3817748708, %v12607_v28, %v12719_v63  ;;  %v4369_v52 = vmax.f32 %v4333_v43, 0.0  ;;  %9656 = vmatmul.mubr.msk.bf16.gmra.mrb[8].mxu1 %vm14386_vm7, %v4634_v32 }
 0x3e8   : > { %vm12711_vm1 = vcmp.lt.s32.totalorder %v14388_v10, 16  ;;  %v4334_v40 = vadd.f32 %v9622_v12, %v12233_v24  ;;  %v14391_v11 = vsel %vm12451_vm13, %v12434_v20, %v12356_v26  ;;  %v4367_v33 = vmax.f32 %v4331_v6, 0.0  ;;  %9659 = vmatprep.mubr.msk.bf16.mxu1 %vm14394_vm9, %v4635_v3  ;;  %v9625_v6 = vpop.f32.mrb[20].mxu0 }
 0x3e9   : > { %vm12729_vm15 = vcmp.lt.s32.totalorder %v14391_v11, 16  ;;  %v12734_v7 = vmul.u32.u64.low 3817748708, %v12624_v44  ;;  %v12735_v49 = vmul.u32.u64.high 3817748708, %v12624_v44, %v12734_v7  ;;  %v4332_v58 = vadd.f32 %v12233_v24, %v4196_v17 }
 0x3ea   : > { %v14395_v2 = vsel %vm12532_vm4, %v12465_v42, %v12404_v56  ;;  %v14396_v26 = vmov 0  ;;  %v12749_v20 = vadd.s32 18, %v12621_v51  ;;  %v931_v61 = vmul.u32 18, %v930_v13 }
 0x3eb   : > { %vm12744_vm7 = vcmp.lt.s32.totalorder %v14395_v2, 16  ;;  %v4477_v10 = vsel %vm12598_vm8, %v4369_v52, 0.0  ;;  %v4370_v12 = vmax.f32 %v4334_v40, 0.0  ;;  %v14398_v1 = vsel %vm12553_vm11, %v12477_v9, %v12407_v18  ;;  %v4607_v63 = vld [vmem:[#allocation3 + $0x71] sm:$0xff] }
 0x3ec   : > { %v14397_v26 = vsel %vm12744_vm7, 4294967295, %v14396_v26  ;;  %vm12758_vm13 = vcmp.lt.s32.totalorder %v14398_v1, 16  ;;  %vm14401_vm4 = vcmp.lt.s32.totalorder %v12590_v4, 0  ;;  %v12771_v42 = vsub.s32 %v12383_v25, %v898_v50  ;;  %v4610_v3 = vld [vmem:[#allocation3 + $0x89] sm:$0xff] }
 0x3ed   : > { %vm12766_vm9 = vmand %vm14401_vm4, %vm1006_vm0  ;;  %v908_v30 = vshrl.u32 %v12647_v57, 4  ;;  %vm14404_vm8 = vcmask 523264   ;;  %v4475_v18 = vsel %vm12616_vm5, %v4367_v33, 0.0  ;;  %v4368_v9 = vmax.f32 %v4332_v58, 0.0  ;;  %v4608_v52 = vld [vmem:[#allocation3 + $0x79] sm:$0xff]  ;;  %v4609_v40 = vld [vmem:[#allocation3 + $0x81] sm:$0xff] }
 0x3ee   : > { %4513 = vst.msk [vmem:[#allocation3 + $0xa3] sm:$0xff] %vm14404_vm8, %v4477_v10  ;;  %v12778_v13 = vmul.u32.u64.low 3817748708, %v12683_v53  ;;  %v12779_v34 = vmul.u32.u64.high 3817748708, %v12683_v53, %v12778_v13  ;;  %vm14405_vm11 = vmmov %vm14404_vm8  ;;  %v4478_v32 = vsel %vm12633_vm6, %v4370_v12, 0.0  ;;  %vm14406_vm4 = vnez %v14378_v55  ;;  %v4209_v33 = vpop.f32.mrb[21].mxu0 }
 0x3ef   : > { %4511 = vst.msk [vmem:[#allocation3 + $0x93] sm:$0xff] %vm14405_vm11, %v4475_v18  ;;  %v12786_v25 = vmul.u32.u64.low 3817748708, %v12686_v27  ;;  %v12787_v57 = vmul.u32.u64.high 3817748708, %v12686_v27, %v12786_v25  ;;  %v4476_v50 = vsel %vm14406_vm4, %v4368_v9, 0.0  ;;  %v1150_v17 = vsel %vm12766_vm9, %v12680_v35, %v12590_v4  ;;  %vm14407_vm0 = vmmov %vm14404_vm8  ;;  %v9626_v1 = vpop.f32.mrb[22].mxu0 }
 0x3f0   : > { %4514 = vst.msk [vmem:[#allocation3 + $0xab] sm:$0xff] %vm14404_vm8, %v4478_v32  ;;  %v12798_v11 = vsub.s32 %v12390_v0, %v931_v61  ;;  %v4337_v7 = vadd.f32 %v9625_v6, %v12233_v24  ;;  %v4636_v58 = vpack.c.bf16 %v4608_v52, %v4607_v63  ;;  %v4637_v2 = vpack.c.bf16 %v4610_v3, %v4609_v40  ;;  %v4212_v18 = vpop.f32.mrb[23].mxu0  ;;  %vm14411_vm11 = vmmov %vm14407_vm0 }
 0x3f1   : > { %4512 = vst.msk [vmem:[#allocation3 + $0x9b] sm:$0xff] %vm14407_vm0, %v4476_v50  ;;  %v12803_v10 = vadd.s32 18, %v12716_v19  ;;  %v4335_v12 = vadd.f32 %v12233_v24, %v4209_v33  ;;  %v14408_v4 = vsel %vm12641_vm12, %v12565_v47, %v12480_v54  ;;  %v14409_v0 = vmov 0 }
 0x3f2   : > { %vm12811_vm9 = vcmp.lt.s32.totalorder %v14408_v4, 16  ;;  %v909_v35 = vmul.u32 18, %v908_v30  ;;  %v4373_v61 = vmax.f32 %v4337_v7, 0.0  ;;  %v4338_v56 = vadd.f32 %v9626_v1, %v12233_v24  ;;  %9660 = vmatmul.mubr.msk.bf16.gmra.mrb[12].mxu1 %vm14411_vm11, %v4636_v58 }
 0x3f3   : > { %v14410_v0 = vsel %vm12811_vm9, 4294967295, %v14409_v0  ;;  %v14412_v54 = vsel %vm12664_vm3, %v12603_v29, %v12485_v59  ;;  %v14413_v47 = vmov 0  ;;  %vm14415_vm0 = vcmp.ne.s32.totalorder %v12621_v51, 0  ;;  %vm14419_vm3 = vmmov %vm14411_vm11 }
 0x3f4   : > { %vm12824_vm12 = vcmp.lt.s32.totalorder %v14412_v54, 16  ;;  %vm14416_vm8 = vcmp.lt.s32.totalorder %v12621_v51, 0  ;;  %v12837_v30 = vadd.s32 18, %v12771_v42  ;;  %v963_v38 = vshrl.u32 %v12720_v23, 4  ;;  %9663 = vmatprep.mubr.msk.bf16.mxu1 %vm14419_vm3, %v4637_v2  ;;  %v9629_v2 = vpop.f32.mrb[24].mxu0 }
 0x3f5   : > { %v14414_v47 = vsel %vm12824_vm12, 4294967295, %v14413_v47  ;;  %vm12832_vm6 = vmand %vm14416_vm8, %vm14415_vm0  ;;  %v4371_v9 = vmax.f32 %v4335_v12, 0.0  ;;  %v4336_v59 = vadd.f32 %v12233_v24, %v4212_v18  ;;  %vm14420_vm11 = vcmp.ne.s32.totalorder %v12716_v19, 0 }
 0x3f6   : > { %vm14421_vm4 = vcmp.lt.s32.totalorder %v12716_v19, 0  ;;  %vm1010_vm0 = vcmp.ne.s32.totalorder %v12798_v11, 0  ;;  %v4481_v23 = vsel %vm12711_vm1, %v4373_v61, 0.0  ;;  %v4374_v13 = vmax.f32 %v4338_v56, 0.0  ;;  %v4611_v12 = vld [vmem:[#allocation3 + $0x91] sm:$0xff]  ;;  %v4225_v61 = vpop.f32.mrb[25].mxu0 }
 0x3f7   : > { %vm12846_vm5 = vmand %vm14421_vm4, %vm14420_vm11  ;;  %vm12854_vm14 = vcmp.lt.s32.totalorder %v1150_v17, 16  ;;  %v14424_v32 = vmov 0  ;;  %vm14426_vm3 = vcmp.ne.s32.totalorder %v12771_v42, 0  ;;  %vm14427_vm2 = vcmp.lt.s32.totalorder %v12771_v42, 0  ;;  %v4614_v17 = vld [vmem:[#allocation3 + $0xa9] sm:$0xff] }
 0x3f8   : > { %v14425_v32 = vsel %vm12854_vm14, 4294967295, %v14424_v32  ;;  %vm12862_vm4 = vmand %vm14427_vm2, %vm14426_vm3  ;;  %v941_v25 = vshrl.u32 %v12735_v49, 4  ;;  %vm14430_vm11 = vcmask 523264   ;;  %v4479_v50 = vsel %vm12729_vm15, %v4371_v9, 0.0 }
 0x3f9   : > { %4517 = vst.msk [vmem:[#allocation3 + $0xc3] sm:$0xff] %vm14430_vm11, %v4481_v23  ;;  %v4372_v6 = vmax.f32 %v4336_v59, 0.0  ;;  %v1118_v63 = vadd.s32 18, %v12798_v11  ;;  %v12872_v52 = vsub.s32 %v12514_v37, %v909_v35  ;;  %vm14431_vm8 = vmmov %vm14430_vm11  ;;  %v4482_v40 = vsel %vm12744_vm7, %v4374_v13, 0.0 }
 0x3fa   : > { %4515 = vst.msk [vmem:[#allocation3 + $0xb3] sm:$0xff] %vm14431_vm8, %v4479_v50  ;;  %v1148_v49 = vsel %vm12832_vm6, %v12749_v20, %v12621_v51  ;;  %vm14432_vm2 = vcmp.lt.s32.totalorder %v12798_v11, 0  ;;  %v964_v37 = vmul.u32 18, %v963_v38  ;;  %v974_v33 = vshrl.u32 %v12779_v34, 4  ;;  %4518 = vst.msk [vmem:[#allocation3 + $0xcb] sm:$0xff] %vm14431_vm8, %v4482_v40  ;;  %v4612_v51 = vld [vmem:[#allocation3 + $0x99] sm:$0xff] }
 0x3fb   : > { %vm12885_vm3 = vmand %vm14432_vm2, %vm1010_vm0  ;;  %v4480_v58 = vsel %vm12758_vm13, %v4372_v6, 0.0  ;;  %v4613_v20 = vld [vmem:[#allocation3 + $0xa1] sm:$0xff]  ;;  %v1153_v1 = vsel %vm12846_vm5, %v12803_v10, %v12716_v19  ;;  %v1151_v4 = vsel %vm12862_vm4, %v12837_v30, %v12771_v42  ;;  %v952_v34 = vshrl.u32 %v12787_v57, 4  ;;  %v9630_v38 = vpop.f32.mrb[26].mxu0 }
 0x3fc   : > { %vm14435_vm6 = vmmov %vm14431_vm8  ;;  %v4341_v35 = vadd.f32 %v9629_v2, %v12233_v24  ;;  %v4638_v56 = vpack.c.bf16 %v4612_v51, %v4611_v12  ;;  %v4639_v18 = vpack.c.bf16 %v4614_v17, %v4613_v20  ;;  %v942_v54 = vmul.u32 18, %v941_v25  ;;  %v4228_v10 = vpop.f32.mrb[27].mxu0 }
 0x3fd   : > { %4516 = vst.msk [vmem:[#allocation3 + $0xbb] sm:$0xff] %vm14435_vm6, %v4480_v58  ;;  %v4339_v60 = vadd.f32 %v12233_v24, %v4225_v61  ;;  %v1154_v19 = vsel %vm12885_vm3, %v1118_v63, %v12798_v11  ;;  %vm1008_vm5 = vcmp.ne.s32.totalorder %v12872_v52, 0  ;;  %vm1044_vm0 = vcmp.lt.s32.totalorder %v12872_v52, 0  ;;  %vm14436_vm4 = vmmov %vm14435_vm6  ;;  %v9633_v58 = vpop.f32.mrb[28].mxu0 }
 0x3fe   : > { %v4377_v42 = vmax.f32 %v4341_v35, 0.0  ;;  %v4342_v57 = vadd.f32 %v9630_v38, %v12233_v24  ;;  %9664 = vmatmul.mubr.msk.bf16.gmra.mrb[16].mxu1 %vm14436_vm4, %v4638_v56  ;;  %v12913_v30 = vsub.s32 %v12607_v28, %v964_v37  ;;  %v975_v9 = vmul.u32 18, %v974_v33  ;;  %vm14437_vm11 = vmmov %vm14436_vm4 }
 0x3ff   : > { %v4375_v59 = vmax.f32 %v4339_v60, 0.0  ;;  %v4340_v29 = vadd.f32 %v12233_v24, %v4228_v10  ;;  %9667 = vmatprep.mubr.msk.bf16.mxu1 %vm14437_vm11, %v4639_v18  ;;  %v1116_v11 = vadd.s32 18, %v12872_v52  ;;  %v953_v23 = vmul.u32 18, %v952_v34  ;;  %vm12932_vm8 = vmand %vm1044_vm0, %vm1008_vm5 }
 0x400   : > { %v4485_v13 = vsel %vm12811_vm9, %v4377_v42, 0.0  ;;  %v4378_v3 = vmax.f32 %v4342_v57, 0.0  ;;  %vm12920_vm2 = vcmp.lt.s32.totalorder %v1148_v49, 16  ;;  %v14438_v25 = vmov 0  ;;  %vm14444_vm6 = vmmov %vm14436_vm4 }
 0x401   : > { %v14439_v25 = vsel %vm12920_vm2, 4294967295, %v14438_v25  ;;  %vm12924_vm3 = vcmp.lt.s32.totalorder %v1153_v1, 16  ;;  %v14440_v28 = vmov 0  ;;  %4521 = vst.msk [vmem:[#allocation3 + $0xe3] sm:$0xff] %vm14444_vm6, %v4485_v13  ;;  %v4483_v6 = vsel %vm12824_vm12, %v4375_v59, 0.0  ;;  %vm14447_vm11 = vmmov %vm14444_vm6  ;;  %v4618_v37 = vld [vmem:[#allocation3 + $0xc9] sm:$0xff] }
 0x402   : > { %v14441_v28 = vsel %vm12924_vm3, 4294967295, %v14440_v28  ;;  %v4376_v63 = vmax.f32 %v4340_v29, 0.0  ;;  %vm12939_vm4 = vcmp.lt.s32.totalorder %v1151_v4, 16  ;;  %v12944_v49 = vsub.s32 %v12624_v44, %v942_v54  ;;  %4519 = vst.msk [vmem:[#allocation3 + $0xd3] sm:$0xff] %vm14447_vm11, %v4483_v6  ;;  %v4615_v12 = vld [vmem:[#allocation3 + $0xb1] sm:$0xff]  ;;  %vm14450_vm0 = vmmov %vm14444_vm6  ;;  %v4241_v4 = vpop.f32.mrb[29].mxu0 }
 0x403   : > { %v4486_v17 = vsel %vm12854_vm14, %v4378_v3, 0.0  ;;  %vm12949_vm5 = vcmp.lt.s32.totalorder %v1154_v19, 16  ;;  %v14448_v7 = vmov 0  ;;  %v12955_v33 = vsub.s32 %v12683_v53, %v975_v9 }
 0x404   : > { %v14449_v7 = vsel %vm12949_vm5, 4294967295, %v14448_v7  ;;  %4522 = vst.msk [vmem:[#allocation3 + $0xeb] sm:$0xff] %vm14444_vm6, %v4486_v17  ;;  %v4484_v44 = vsel %vm12920_vm2, %v4376_v63, 0.0  ;;  %v1152_v2 = vsel %vm12932_vm8, %v1116_v11, %v12872_v52  ;;  %v4616_v51 = vld [vmem:[#allocation3 + $0xb9] sm:$0xff]  ;;  %v4617_v20 = vld [vmem:[#allocation3 + $0xc1] sm:$0xff]  ;;  %v12965_v1 = vsub.s32 %v12686_v27, %v953_v23  ;;  %v9634_v52 = vpop.f32.mrb[30].mxu0  ;;  %vm14451_vm2 = vmmov %vm14450_vm0 }
 0x405   : > { %4520 = vst.msk [vmem:[#allocation3 + $0xdb] sm:$0xff] %vm14450_vm0, %v4484_v44  ;;  %v4345_v53 = vadd.f32 %v9633_v58, %v12233_v24  ;;  %v4640_v34 = vpack.c.bf16 %v4616_v51, %v4615_v12  ;;  %v4641_v35 = vpack.c.bf16 %v4618_v37, %v4617_v20  ;;  %v1121_v61 = vadd.s32 18, %v12913_v30  ;;  %v4244_v60 = vpop.f32.mrb[31].mxu0  ;;  %v4532_v63 = vld [vmem:[#allocation3 + $0x8] sm:$0xff] }
 0x406   : > { %v4343_v56 = vadd.f32 %v12233_v24, %v4241_v4  ;;  %v1119_v18 = vadd.s32 18, %v12944_v49  ;;  %v4346_v54 = vadd.f32 %v9634_v52, %v12233_v24  ;;  %v4344_v19 = vadd.f32 %v12233_v24, %v4244_v60  ;;  %v9637_v44 = vpop.f32.mrb[32].mxu0 }
 0x407   : > { %v4381_v27 = vmax.f32 %v4345_v53, 0.0  ;;  %9668 = vmatmul.mubr.msk.bf16.gmra.mrb[20].mxu1 %vm14450_vm0, %v4640_v34  ;;  %vm14452_vm8 = vcmp.ne.s32.totalorder %v12913_v30, 0  ;;  %vm14453_vm6 = vcmp.lt.s32.totalorder %v12913_v30, 0  ;;  %vm1048_vm0 = vcmp.lt.s32.totalorder %v12965_v1, 0  ;;  %v4257_v20 = vpop.f32.mrb[33].mxu0 }
 0x408   : > { %v4379_v38 = vmax.f32 %v4343_v56, 0.0  ;;  %9671 = vmatprep.mubr.msk.bf16.mxu1 %vm14451_vm2, %v4641_v35  ;;  %vm12984_vm9 = vmand %vm14453_vm6, %vm14452_vm8  ;;  %v4382_v10 = vmax.f32 %v4346_v54, 0.0  ;;  %vm12992_vm14 = vcmp.lt.s32.totalorder %v1152_v2, 16  ;;  %v14456_v9 = vmov 0 }
 0x409   : > { %v4489_v57 = vsel %vm12924_vm3, %v4381_v27, 0.0  ;;  %v14457_v9 = vsel %vm12992_vm14, 4294967295, %v14456_v9  ;;  %vm14458_vm2 = vcmp.ne.s32.totalorder %v12944_v49, 0  ;;  %vm14459_vm11 = vcmp.lt.s32.totalorder %v12944_v49, 0  ;;  %v4619_v2 = vld [vmem:[#allocation3 + $0xd1] sm:$0xff] }
 0x40a   : > { %vm13000_vm8 = vmand %vm14459_vm11, %vm14458_vm2  ;;  %v1122_v29 = vadd.s32 18, %v12955_v33  ;;  %vm14462_vm6 = vcmask 523264   ;;  %v4487_v11 = vsel %vm12939_vm4, %v4379_v38, 0.0  ;;  %v4380_v23 = vmax.f32 %v4344_v19, 0.0 }
 0x40b   : > { %4525 = vst.msk [vmem:[#allocation3 + $0x103] sm:$0xff] %vm14462_vm6, %v4489_v57  ;;  %vm14463_vm12 = vcmp.ne.s32.totalorder %v12955_v33, 0  ;;  %vm14464_vm3 = vcmp.lt.s32.totalorder %v12955_v33, 0  ;;  %v1120_v3 = vadd.s32 18, %v12965_v1  ;;  %vm14467_vm11 = vmmov %vm14462_vm6  ;;  %v4490_v50 = vsel %vm12949_vm5, %v4382_v10, 0.0  ;;  %v4622_v17 = vld [vmem:[#allocation3 + $0xe9] sm:$0xff] }
 0x40c   : > { %vm13012_vm7 = vmand %vm14464_vm3, %vm14463_vm12  ;;  %4523 = vst.msk [vmem:[#allocation3 + $0xf3] sm:$0xff] %vm14467_vm11, %v4487_v11  ;;  %v1157_v6 = vsel %vm12984_vm9, %v1121_v61, %v12913_v30  ;;  %vm14468_vm2 = vcmp.ne.s32.totalorder %v12965_v1, 0  ;;  %v4488_v37 = vsel %vm12992_vm14, %v4380_v23, 0.0  ;;  %v1155_v58 = vsel %vm13000_vm8, %v1119_v18, %v12944_v49  ;;  %v4620_v12 = vld [vmem:[#allocation3 + $0xd9] sm:$0xff]  ;;  %v4621_v30 = vld [vmem:[#allocation3 + $0xe1] sm:$0xff]  ;;  %v9638_v61 = vpop.f32.mrb[34].mxu0 }
 0x40d   : > { %vm13025_vm6 = vmand %vm1048_vm0, %vm14468_vm2  ;;  %v4349_v51 = vadd.f32 %v9637_v44, %v12233_v24  ;;  %v1158_v53 = vsel %vm13012_vm7, %v1122_v29, %v12955_v33  ;;  %v4642_v4 = vpack.c.bf16 %v4620_v12, %v4619_v2  ;;  %v4643_v34 = vpack.c.bf16 %v4622_v17, %v4621_v30  ;;  %v4260_v27 = vpop.f32.mrb[35].mxu0  ;;  %v4534_v2 = vld [vmem:[#allocation3 + $0x18] sm:$0xff]  ;;  %v4535_v12 = vld [vmem:[#allocation3 + $0x20] sm:$0xff] }
 0x40e   : > { %vm14471_vm12 = vmmov %vm14467_vm11  ;;  %vm13040_vm3 = vcmp.lt.s32.totalorder %v1157_v6, 16  ;;  %v14473_v35 = vmov 0  ;;  %v4347_v49 = vadd.f32 %v12233_v24, %v4257_v20  ;;  %v1156_v56 = vsel %vm13025_vm6, %v1120_v3, %v12965_v1  ;;  %v4531_v6 = vld [vmem:[#allocation3] sm:$0xff]  ;;  %v4536_v30 = vld [vmem:[#allocation3 + $0x28] sm:$0xff] }
 0x40f   : > { %4526 = vst.msk [vmem:[#allocation3 + $0x10b] sm:$0xff] %vm14471_vm12, %v4490_v50  ;;  %vm14472_vm9 = vmmov %vm14467_vm11  ;;  %v14474_v35 = vsel %vm13040_vm3, 4294967295, %v14473_v35  ;;  %v4385_v52 = vmax.f32 %v4349_v51, 0.0  ;;  %vm13048_vm0 = vcmp.lt.s32.totalorder %v1155_v58, 16  ;;  %v14475_v18 = vmov 0  ;;  %v4533_v51 = vld [vmem:[#allocation3 + $0x10] sm:$0xff] }
 0x410   : > { %4524 = vst.msk [vmem:[#allocation3 + $0xfb] sm:$0xff] %vm14472_vm9, %v4488_v37  ;;  %v14476_v18 = vsel %vm13048_vm0, 4294967295, %v14475_v18  ;;  %v4350_v33 = vadd.f32 %v9638_v61, %v12233_v24  ;;  %vm14477_vm7 = vmmov %vm14472_vm9  ;;  %v4383_v54 = vmax.f32 %v4347_v49, 0.0  ;;  %vm13054_vm8 = vcmp.lt.s32.totalorder %v1158_v53, 16  ;;  %v10802_v53 = vld [vmem:[#allocation9 + $0x48] sm:$0xff]   ;;  %v4539_v61 = vld [vmem:[#allocation3 + $0x40] sm:$0xff] }
 0x411   : > { %9672 = vmatmul.mubr.msk.bf16.gmra.mrb[24].mxu1 %vm14477_vm7, %v4642_v4  ;;  %v14478_v60 = vmov 0  ;;  %v4348_v38 = vadd.f32 %v12233_v24, %v4260_v27  ;;  %vm14480_vm11 = vmmov %vm14477_vm7  ;;  %v4493_v1 = vsel %vm13040_vm3, %v4385_v52, 0.0  ;;  %vm13062_vm2 = vcmp.lt.s32.totalorder %v1156_v56, 16  ;;  %v4538_v49 = vld [vmem:[#allocation3 + $0x38] sm:$0xff]  ;;  %v4540_v56 = vld [vmem:[#allocation3 + $0x48] sm:$0xff] }
 0x412   : > { %v14479_v60 = vsel %vm13054_vm8, 4294967295, %v14478_v60  ;;  %9675 = vmatprep.mubr.msk.bf16.mxu1 %vm14480_vm11, %v4643_v34  ;;  %v4386_v19 = vmax.f32 %v4350_v33, 0.0  ;;  %v14481_v42 = vmov 0  ;;  %vm14483_vm6 = vmmov %vm14477_vm7  ;;  %v4491_v57 = vsel %vm13048_vm0, %v4383_v54, 0.0  ;;  %v10803_v34 = vld [vmem:[#allocation9 + $0x50] sm:$0xff]   ;;  %v4537_v52 = vld [vmem:[#allocation3 + $0x30] sm:$0xff] }
 0x413   : > { %v14482_v42 = vsel %vm13062_vm2, 4294967295, %v14481_v42  ;;  %4529 = vst.msk [vmem:[#allocation3 + $0x123] sm:$0xff] %vm14483_vm6, %v4493_v1  ;;  %v4384_v10 = vmax.f32 %v4348_v38, 0.0  ;;  %vm14484_vm12 = vmmov %vm14483_vm6  ;;  %v4623_v11 = vld [vmem:[#allocation3 + $0xf1] sm:$0xff]  ;;  %v4567_v44 = vpack.c.bf16 %v4532_v63, %v4531_v6  ;;  %v4568_v20 = vpack.c.bf16 %v4534_v2, %v4533_v51  ;;  %v10804_v27 = vld [vmem:[#allocation9 + $0x58] sm:$0xff]  }
 0x414   : > { %4527 = vst.msk [vmem:[#allocation3 + $0x113] sm:$0xff] %vm14484_vm12, %v4491_v57  ;;  %v4494_v24 = vsel %vm13054_vm8, %v4386_v19, 0.0  ;;  %vm14485_vm9 = vmmov %vm14483_vm6  ;;  %v4569_v4 = vpack.c.bf16 %v4536_v30, %v4535_v12  ;;  %v4570_v33 = vpack.c.bf16 %v4538_v49, %v4537_v52  ;;  %v4571_v54 = vpack.c.bf16 %v4540_v56, %v4539_v61  ;;  %v13085_v38 = vld [vmem:[#allocation9 + $0x60] sm:$0xff]   ;;  %v4543_v1 = vld [vmem:[#allocation3 + $0x60] sm:$0xff] }
 0x415   : > { %4530 = vst.msk [vmem:[#allocation3 + $0x12b] sm:$0xff] %vm14485_vm9, %v4494_v24  ;;  %v4492_v29 = vsel %vm13062_vm2, %v4384_v10, 0.0  ;;  %vm14486_vm7 = vmmov %vm14483_vm6  ;;  %v4544_v19 = vld [vmem:[#allocation3 + $0x68] sm:$0xff]  ;;  %v4541_v57 = vld [vmem:[#allocation3 + $0x50] sm:$0xff] }
 0x416   : > { %v4626_v59 = vld [vmem:[#allocation3 + $0x109] sm:$0xff]  ;;  %4528 = vst.msk [vmem:[#allocation3 + $0x11b] sm:$0xff] %vm14486_vm7, %v4492_v29  ;;  %vm14487_vm11 = vmmov %vm14483_vm6  ;;  %v4573_v24 = vpack.c.bf16 %v4544_v19, %v4543_v1  ;;  %v4547_v29 = vld [vmem:[#allocation3 + $0x80] sm:$0xff] }
 0x417   : > { %v4624_v23 = vld [vmem:[#allocation3 + $0xf9] sm:$0xff]  ;;  %v4625_v13 = vld [vmem:[#allocation3 + $0x101] sm:$0xff]  ;;  %vm14488_vm12 = vmmov %vm14483_vm6 }
 0x418   : > { %v4644_v3 = vpack.c.bf16 %v4624_v23, %v4623_v11  ;;  %v4645_v50 = vpack.c.bf16 %v4626_v59, %v4625_v13  ;;  %vm14489_vm9 = vmmov %vm14483_vm6  ;;  %v4546_v59 = vld [vmem:[#allocation3 + $0x78] sm:$0xff]  ;;  %v4548_v11 = vld [vmem:[#allocation3 + $0x88] sm:$0xff] }
 0x419   : > { %vm14490_vm7 = vmmov %vm14483_vm6  ;;  %v4545_v23 = vld [vmem:[#allocation3 + $0x70] sm:$0xff]  ;;  %v4551_v6 = vld [vmem:[#allocation3 + $0xa0] sm:$0xff] }
 0x41a   : > { %9676 = vmatmul.mubr.msk.bf16.gmra.mrb[28].mxu1 %vm14487_vm11, %v4644_v3  ;;  %vm14491_vm11 = vmmov %vm14483_vm6  ;;  %v4574_v13 = vpack.c.bf16 %v4546_v59, %v4545_v23  ;;  %v4575_v3 = vpack.c.bf16 %v4548_v11, %v4547_v29  ;;  %v4552_v63 = vld [vmem:[#allocation3 + $0xa8] sm:$0xff]  ;;  %v4555_v2 = vld [vmem:[#allocation3 + $0xc0] sm:$0xff] }
 0x41b   : > { %9679 = vmatprep.mubr.msk.bf16.mxu1 %vm14483_vm6, %v4645_v50  ;;  %v4627_v17 = vld [vmem:[#allocation3 + $0x111] sm:$0xff]  ;;  %v4556_v12 = vld [vmem:[#allocation3 + $0xc8] sm:$0xff]  ;;  %v5169_v11 = vld [vmem:[#allocation3 + $0x1a] sm:$0xff] }
 0x41c   : > { %v4550_v50 = vld [vmem:[#allocation3 + $0x98] sm:$0xff]  ;;  %v4553_v30 = vld [vmem:[#allocation3 + $0xb0] sm:$0xff]  ;;  %v5166_v19 = vld [vmem:[#allocation3 + $0x2] sm:$0xff] }
 0x41d   : > { %v4628_v37 = vld [vmem:[#allocation3 + $0x119] sm:$0xff]  ;;  %v4557_v49 = vld [vmem:[#allocation3 + $0xd0] sm:$0xff]  ;;  %v5170_v23 = vld [vmem:[#allocation3 + $0x22] sm:$0xff] }
 0x41e   : > { %v4646_v58 = vpack.c.bf16 %v4628_v37, %v4627_v17  ;;  %v4549_v17 = vld [vmem:[#allocation3 + $0x90] sm:$0xff]  ;;  %v4562_v52 = vld [vmem:[#allocation3 + $0xf8] sm:$0xff]  ;;  %vm14518_vm8 = vmmov %vm14483_vm6 }
 0x41f   : > { %v4576_v37 = vpack.c.bf16 %v4550_v50, %v4549_v17  ;;  %v10807_v17 = vld [vmem:[#allocation9 + $0x70] sm:$0xff]   ;;  %vm14526_vm2 = vmmov %vm14483_vm6 }
 0x420   : > { %vm14527_vm3 = vmmov %vm14526_vm2 }
 0x421   : > { %vm14530_vm0 = vmmov %vm14526_vm2 }
 0x422   : > { %9680 = vmatmul.mubr.msk.bf16.gmra.mrb[32].mxu1 %vm14488_vm12, %v4646_v58  ;;  %vm14492_vm12 = vmmov %vm14483_vm6  ;;  %v4554_v58 = vld [vmem:[#allocation3 + $0xb8] sm:$0xff] }
 0x423   : > { %9691 = vmatprep.mubr.msk.bf16.mxu1 %vm14489_vm9, %v4567_v44  ;;  %vm14493_vm9 = vmmov %vm14483_vm6  ;;  %v4577_v44 = vpack.c.bf16 %v4552_v63, %v4551_v6  ;;  %v4578_v51 = vpack.c.bf16 %v4554_v58, %v4553_v30  ;;  %v10806_v6 = vld [vmem:[#allocation9 + $0x68] sm:$0xff]   ;;  %v5175_v58 = vld [vmem:[#allocation3 + $0x4a] sm:$0xff] }
 0x424   : > { %v10808_v30 = vld [vmem:[#allocation9 + $0x78] sm:$0xff]   ;;  %vm14531_vm5 = vmmov %vm14530_vm0 }
 0x425   : > { %vm14532_vm14 = vmmov %vm14530_vm0 }
 0x42a   : > { %9692 = vmatmul.mubr.msk.bf16.vlgmr.msra.gmra.mrb[0].mxu1 %vm14490_vm7, %v4568_v20  ;;  %vm14494_vm7 = vmmov %vm14483_vm6  ;;  %v4579_v20 = vpack.c.bf16 %v4556_v12, %v4555_v2  ;;  %v5172_v2 = vld [vmem:[#allocation3 + $0x32] sm:$0xff] }
 0x42b   : > { %9695 = vmatprep.mubr.msk.bf16.mxu1 %vm14491_vm11, %v4569_v4  ;;  %9728 = vmatpush3.bf16.msra.mxu1 %v12670_v48  ;;  %v4542_v48 = vld [vmem:[#allocation3 + $0x58] sm:$0xff]  ;;  %vm14495_vm11 = vmmov %vm14483_vm6  ;;  %v4559_v4 = vld [vmem:[#allocation3 + $0xe0] sm:$0xff] }
 0x42c   : > { %9729 = vmatprep.subr.bf16.mxu1 %v10802_v53  ;;  %v4572_v10 = vpack.c.bf16 %v4542_v48, %v4541_v57  ;;  %v5167_v57 = vld [vmem:[#allocation3 + $0xa] sm:$0xff] }
 0x42d   : > { %v5202_v59 = vpack.c.bf16 %v5167_v57, %v5166_v19  ;;  %v5186_v19 = vld [vmem:[#allocation3 + $0xa2] sm:$0xff]  ;;  %v5187_v57 = vld [vmem:[#allocation3 + $0xaa] sm:$0xff] }
 0x42f   : > { %9730 = vmatpush3.bf16.msra.mxu1 %v10802_v53  ;;  %v4558_v53 = vld [vmem:[#allocation3 + $0xd8] sm:$0xff] }
 0x430   : > { %9731 = vmatprep.subr.bf16.mxu1 %v10803_v34  ;;  %v4580_v61 = vpack.c.bf16 %v4558_v53, %v4557_v49  ;;  %v5178_v53 = vld [vmem:[#allocation3 + $0x62] sm:$0xff] }
 0x432   : > { %9696 = vmatmul.mubr.msk.bf16.gmra.mrb[4].mxu1 %vm14483_vm6, %v4570_v33  ;;  %v4563_v33 = vld [vmem:[#allocation3 + $0x100] sm:$0xff] }
 0x433   : > { %9699 = vmatprep.mubr.msk.bf16.mxu1 %vm14492_vm12, %v4571_v54  ;;  %9732 = vmatpush3.bf16.msra.mxu1 %v10803_v34  ;;  %vm14496_vm12 = vmmov %vm14483_vm6  ;;  %v4560_v34 = vld [vmem:[#allocation3 + $0xe8] sm:$0xff]  ;;  %v4561_v54 = vld [vmem:[#allocation3 + $0xf0] sm:$0xff] }
 0x434   : > { %9733 = vmatprep.subr.bf16.mxu1 %v10804_v27  ;;  %v4581_v56 = vpack.c.bf16 %v4560_v34, %v4559_v4  ;;  %v4582_v48 = vpack.c.bf16 %v4562_v52, %v4561_v54  ;;  %v5179_v4 = vld [vmem:[#allocation3 + $0x6a] sm:$0xff]  ;;  %v5176_v34 = vld [vmem:[#allocation3 + $0x52] sm:$0xff]  ;;  %v5182_v52 = vld [vmem:[#allocation3 + $0x82] sm:$0xff] }
 0x437   : > { %9734 = vmatpush3.bf16.msra.mxu1 %v10804_v27  ;;  %v4564_v27 = vld [vmem:[#allocation3 + $0x108] sm:$0xff] }
 0x438   : > { %9771 = vmatprep.subr.bf16.mxu1 %v13085_v38  ;;  %v4583_v1 = vpack.c.bf16 %v4564_v27, %v4563_v33  ;;  %v5183_v33 = vld [vmem:[#allocation3 + $0x8a] sm:$0xff]  ;;  %v5180_v27 = vld [vmem:[#allocation3 + $0x72] sm:$0xff] }
 0x43a   : > { %9700 = vmatmul.mubr.msk.bf16.gmra.mrb[8].mxu1 %vm14493_vm9, %v4572_v10  ;;  %vm14497_vm9 = vmmov %vm14483_vm6  ;;  %v4566_v10 = vld [vmem:[#allocation3 + $0x118] sm:$0xff] }
 0x43b   : > { %9703 = vmatprep.mubr.msk.bf16.mxu1 %vm14494_vm7, %v4573_v24  ;;  %vm14498_vm7 = vmmov %vm14483_vm6  ;;  %v4565_v24 = vld [vmem:[#allocation3 + $0x110] sm:$0xff] }
 0x43c   : > { %v4584_v29 = vpack.c.bf16 %v4566_v10, %v4565_v24  ;;  %v5184_v10 = vld [vmem:[#allocation3 + $0x92] sm:$0xff] }
 0x442   : > { %9704 = vmatmul.mubr.msk.bf16.gmra.mrb[12].mxu1 %vm14495_vm11, %v4574_v13  ;;  %vm14499_vm11 = vmmov %vm14483_vm6  ;;  %v5171_v13 = vld [vmem:[#allocation3 + $0x2a] sm:$0xff] }
 0x443   : > { %9707 = vmatprep.mubr.msk.bf16.mxu1 %vm14483_vm6, %v4575_v3  ;;  %v5168_v3 = vld [vmem:[#allocation3 + $0x12] sm:$0xff]  ;;  %v13104_v63 = vpack.c.bf16 %v5171_v13, %v5170_v23  ;;  %v5191_v23 = vld [vmem:[#allocation3 + $0xca] sm:$0xff] }
 0x444   : > { %v13102_v50 = vpack.c.bf16 %v5169_v11, %v5168_v3  ;;  %v5190_v11 = vld [vmem:[#allocation3 + $0xc2] sm:$0xff]  ;;  %v5188_v13 = vld [vmem:[#allocation3 + $0xb2] sm:$0xff] }
 0x44a   : > { %9708 = vmatmul.mubr.msk.bf16.gmra.mrb[16].mxu1 %vm14496_vm12, %v4576_v37  ;;  %vm14500_vm12 = vmmov %vm14483_vm6  ;;  %v5173_v37 = vld [vmem:[#allocation3 + $0x3a] sm:$0xff] }
 0x44b   : > { %9711 = vmatprep.mubr.msk.bf16.mxu1 %vm14497_vm9, %v4577_v44  ;;  %vm14501_vm9 = vmmov %vm14483_vm6  ;;  %v5174_v44 = vld [vmem:[#allocation3 + $0x42] sm:$0xff]  ;;  %v13111_v12 = vpack.c.bf16 %v5173_v37, %v5172_v2 }
 0x44c   : > { %v5194_v37 = vld [vmem:[#allocation3 + $0xe2] sm:$0xff] }
 0x452   : > { %9712 = vmatmul.mubr.msk.bf16.gmra.mrb[20].mxu1 %vm14498_vm7, %v4578_v51  ;;  %vm14502_vm7 = vmmov %vm14483_vm6  ;;  %v13113_v51 = vpack.c.bf16 %v5175_v58, %v5174_v44  ;;  %v5195_v44 = vld [vmem:[#allocation3 + $0xea] sm:$0xff]  ;;  %v5192_v58 = vld [vmem:[#allocation3 + $0xd2] sm:$0xff] }
 0x453   : > { %9715 = vmatprep.mubr.msk.bf16.mxu1 %vm14499_vm11, %v4579_v20  ;;  %vm14503_vm11 = vmmov %vm14483_vm6  ;;  %v5177_v20 = vld [vmem:[#allocation3 + $0x5a] sm:$0xff] }
 0x454   : > { %v5207_v49 = vpack.c.bf16 %v5177_v20, %v5176_v34  ;;  %v5197_v20 = vld [vmem:[#allocation3 + $0xfa] sm:$0xff]  ;;  %v5196_v34 = vld [vmem:[#allocation3 + $0xf2] sm:$0xff] }
 0x45a   : > { %9716 = vmatmul.mubr.msk.bf16.gmra.mrb[24].mxu1 %vm14483_vm6, %v4580_v61  ;;  %v13119_v61 = vpack.c.bf16 %v5179_v4, %v5178_v53  ;;  %v5198_v53 = vld [vmem:[#allocation3 + $0x102] sm:$0xff]  ;;  %v5199_v4 = vld [vmem:[#allocation3 + $0x10a] sm:$0xff] }
 0x45b   : > { %9719 = vmatprep.mubr.msk.bf16.mxu1 %vm14500_vm12, %v4581_v56  ;;  %vm14504_vm12 = vmmov %vm14483_vm6  ;;  %v5181_v56 = vld [vmem:[#allocation3 + $0x7a] sm:$0xff] }
 0x45c   : > { %v5209_v54 = vpack.c.bf16 %v5181_v56, %v5180_v27  ;;  %v5217_v56 = vpack.c.bf16 %v5197_v20, %v5196_v34  ;;  %v5200_v27 = vld [vmem:[#allocation3 + $0x112] sm:$0xff] }
 0x45d   : > { %v5885_v20 = vld [vmem:[#allocation3 + $0x6b] sm:$0xff] }
 0x462   : > { %9720 = vmatmul.mubr.msk.bf16.gmra.mrb[28].mxu1 %vm14501_vm9, %v4582_v48  ;;  %vm14505_vm9 = vmmov %vm14483_vm6  ;;  %v5210_v48 = vpack.c.bf16 %v5183_v33, %v5182_v52  ;;  %v5218_v52 = vpack.c.bf16 %v5199_v4, %v5198_v53  ;;  %v5201_v33 = vld [vmem:[#allocation3 + $0x11a] sm:$0xff]  ;;  %v5884_v4 = vld [vmem:[#allocation3 + $0x63] sm:$0xff] }
 0x463   : > { %9723 = vmatprep.mubr.msk.bf16.mxu1 %vm14502_vm7, %v4583_v1  ;;  %vm14506_vm7 = vmmov %vm14483_vm6  ;;  %v5185_v1 = vld [vmem:[#allocation3 + $0x9a] sm:$0xff]  ;;  %v5915_v34 = vpack.c.bf16 %v5885_v20, %v5884_v4  ;;  %v5909_v4 = vld [vmem:[#allocation3 + $0x12b] sm:$0xff] }
 0x464   : > { %v5211_v24 = vpack.c.bf16 %v5185_v1, %v5184_v10  ;;  %v5219_v1 = vpack.c.bf16 %v5201_v33, %v5200_v27  ;;  %v10812_v10 = vld [vmem:[#allocation9 + $0x98] sm:$0xff]   ;;  %v5887_v53 = vld [vmem:[#allocation3 + $0x7b] sm:$0xff]  ;;  %v5906_v20 = vld [vmem:[#allocation3 + $0x113] sm:$0xff] }
 0x465   : > { %v5889_v33 = vld [vmem:[#allocation3 + $0x8b] sm:$0xff]  ;;  %v5891_v27 = vld [vmem:[#allocation3 + $0x9b] sm:$0xff] }
 0x46a   : > { %9724 = vmatmul.mubr.msk.bf16.gmra.mrb[32].mxu1 %vm14503_vm11, %v4584_v29  ;;  %vm14507_vm11 = vmmov %vm14483_vm6  ;;  %v5189_v29 = vld [vmem:[#allocation3 + $0xba] sm:$0xff] }
 0x46b   : > { %9735 = vmatprep.mubr.msk.bf16.mxu1 %vm14483_vm6, %v5202_v59  ;;  %v5212_v59 = vpack.c.bf16 %v5187_v57, %v5186_v19  ;;  %v5213_v3 = vpack.c.bf16 %v5189_v29, %v5188_v13  ;;  %v10810_v19 = vld [vmem:[#allocation9 + $0x88] sm:$0xff]   ;;  %v10811_v57 = vld [vmem:[#allocation9 + $0x90] sm:$0xff]  }
 0x46c   : > { %v5878_v29 = vld [vmem:[#allocation3 + $0x33] sm:$0xff]  ;;  %v10815_v13 = vld [vmem:[#allocation9 + $0xb0] sm:$0xff]  }
 0x472   : > { %9736 = vmatmul.mubr.msk.bf16.vlgmr.msra.gmra.mrb[0].mxu1 %vm14504_vm12, %v13102_v50  ;;  %vm14508_vm12 = vmmov %vm14483_vm6 }
 0x473   : > { %9739 = vmatprep.mubr.msk.bf16.mxu1 %vm14505_vm9, %v13104_v63  ;;  %9772 = vmatpush3.bf16.msra.mxu1 %v13085_v38  ;;  %v10809_v38 = vld [vmem:[#allocation9 + $0x80] sm:$0xff]   ;;  %vm14509_vm9 = vmmov %vm14483_vm6 }
 0x474   : > { %9773 = vmatprep.subr.bf16.mxu1 %v10806_v6 }
 0x477   : > { %9774 = vmatpush3.bf16.msra.mxu1 %v10806_v6  ;;  %v5214_v6 = vpack.c.bf16 %v5191_v23, %v5190_v11  ;;  %v10814_v11 = vld [vmem:[#allocation9 + $0xa8] sm:$0xff]  }
 0x478   : > { %9775 = vmatprep.subr.bf16.mxu1 %v10807_v17 }
 0x47a   : > { %9740 = vmatmul.mubr.msk.bf16.gmra.mrb[4].mxu1 %vm14506_vm7, %v13111_v12  ;;  %vm14510_vm7 = vmmov %vm14483_vm6 }
 0x47b   : > { %9743 = vmatprep.mubr.msk.bf16.mxu1 %vm14507_vm11, %v13113_v51  ;;  %9776 = vmatpush3.bf16.msra.mxu1 %v10807_v17  ;;  %vm14511_vm11 = vmmov %vm14483_vm6  ;;  %v5193_v17 = vld [vmem:[#allocation3 + $0xda] sm:$0xff] }
 0x47c   : > { %9777 = vmatprep.subr.bf16.mxu1 %v10808_v30  ;;  %v5215_v2 = vpack.c.bf16 %v5193_v17, %v5192_v58  ;;  %v5880_v17 = vld [vmem:[#allocation3 + $0x43] sm:$0xff] }
 0x47d   : > { %v10816_v58 = vld [vmem:[#allocation9 + $0xb8] sm:$0xff]  }
 0x47f   : > { %9778 = vmatpush3.bf16.msra.mxu1 %v10808_v30  ;;  %v5216_v30 = vpack.c.bf16 %v5195_v44, %v5194_v37  ;;  %v5882_v44 = vld [vmem:[#allocation3 + $0x53] sm:$0xff] }
 0x480   : > { %9815 = vmatprep.subr.bf16.mxu1 %v10809_v38 }
 0x482   : > { %9744 = vmatmul.mubr.msk.bf16.gmra.mrb[8].mxu1 %vm14483_vm6, %v5207_v49 }
 0x483   : > { %9747 = vmatprep.mubr.msk.bf16.mxu1 %vm14508_vm12, %v13119_v61  ;;  %vm14512_vm12 = vmmov %vm14483_vm6 }
 0x48a   : > { %9748 = vmatmul.mubr.msk.bf16.gmra.mrb[12].mxu1 %vm14509_vm9, %v5209_v54  ;;  %vm14513_vm9 = vmmov %vm14483_vm6 }
 0x48b   : > { %9751 = vmatprep.mubr.msk.bf16.mxu1 %vm14510_vm7, %v5210_v48  ;;  %vm14514_vm7 = vmmov %vm14483_vm6 }
 0x492   : > { %9752 = vmatmul.mubr.msk.bf16.gmra.mrb[16].mxu1 %vm14511_vm11, %v5211_v24  ;;  %vm14515_vm11 = vmmov %vm14483_vm6 }
 0x493   : > { %9755 = vmatprep.mubr.msk.bf16.mxu1 %vm14483_vm6, %v5212_v59 }
 0x49a   : > { %9756 = vmatmul.mubr.msk.bf16.gmra.mrb[20].mxu1 %vm14512_vm12, %v5213_v3  ;;  %vm14516_vm12 = vmmov %vm14483_vm6 }
 0x49b   : > { %9759 = vmatprep.mubr.msk.bf16.mxu1 %vm14513_vm9, %v5214_v6  ;;  %vm14517_vm9 = vmmov %vm14483_vm6 }
 0x4a2   : > { %9760 = vmatmul.mubr.msk.bf16.gmra.mrb[24].mxu1 %vm14514_vm7, %v5215_v2  ;;  %vm14519_vm7 = vmmov %vm14483_vm6 }
 0x4a3   : > { %9763 = vmatprep.mubr.msk.bf16.mxu1 %vm14515_vm11, %v5216_v30  ;;  %vm14520_vm11 = vmmov %vm14483_vm6 }
 0x4aa   : > { %9764 = vmatmul.mubr.msk.bf16.gmra.mrb[28].mxu1 %vm14483_vm6, %v5217_v56 }
 0x4ab   : > { %9767 = vmatprep.mubr.msk.bf16.mxu1 %vm14516_vm12, %v5218_v52  ;;  %vm14521_vm12 = vmmov %vm14483_vm6 }
 0x4b2   : > { %9768 = vmatmul.mubr.msk.bf16.gmra.mrb[32].mxu1 %vm14517_vm9, %v5219_v1  ;;  %vm14523_vm9 = vmmov %vm14483_vm6 }
 0x4b3   : > { %9779 = vmatprep.mubr.msk.bf16.mxu1 %vm14518_vm8, %v13102_v50  ;;  %v10813_v50 = vld [vmem:[#allocation9 + $0xa0] sm:$0xff]   ;;  %vm14522_vm8 = vmmov %vm14483_vm6 }
 0x4ba   : > { %9780 = vmatmul.mubr.msk.bf16.vlgmr.msra.gmra.mrb[0].mxu1 %vm14519_vm7, %v13104_v63  ;;  %vm14524_vm7 = vmmov %vm14483_vm6  ;;  %v5554_v63 = vld [vmem:[#allocation3 + $0x122] sm:$0xff] }
 0x4bb   : > { %9783 = vmatprep.mubr.msk.bf16.mxu1 %vm14520_vm11, %v13111_v12  ;;  %9816 = vmatpush3.bf16.msra.mxu1 %v10809_v38  ;;  %vm14525_vm11 = vmmov %vm14483_vm6  ;;  %v5555_v12 = vld [vmem:[#allocation3 + $0x12a] sm:$0xff] }
 0x4bc   : > { %9817 = vmatprep.subr.bf16.mxu1 %v10810_v19  ;;  %v5573_v38 = vpack.c.bf16 %v5555_v12, %v5554_v63  ;;  %v5895_v63 = vld [vmem:[#allocation3 + $0xbb] sm:$0xff]  ;;  %v5892_v12 = vld [vmem:[#allocation3 + $0xa3] sm:$0xff] }
 0x4bf   : > { %9818 = vmatpush3.bf16.msra.mxu1 %v10810_v19 }
 0x4c0   : > { %9819 = vmatprep.subr.bf16.mxu1 %v10811_v57 }
 0x4c2   : > { %9784 = vmatmul.mubr.msk.bf16.gmra.mrb[4].mxu1 %vm14483_vm6, %v13113_v51  ;;  %vm14528_vm6 = vmmov %vm14526_vm2  ;;  %v5875_v51 = vld [vmem:[#allocation3 + $0x1b] sm:$0xff] }
 0x4c3   : > { %9787 = vmatprep.mubr.msk.bf16.mxu1 %vm14521_vm12, %v5207_v49  ;;  %9820 = vmatpush3.bf16.msra.mxu1 %v10811_v57  ;;  %vm14529_vm12 = vmmov %vm14526_vm2  ;;  %v5874_v49 = vld [vmem:[#allocation3 + $0x13] sm:$0xff] }
 0x4c4   : > { %9821 = vmatprep.subr.bf16.mxu1 %v10812_v10  ;;  %v5890_v57 = vld [vmem:[#allocation3 + $0x93] sm:$0xff] }
 0x4c7   : > { %9822 = vmatpush3.bf16.msra.mxu1 %v10812_v10  ;;  %v5918_v10 = vpack.c.bf16 %v5891_v27, %v5890_v57  ;;  %v6233_v57 = vld [vmem:[#allocation3 + $0x3c] sm:$0xff] }
 0x4c8   : > { %9859 = vmatprep.subr.bf16.mxu1 %v10813_v50 }
 0x4ca   : > { %9788 = vmatmul.mubr.msk.bf16.gmra.mrb[8].mxu1 %vm14522_vm8, %v13119_v61  ;;  %vm14533_vm8 = vmmov %vm14530_vm0  ;;  %v5910_v61 = vpack.c.bf16 %v5875_v51, %v5874_v49 }
 0x4cb   : > { %9791 = vmatprep.mubr.msk.bf16.mxu1 %vm14523_vm9, %v5209_v54  ;;  %v5877_v54 = vld [vmem:[#allocation3 + $0x2b] sm:$0xff]  ;;  %vm14538_vm9 = vmmov %vm14530_vm0 }
 0x4d2   : > { %9792 = vmatmul.mubr.msk.bf16.gmra.mrb[12].mxu1 %vm14524_vm7, %v5210_v48  ;;  %v5879_v48 = vld [vmem:[#allocation3 + $0x3b] sm:$0xff]  ;;  %vm14539_vm7 = vmmov %vm14530_vm0 }
 0x4d3   : > { %9795 = vmatprep.mubr.msk.bf16.mxu1 %vm14525_vm11, %v5211_v24  ;;  %v5876_v24 = vld [vmem:[#allocation3 + $0x23] sm:$0xff]  ;;  %v5912_v23 = vpack.c.bf16 %v5879_v48, %v5878_v29  ;;  %vm14540_vm11 = vmmov %vm14530_vm0 }
 0x4d4   : > { %v5896_v48 = vld [vmem:[#allocation3 + $0xc3] sm:$0xff] }
 0x4da   : > { %9796 = vmatmul.mubr.msk.bf16.gmra.mrb[16].mxu1 %vm14526_vm2, %v5212_v59  ;;  %vm14534_vm2 = vmmov %vm14530_vm0  ;;  %v5911_v59 = vpack.c.bf16 %v5877_v54, %v5876_v24  ;;  %v5899_v54 = vld [vmem:[#allocation3 + $0xdb] sm:$0xff] }
 0x4db   : > { %9799 = vmatprep.mubr.msk.bf16.mxu1 %vm14527_vm3, %v5213_v3  ;;  %vm14535_vm3 = vmmov %vm14530_vm0  ;;  %v5881_v3 = vld [vmem:[#allocation3 + $0x4b] sm:$0xff] }
 0x4dc   : > { %v5913_v37 = vpack.c.bf16 %v5881_v3, %v5880_v17 }
 0x4e2   : > { %9800 = vmatmul.mubr.msk.bf16.gmra.mrb[20].mxu1 %vm14528_vm6, %v5214_v6  ;;  %v5883_v6 = vld [vmem:[#allocation3 + $0x5b] sm:$0xff]  ;;  %vm14541_vm6 = vmmov %vm14530_vm0 }
 0x4e3   : > { %9803 = vmatprep.mubr.msk.bf16.mxu1 %vm14529_vm12, %v5215_v2  ;;  %v5914_v2 = vpack.c.bf16 %v5883_v6, %v5882_v44  ;;  %vm14542_vm12 = vmmov %vm14530_vm0  ;;  %v5902_v6 = vld [vmem:[#allocation3 + $0xf3] sm:$0xff]  ;;  %v5907_v44 = vld [vmem:[#allocation3 + $0x11b] sm:$0xff] }
 0x4ea   : > { %9804 = vmatmul.mubr.msk.bf16.gmra.mrb[24].mxu1 %vm14530_vm0, %v5216_v30  ;;  %v13163_v30 = vld [vmem:[#allocation9 + $0xc0] sm:$0xff]  }
 0x4eb   : > { %9807 = vmatprep.mubr.msk.bf16.mxu1 %vm14531_vm5, %v5217_v56  ;;  %vm14537_vm5 = vmmov %vm14530_vm0  ;;  %v5886_v56 = vld [vmem:[#allocation3 + $0x73] sm:$0xff] }
 0x4f2   : > { %9808 = vmatmul.mubr.msk.bf16.gmra.mrb[28].mxu1 %vm14532_vm14, %v5218_v52  ;;  %vm14536_vm14 = vmmov %vm14530_vm0  ;;  %v5916_v52 = vpack.c.bf16 %v5887_v53, %v5886_v56  ;;  %v5926_v53 = vpack.c.bf16 %v5907_v44, %v5906_v20  ;;  %v6229_v56 = vld [vmem:[#allocation3 + $0x1c] sm:$0xff] }
 0x4f3   : > { %9811 = vmatprep.mubr.msk.bf16.mxu1 %vm14533_vm8, %v5219_v1  ;;  %v5888_v1 = vld [vmem:[#allocation3 + $0x83] sm:$0xff]  ;;  %vm14543_vm8 = vmmov %vm14530_vm0 }
 0x4f4   : > { %v5917_v19 = vpack.c.bf16 %v5889_v33, %v5888_v1  ;;  %v6231_v1 = vld [vmem:[#allocation3 + $0x2c] sm:$0xff]  ;;  %v6245_v44 = vld [vmem:[#allocation3 + $0x9c] sm:$0xff] }
 0x4fa   : > { %9812 = vmatmul.mubr.msk.bf16.gmra.mrb[32].mxu1 %vm14534_vm2, %v5573_v38  ;;  %v5894_v38 = vld [vmem:[#allocation3 + $0xb3] sm:$0xff]  ;;  %vm14544_vm2 = vmmov %vm14530_vm0 }
 0x4fb   : > { %9823 = vmatprep.mubr.msk.bf16.mxu1 %vm14535_vm3, %v5910_v61  ;;  %v5920_v49 = vpack.c.bf16 %v5895_v63, %v5894_v38  ;;  %v5897_v61 = vld [vmem:[#allocation3 + $0xcb] sm:$0xff]  ;;  %vm14545_vm3 = vmmov %vm14530_vm0  ;;  %v10818_v63 = vld [vmem:[#allocation9 + $0xc8] sm:$0xff]  }
 0x4fc   : > { %v5921_v24 = vpack.c.bf16 %v5897_v61, %v5896_v48  ;;  %v6235_v38 = vld [vmem:[#allocation3 + $0x4c] sm:$0xff]  ;;  %v6237_v61 = vld [vmem:[#allocation3 + $0x5c] sm:$0xff] }
 0x502   : > { %9824 = vmatmul.mubr.msk.bf16.vlgmr.msra.gmra.mrb[0].mxu1 %vm14536_vm14, %v5911_v59  ;;  %v5898_v59 = vld [vmem:[#allocation3 + $0xd3] sm:$0xff]  ;;  %vm14546_vm14 = vmmov %vm14530_vm0 }
 0x503   : > { %9827 = vmatprep.mubr.msk.bf16.mxu1 %vm14537_vm5, %v5912_v23  ;;  %9860 = vmatpush3.bf16.msra.mxu1 %v10813_v50  ;;  %v5893_v50 = vld [vmem:[#allocation3 + $0xab] sm:$0xff]  ;;  %v5922_v29 = vpack.c.bf16 %v5899_v54, %v5898_v59  ;;  %v5903_v23 = vld [vmem:[#allocation3 + $0xfb] sm:$0xff]  ;;  %vm14547_vm5 = vmmov %vm14530_vm0 }
 0x504   : > { %9861 = vmatprep.subr.bf16.mxu1 %v10814_v11  ;;  %v5919_v51 = vpack.c.bf16 %v5893_v50, %v5892_v12  ;;  %v5924_v17 = vpack.c.bf16 %v5903_v23, %v5902_v6  ;;  %v6234_v54 = vld [vmem:[#allocation3 + $0x44] sm:$0xff]  ;;  %v6241_v23 = vld [vmem:[#allocation3 + $0x7c] sm:$0xff] }
 0x505   : > { %v13189_v48 = vpack.c.bf16 %v6235_v38, %v6234_v54  ;;  %v6256_v38 = vld [vmem:[#allocation3 + $0xf4] sm:$0xff] }
 0x507   : > { %9862 = vmatpush3.bf16.msra.mxu1 %v10814_v11  ;;  %v5901_v11 = vld [vmem:[#allocation3 + $0xeb] sm:$0xff] }
 0x508   : > { %9863 = vmatprep.subr.bf16.mxu1 %v10815_v13 }
 0x50a   : > { %9828 = vmatmul.mubr.msk.bf16.gmra.mrb[4].mxu1 %vm14530_vm0, %v5913_v37  ;;  %v5905_v37 = vld [vmem:[#allocation3 + $0x10b] sm:$0xff] }
 0x50b   : > { %9831 = vmatprep.mubr.msk.bf16.mxu1 %vm14538_vm9, %v5914_v2  ;;  %9864 = vmatpush3.bf16.msra.mxu1 %v10815_v13  ;;  %v5900_v13 = vld [vmem:[#allocation3 + $0xe3] sm:$0xff]  ;;  %vm14548_vm9 = vmmov %vm14530_vm0 }
 0x50c   : > { %9865 = vmatprep.subr.bf16.mxu1 %v10816_v58  ;;  %v5923_v3 = vpack.c.bf16 %v5901_v11, %v5900_v13  ;;  %v6240_v11 = vld [vmem:[#allocation3 + $0x74] sm:$0xff]  ;;  %v6238_v13 = vld [vmem:[#allocation3 + $0x64] sm:$0xff] }
 0x50d   : > { %v13197_v6 = vpack.c.bf16 %v6241_v23, %v6240_v11  ;;  %v6260_v11 = vld [vmem:[#allocation3 + $0x114] sm:$0xff]  ;;  %v6261_v23 = vld [vmem:[#allocation3 + $0x11c] sm:$0xff] }
 0x50f   : > { %9866 = vmatpush3.bf16.msra.mxu1 %v10816_v58  ;;  %v5904_v58 = vld [vmem:[#allocation3 + $0x103] sm:$0xff] }
 0x510   : > { %9903 = vmatprep.subr.bf16.mxu1 %v13163_v30  ;;  %v5925_v2 = vpack.c.bf16 %v5905_v37, %v5904_v58  ;;  %v6244_v37 = vld [vmem:[#allocation3 + $0x94] sm:$0xff]  ;;  %v6242_v58 = vld [vmem:[#allocation3 + $0x84] sm:$0xff] }
 0x511   : > { %v6272_v20 = vpack.c.bf16 %v6245_v44, %v6244_v37  ;;  %v6280_v37 = vpack.c.bf16 %v6261_v23, %v6260_v11  ;;  %v6262_v44 = vld [vmem:[#allocation3 + $0x124] sm:$0xff]  ;;  %v6949_v11 = vld [vmem:[#allocation3 + $0x8d] sm:$0xff] }
 0x512   : > { %9832 = vmatmul.mubr.msk.bf16.gmra.mrb[8].mxu1 %vm14539_vm7, %v5915_v34  ;;  %vm14549_vm7 = vmmov %vm14530_vm0  ;;  %v6228_v34 = vld [vmem:[#allocation3 + $0x14] sm:$0xff] }
 0x513   : > { %9835 = vmatprep.mubr.msk.bf16.mxu1 %vm14540_vm11, %v5916_v52  ;;  %v5908_v52 = vld [vmem:[#allocation3 + $0x123] sm:$0xff]  ;;  %v6264_v27 = vpack.c.bf16 %v6229_v56, %v6228_v34  ;;  %vm14550_vm11 = vmmov %vm14530_vm0 }
 0x514   : > { %v5927_v33 = vpack.c.bf16 %v5909_v4, %v5908_v52  ;;  %v6248_v4 = vld [vmem:[#allocation3 + $0xb4] sm:$0xff]  ;;  %v6249_v34 = vld [vmem:[#allocation3 + $0xbc] sm:$0xff]  ;;  %v6246_v56 = vld [vmem:[#allocation3 + $0xa4] sm:$0xff] }
 0x51a   : > { %9836 = vmatmul.mubr.msk.bf16.gmra.mrb[12].mxu1 %vm14541_vm6, %v5917_v19  ;;  %vm14551_vm6 = vmmov %vm14530_vm0  ;;  %v6232_v19 = vld [vmem:[#allocation3 + $0x34] sm:$0xff] }
 0x51b   : > { %9839 = vmatprep.mubr.msk.bf16.mxu1 %vm14542_vm12, %v5918_v10  ;;  %v6230_v10 = vld [vmem:[#allocation3 + $0x24] sm:$0xff]  ;;  %v13182_v12 = vpack.c.bf16 %v6233_v57, %v6232_v19  ;;  %vm14552_vm12 = vmmov %vm14530_vm0  ;;  %v6253_v19 = vld [vmem:[#allocation3 + $0xdc] sm:$0xff] }
 0x51c   : > { %v13180_v50 = vpack.c.bf16 %v6231_v1, %v6230_v10  ;;  %v6252_v1 = vld [vmem:[#allocation3 + $0xd4] sm:$0xff]  ;;  %v6250_v57 = vld [vmem:[#allocation3 + $0xc4] sm:$0xff] }
 0x522   : > { %9840 = vmatmul.mubr.msk.bf16.gmra.mrb[16].mxu1 %vm14543_vm8, %v5919_v51  ;;  %vm14553_vm8 = vmmov %vm14530_vm0  ;;  %v10819_v51 = vld [vmem:[#allocation9 + $0xd0] sm:$0xff]  }
 0x523   : > { %9843 = vmatprep.mubr.msk.bf16.mxu1 %vm14544_vm2, %v5920_v49  ;;  %v6236_v49 = vld [vmem:[#allocation3 + $0x54] sm:$0xff]  ;;  %vm14554_vm2 = vmmov %vm14530_vm0 }
 0x524   : > { %v13191_v59 = vpack.c.bf16 %v6237_v61, %v6236_v49  ;;  %v6257_v49 = vld [vmem:[#allocation3 + $0xfc] sm:$0xff]  ;;  %v6254_v61 = vld [vmem:[#allocation3 + $0xe4] sm:$0xff] }
 0x52a   : > { %9844 = vmatmul.mubr.msk.bf16.gmra.mrb[20].mxu1 %vm14545_vm3, %v5921_v24  ;;  %v10820_v24 = vld [vmem:[#allocation9 + $0xd8] sm:$0xff]   ;;  %vm14555_vm3 = vmmov %vm14530_vm0 }
 0x52b   : > { %9847 = vmatprep.mubr.msk.bf16.mxu1 %vm14546_vm14, %v5922_v29  ;;  %v6239_v29 = vld [vmem:[#allocation3 + $0x6c] sm:$0xff]  ;;  %vm14556_vm14 = vmmov %vm14530_vm0 }
 0x532   : > { %9848 = vmatmul.mubr.msk.bf16.gmra.mrb[24].mxu1 %vm14547_vm5, %v5923_v3  ;;  %v6269_v3 = vpack.c.bf16 %v6239_v29, %v6238_v13  ;;  %vm14557_vm5 = vmmov %vm14530_vm0  ;;  %v6259_v29 = vld [vmem:[#allocation3 + $0x10c] sm:$0xff]  ;;  %v6258_v13 = vld [vmem:[#allocation3 + $0x104] sm:$0xff] }
 0x533   : > { %9851 = vmatprep.mubr.msk.bf16.mxu1 %vm14530_vm0, %v5924_v17  ;;  %v6243_v17 = vld [vmem:[#allocation3 + $0x8c] sm:$0xff] }
 0x53a   : > { %9852 = vmatmul.mubr.msk.bf16.gmra.mrb[28].mxu1 %vm14548_vm9, %v5925_v2  ;;  %v6271_v2 = vpack.c.bf16 %v6243_v17, %v6242_v58  ;;  %vm14558_vm9 = vmmov %vm14530_vm0  ;;  %v6279_v17 = vpack.c.bf16 %v6259_v29, %v6258_v13  ;;  %v6263_v58 = vld [vmem:[#allocation3 + $0x12c] sm:$0xff]  ;;  %v6947_v29 = vld [vmem:[#allocation3 + $0x7d] sm:$0xff] }
 0x53b   : > { %9855 = vmatprep.mubr.msk.bf16.mxu1 %vm14549_vm7, %v5926_v53  ;;  %v6247_v53 = vld [vmem:[#allocation3 + $0xac] sm:$0xff]  ;;  %vm14559_vm7 = vmmov %vm14530_vm0 }
 0x53c   : > { %v6273_v52 = vpack.c.bf16 %v6247_v53, %v6246_v56  ;;  %v6281_v53 = vpack.c.bf16 %v6263_v58, %v6262_v44  ;;  %v10824_v56 = vld [vmem:[#allocation9 + $0xf8] sm:$0xff]   ;;  %v6951_v44 = vld [vmem:[#allocation3 + $0x9d] sm:$0xff] }
 0x53d   : > { %v6948_v13 = vld [vmem:[#allocation3 + $0x85] sm:$0xff]  ;;  %v6953_v58 = vld [vmem:[#allocation3 + $0xad] sm:$0xff] }
 0x542   : > { %9856 = vmatmul.mubr.msk.bf16.gmra.mrb[32].mxu1 %vm14550_vm11, %v5927_v33  ;;  %v6274_v33 = vpack.c.bf16 %v6249_v34, %v6248_v4  ;;  %vm14560_vm11 = vmmov %vm14530_vm0  ;;  %v10822_v4 = vld [vmem:[#allocation9 + $0xe8] sm:$0xff]   ;;  %v10823_v34 = vld [vmem:[#allocation9 + $0xf0] sm:$0xff]  }
 0x543   : > { %9867 = vmatprep.mubr.msk.bf16.mxu1 %vm14551_vm6, %v6264_v27  ;;  %v6251_v27 = vld [vmem:[#allocation3 + $0xcc] sm:$0xff]  ;;  %vm14561_vm6 = vmmov %vm14530_vm0 }
 0x544   : > { %v6275_v10 = vpack.c.bf16 %v6251_v27, %v6250_v57  ;;  %v6940_v27 = vld [vmem:[#allocation3 + $0x45] sm:$0xff] }
 0x545   : > { %v10827_v57 = vld [vmem:[#allocation9 + $0x110] sm:$0xff]  }
 0x54a   : > { %9868 = vmatmul.mubr.msk.bf16.vlgmr.msra.gmra.mrb[0].mxu1 %vm14552_vm12, %v13180_v50  ;;  %vm14562_vm12 = vmmov %vm14530_vm0 }
 0x54b   : > { %9871 = vmatprep.mubr.msk.bf16.mxu1 %vm14553_vm8, %v13182_v12  ;;  %9904 = vmatpush3.bf16.msra.mxu1 %v13163_v30  ;;  %v10821_v30 = vld [vmem:[#allocation9 + $0xe0] sm:$0xff]   ;;  %vm14563_vm8 = vmmov %vm14530_vm0 }
 0x54c   : > { %9905 = vmatprep.subr.bf16.mxu1 %v10818_v63 }
 0x54f   : > { %9906 = vmatpush3.bf16.msra.mxu1 %v10818_v63  ;;  %v6276_v63 = vpack.c.bf16 %v6253_v19, %v6252_v1  ;;  %v10826_v1 = vld [vmem:[#allocation9 + $0x108] sm:$0xff]  }
 0x550   : > { %9907 = vmatprep.subr.bf16.mxu1 %v10819_v51 }
 0x552   : > { %9872 = vmatmul.mubr.msk.bf16.gmra.mrb[4].mxu1 %vm14554_vm2, %v13189_v48  ;;  %vm14564_vm2 = vmmov %vm14530_vm0 }
 0x553   : > { %9875 = vmatprep.mubr.msk.bf16.mxu1 %vm14555_vm3, %v13191_v59  ;;  %9908 = vmatpush3.bf16.msra.mxu1 %v10819_v51  ;;  %v6255_v51 = vld [vmem:[#allocation3 + $0xec] sm:$0xff]  ;;  %vm14565_vm3 = vmmov %vm14530_vm0 }
 0x554   : > { %9909 = vmatprep.subr.bf16.mxu1 %v10820_v24  ;;  %v6277_v54 = vpack.c.bf16 %v6255_v51, %v6254_v61  ;;  %v6945_v51 = vld [vmem:[#allocation3 + $0x6d] sm:$0xff] }
 0x555   : > { %v10828_v61 = vld [vmem:[#allocation9 + $0x118] sm:$0xff]  }
 0x557   : > { %9910 = vmatpush3.bf16.msra.mxu1 %v10820_v24  ;;  %v6278_v24 = vpack.c.bf16 %v6257_v49, %v6256_v38  ;;  %v6944_v49 = vld [vmem:[#allocation3 + $0x65] sm:$0xff] }
 0x558   : > { %9947 = vmatprep.subr.bf16.mxu1 %v10821_v30 }
 0x55a   : > { %9876 = vmatmul.mubr.msk.bf16.gmra.mrb[8].mxu1 %vm14556_vm14, %v6269_v3  ;;  %vm14566_vm14 = vmmov %vm14530_vm0 }
 0x55b   : > { %9879 = vmatprep.mubr.msk.bf16.mxu1 %vm14557_vm5, %v13197_v6  ;;  %vm14567_vm5 = vmmov %vm14530_vm0 }
 0x562   : > { %9880 = vmatmul.mubr.msk.bf16.gmra.mrb[12].mxu1 %vm14530_vm0, %v6271_v2 }
 0x563   : > { %9883 = vmatprep.mubr.msk.bf16.mxu1 %vm14558_vm9, %v6272_v20  ;;  %vm14568_vm9 = vmmov %vm14530_vm0 }
 0x56a   : > { %9884 = vmatmul.mubr.msk.bf16.gmra.mrb[16].mxu1 %vm14559_vm7, %v6273_v52  ;;  %vm14569_vm7 = vmmov %vm14530_vm0 }
 0x56b   : > { %9887 = vmatprep.mubr.msk.bf16.mxu1 %vm14560_vm11, %v6274_v33  ;;  %vm14570_vm11 = vmmov %vm14530_vm0 }
 0x572   : > { %9888 = vmatmul.mubr.msk.bf16.gmra.mrb[20].mxu1 %vm14561_vm6, %v6275_v10  ;;  %vm14571_vm6 = vmmov %vm14530_vm0 }
 0x573   : > { %9891 = vmatprep.mubr.msk.bf16.mxu1 %vm14562_vm12, %v6276_v63  ;;  %vm14572_vm12 = vmmov %vm14530_vm0 }
 0x57a   : > { %9892 = vmatmul.mubr.msk.bf16.gmra.mrb[24].mxu1 %vm14563_vm8, %v6277_v54  ;;  %vm14573_vm8 = vmmov %vm14530_vm0 }
 0x57b   : > { %9895 = vmatprep.mubr.msk.bf16.mxu1 %vm14564_vm2, %v6278_v24  ;;  %vm14574_vm2 = vmmov %vm14530_vm0 }
 0x582   : > { %9896 = vmatmul.mubr.msk.bf16.gmra.mrb[28].mxu1 %vm14565_vm3, %v6279_v17  ;;  %vm14575_vm3 = vmmov %vm14530_vm0 }
 0x583   : > { %9899 = vmatprep.mubr.msk.bf16.mxu1 %vm14566_vm14, %v6280_v37  ;;  %vm14576_vm14 = vmmov %vm14530_vm0 }
 0x58a   : > { %9900 = vmatmul.mubr.msk.bf16.gmra.mrb[32].mxu1 %vm14567_vm5, %v6281_v53  ;;  %vm14577_vm5 = vmmov %vm14530_vm0 }
 0x58b   : > { %9911 = vmatprep.mubr.msk.bf16.mxu1 %vm14530_vm0, %v13180_v50  ;;  %v10825_v50 = vld [vmem:[#allocation9 + $0x100] sm:$0xff]  }
 0x592   : > { %9912 = vmatmul.mubr.msk.bf16.vlgmr.msra.gmra.mrb[0].mxu1 %vm14568_vm9, %v13182_v12  ;;  %vm14578_vm9 = vmmov %vm14530_vm0  ;;  %v6616_v12 = vld [vmem:[#allocation3 + $0x134] sm:$0xff] }
 0x593   : > { %9915 = vmatprep.mubr.msk.bf16.mxu1 %vm14569_vm7, %v13189_v48  ;;  %9948 = vmatpush3.bf16.msra.mxu1 %v10821_v30  ;;  %vm14579_vm7 = vmmov %vm14530_vm0  ;;  %v6617_v48 = vld [vmem:[#allocation3 + $0x13c] sm:$0xff]  ;;  %v6937_v30 = vld [vmem:[#allocation3 + $0x2d] sm:$0xff] }
 0x594   : > { %9949 = vmatprep.subr.bf16.mxu1 %v10822_v4 }
 0x597   : > { %9950 = vmatpush3.bf16.msra.mxu1 %v10822_v4  ;;  %v6952_v4 = vld [vmem:[#allocation3 + $0xa5] sm:$0xff] }
 0x598   : > { %9951 = vmatprep.subr.bf16.mxu1 %v10823_v34 }
 0x59a   : > { %9916 = vmatmul.mubr.msk.bf16.gmra.mrb[4].mxu1 %vm14570_vm11, %v13191_v59  ;;  %vm14580_vm11 = vmmov %vm14530_vm0  ;;  %v6635_v59 = vpack.c.bf16 %v6617_v48, %v6616_v12  ;;  %v6957_v12 = vld [vmem:[#allocation3 + $0xcd] sm:$0xff] }
 0x59b   : > { %9919 = vmatprep.mubr.msk.bf16.mxu1 %vm14571_vm6, %v6269_v3  ;;  %9952 = vmatpush3.bf16.msra.mxu1 %v10823_v34  ;;  %vm14581_vm6 = vmmov %vm14530_vm0  ;;  %v6936_v3 = vld [vmem:[#allocation3 + $0x25] sm:$0xff]  ;;  %v6980_v34 = vpack.c.bf16 %v6953_v58, %v6952_v4 }
 0x59c   : > { %9953 = vmatprep.subr.bf16.mxu1 %v10824_v56  ;;  %v7293_v58 = vld [vmem:[#allocation3 + $0x3e] sm:$0xff] }
 0x59f   : > { %9954 = vmatpush3.bf16.msra.mxu1 %v10824_v56  ;;  %v6954_v56 = vld [vmem:[#allocation3 + $0xb5] sm:$0xff] }
 0x5a0   : > { %9991 = vmatprep.subr.bf16.mxu1 %v10825_v50 }
 0x5a2   : > { %9920 = vmatmul.mubr.msk.bf16.gmra.mrb[8].mxu1 %vm14572_vm12, %v13197_v6  ;;  %vm14582_vm12 = vmmov %vm14530_vm0  ;;  %v6972_v6 = vpack.c.bf16 %v6937_v30, %v6936_v3  ;;  %v6958_v3 = vld [vmem:[#allocation3 + $0xd5] sm:$0xff] }
 0x5a3   : > { %9923 = vmatprep.mubr.msk.bf16.mxu1 %vm14573_vm8, %v6271_v2  ;;  %vm14583_vm8 = vmmov %vm14530_vm0  ;;  %v6938_v2 = vld [vmem:[#allocation3 + $0x35] sm:$0xff] }
 0x5aa   : > { %9924 = vmatmul.mubr.msk.bf16.gmra.mrb[12].mxu1 %vm14574_vm2, %v6272_v20  ;;  %vm14584_vm2 = vmmov %vm14530_vm0  ;;  %v6939_v20 = vld [vmem:[#allocation3 + $0x3d] sm:$0xff] }
 0x5ab   : > { %9927 = vmatprep.mubr.msk.bf16.mxu1 %vm14575_vm3, %v6273_v52  ;;  %v6941_v52 = vld [vmem:[#allocation3 + $0x4d] sm:$0xff]  ;;  %vm14585_vm3 = vmmov %vm14530_vm0 }
 0x5ac   : > { %v6974_v19 = vpack.c.bf16 %v6941_v52, %v6940_v27  ;;  %v6960_v52 = vld [vmem:[#allocation3 + $0xe5] sm:$0xff]  ;;  %v6962_v27 = vld [vmem:[#allocation3 + $0xf5] sm:$0xff] }
 0x5b2   : > { %9928 = vmatmul.mubr.msk.bf16.gmra.mrb[16].mxu1 %vm14576_vm14, %v6274_v33  ;;  %v6973_v33 = vpack.c.bf16 %v6939_v20, %v6938_v2  ;;  %vm14586_vm14 = vmmov %vm14530_vm0  ;;  %v6961_v2 = vld [vmem:[#allocation3 + $0xed] sm:$0xff] }
 0x5b3   : > { %9931 = vmatprep.mubr.msk.bf16.mxu1 %vm14577_vm5, %v6275_v10  ;;  %v6942_v10 = vld [vmem:[#allocation3 + $0x55] sm:$0xff]  ;;  %vm14587_vm5 = vmmov %vm14530_vm0 }
 0x5ba   : > { %9932 = vmatmul.mubr.msk.bf16.gmra.mrb[20].mxu1 %vm14530_vm0, %v6276_v63  ;;  %v6943_v63 = vld [vmem:[#allocation3 + $0x5d] sm:$0xff] }
 0x5bb   : > { %9935 = vmatprep.mubr.msk.bf16.mxu1 %vm14578_vm9, %v6277_v54  ;;  %v6975_v38 = vpack.c.bf16 %v6943_v63, %v6942_v10  ;;  %v6976_v54 = vpack.c.bf16 %v6945_v51, %v6944_v49  ;;  %vm14588_vm9 = vmmov %vm14530_vm0  ;;  %v6964_v10 = vld [vmem:[#allocation3 + $0x105] sm:$0xff]  ;;  %v6966_v51 = vld [vmem:[#allocation3 + $0x115] sm:$0xff] }
 0x5bc   : > { %v6968_v49 = vld [vmem:[#allocation3 + $0x125] sm:$0xff] }
 0x5c2   : > { %9936 = vmatmul.mubr.msk.bf16.gmra.mrb[24].mxu1 %vm14579_vm7, %v6278_v24  ;;  %v6946_v24 = vld [vmem:[#allocation3 + $0x75] sm:$0xff]  ;;  %vm14589_vm7 = vmmov %vm14530_vm0 }
 0x5c3   : > { %9939 = vmatprep.mubr.msk.bf16.mxu1 %vm14580_vm11, %v6279_v17  ;;  %v6977_v23 = vpack.c.bf16 %v6947_v29, %v6946_v24  ;;  %v6978_v17 = vpack.c.bf16 %v6949_v11, %v6948_v13  ;;  %vm14590_vm11 = vmmov %vm14530_vm0  ;;  %v6970_v29 = vld [vmem:[#allocation3 + $0x135] sm:$0xff]  ;;  %v6971_v11 = vld [vmem:[#allocation3 + $0x13d] sm:$0xff] }
 0x5c4   : > { %v7291_v13 = vld [vmem:[#allocation3 + $0x2e] sm:$0xff] }
 0x5ca   : > { %9940 = vmatmul.mubr.msk.bf16.gmra.mrb[28].mxu1 %vm14581_vm6, %v6280_v37  ;;  %v6950_v37 = vld [vmem:[#allocation3 + $0x95] sm:$0xff]  ;;  %vm14591_vm6 = vmmov %vm14530_vm0 }
 0x5cb   : > { %9943 = vmatprep.mubr.msk.bf16.mxu1 %vm14582_vm12, %v6281_v53  ;;  %v6979_v53 = vpack.c.bf16 %v6951_v44, %v6950_v37  ;;  %vm14592_vm12 = vmmov %vm14530_vm0  ;;  %v7292_v44 = vld [vmem:[#allocation3 + $0x36] sm:$0xff] }
 0x5cc   : > { %v7327_v4 = vpack.c.bf16 %v7293_v58, %v7292_v44  ;;  %v7316_v58 = vld [vmem:[#allocation3 + $0xf6] sm:$0xff] }
 0x5d2   : > { %9944 = vmatmul.mubr.msk.bf16.gmra.mrb[32].mxu1 %vm14583_vm8, %v6635_v59  ;;  %v6956_v59 = vld [vmem:[#allocation3 + $0xc5] sm:$0xff]  ;;  %vm14593_vm8 = vmmov %vm14530_vm0 }
 0x5d3   : > { %9955 = vmatprep.mubr.msk.bf16.mxu1 %vm14584_vm2, %v6972_v6  ;;  %v6982_v30 = vpack.c.bf16 %v6957_v12, %v6956_v59  ;;  %v6959_v6 = vld [vmem:[#allocation3 + $0xdd] sm:$0xff]  ;;  %vm14594_vm2 = vmmov %vm14530_vm0 }
 0x5d4   : > { %v6983_v20 = vpack.c.bf16 %v6959_v6, %v6958_v3  ;;  %v7297_v12 = vld [vmem:[#allocation3 + $0x5e] sm:$0xff]  ;;  %v7300_v6 = vld [vmem:[#allocation3 + $0x76] sm:$0xff] }
 0x5da   : > { %9956 = vmatmul.mubr.msk.bf16.vlgmr.msra.gmra.mrb[0].mxu1 %vm14585_vm3, %v6973_v33  ;;  %v6984_v33 = vpack.c.bf16 %v6961_v2, %v6960_v52  ;;  %vm14595_vm3 = vmmov %vm14530_vm0  ;;  %v7301_v2 = vld [vmem:[#allocation3 + $0x7e] sm:$0xff] }
 0x5db   : > { %9959 = vmatprep.mubr.msk.bf16.mxu1 %vm14586_vm14, %v6974_v19  ;;  %9992 = vmatpush3.bf16.msra.mxu1 %v10825_v50  ;;  %v6955_v50 = vld [vmem:[#allocation3 + $0xbd] sm:$0xff]  ;;  %v6965_v19 = vld [vmem:[#allocation3 + $0x10d] sm:$0xff]  ;;  %vm14596_vm14 = vmmov %vm14530_vm0  ;;  %v7331_v52 = vpack.c.bf16 %v7301_v2, %v7300_v6 }
 0x5dc   : > { %9993 = vmatprep.subr.bf16.mxu1 %v10826_v1  ;;  %v6981_v48 = vpack.c.bf16 %v6955_v50, %v6954_v56  ;;  %v6986_v63 = vpack.c.bf16 %v6965_v19, %v6964_v10  ;;  %v7296_v50 = vld [vmem:[#allocation3 + $0x56] sm:$0xff]  ;;  %v7305_v19 = vld [vmem:[#allocation3 + $0x9e] sm:$0xff] }
 0x5dd   : > { %v7329_v59 = vpack.c.bf16 %v7297_v12, %v7296_v50  ;;  %v7320_v12 = vld [vmem:[#allocation3 + $0x116] sm:$0xff] }
 0x5de   : > { %v7324_v2 = vld [vmem:[#allocation3 + $0x136] sm:$0xff] }
 0x5df   : > { %9994 = vmatpush3.bf16.msra.mxu1 %v10826_v1  ;;  %v6963_v1 = vld [vmem:[#allocation3 + $0xfd] sm:$0xff] }
 0x5e0   : > { %9995 = vmatprep.subr.bf16.mxu1 %v10827_v57 }
 0x5e2   : > { %9960 = vmatmul.mubr.msk.bf16.gmra.mrb[4].mxu1 %vm14587_vm5, %v6975_v38  ;;  %vm14597_vm5 = vmmov %vm14530_vm0  ;;  %v6967_v38 = vld [vmem:[#allocation3 + $0x11d] sm:$0xff] }
 0x5e3   : > { %9963 = vmatprep.mubr.msk.bf16.mxu1 %vm14530_vm0, %v6976_v54  ;;  %9996 = vmatpush3.bf16.msra.mxu1 %v10827_v57  ;;  %v6985_v57 = vpack.c.bf16 %v6963_v1, %v6962_v27  ;;  %v6987_v54 = vpack.c.bf16 %v6967_v38, %v6966_v51  ;;  %v7304_v1 = vld [vmem:[#allocation3 + $0x96] sm:$0xff] }
 0x5e4   : > { %9997 = vmatprep.subr.bf16.mxu1 %v10828_v61  ;;  %v7333_v10 = vpack.c.bf16 %v7305_v19, %v7304_v1  ;;  %v7308_v38 = vld [vmem:[#allocation3 + $0xb6] sm:$0xff] }
 0x5e7   : > { %9998 = vmatpush3.bf16.msra.mxu1 %v10828_v61  ;;  %v6969_v61 = vld [vmem:[#allocation3 + $0x12d] sm:$0xff] }
 0x5e8   : > { %v6988_v24 = vpack.c.bf16 %v6969_v61, %v6968_v49  ;;  %v7309_v49 = vld [vmem:[#allocation3 + $0xbe] sm:$0xff]  ;;  %v7311_v61 = vld [vmem:[#allocation3 + $0xce] sm:$0xff] }
 0x5ea   : > { %9964 = vmatmul.mubr.msk.bf16.gmra.mrb[8].mxu1 %vm14588_vm9, %v6977_v23  ;;  %vm14598_vm9 = vmmov %vm14530_vm0  ;;  %v6989_v23 = vpack.c.bf16 %v6971_v11, %v6970_v29  ;;  %v7312_v11 = vld [vmem:[#allocation3 + $0xd6] sm:$0xff] }
 0x5eb   : > { %9967 = vmatprep.mubr.msk.bf16.mxu1 %vm14589_vm7, %v6978_v17  ;;  %v7290_v17 = vld [vmem:[#allocation3 + $0x26] sm:$0xff]  ;;  %vm14599_vm7 = vmmov %vm14530_vm0 }
 0x5ec   : > { %v7326_v37 = vpack.c.bf16 %v7291_v13, %v7290_v17  ;;  %v7315_v13 = vld [vmem:[#allocation3 + $0xee] sm:$0xff] }
 0x5f2   : > { %9968 = vmatmul.mubr.msk.bf16.gmra.mrb[12].mxu1 %vm14590_vm11, %v6979_v53  ;;  %vm14600_vm11 = vmmov %vm14530_vm0  ;;  %v7295_v53 = vld [vmem:[#allocation3 + $0x4e] sm:$0xff] }
 0x5f3   : > { %9971 = vmatprep.mubr.msk.bf16.mxu1 %vm14591_vm6, %v6980_v34  ;;  %v7294_v34 = vld [vmem:[#allocation3 + $0x46] sm:$0xff]  ;;  %vm14601_vm6 = vmmov %vm14530_vm0 }
 0x5f4   : > { %v7328_v56 = vpack.c.bf16 %v7295_v53, %v7294_v34  ;;  %v7317_v53 = vld [vmem:[#allocation3 + $0xfe] sm:$0xff] }
 0x5f5   : > { %v7339_v34 = vpack.c.bf16 %v7317_v53, %v7316_v58 }
 0x5fa   : > { %9972 = vmatmul.mubr.msk.bf16.gmra.mrb[16].mxu1 %vm14592_vm12, %v6981_v48  ;;  %vm14602_vm12 = vmmov %vm14530_vm0  ;;  %v7299_v48 = vld [vmem:[#allocation3 + $0x6e] sm:$0xff] }
 0x5fb   : > { %9975 = vmatprep.mubr.msk.bf16.mxu1 %vm14593_vm8, %v6982_v30  ;;  %v7298_v30 = vld [vmem:[#allocation3 + $0x66] sm:$0xff]  ;;  %vm14603_vm8 = vmmov %vm14530_vm0 }
 0x5fc   : > { %v7330_v3 = vpack.c.bf16 %v7299_v48, %v7298_v30  ;;  %v7321_v48 = vld [vmem:[#allocation3 + $0x11e] sm:$0xff]  ;;  %v7323_v30 = vld [vmem:[#allocation3 + $0x12e] sm:$0xff] }
 0x602   : > { %9976 = vmatmul.mubr.msk.bf16.gmra.mrb[20].mxu1 %vm14594_vm2, %v6983_v20  ;;  %vm14604_vm2 = vmmov %vm14530_vm0  ;;  %v7303_v20 = vld [vmem:[#allocation3 + $0x8e] sm:$0xff] }
 0x603   : > { %9979 = vmatprep.mubr.msk.bf16.mxu1 %vm14595_vm3, %v6984_v33  ;;  %v7302_v33 = vld [vmem:[#allocation3 + $0x86] sm:$0xff]  ;;  %vm14605_vm3 = vmmov %vm14530_vm0 }
 0x604   : > { %v7332_v27 = vpack.c.bf16 %v7303_v20, %v7302_v33  ;;  %v7325_v20 = vld [vmem:[#allocation3 + $0x13e] sm:$0xff]  ;;  %v13275_v33 = vld [vmem:[%s14082_s4] ss:$0 sm:$0xff] }
 0x60a   : > { %9980 = vmatmul.mubr.msk.bf16.gmra.mrb[24].mxu1 %vm14596_vm14, %v6985_v57  ;;  %vm14606_vm14 = vmmov %vm14530_vm0  ;;  %v7307_v57 = vld [vmem:[#allocation3 + $0xae] sm:$0xff] }
 0x60b   : > { %9983 = vmatprep.mubr.msk.bf16.mxu1 %vm14597_vm5, %v6986_v63  ;;  %v7306_v63 = vld [vmem:[#allocation3 + $0xa6] sm:$0xff]  ;;  %vm14607_vm5 = vmmov %vm14530_vm0 }
 0x60c   : > { %v7334_v51 = vpack.c.bf16 %v7307_v57, %v7306_v63 }
 0x612   : > { %9984 = vmatmul.mubr.msk.bf16.gmra.mrb[28].mxu1 %vm14530_vm0, %v6987_v54  ;;  %v7335_v54 = vpack.c.bf16 %v7309_v49, %v7308_v38 }
 0x613   : > { %9987 = vmatprep.mubr.msk.bf16.mxu1 %vm14598_vm9, %v6988_v24  ;;  %v7310_v24 = vld [vmem:[#allocation3 + $0xc6] sm:$0xff]  ;;  %vm14608_vm9 = vmmov %vm14530_vm0 }
 0x614   : > { %v7336_v29 = vpack.c.bf16 %v7311_v61, %v7310_v24 }
 0x61a   : > { %9988 = vmatmul.mubr.msk.bf16.gmra.mrb[32].mxu1 %vm14599_vm7, %v6989_v23  ;;  %vm14609_vm7 = vmmov %vm14530_vm0  ;;  %v7313_v23 = vld [vmem:[#allocation3 + $0xde] sm:$0xff] }
 0x61b   : > { %9999 = vmatprep.mubr.msk.bf16.mxu1 %vm14600_vm11, %v7326_v37  ;;  %v7337_v17 = vpack.c.bf16 %v7313_v23, %v7312_v11  ;;  %v7314_v37 = vld [vmem:[#allocation3 + $0xe6] sm:$0xff]  ;;  %vm14610_vm11 = vmmov %vm14530_vm0 }
 0x61c   : > { %v7338_v44 = vpack.c.bf16 %v7315_v13, %v7314_v37 }
 0x622   : > { %10000 = vmatmul.mubr.msk.bf16.vlgmr.msra.gmra.mrb[0].mxu1 %vm14601_vm6, %v7327_v4  ;;  %vm14611_vm6 = vmmov %vm14530_vm0  ;;  %v7319_v4 = vld [vmem:[#allocation3 + $0x10e] sm:$0xff] }
 0x623   : > { %10003 = vmatprep.mubr.msk.bf16.mxu1 %vm14602_vm12, %v7328_v56  ;;  %v7318_v56 = vld [vmem:[#allocation3 + $0x106] sm:$0xff]  ;;  %vm14612_vm12 = vmmov %vm14530_vm0 }
 0x624   : > { %v7340_v50 = vpack.c.bf16 %v7319_v4, %v7318_v56 }
 0x62a   : > { %10004 = vmatmul.mubr.msk.bf16.gmra.mrb[4].mxu1 %vm14603_vm8, %v7329_v59  ;;  %vm14613_vm8 = vmmov %vm14530_vm0  ;;  %v7322_v59 = vld [vmem:[#allocation3 + $0x126] sm:$0xff] }
 0x62b   : > { %10007 = vmatprep.mubr.msk.bf16.mxu1 %vm14604_vm2, %v7330_v3  ;;  %v7341_v3 = vpack.c.bf16 %v7321_v48, %v7320_v12  ;;  %v7342_v6 = vpack.c.bf16 %v7323_v30, %v7322_v59  ;;  %vm14614_vm2 = vmmov %vm14530_vm0 }
 0x632   : > { %10008 = vmatmul.mubr.msk.bf16.gmra.mrb[8].mxu1 %vm14605_vm3, %v7331_v52  ;;  %vm14615_vm3 = vmmov %vm14530_vm0  ;;  %v7343_v52 = vpack.c.bf16 %v7325_v20, %v7324_v2  ;;  %v14630_v20 = vld [vmem:[#allocation31_spill] sm:$0xff] }
 0x633   : > { %10011 = vmatprep.mubr.msk.bf16.mxu1 %vm14606_vm14, %v7332_v27  ;;  %vm14616_vm14 = vmmov %vm14530_vm0 }
 0x63a   : > { %10012 = vmatmul.mubr.msk.bf16.gmra.mrb[12].mxu1 %vm14607_vm5, %v7333_v10  ;;  %vm423_vm5 = vcmask 519168  }
 0x63b   : > { %10015 = vmatprep.mubr.msk.bf16.mxu1 %vm14530_vm0, %v7334_v51  ;;  %vm14617_vm0 = vnez %v14250_v46  ;;  %v14623_v46 = vld [vmem:[#allocation27_spill] sm:$0xff] }
 0x642   : > { %10016 = vmatmul.mubr.msk.bf16.gmra.mrb[16].mxu1 %vm14608_vm9, %v7335_v54  ;;  %vm14618_vm9 = vnez %v14244_v21  ;;  %v14619_v54 = vld [vmem:[#allocation28_spill] sm:$0xff] }
 0x643   : > { %10019 = vmatprep.mubr.msk.bf16.mxu1 %vm14609_vm7, %v7336_v29  ;;  %vm14620_vm7 = vnez %v14619_v54 }
 0x64a   : > { %10020 = vmatmul.mubr.msk.bf16.gmra.mrb[20].mxu1 %vm14610_vm11, %v7337_v17  ;;  %vm14621_vm11 = vmmov %vm14614_vm2 }
 0x64b   : > { %10023 = vmatprep.mubr.msk.bf16.mxu1 %vm14611_vm6, %v7338_v44  ;;  %vm14622_vm6 = vmmov %vm14614_vm2 }
 0x652   : > { %10024 = vmatmul.mubr.msk.bf16.gmra.mrb[24].mxu1 %vm14612_vm12, %v7339_v34  ;;  %vm14624_vm12 = vnez %v14623_v46 }
 0x653   : > { %10027 = vmatprep.mubr.msk.bf16.mxu1 %vm14613_vm8, %v7340_v50  ;;  %vm14625_vm8 = vmmov %vm14614_vm2 }
 0x65a   : > { %10028 = vmatmul.mubr.msk.bf16.gmra.mrb[28].mxu1 %vm14614_vm2, %v7341_v3  ;;  %v14628_v3 = vld [vmem:[#allocation29_spill] sm:$0xff] }
 0x65b   : > { %10031 = vmatprep.mubr.msk.bf16.mxu1 %vm14615_vm3, %v7342_v6  ;;  %vm14626_vm3 = vnez %v14274_v62 }
 0x662   : > { %10032 = vmatmul.mubr.msk.bf16.gmra.mrb[32].mxu1 %vm14616_vm14, %v7343_v52  ;;  %vm14627_vm14 = vmmov %vm14614_vm2 }
 0x6f5   : > { %v10001_v27 = vpop.f32.mrb[0].mxu1 }
 0x6f6   : > { %v7465_v1 = vpop.f32.mrb[1].mxu1  ;;  %v13278_v19 = vadd.f32 %v10001_v27, %v13275_v33  ;;  %v14633_v27 = vld [vmem:[#allocation30_spill] sm:$0xff] }
 0x6f7   : > { %v13281_v57 = vadd.f32 %v13275_v33, %v7465_v1  ;;  %v10002_v10 = vpop.f32.mrb[2].mxu1 }
 0x6f8   : > { %v7468_v63 = vpop.f32.mrb[3].mxu1  ;;  %v13287_v38 = vadd.f32 %v10002_v10, %v13275_v33  ;;  %v7689_v61 = vsel %vm14618_vm9, %v13278_v19, 0.0  ;;  %vm14631_vm9 = vnez %v14630_v20 }
 0x6f9   : > { %v7687_v51 = vsel %vm14617_vm0, %v13281_v57, 0.0  ;;  %v13290_v49 = vadd.f32 %v13275_v33, %v7468_v63  ;;  %v7726_v37 = vsel %vm14625_vm8, %v7689_v61, 0.0  ;;  %vm14629_vm0 = vnez %v14628_v3 }
 0x6fa   : > { %v7723_v29 = vsel %vm14621_vm11, %v7687_v51, 0.0  ;;  %v7690_v23 = vsel %vm14624_vm12, %v13287_v38, 0.0  ;;  %vm14634_vm11 = vnez %v14633_v27  ;;  %vm14636_vm12 = vmmov %vm14614_vm2  ;;  %vm14637_vm8 = vnez %v14308_v36 }
 0x6fb   : > { %v7688_v24 = vsel %vm14620_vm7, %v13290_v49, 0.0  ;;  %v7728_v34 = vsel %vm14614_vm2, %v7690_v23, 0.0  ;;  %vm14632_vm7 = vmmov %vm14614_vm2 }
 0x6fc   : > { %v7724_v11 = vsel %vm14622_vm6, %v7688_v24, 0.0  ;;  %vm14635_vm6 = vmmov %vm14614_vm2 }
 0x6fd   : > { %v7725_v13 = vadd.f32 %v7724_v11, %v7723_v29  ;;  %v10005_v17 = vpop.f32.mrb[4].mxu1 }
 0x6fe   : > { %v7481_v44 = vpop.f32.mrb[5].mxu1  ;;  %v13305_v21 = vadd.f32 %v10005_v17, %v13275_v33 }
 0x6ff   : > { %v7727_v58 = vadd.f32 %v7726_v37, %v7725_v13  ;;  %v13308_v53 = vadd.f32 %v13275_v33, %v7481_v44  ;;  %v10006_v4 = vpop.f32.mrb[6].mxu1 }
 0x700   : > { %v7484_v56 = vpop.f32.mrb[7].mxu1  ;;  %v13315_v48 = vadd.f32 %v10006_v4, %v13275_v33  ;;  %v7693_v6 = vsel %vm14629_vm0, %v13305_v21, 0.0  ;;  %v14638_v4 = vld [vmem:[#allocation32_spill] sm:$0xff]  ;;  %vm14642_vm0 = vmmov %vm14614_vm2 }
 0x701   : > { %v7691_v50 = vsel %vm14626_vm3, %v13308_v53, 0.0  ;;  %v7729_v12 = vadd.f32 %v7728_v34, %v7727_v58  ;;  %v13318_v59 = vadd.f32 %v13275_v33, %v7484_v56  ;;  %v7734_v51 = vsel %vm14635_vm6, %v7693_v6, 0.0  ;;  %vm14647_vm6 = vmmov %vm14642_vm0 }
 0x702   : > { %v7730_v30 = vsel %vm14627_vm14, %v7691_v50, 0.0  ;;  %v7694_v1 = vsel %vm14634_vm11, %v13315_v48, 0.0  ;;  %vm14639_vm3 = vnez %v14638_v4  ;;  %v14640_v50 = vld [vmem:[#allocation18_spill] sm:$0xff]  ;;  %vm14646_vm11 = vmmov %vm14642_vm0 }
 0x703   : > { %v7731_v2 = vadd.f32 %v7730_v30, %v7729_v12  ;;  %v7692_v52 = vsel %vm14631_vm9, %v13318_v59, 0.0  ;;  %v7736_v46 = vsel %vm14636_vm12, %v7694_v1, 0.0  ;;  %vm14641_vm14 = vnez %v14640_v50  ;;  %v14643_v30 = vld [vmem:[#allocation21_spill] sm:$0xff] }
 0x704   : > { %v7732_v62 = vsel %vm14632_vm7, %v7692_v52, 0.0  ;;  %vm14644_vm9 = vnez %v14643_v30  ;;  %vm14645_vm7 = vmmov %vm14642_vm0  ;;  %vm14648_vm12 = vnez %v14330_v39 }
 0x705   : > { %v7733_v10 = vadd.f32 %v7732_v62, %v7731_v2  ;;  %v10009_v63 = vpop.f32.mrb[8].mxu1 }
 0x706   : > { %v7497_v61 = vpop.f32.mrb[9].mxu1  ;;  %v13333_v24 = vadd.f32 %v10009_v63, %v13275_v33 }
 0x707   : > { %v7735_v54 = vadd.f32 %v7734_v51, %v7733_v10  ;;  %v13336_v29 = vadd.f32 %v13275_v33, %v7497_v61  ;;  %v10010_v11 = vpop.f32.mrb[10].mxu1 }
 0x708   : > { %v7500_v23 = vpop.f32.mrb[11].mxu1  ;;  %v13343_v37 = vadd.f32 %v10010_v11, %v13275_v33  ;;  %v7697_v34 = vsel %vm14639_vm3, %v13333_v24, 0.0  ;;  %vm14652_vm3 = vmmov %vm14642_vm0 }
 0x709   : > { %v7695_v13 = vsel %vm14637_vm8, %v13336_v29, 0.0  ;;  %v7737_v17 = vadd.f32 %v7736_v46, %v7735_v54  ;;  %v13346_v44 = vadd.f32 %v13275_v33, %v7500_v23  ;;  %v7742_v20 = vsel %vm14645_vm7, %v7697_v34, 0.0 }
 0x70a   : > { %v7738_v58 = vsel %vm14614_vm2, %v7695_v13, 0.0  ;;  %v7698_v3 = vsel %vm14644_vm9, %v13343_v37, 0.0  ;;  %vm14649_vm8 = vnez %v14348_v41  ;;  %vm14650_vm2 = vmmov %vm14642_vm0  ;;  %vm14656_vm7 = vnez %v14362_v16 }
 0x70b   : > { %v7739_v56 = vadd.f32 %v7738_v58, %v7737_v17  ;;  %v7696_v12 = vsel %vm14641_vm14, %v13346_v44, 0.0  ;;  %v7744_v63 = vsel %vm14646_vm11, %v7698_v3, 0.0  ;;  %vm14653_vm14 = vmmov %vm14642_vm0  ;;  %vm14657_vm11 = vnez %v14378_v55 }
 0x70c   : > { %v7740_v36 = vsel %vm14642_vm0, %v7696_v12, 0.0  ;;  %vm14654_vm0 = vnez %v14366_v31  ;;  %vm14655_vm9 = vmmov %vm14650_vm2 }
 0x70d   : > { %v7741_v6 = vadd.f32 %v7740_v36, %v7739_v56  ;;  %v10013_v2 = vpop.f32.mrb[12].mxu1 }
 0x70e   : > { %v7513_v52 = vpop.f32.mrb[13].mxu1  ;;  %v13361_v27 = vadd.f32 %v10013_v2, %v13275_v33 }
 0x70f   : > { %v7743_v62 = vadd.f32 %v7742_v20, %v7741_v6  ;;  %v13364_v1 = vadd.f32 %v13275_v33, %v7513_v52  ;;  %v10014_v10 = vpop.f32.mrb[14].mxu1 }
 0x710   : > { %v7516_v51 = vpop.f32.mrb[15].mxu1  ;;  %v13371_v11 = vadd.f32 %v10014_v10, %v13275_v33  ;;  %v7701_v13 = vsel %vm14648_vm12, %v13361_v27, 0.0  ;;  %vm14659_vm12 = vnez %v14371_v15 }
 0x711   : > { %v7699_v61 = vsel %vm12508_vm10, %v13364_v1, 0.0  ;;  %v7745_v54 = vadd.f32 %v7744_v63, %v7743_v62  ;;  %v13374_v46 = vadd.f32 %v13275_v33, %v7516_v51  ;;  %vm14651_vm10 = vnez %v14340_v5 }
 0x712   : > { %v7746_v23 = vsel %vm14647_vm6, %v7699_v61, 0.0  ;;  %v7702_v4 = vsel %vm14651_vm10, %v13371_v11, 0.0  ;;  %v7750_v50 = vsel %vm14652_vm3, %v7701_v13, 0.0  ;;  %vm14658_vm6 = vmmov %vm14650_vm2 }
 0x713   : > { %v7747_v17 = vadd.f32 %v7746_v23, %v7745_v54  ;;  %v7700_v58 = vsel %vm14649_vm8, %v13374_v46, 0.0  ;;  %v7752_v3 = vsel %vm14653_vm14, %v7702_v4, 0.0  ;;  %vm14660_vm8 = vmmov %vm14650_vm2 }
 0x714   : > { %v7748_v22 = vsel %vm14650_vm2, %v7700_v58, 0.0  ;;  %vm14661_vm10 = vmmov %vm14650_vm2 }
 0x715   : > { %v7749_v34 = vadd.f32 %v7748_v22, %v7747_v17  ;;  %v10017_v56 = vpop.f32.mrb[16].mxu1  ;;  %vm14662_vm3 = vmmov %vm14650_vm2 }
 0x716   : > { %v7529_v12 = vpop.f32.mrb[17].mxu1  ;;  %v13389_v39 = vadd.f32 %v10017_v56, %v13275_v33  ;;  %vm14664_vm14 = vmmov %vm14650_vm2 }
 0x717   : > { %v7751_v36 = vadd.f32 %v7750_v50, %v7749_v34  ;;  %v13392_v30 = vadd.f32 %v13275_v33, %v7529_v12  ;;  %v10018_v41 = vpop.f32.mrb[18].mxu1 }
 0x718   : > { %v7532_v6 = vpop.f32.mrb[19].mxu1  ;;  %v13399_v20 = vadd.f32 %v10018_v41, %v13275_v33  ;;  %v7705_v10 = vsel %vm14656_vm7, %v13389_v39, 0.0  ;;  %vm14669_vm7 = vnez %v14439_v25 }
 0x719   : > { %v7703_v5 = vsel %vm14654_vm0, %v13392_v30, 0.0  ;;  %v7753_v2 = vadd.f32 %v7752_v3, %v7751_v36  ;;  %v13402_v52 = vadd.f32 %v13275_v33, %v7532_v6  ;;  %v7758_v13 = vsel %vm14660_vm8, %v7705_v10, 0.0 }
 0x71a   : > { %v7754_v62 = vsel %vm14655_vm9, %v7703_v5, 0.0  ;;  %v7706_v61 = vsel %vm14659_vm12, %v13399_v20, 0.0  ;;  %vm14668_vm9 = vnez %v14410_v0 }
 0x71b   : > { %v7755_v63 = vadd.f32 %v7754_v62, %v7753_v2  ;;  %v7704_v51 = vsel %vm14657_vm11, %v13402_v52, 0.0  ;;  %v7760_v4 = vsel %vm14650_vm2, %v7706_v61, 0.0 }
 0x71c   : > { %v7756_v31 = vsel %vm14658_vm6, %v7704_v51, 0.0  ;;  %vm14671_vm6 = vnez %v14425_v32 }
 0x71d   : > { %v7757_v54 = vadd.f32 %v7756_v31, %v7755_v63  ;;  %v10021_v23 = vpop.f32.mrb[20].mxu1 }
 0x71e   : > { %v7545_v17 = vpop.f32.mrb[21].mxu1  ;;  %v13417_v16 = vadd.f32 %v10021_v23, %v13275_v33 }
 0x71f   : > { %v7759_v58 = vadd.f32 %v7758_v13, %v7757_v54  ;;  %v13420_v22 = vadd.f32 %v13275_v33, %v7545_v17  ;;  %v10022_v55 = vpop.f32.mrb[22].mxu1 }
 0x720   : > { %v7548_v34 = vpop.f32.mrb[23].mxu1  ;;  %v13427_v50 = vadd.f32 %v10022_v55, %v13275_v33  ;;  %v7709_v41 = vsel %vm12711_vm1, %v13417_v16, 0.0  ;;  %vm14665_vm1 = vmmov %vm14650_vm2 }
 0x721   : > { %v7707_v15 = vsel %vm12729_vm15, %v13420_v22, 0.0  ;;  %v7761_v56 = vadd.f32 %v7760_v4, %v7759_v58  ;;  %v13430_v12 = vadd.f32 %v13275_v33, %v7548_v34  ;;  %vm14663_vm15 = vnez %v14397_v26  ;;  %vm14667_vm0 = vmmov %vm14665_vm1 }
 0x722   : > { %v7762_v36 = vsel %vm14661_vm10, %v7707_v15, 0.0  ;;  %v7710_v5 = vsel %vm14663_vm15, %v13427_v50, 0.0  ;;  %v7766_v10 = vsel %vm14664_vm14, %v7709_v41, 0.0  ;;  %vm14670_vm11 = vmmov %vm14667_vm0  ;;  %vm14679_vm10 = vnez %v14441_v28 }
 0x723   : > { %v7763_v3 = vadd.f32 %v7762_v36, %v7761_v56  ;;  %v7708_v6 = vsel %vm12758_vm13, %v13430_v12, 0.0  ;;  %v7768_v61 = vsel %vm14665_vm1, %v7710_v5, 0.0  ;;  %vm14666_vm13 = vnez %v14414_v47  ;;  %vm14672_vm12 = vmmov %vm14667_vm0 }
 0x724   : > { %v7764_v8 = vsel %vm14662_vm3, %v7708_v6, 0.0  ;;  %vm14675_vm8 = vmmov %vm14667_vm0  ;;  %vm14680_vm3 = vnez %v14457_v9 }
 0x725   : > { %v7765_v2 = vadd.f32 %v7764_v8, %v7763_v3  ;;  %v10025_v62 = vpop.f32.mrb[24].mxu1  ;;  %vm14678_vm2 = vmmov %vm14667_vm0 }
 0x726   : > { %v7561_v63 = vpop.f32.mrb[25].mxu1  ;;  %v13445_v45 = vadd.f32 %v10025_v62, %v13275_v33  ;;  %vm14681_vm15 = vmmov %vm14667_vm0 }
 0x727   : > { %v7767_v51 = vadd.f32 %v7766_v10, %v7765_v2  ;;  %v13448_v31 = vadd.f32 %v13275_v33, %v7561_v63  ;;  %v10026_v43 = vpop.f32.mrb[26].mxu1  ;;  %vm14683_vm14 = vmmov %vm14667_vm0 }
 0x728   : > { %v7564_v54 = vpop.f32.mrb[27].mxu1  ;;  %v13455_v13 = vadd.f32 %v10026_v43, %v13275_v33  ;;  %v7713_v55 = vsel %vm14668_vm9, %v13445_v45, 0.0  ;;  %vm14686_vm1 = vmmov %vm14667_vm0  ;;  %vm14690_vm9 = vnez %v14474_v35 }
 0x729   : > { %v7711_v26 = vsel %vm14666_vm13, %v13448_v31, 0.0  ;;  %v7769_v23 = vadd.f32 %v7768_v61, %v7767_v51  ;;  %v13458_v17 = vadd.f32 %v13275_v33, %v7564_v54  ;;  %v7774_v41 = vsel %vm14672_vm12, %v7713_v55, 0.0  ;;  %vm14694_vm12 = vmmov %vm14667_vm0 }
 0x72a   : > { %v7770_v58 = vsel %vm14667_vm0, %v7711_v26, 0.0  ;;  %v7714_v15 = vsel %vm14671_vm6, %v13455_v13, 0.0  ;;  %vm14687_vm13 = vnez %v14476_v18  ;;  %vm14693_vm6 = vnez %v14479_v60 }
 0x72b   : > { %v7771_v4 = vadd.f32 %v7770_v58, %v7769_v23  ;;  %v7712_v34 = vsel %vm14669_vm7, %v13458_v17, 0.0  ;;  %v7776_v5 = vsel %vm14675_vm8, %v7714_v15, 0.0  ;;  %vm14691_vm7 = vnez %v14482_v42  ;;  %vm14695_vm8 = vmmov %vm14667_vm0 }
 0x72c   : > { %v7772_v47 = vsel %vm14670_vm11, %v7712_v34, 0.0  ;;  %vm14692_vm11 = vmmov %vm14667_vm0 }
 0x72d   : > { %v7773_v56 = vadd.f32 %v7772_v47, %v7771_v4  ;;  %v10029_v36 = vpop.f32.mrb[28].mxu1 }
 0x72e   : > { %v7577_v3 = vpop.f32.mrb[29].mxu1  ;;  %v13473_v0 = vadd.f32 %v10029_v36, %v13275_v33 }
 0x72f   : > { %v7775_v6 = vadd.f32 %v7774_v41, %v7773_v56  ;;  %v13476_v8 = vadd.f32 %v13275_v33, %v7577_v3  ;;  %v10030_v25 = vpop.f32.mrb[30].mxu1 }
 0x730   : > { %14673 = vst [vmem:[#allocation16_spill] sm:$0xff] %v13473_v0  ;;  %v7580_v2 = vpop.f32.mrb[31].mxu1  ;;  %v13483_v10 = vadd.f32 %v10030_v25, %v13275_v33  ;;  %v7717_v43 = vsel %vm14679_vm10, %v13473_v0, 0.0  ;;  %vm7949_vm10 = vcmask 1041408  }
 0x731   : > { %14674 = vst [vmem:[#allocation23_spill] sm:$0xff] %v13476_v8  ;;  %v7715_v32 = vsel %vm12939_vm4, %v13476_v8, 0.0  ;;  %v7777_v62 = vadd.f32 %v7776_v5, %v7775_v6  ;;  %v13486_v63 = vadd.f32 %v13275_v33, %v7580_v2  ;;  %vm14682_vm4 = vnez %v14449_v7 }
 0x732   : > { %14676 = vst [vmem:[#allocation19_spill] sm:$0xff] %v13483_v10  ;;  %v7778_v51 = vsel %vm14678_vm2, %v7715_v32, 0.0  ;;  %v7718_v26 = vsel %vm14682_vm4, %v13483_v10, 0.0  ;;  %v7782_v55 = vsel %vm14683_vm14, %v7717_v43, 0.0  ;;  %vm7848_vm2 = vcmask 31744  }
 0x733   : > { %14677 = vst [vmem:[#allocation17_spill] sm:$0xff] %v13486_v63  ;;  %v7779_v61 = vadd.f32 %v7778_v51, %v7777_v62  ;;  %v7716_v54 = vsel %vm14680_vm3, %v13486_v63, 0.0  ;;  %v7784_v15 = vsel %vm14686_vm1, %v7718_v26, 0.0  ;;  %vm7994_vm3 = vcmask 1045504  }
 0x734   : > { %v7780_v40 = vsel %vm14681_vm15, %v7716_v54, 0.0  ;;  %vm7972_vm15 = vcmask 1043456   ;;  %vm7963_vm4 = vcmask 523266   ;;  %vm7966_vm14 = vcmask 517120  }
 0x735   : > { %v7781_v23 = vadd.f32 %v7780_v40, %v7779_v61  ;;  %v10033_v58 = vpop.f32.mrb[32].mxu1  ;;  %vm7986_vm1 = vcmask 523268  }
 0x736   : > { %v7593_v4 = vpop.f32.mrb[33].mxu1  ;;  %v13501_v28 = vadd.f32 %v10033_v58, %v13275_v33 }
 0x737   : > { %v7783_v34 = vadd.f32 %v7782_v55, %v7781_v23  ;;  %v13504_v47 = vadd.f32 %v13275_v33, %v7593_v4  ;;  %v10034_v9 = vpop.f32.mrb[34].mxu1  ;;  %v7832_v55 = vld [vmem:[%s14083_s5] sm:$0xff] }
 0x738   : > { %14684 = vst [vmem:[#allocation15_spill] sm:$0xff] %v13501_v28  ;;  %v7596_v56 = vpop.f32.mrb[35].mxu1  ;;  %v13511_v41 = vadd.f32 %v10034_v9, %v13275_v33  ;;  %v7721_v25 = vsel %vm14690_vm9, %v13501_v28, 0.0  ;;  %v7833_v9 = vld [vmem:[%s14083_s5 + $0x8] sm:$0xff]  ;;  %v13653_v28 = vld [vmem:[%s11230_s22 + $0xf8] sm:$0xff]  ;;  %vm14760_vm9 = vmmov %vm14695_vm8 }
 0x739   : > { %14685 = vst [vmem:[#allocation24_spill] sm:$0xff] %v13504_v47  ;;  %v7719_v7 = vsel %vm14687_vm13, %v13504_v47, 0.0  ;;  %v7785_v36 = vadd.f32 %v7784_v15, %v7783_v34  ;;  %v13514_v3 = vadd.f32 %v13275_v33, %v7596_v56  ;;  %v7790_v33 = vsel %vm14694_vm12, %v7721_v25, 0.0  ;;  %v7834_v34 = vld [vmem:[%s14083_s5 + $0x10] sm:$0xff]  ;;  %v7835_v56 = vld [vmem:[%s14083_s5 + $0x18] sm:$0xff]  ;;  %14706 = vst [vmem:[#allocation33_spill] sm:$0xff] %v13653_v28 }
 0x73a   : > { %14688 = vst [vmem:[#allocation20_spill] sm:$0xff] %v13511_v41  ;;  %v7786_v6 = vsel %vm14667_vm0, %v7719_v7, 0.0  ;;  %v7722_v32 = vsel %vm14693_vm6, %v13511_v41, 0.0  ;;  %v13650_v41 = vld [vmem:[%s11230_s22 + $0xf0] sm:$0xff]  ;;  %vm8008_vm13 = vcmask 523270   ;;  %vm8011_vm0 = vcmask 521216  }
 0x73b   : > { %14689 = vst [vmem:[#allocation26_spill] sm:$0xff] %v13514_v3  ;;  %v7787_v5 = vadd.f32 %v7786_v6, %v7785_v36  ;;  %v7720_v2 = vsel %vm14691_vm7, %v13514_v3, 0.0  ;;  %v7792_v43 = vsel %vm14695_vm8, %v7722_v32, 0.0  ;;  %14705 = vst [vmem:[#allocation21_spill] sm:$0xff] %v13650_v41 }
 0x73c   : > { %v7788_v18 = vsel %vm14692_vm11, %v7720_v2, 0.0  ;;  %vm14761_vm7 = vmmov %vm14695_vm8 }
 0x73d   : > { %v7789_v62 = vadd.f32 %v7788_v18, %v7787_v5  ;;  %v7836_v5 = vld [vmem:[%s14083_s5 + $0x20] sm:$0xff]  ;;  %vm14762_vm11 = vmmov %vm14761_vm7 }
 0x73e   : > { %vm14767_vm6 = vmmov %vm14761_vm7 }
 0x73f   : > { %v7791_v51 = vadd.f32 %v7790_v33, %v7789_v62  ;;  %v7837_v33 = vld [vmem:[%s14083_s5 + $0x28] sm:$0xff]  ;;  %vm14770_vm12 = vmmov %vm14767_vm6 }
 0x740   : > { %vm14771_vm8 = vmmov %vm14767_vm6 }
 0x741   : > { %v7793_v61 = vadd.f32 %v7792_v43, %v7791_v51 }
 0x743   : > { %v7794_v35 = vrot.slane %v7793_v61, 4 }
 0x745   : > { %v7795_v54 = vadd.f32 %v7794_v35, %v7793_v61 }
 0x747   : > { %v7796_v40 = vrot.slane %v7795_v54, 2 }
 0x749   : > { %v7797_v26 = vadd.f32 %v7796_v40, %v7795_v54  ;;  %v7838_v40 = vld [vmem:[%s14083_s5 + $0x30] sm:$0xff] }
 0x74b   : > { %v7798_v23 = vrot.slane %v7797_v26, 1 }
 0x74d   : > { %v7799_v42 = vadd.f32 %v7798_v23, %v7797_v26 }
 0x74f   : > { %v7800_v58 = vmul.f32 0.00390625, %v7799_v42 }
 0x751   : > { %7810 = vbcast.lane.b32.xlu1 %v7800_v58, 272  ;;  %7802 = vbcast.lane.b32.xlu0 %v7800_v58, 256 }
 0x755   : > { %7814 = vbcast.lane.b32.xlu1 %v7800_v58, 280  ;;  %7806 = vbcast.lane.b32.xlu0 %v7800_v58, 264 }
 0x759   : > { %7822 = vbcast.lane.b32.xlu1 %v7800_v58, 296  ;;  %7818 = vbcast.lane.b32.xlu0 %v7800_v58, 288 }
 0x75d   : > { %7830 = vbcast.lane.b32.xlu1 %v7800_v58, 312  ;;  %7826 = vbcast.lane.b32.xlu0 %v7800_v58, 304  ;;  %v7839_v58 = vld [vmem:[%s14083_s5 + $0x38] sm:$0xff] }
 0x7c3   : > { %v7811_v60 = vpop.permute.xlu1 %7810  ;;  %v7803_v4 = vpop.permute.xlu0 %7802 }
 0x7c4   : > { %v7840_v15 = vmul.f32 %v7832_v55, %v7803_v4  ;;  %v7842_v6 = vmul.f32 %v7834_v34, %v7811_v60 }
 0x7c6   : > { %v7849_v2 = vsel %vm7848_vm2, %v7840_v15, 0.0  ;;  %v7852_v61 = vsel %vm7848_vm2, %v7842_v6, 0.0 }
 0x7c7   : > { %v7815_v7 = vpop.permute.xlu1 %7814  ;;  %v7807_v36 = vpop.permute.xlu0 %7806 }
 0x7c8   : > { %v7841_v25 = vmul.f32 %v7833_v9, %v7807_v36  ;;  %v7843_v18 = vmul.f32 %v7835_v56, %v7815_v7 }
 0x7ca   : > { %v7850_v32 = vsel %vm7848_vm2, %v7841_v25, 0.0  ;;  %v7854_v26 = vsel %vm7848_vm2, %v7843_v18, 0.0 }
 0x7cb   : > { %v7851_v62 = vadd.f32 %v7850_v32, %v7849_v2  ;;  %v7823_v51 = vpop.permute.xlu1 %7822  ;;  %v7819_v43 = vpop.permute.xlu0 %7818 }
 0x7cc   : > { %v7844_v35 = vmul.f32 %v7836_v5, %v7819_v43  ;;  %v7845_v23 = vmul.f32 %v7837_v33, %v7823_v51  ;;  %v7870_v51 = vld [vmem:[%s14084_s6] sm:$0x1] }
 0x7cd   : > { %v7853_v54 = vadd.f32 %v7852_v61, %v7851_v62 }
 0x7ce   : > { %v7856_v4 = vsel %vm7848_vm2, %v7844_v35, 0.0  ;;  %v7858_v15 = vsel %vm7848_vm2, %v7845_v23, 0.0  ;;  %v14157_v35 = vsub.s32 0, %v11686_v14 }
 0x7cf   : > { %v7855_v42 = vadd.f32 %v7854_v26, %v7853_v54  ;;  %v7831_v60 = vpop.permute.xlu1 %7830  ;;  %v7827_v55 = vpop.permute.xlu0 %7826  ;;  %v7880_v26 = vld [vmem:[%s14085_s7] sm:$0xf] }
 0x7d0   : > { %v7846_v34 = vmul.f32 %v7838_v40, %v7827_v55  ;;  %v7847_v56 = vmul.f32 %v7839_v58, %v7831_v60 }
 0x7d1   : > { %v7857_v9 = vadd.f32 %v7856_v4, %v7855_v42 }
 0x7d2   : > { %v7860_v36 = vsel %vm7848_vm2, %v7846_v34, 0.0  ;;  %v7862_v25 = vsel %vm7848_vm2, %v7847_v56, 0.0  ;;  %vm14777_vm2 = vmmov %vm14767_vm6 }
 0x7d3   : > { %v7859_v7 = vadd.f32 %v7858_v15, %v7857_v9  ;;  %v7889_v15 = vld [vmem:[%s14086_s8] sm:$0x1] }
 0x7d5   : > { %v7861_v6 = vadd.f32 %v7860_v36, %v7859_v7 }
 0x7d7   : > { %v7863_v5 = vadd.f32 %v7862_v25, %v7861_v6  ;;  %v13575_v25 = vld [vmem:[%s11230_s22 + $0x10] sm:$0xff] }
 0x7d8   : > { %v14709_v47 = vrot.slane %v13575_v25, 6 }
 0x7d9   : > { %v7864_v2 = vrot.slane %v7863_v5, 4 }
 0x7db   : > { %v7865_v18 = vadd.f32 %v7864_v2, %v7863_v5  ;;  %v13578_v5 = vld [vmem:[%s11230_s22 + $0x18] sm:$0xff]  ;;  %v13581_v2 = vld [vmem:[%s11230_s22 + $0x28] sm:$0xff] }
 0x7dc   : > { %14696 = vst [vmem:[#allocation25_spill] sm:$0xff] %v13578_v5  ;;  %v14708_v3 = vrot.slane %v13578_v5, 6  ;;  %v14713_v0 = vrot.slane %v13581_v2, 4 }
 0x7dd   : > { %v7866_v32 = vrot.slane %v7865_v18, 2 }
 0x7df   : > { %v7867_v62 = vadd.f32 %v7866_v32, %v7865_v18  ;;  %v13584_v32 = vld [vmem:[%s11230_s22 + $0x30] sm:$0xff] }
 0x7e1   : > { %v7868_v33 = vrot.slane %v7867_v62, 1 }
 0x7e3   : > { %v7869_v43 = vadd.f32 %v7868_v33, %v7867_v62  ;;  %v13587_v62 = vld [vmem:[%s11230_s22 + $0x20] sm:$0xff]  ;;  %v13590_v33 = vld [vmem:[%s11230_s22 + $0x38] sm:$0xff] }
 0x7e4   : > { %14697 = vst [vmem:[#allocation22_spill] sm:$0xff] %v13590_v33  ;;  %v14714_v63 = vrot.slane %v13587_v62, 4 }
 0x7e5   : > { %v7871_v61 = vadd.f32 %v7870_v51, %v7869_v43  ;;  %v13593_v51 = vld [vmem:[%s11230_s22 + $0x50] sm:$0xff]  ;;  %v13596_v43 = vld [vmem:[%s11230_s22 + $0x60] sm:$0xff] }
 0x7e6   : > { %v14716_v5 = vrot.slane %v13596_v43, 4 }
 0x7e7   : > { %v7872_v54 = vmax.f32 %v7871_v61, 0.0  ;;  %v13599_v61 = vld [vmem:[%s11230_s22 + $0x68] sm:$0xff] }
 0x7e8   : > { %14698 = vst [vmem:[#allocation28_spill] sm:$0xff] %v13599_v61 }
 0x7e9   : > { %v7876_v40 = vrot.slane %v7872_v54, %v14157_v35  ;;  %v14710_v54 = vrot.slane %v13590_v33, 2  ;;  %v7975_v35 = vsel %vm7972_vm15, %v14714_v63, %v14713_v0  ;;  %v14719_v33 = vrot.slane %v13593_v51, 6 }
 0x7eb   : > { %7878 = vbcast.lane.b32.xlu0 %v7876_v40, 256  ;;  %v14711_v40 = vrot.slane %v13584_v32, 2 }
 0x7ed   : > { %v13680_v10 = vsel %vm7994_vm3, %v14711_v40, %v14710_v54 }
 0x7ee   : > { %14712 = vst [vmem:[#allocation35_spill] sm:$0xff] %v13680_v10 }
 0x85d   : > { %v7879_v23 = vpop.permute.xlu0 %7878 }
 0x85e   : > { %v7881_v42 = vmul.f32 %v7880_v26, %v7879_v23  ;;  %v13604_v26 = vld [vmem:[%s11230_s22 + $0x58] sm:$0xff]  ;;  %v13607_v23 = vld [vmem:[%s11230_s22 + $0x70] sm:$0xff] }
 0x85f   : > { %v14721_v10 = vrot.slane %v13607_v23, 2 }
 0x860   : > { %v7882_v58 = vsel %vm423_vm5, %v7881_v42, 0.0  ;;  %v13610_v42 = vld [vmem:[%s11230_s22 + $0x78] sm:$0xff] }
 0x861   : > { %v7883_v60 = vrot.slane %v7882_v58, 4  ;;  %14699 = vst [vmem:[#allocation27_spill] sm:$0xff] %v13610_v42  ;;  %v14720_v40 = vrot.slane %v13610_v42, 2 }
 0x863   : > { %v7884_v55 = vadd.f32 %v7883_v60, %v7882_v58  ;;  %v13638_v58 = vld [vmem:[%s11230_s22 + $0xd0] sm:$0xff]  ;;  %v13644_v60 = vld [vmem:[%s11230_s22 + $0xe0] sm:$0xff]  ;;  %v13706_v0 = vsel %vm7994_vm3, %v14721_v10, %v14720_v40 }
 0x864   : > { %14702 = vst [vmem:[#allocation30_spill] sm:$0xff] %v13638_v58  ;;  %14704 = vst [vmem:[#allocation18_spill] sm:$0xff] %v13644_v60 }
 0x865   : > { %v7885_v4 = vrot.slane %v7884_v55, 2 }
 0x867   : > { %v7886_v34 = vadd.f32 %v7885_v4, %v7884_v55  ;;  %v13615_v55 = vld [vmem:[%s11230_s22 + $0x98] sm:$0xff]  ;;  %v13618_v4 = vld [vmem:[%s11230_s22 + $0xa0] sm:$0xff] }
 0x869   : > { %v7887_v9 = vrot.slane %v7886_v34, 1 }
 0x86b   : > { %v7888_v56 = vadd.f32 %v7887_v9, %v7886_v34  ;;  %v13621_v34 = vld [vmem:[%s11230_s22 + $0x90] sm:$0xff]  ;;  %v13641_v9 = vld [vmem:[%s11230_s22 + $0xd8] sm:$0xff] }
 0x86c   : > { %14703 = vst [vmem:[#allocation32_spill] sm:$0xff] %v13641_v9 }
 0x86d   : > { %v7890_v7 = vadd.f32 %v7889_v15, %v7888_v56  ;;  %v13626_v56 = vld [vmem:[%s11230_s22 + $0xa8] sm:$0xff]  ;;  %v7952_v15 = vsel %vm7949_vm10, %v14709_v47, %v14708_v3  ;;  %v14718_v3 = vrot.slane %v13604_v26, 6 }
 0x86e   : > { %14700 = vst [vmem:[#allocation29_spill] sm:$0xff] %v13626_v56  ;;  %v14722_v63 = vrot.slane %v13626_v56, 4 }
 0x86f   : > { %v8767_v36 = vmul.f32 -1.442695, %v7890_v7  ;;  %v13629_v7 = vld [vmem:[%s11230_s22 + $0xb8] sm:$0xff]  ;;  %v13699_v54 = vsel %vm7949_vm10, %v14719_v33, %v14718_v3  ;;  %v14727_v3 = vsub.s32 0, %v11686_v14 }
 0x870   : > { %14701 = vst [vmem:[#allocation31_spill] sm:$0xff] %v13629_v7  ;;  %v14728_v10 = vrot.slane %v13629_v7, 2 }
 0x871   : > { %10829 = vpow2.f32 %v8767_v36  ;;  %v13632_v36 = vld [vmem:[%s11230_s22 + $0xb0] sm:$0xff] }
 0x872   : > { %v14729_v40 = vrot.slane %v13632_v36, 2 }
 0x874   : > { %v13729_v56 = vsel %vm7994_vm3, %v14729_v40, %v14728_v10 }
 0x87b   : > { %v10830_v6 = vpop.eup %10829 }
 0x87c   : > { %v7894_v18 = vadd.f32 1.0, %v10830_v6  ;;  %v13656_v6 = vld [vmem:[%s11230_s22 + $0xe8] sm:$0xff] }
 0x87d   : > { %14707 = vst [vmem:[#allocation34_spill] sm:$0xff] %v13656_v6 }
 0x87e   : > { %10831 = vrcp.f32 %v7894_v18  ;;  %v14715_v18 = vrot.slane %v13599_v61, 4  ;;  %v14723_v61 = vrot.slane %v13618_v4, 4 }
 0x880   : > { %v13692_v47 = vsel %vm7972_vm15, %v14716_v5, %v14715_v18  ;;  %v13713_v5 = vsel %vm7972_vm15, %v14723_v61, %v14722_v63  ;;  %v14725_v18 = vrot.slane %v13615_v55, 6  ;;  %v14730_v61 = vrot.slane %v13641_v9, 6 }
 0x881   : > { %14717 = vst [vmem:[#allocation36_spill] sm:$0xff] %v13692_v47  ;;  %14724 = vst [vmem:[#allocation37_spill] sm:$0xff] %v13713_v5  ;;  %v14726_v47 = vrot.slane %v13621_v34, 6  ;;  %v14731_v63 = vrot.slane %v13638_v58, 6 }
 0x883   : > { %v13720_v33 = vsel %vm7949_vm10, %v14726_v47, %v14725_v18  ;;  %v13736_v5 = vsel %vm7949_vm10, %v14731_v63, %v14730_v61  ;;  %v14733_v47 = vrot.slane %v13653_v28, 2  ;;  %v14734_v18 = vrot.slane %v13650_v41, 2  ;;  %v14744_v41 = vld [vmem:[#allocation16_spill] sm:$0xff]  ;;  %vm14778_vm10 = vmmov %vm14777_vm2 }
 0x884   : > { %14732 = vst [vmem:[#allocation38_spill] sm:$0xff] %v13736_v5 }
 0x885   : > { %v13743_v14 = vsel %vm7994_vm3, %v14734_v18, %v14733_v47  ;;  %vm14781_vm3 = vmmov %vm14777_vm2 }
 0x886   : > { %14735 = vst [vmem:[#allocation39_spill] sm:$0xff] %v13743_v14 }
 0x888   : > { %v10832_v8 = vpop.eup %10831 }
 0x889   : > { %v7900_v42 = vrot.slane %v10832_v8, %v14727_v3  ;;  %v14736_v8 = vrot.slane %v13656_v6, 4  ;;  %v14737_v3 = vrot.slane %v13644_v60, 4  ;;  %v14746_v6 = vld [vmem:[#allocation19_spill] sm:$0xff] }
 0x88b   : > { %v13750_v10 = vsel %vm7972_vm15, %v14737_v3, %v14736_v8  ;;  %v7901_v40 = vmul.f32 %v7900_v42, %v13281_v57  ;;  %v7902_v9 = vmul.f32 %v7900_v42, %v13290_v49  ;;  %v7903_v61 = vmul.f32 %v7900_v42, %v13278_v19  ;;  %vm14785_vm15 = vmmov %vm14777_vm2 }
 0x88c   : > { %14738 = vst [vmem:[#allocation40_spill] sm:$0xff] %v13750_v10  ;;  %v7904_v63 = vmul.f32 %v7900_v42, %v13287_v38  ;;  %v7905_v28 = vmul.f32 %v7900_v42, %v13308_v53  ;;  %v7906_v47 = vmul.f32 %v7900_v42, %v13318_v59  ;;  %v7907_v18 = vmul.f32 %v7900_v42, %v13305_v21 }
 0x88d   : > { %v7908_v14 = vmul.f32 %v7900_v42, %v13315_v48  ;;  %v7909_v8 = vmul.f32 %v7900_v42, %v13336_v29  ;;  %v7910_v3 = vmul.f32 %v7900_v42, %v13346_v44  ;;  %v13763_v57 = vmul.f32 %v7900_v42, %v13333_v24 }
 0x88e   : > { %v13766_v19 = vmul.f32 %v7900_v42, %v13343_v37  ;;  %v7913_v38 = vmul.f32 %v7900_v42, %v13364_v1  ;;  %v13770_v49 = vmul.f32 %v7900_v42, %v13374_v46  ;;  %v13773_v21 = vmul.f32 %v7900_v42, %v13361_v27  ;;  %v7938_v46 = vld [vmem:[%s11230_s22 + $0x8] sm:$0xff] }
 0x88f   : > { %v13776_v53 = vmul.f32 %v7900_v42, %v13371_v11  ;;  %v13779_v48 = vmul.f32 %v7900_v42, %v13392_v30  ;;  %v13782_v59 = vmul.f32 %v7900_v42, %v13402_v52  ;;  %v13785_v24 = vmul.f32 %v7900_v42, %v13389_v39  ;;  %v7937_v11 = vld [vmem:[%s11230_s22] sm:$0xff] }
 0x890   : > { %v13788_v29 = vmul.f32 %v7900_v42, %v13399_v20  ;;  %v13791_v37 = vmul.f32 %v7900_v42, %v13420_v22  ;;  %v13794_v44 = vmul.f32 %v7900_v42, %v13430_v12  ;;  %v13797_v27 = vmul.f32 %v7900_v42, %v13417_v16  ;;  %v14740_v16 = vld [vmem:[#allocation23_spill] sm:$0xff] }
 0x891   : > { %v13800_v1 = vmul.f32 %v7900_v42, %v13427_v50  ;;  %v13805_v39 = vmul.f32 %v7900_v42, %v13448_v31  ;;  %v13808_v30 = vmul.f32 %v7900_v42, %v13458_v17  ;;  %v13811_v20 = vmul.f32 %v7900_v42, %v13445_v45  ;;  %v14742_v50 = vld [vmem:[#allocation17_spill] sm:$0xff]  ;;  %v14748_v17 = vld [vmem:[#allocation24_spill] sm:$0xff]  ;;  %v14750_v45 = vld [vmem:[#allocation26_spill] sm:$0xff] }
 0x892   : > { %v13814_v52 = vmul.f32 %v7900_v42, %v13455_v13  ;;  %v13817_v22 = vmul.f32 %v7900_v42, %v14740_v16  ;;  %v13820_v12 = vmul.f32 %v7900_v42, %v14742_v50  ;;  %v13823_v31 = vmul.f32 %v7900_v42, %v14744_v41  ;;  %v14752_v13 = vld [vmem:[#allocation15_spill] sm:$0xff]  ;;  %v14754_v16 = vld [vmem:[#allocation20_spill] sm:$0xff] }
 0x893   : > { %v13826_v10 = vmul.f32 %v7900_v42, %v14746_v6  ;;  %v13829_v60 = vmul.f32 %v7900_v42, %v14748_v17  ;;  %v13832_v5 = vmul.f32 %v7900_v42, %v14750_v45  ;;  %v13835_v58 = vmul.f32 %v7900_v42, %v14752_v13 }
 0x894   : > { %14739 = vst [vmem:[#allocation41_spill] sm:$0xff] %v13814_v52  ;;  %14741 = vst [vmem:[#allocation23_spill] sm:$0xff] %v13817_v22  ;;  %v13838_v22 = vmul.f32 %v7900_v42, %v14754_v16  ;;  %v7939_v50 = vadd.f32 %v7937_v11, %v7901_v40  ;;  %v14755_v41 = vrot.slane %v13575_v25, 6  ;;  %v7957_v6 = vadd.f32 %v7952_v15, %v7904_v63  ;;  %v14756_v52 = vld [vmem:[#allocation25_spill] sm:$0xff]  ;;  %v8784_v42 = vld [vmem:[%s11230_s22 + $0x48] sm:$0xff] }
 0x895   : > { %14743 = vst [vmem:[#allocation17_spill] sm:$0xff] %v13820_v12  ;;  %14745 = vst [vmem:[#allocation16_spill] sm:$0xff] %v13823_v31  ;;  %v7940_v12 = vadd.f32 %v7938_v46, %v7902_v9  ;;  %v14757_v17 = vrot.slane %v14756_v52, 6  ;;  %v14758_v45 = vrot.slane %v13587_v62, 4  ;;  %v7980_v7 = vadd.f32 %v7975_v35, %v7906_v47 }
 0x896   : > { %14747 = vst [vmem:[#allocation19_spill] sm:$0xff] %v13826_v10  ;;  %14749 = vst [vmem:[#allocation24_spill] sm:$0xff] %v13829_v60  ;;  %v7956_v31 = vadd.f32 %v14755_v41, %v7903_v61  ;;  %v8783_v10 = vld [vmem:[%s11230_s22 + $0x40] sm:$0xff]  ;;  %v14759_v13 = vrot.slane %v13581_v2, 4  ;;  %v7941_v16 = vmax.f32 %v7939_v50, 0.0  ;;  %v7960_v11 = vmax.f32 %v7957_v6, 0.0 }
 0x897   : > { %14751 = vst [vmem:[#allocation26_spill] sm:$0xff] %v13832_v5  ;;  %14753 = vst [vmem:[#allocation15_spill] sm:$0xff] %v13835_v58  ;;  %v7958_v60 = vadd.f32 %v14757_v17, %v7905_v28  ;;  %v7979_v5 = vadd.f32 %v14758_v45, %v7905_v28  ;;  %v7942_v40 = vmax.f32 %v7940_v12, 0.0  ;;  %v7983_v46 = vmax.f32 %v7980_v7, 0.0  ;;  %v14764_v2 = vld [vmem:[#allocation35_spill] sm:$0xff]  ;;  %v14774_v17 = vld [vmem:[#allocation28_spill] sm:$0xff] }
 0x898   : > { %v7981_v58 = vadd.f32 %v14759_v13, %v7907_v18  ;;  %v7959_v9 = vmax.f32 %v7956_v31, 0.0  ;;  %7943 = vst.msk [vmem:[%s13852_s21] sm:$0xff] %vm14760_vm9, %v7941_v16  ;;  %v14763_v28 = vrot.slane %v13584_v32, 2  ;;  %v8002_v62 = vadd.f32 %v14764_v2, %v7908_v14  ;;  %vm14786_vm9 = vmmov %vm14777_vm2 }
 0x899   : > { %v7961_v25 = vmax.f32 %v7958_v60, 0.0  ;;  %v7982_v61 = vmax.f32 %v7979_v5, 0.0  ;;  %7944 = vst.msk [vmem:[%s13852_s21 + $0x8] sm:$0xff] %vm14761_vm7, %v7942_v40  ;;  %v8015_v5 = vadd.f32 %v8783_v10, %v7910_v3  ;;  %v8016_v63 = vadd.f32 %v8784_v42, %v13763_v57  ;;  %v8803_v3 = vld [vmem:[%s11230_s22 + $0x88] sm:$0xff]  ;;  %vm14787_vm7 = vmmov %vm14777_vm2 }
 0x89a   : > { %v7984_v15 = vmax.f32 %v7981_v58, 0.0  ;;  %8770 = vst.msk [vmem:[%s13852_s21 + $0xe] sm:$0xfc] %vm7963_vm4, %v7959_v9  ;;  %v8001_v35 = vadd.f32 %v14763_v28, %v7907_v18  ;;  %v14765_v58 = vld [vmem:[#allocation22_spill] sm:$0xff]  ;;  %v14768_v32 = vrot.slane %v13593_v51, 6  ;;  %v8033_v10 = vadd.f32 %v13699_v54, %v7913_v38  ;;  %v14773_v38 = vld [vmem:[#allocation36_spill] sm:$0xff] }
 0x89b   : > { %8771 = vst.msk [vmem:[%s13852_s21 + $0x16] sm:$0xff] %vm14762_vm11, %v7960_v11  ;;  %v14766_v60 = vrot.slane %v14765_v58, 2  ;;  %v14769_v47 = vrot.slane %v13604_v26, 6  ;;  %v8005_v12 = vmax.f32 %v8002_v62, 0.0  ;;  %v8017_v57 = vmax.f32 %v8015_v5, 0.0  ;;  %v8821_v58 = vld [vmem:[%s11230_s22 + $0xc0] sm:$0xff]  ;;  %vm14794_vm11 = vmmov %vm14777_vm2 }
 0x89c   : > { %8772 = vst.msk [vmem:[%s13852_s21 + $0x1e] sm:$0x3] %vm7966_vm14, %v7961_v25  ;;  %v8032_v14 = vadd.f32 %v14768_v32, %v13766_v19  ;;  %v8004_v52 = vmax.f32 %v8001_v35, 0.0  ;;  %v8018_v51 = vmax.f32 %v8016_v63, 0.0  ;;  %v8036_v19 = vmax.f32 %v8033_v10, 0.0 }
 0x89d   : > { %v8003_v7 = vadd.f32 %v14766_v60, %v7909_v8  ;;  %8775 = vst.msk [vmem:[%s13852_s21 + $0x1c] sm:$0xf0] %vm7986_vm1, %v7982_v61  ;;  %v8034_v18 = vadd.f32 %v14769_v47, %v13770_v49  ;;  %v8802_v8 = vld [vmem:[%s11230_s22 + $0x80] sm:$0xff]  ;;  %v14772_v26 = vrot.slane %v13596_v43, 4  ;;  %v8053_v6 = vadd.f32 %v14773_v38, %v13773_v21  ;;  %v8822_v60 = vld [vmem:[%s11230_s22 + $0xc8] sm:$0xff]  ;;  %s8234_s22 = sshll.u32 %s13852_s21, 4  ;;  %s14024_s22 = int_to_ptr.vmem [resolvable:$true] %s8234_s22 }
 0x89e   : > { %8776 = vst.msk [vmem:[%s13852_s21 + $0x24] sm:$0xff] %vm14767_vm6, %v7983_v46  ;;  %v8035_v50 = vmax.f32 %v8032_v14, 0.0  ;;  %v14775_v45 = vrot.slane %v14774_v17, 4  ;;  %v14776_v42 = vrot.slane %v13607_v23, 2  ;;  %v8073_v43 = vadd.f32 %v13706_v0, %v13779_v48  ;;  %v14792_v47 = vld [vmem:[#allocation31_spill] sm:$0xff]  ;;  %vm14800_vm6 = vmmov %vm14777_vm2  ;;  %v14806_v17 = vld [vmem:[#allocation18_spill] sm:$0xff]  ;;  %p10926_p7 = scmp.lt.s32.totalorder %s14024_s22, %s10924_s14 }
 0x89f   : > { %8777 = vst.msk [vmem:[%s13852_s21 + $0x2c] sm:$0xf] %vm423_vm5, %v7984_v15  ;;  %v8006_v31 = vmax.f32 %v8003_v7, 0.0  ;;  %v8037_v41 = vmax.f32 %v8034_v18, 0.0  ;;  %v8052_v54 = vadd.f32 %v14772_v26, %v13770_v49  ;;  %v14779_v49 = vld [vmem:[#allocation27_spill] sm:$0xff]  ;;  %v8085_v40 = vadd.f32 %v8803_v3, %v13788_v29  ;;  %s10919_s15 = scalar_lea.vmem %s14024_s22, 4096 }
 0x8a0   : > { %8780 = vst.msk [vmem:[%s13852_s21 + $0x2a] sm:$0xc0] %vm8008_vm13, %v8004_v52  ;;  %v8054_v13 = vadd.f32 %v14775_v45, %v13776_v53  ;;  %v8072_v16 = vadd.f32 %v14776_v42, %v13776_v53  ;;  %v14780_v21 = vrot.slane %v14779_v49, 2  ;;  %v8084_v53 = vadd.f32 %v8802_v8, %v13785_v24  ;;  %v14803_v26 = vld [vmem:[#allocation19_spill] sm:$0xff]  ;;  %v14809_v49 = vld [vmem:[#allocation24_spill] sm:$0xff]  ;;  %p10920_p11 = scmp.ne.s32.totalorder %s14024_s22, %s10919_s15  ;;  %p10927_p9 = scmp.lt.s32.totalorder %s10925_s16, %s10919_s15 }
 0x8a1   : > { %8781 = vst.msk [vmem:[%s13852_s21 + $0x32] sm:$0xff] %vm14770_vm12, %v8005_v12  ;;  %v8055_v9 = vmax.f32 %v8052_v54, 0.0  ;;  %v8056_v11 = vmax.f32 %v8053_v6, 0.0  ;;  %v8076_v46 = vmax.f32 %v8073_v43, 0.0  ;;  %v8087_v48 = vmax.f32 %v8085_v40, 0.0  ;;  %v14797_v12 = vld [vmem:[#allocation17_spill] sm:$0xff]  ;;  %vm14808_vm12 = vmmov %vm14777_vm2 }
 0x8a2   : > { %8782 = vst.msk [vmem:[%s13852_s21 + $0x3a] sm:$0x3f] %vm8011_vm0, %v8006_v31  ;;  %v8074_v23 = vadd.f32 %v14780_v21, %v13782_v59  ;;  %v8057_v25 = vmax.f32 %v8054_v13, 0.0  ;;  %v8075_v61 = vmax.f32 %v8072_v16, 0.0  ;;  %v8086_v0 = vmax.f32 %v8084_v53, 0.0  ;;  %v14798_v31 = vld [vmem:[#allocation30_spill] sm:$0xff]  ;;  %p10921_p1 = pnand %p10920_p11, %p14824_p0  ;;  %p10928_p12 = por %p10927_p9, %p10926_p7 }
 0x8a3   : > { %8785 = vst.msk [vmem:[%s13852_s21 + $0x40] sm:$0xff] %vm14771_vm8, %v8017_v57  ;;  %v14782_v59 = vrot.slane %v13621_v34, 6  ;;  %v8102_v29 = vadd.f32 %v13720_v33, %v13794_v44  ;;  %v14783_v28 = vrot.slane %v13615_v55, 6  ;;  %v14784_v2 = vrot.slane %v13618_v4, 4  ;;  %v14788_v55 = vld [vmem:[#allocation37_spill] sm:$0xff]  ;;  %v14804_v54 = vld [vmem:[#allocation32_spill] sm:$0xff]  ;;  %vm14814_vm8 = vmmov %vm14777_vm2 }
 0x8a4   : > { %8786 = vst.msk [vmem:[%s13852_s21 + $0x48] sm:$0xff] %vm14777_vm2, %v8018_v51  ;;  %v8077_v15 = vmax.f32 %v8074_v23, 0.0  ;;  %v8122_v34 = vadd.f32 %v14788_v55, %v13800_v1  ;;  %v14789_v4 = vld [vmem:[#allocation29_spill] sm:$0xff]  ;;  %v14791_v44 = vrot.slane %v13632_v36, 2  ;;  %v8142_v7 = vadd.f32 %v13729_v56, %v13808_v30  ;;  %v14796_v30 = vld [vmem:[#allocation23_spill] sm:$0xff]  ;;  %v14810_v21 = vld [vmem:[#allocation40_spill] sm:$0xff]  ;;  %p10922_p3 = pneg %p10921_p1 }
 0x8a5   : > { %8789 = vst.msk [vmem:[%s13852_s21 + $0x4e] sm:$0xfc] %vm7963_vm4, %v8035_v50  ;;  %v8101_v24 = vadd.f32 %v14782_v59, %v13791_v37  ;;  %v8103_v35 = vadd.f32 %v14783_v28, %v13797_v27  ;;  %v8121_v62 = vadd.f32 %v14784_v2, %v13797_v27  ;;  %v14790_v33 = vrot.slane %v14789_v4, 4  ;;  %v14795_v36 = vld [vmem:[#allocation41_spill] sm:$0xff]  ;;  %v14801_v50 = vld [vmem:[#allocation16_spill] sm:$0xff] }
 0x8a6   : > { %8790 = vst.msk [vmem:[%s13852_s21 + $0x56] sm:$0xff] %vm14778_vm10, %v8036_v19  ;;  %v8141_v27 = vadd.f32 %v14791_v44, %v13805_v39  ;;  %v8105_v63 = vmax.f32 %v8102_v29, 0.0  ;;  %v8125_v10 = vmax.f32 %v8122_v34, 0.0  ;;  %v14793_v18 = vrot.slane %v14792_v47, 2  ;;  %v14802_v19 = vld [vmem:[#allocation38_spill] sm:$0xff]  ;;  %v14818_v29 = vld [vmem:[#allocation39_spill] sm:$0xff]  ;;  %vm14821_vm10 = vmmov %vm14777_vm2  ;;  %p10929_p2 = pnand %p10928_p12, %p10922_p3 }
 0x8a7   : > { %8791 = vst.msk [vmem:[%s13852_s21 + $0x5e] sm:$0x3] %vm7966_vm14, %v8037_v41  ;;  %v8123_v37 = vadd.f32 %v14790_v33, %v13805_v39  ;;  %v8104_v5 = vmax.f32 %v8101_v24, 0.0  ;;  %v8106_v32 = vmax.f32 %v8103_v35, 0.0  ;;  %v8124_v14 = vmax.f32 %v8121_v62, 0.0  ;;  %v14817_v24 = vld [vmem:[#allocation15_spill] sm:$0xff] }
 0x8a8   : > { %8794 = vst.msk [vmem:[%s13852_s21 + $0x5c] sm:$0xf0] %vm7986_vm1, %v8055_v9  ;;  %v8143_v8 = vadd.f32 %v14793_v18, %v13811_v20  ;;  %v8144_v3 = vmax.f32 %v8141_v27, 0.0  ;;  %v8145_v56 = vmax.f32 %v8142_v7, 0.0  ;;  %v8153_v39 = vadd.f32 %v8821_v58, %v14795_v36  ;;  %v14811_v9 = vld [vmem:[#allocation26_spill] sm:$0xff]  ;;  %v14819_v35 = vld [vmem:[#allocation33_spill] sm:$0xff] }
 0x8a9   : > { %8795 = vst.msk [vmem:[%s13852_s21 + $0x64] sm:$0xff] %vm14781_vm3, %v8056_v11  ;;  %v8126_v1 = vmax.f32 %v8123_v37, 0.0  ;;  %v8154_v52 = vadd.f32 %v8822_v60, %v14796_v30  ;;  %v14799_v20 = vrot.slane %v14798_v31, 6  ;;  %v8171_v41 = vadd.f32 %v14802_v19, %v14801_v50  ;;  %v14812_v11 = vld [vmem:[#allocation34_spill] sm:$0xff] }
 0x8aa   : > { %8796 = vst.msk [vmem:[%s13852_s21 + $0x6c] sm:$0xf] %vm423_vm5, %v8057_v25  ;;  %v8146_v51 = vmax.f32 %v8143_v8, 0.0  ;;  %v14805_v38 = vrot.slane %v14804_v54, 6  ;;  %v14807_v45 = vrot.slane %v14806_v17, 4  ;;  %v8155_v42 = vmax.f32 %v8153_v39, 0.0 }
 0x8ab   : > { %8799 = vst.msk [vmem:[%s13852_s21 + $0x6a] sm:$0xc0] %vm8008_vm13, %v8075_v61  ;;  %v8170_v57 = vadd.f32 %v14799_v20, %v14797_v12  ;;  %8818 = vst.msk [vmem:[%s13852_s21 + $0xaa] sm:$0xc0] %vm8008_vm13, %v8144_v3  ;;  %v8156_v16 = vmax.f32 %v8154_v52, 0.0  ;;  %v8191_v23 = vadd.f32 %v14810_v21, %v14809_v49  ;;  %v8174_v53 = vmax.f32 %v8171_v41, 0.0 }
 0x8ac   : > { %8800 = vst.msk [vmem:[%s13852_s21 + $0x72] sm:$0xff] %vm14785_vm15, %v8076_v46  ;;  %v8172_v6 = vadd.f32 %v14805_v38, %v14803_v26  ;;  %v8190_v13 = vadd.f32 %v14807_v45, %v14803_v26  ;;  %v14813_v25 = vrot.slane %v14812_v11, 4  ;;  %v8211_v28 = vadd.f32 %v14818_v29, %v14817_v24 }
 0x8ad   : > { %8801 = vst.msk [vmem:[%s13852_s21 + $0x7a] sm:$0x3f] %vm8011_vm0, %v8077_v15  ;;  %v8173_v43 = vmax.f32 %v8170_v57, 0.0  ;;  %8820 = vst.msk [vmem:[%s13852_s21 + $0xba] sm:$0x3f] %vm8011_vm0, %v8146_v51  ;;  %v8194_v15 = vmax.f32 %v8191_v23, 0.0 }
 0x8ae   : > { %8804 = vst.msk [vmem:[%s13852_s21 + $0x80] sm:$0xff] %vm14786_vm9, %v8086_v0  ;;  %v8175_v40 = vmax.f32 %v8172_v6, 0.0  ;;  %v8192_v61 = vadd.f32 %v14813_v25, %v14811_v9  ;;  %v8193_v46 = vmax.f32 %v8190_v13, 0.0  ;;  %v14815_v0 = vld [vmem:[#allocation21_spill] sm:$0xff]  ;;  %v14820_v2 = vrot.slane %v14819_v35, 2 }
 0x8af   : > { %8805 = vst.msk [vmem:[%s13852_s21 + $0x88] sm:$0xff] %vm14787_vm7, %v8087_v48  ;;  %v14816_v48 = vrot.slane %v14815_v0, 2  ;;  %v8214_v60 = vmax.f32 %v8211_v28, 0.0 }
 0x8b0   : > { %8808 = vst.msk [vmem:[%s13852_s21 + $0x8e] sm:$0xfc] %vm7963_vm4, %v8104_v5  ;;  %8827 = vst.msk [vmem:[%s13852_s21 + $0xce] sm:$0xfc] %vm7963_vm4, %v8173_v43  ;;  %v8212_v62 = vadd.f32 %v14820_v2, %v13838_v22  ;;  %v8195_v58 = vmax.f32 %v8192_v61, 0.0 }
 0x8b1   : > { %8809 = vst.msk [vmem:[%s13852_s21 + $0x96] sm:$0xff] %vm14794_vm11, %v8105_v63  ;;  %v8210_v59 = vadd.f32 %v14816_v48, %v14811_v9  ;;  %vm14822_vm4 = vmmov %vm14777_vm2 }
 0x8b2   : > { %8810 = vst.msk [vmem:[%s13852_s21 + $0x9e] sm:$0x3] %vm7966_vm14, %v8106_v32  ;;  %8829 = vst.msk [vmem:[%s13852_s21 + $0xde] sm:$0x3] %vm7966_vm14, %v8175_v40  ;;  %v8215_v55 = vmax.f32 %v8212_v62, 0.0 }
 0x8b3   : > { %8813 = vst.msk [vmem:[%s13852_s21 + $0x9c] sm:$0xf0] %vm7986_vm1, %v8124_v14  ;;  %8832 = vst.msk [vmem:[%s13852_s21 + $0xdc] sm:$0xf0] %vm7986_vm1, %v8193_v46  ;;  %v8213_v22 = vmax.f32 %v8210_v59, 0.0 }
 0x8b4   : > { %8814 = vst.msk [vmem:[%s13852_s21 + $0xa4] sm:$0xff] %vm14800_vm6, %v8125_v10  ;;  %vm14823_vm14 = vmmov %vm14777_vm2 }
 0x8b5   : > { %8815 = vst.msk [vmem:[%s13852_s21 + $0xac] sm:$0xf] %vm423_vm5, %v8126_v1  ;;  %8834 = vst.msk [vmem:[%s13852_s21 + $0xec] sm:$0xf] %vm423_vm5, %v8195_v58 }
 0x8b6   : > { %8819 = vst.msk [vmem:[%s13852_s21 + $0xb2] sm:$0xff] %vm14808_vm12, %v8145_v56 }
 0x8b7   : > { %8823 = vst.msk [vmem:[%s13852_s21 + $0xc0] sm:$0xff] %vm14814_vm8, %v8155_v42 }
 0x8b8   : > { %8824 = vst.msk [vmem:[%s13852_s21 + $0xc8] sm:$0xff] %vm14777_vm2, %v8156_v16 }
 0x8b9   : > { %8828 = vst.msk [vmem:[%s13852_s21 + $0xd6] sm:$0xff] %vm14821_vm10, %v8174_v53 }
 0x8ba   : > { %8833 = vst.msk [vmem:[%s13852_s21 + $0xe4] sm:$0xff] %vm14822_vm4, %v8194_v15 }
 0x8bb   : > { %8837 = vst.msk [vmem:[%s13852_s21 + $0xea] sm:$0xc0] %vm8008_vm13, %v8213_v22 }
 0x8bc   : > { %8838 = vst.msk [vmem:[%s13852_s21 + $0xf2] sm:$0xff] %vm14823_vm14, %v8214_v60 }
 0x8bd   : > { %8839 = vst.msk [vmem:[%s13852_s21 + $0xfa] sm:$0x3f] %vm8011_vm0, %v8215_v55 }
 0x8be   : > { %10932 = shalt.err (!%p10929_p2)
}
 0x8bf   : > { %s10933_s23 = scalar_lea.hbm %s14022_s18, 4096  ;;  %s10937_s28 = scalar_lea.hbm %s14087_s9, 8192 }
 0x8c0   : > { %p10934_p13 = scmp.ne.s32.totalorder %s14022_s18, %s10933_s23  ;;  %p10938_p4 = scmp.lt.u32.totalorder %s14022_s18, %s14087_s9 }
 0x8c1   : > { %p10939_p5 = scmp.lt.u32.totalorder %s10937_s28, %s10933_s23  ;;  %p10941_p11 = scmp.lt.u32.totalorder %s10933_s23, %s14022_s18 }
 0x8c2   : > { %p10935_p6 = pnand %p10934_p13, %p14824_p0 }
 0x8c3   : > { %p10940_p8 = por %p10939_p5, %p10938_p4 }
 0x8c4   : > { %p10936_p10 = pneg %p10935_p6 }
 0x8c5   : > { %p10942_p1 = por %p10941_p11, %p10940_p8 }
 0x8c7   : > { %p10943_p3 = pnand %p10942_p1, %p10936_p10 }
 0x8c9   : > { %10946 = shalt.err (!%p10943_p3)
}
 0x8ca   : > { %s11000_s15 = smov 128   ;;  %s11001_s17 = smov 8  }
 0x8cb   : > { %10693 = dma.vmem_to_hbm [thread:$0]  (%p14824_p0), %s14024_s22, 4096, %s14022_s18, %s8221_s29, %s11000_s15, %s11000_s15, %s11001_s17  }
 0x8cc PF: > { %s14825_s14 = sld [smem:[#allocation14_spill]]  ;;  %s8249_s16 = sand.u32 1, %s10977_s30  }
 0x8cd   : > { %p14827_p9 = scmp.ge.s32.totalorder %s10989_s12, 2  ;;  %s8250_s23 = scalar_lea.sflag [#allocation6], %s8249_s16 }
 0x8d2   : > { %p14826_p7 = scmp.ne.s32.totalorder %s14825_s14, 0 }
 0x8d4   : > { %p10707_p12 = pnand %p14827_p9, %p14826_p7 }
 0x8d6   : > { %10972 = dma.done.wait (!%p10707_p12), %s8250_s23, 4096  }
 0x8d7   : > { %10974 = vsyncadd (!%p10707_p12), %s8250_s23, 4294963200  ;;  %p23_p2 = scmp.ge.s32.totalorder %s11162_s24, 4   ;;  %s14828_s30 = smov %s10981_s10 }
 0x8d8   : > { %s14829_s10 = smov %s10985_s11  ;;  %s14830_s11 = smov %s11178_s27 }
 0x8d9   : > { %s14831_s12 = smov %s11162_s24  ;;  %25 = sbr.rel (!%p23_p2) target bundleno = 6 (0x6), region = 155 }
 0x8e0   :  { %8255 = vsyncpa [#allocation5], 1 }
 0x8e1   :  { %8257 = vsyncpa [#allocation5 + $0x1], 1 }
 0x8e2   :  { %8258 = vsyncpa [#allocation8], 1 }
 0x8e3   :  { %8259 = vsyncpa [#allocation6], 1 }
 0x8e4   :  { %8261 = vsyncpa [#allocation6 + $0x1], 1 }

</bundles_post_ra>
